<compile_context>
chip_gen: v7x
topology: tpu7x:2x2x1
jax: 0.10.0
libtpu: 0.0.40
codegen_flags: <defaults>
</compile_context>

<pallas_src>
import functools

import jax
import jax.numpy as jnp
from jax.experimental import pallas as pl
from jax.experimental.pallas import tpu as pltpu

NEG_SLOPE = 0.01                 # torch.nn.LeakyReLU default
LANE = 128
VMEM_LIMIT = 48 * 1024 * 1024    # leaves headroom on v7x (64 MiB physical VMEM)
ROW_TILE_TARGET = 512            # rows per grid step (points / samples)


def _lrelu(v):
    return jnp.where(v > 0, v, NEG_SLOPE * v)


def _pad_up(n, m):
    return ((n + m - 1) // m) * m


def _pad2(w, rows, cols):
    r, c = w.shape
    return jnp.pad(w, ((0, rows - r), (0, cols - c)))


def _pick_row_tile(n, target=ROW_TILE_TARGET):
    if n >= target:
        return target
    return max(8, _pad_up(n, 8))


# ----------------------------------------------------------------------------
# Kernel 1: fused PointNet encoder (conv00..conv4 + point-wise max)
#   grid = (batch, point-tiles); weights resident (constant index_map);
#   running max kept in a VMEM scratch; output is the pooled (1, NLp) vector.
#   NOTE: the running max accumulates across the t axis -> t must remain the
#   innermost grid axis and be marked "arbitrary".
# ----------------------------------------------------------------------------
def _encoder_kernel(x_ref, cond_ref, w00_ref,
                    w1_ref, b1_ref, w2_ref, b2_ref, w3_ref, b3_ref,
                    w4_ref, b4_ref,
                    o_ref, gmax_ref, *, rt, npts):
    bf16 = jnp.bfloat16
    t = pl.program_id(1)

    x = x_ref[0]                                                   # (rt, dim) f32
    h = jnp.dot(x, w00_ref[...], preferred_element_type=jnp.float32) + cond_ref[0]
    h = _lrelu(h)
    h = _lrelu(jnp.dot(h.astype(bf16), w1_ref[...],
                       preferred_element_type=jnp.float32) + b1_ref[...])
    h = _lrelu(jnp.dot(h.astype(bf16), w2_ref[...],
                       preferred_element_type=jnp.float32) + b2_ref[...])
    h = _lrelu(jnp.dot(h.astype(bf16), w3_ref[...],
                       preferred_element_type=jnp.float32) + b3_ref[...])
    h = jnp.dot(h.astype(bf16), w4_ref[...],
                preferred_element_type=jnp.float32) + b4_ref[...]

    if npts % rt != 0:
        # Ragged last tile: rows >= npts are boundary padding -> exclude from max.
        rows = t * rt + jax.lax.broadcasted_iota(jnp.int32, (rt, 1), 0)
        h = jnp.where(rows < npts, h, -jnp.inf)

    tile_max = jnp.max(h, axis=0, keepdims=True)                   # (1, NLp)

    @pl.when(t == 0)
    def _():
        gmax_ref[...] = jnp.full(gmax_ref.shape, -jnp.inf, jnp.float32)

    gmax_ref[...] = jnp.maximum(gmax_ref[...], tile_max)

    @pl.when(t == pl.num_programs(1) - 1)
    def _():
        o_ref[0] = gmax_ref[...]


def _encoder_call(x3, cond3, en, rt, npts):
    bs, npts_a, dim = x3.shape
    c0p = en["w00"].shape[1]
    nlp = en["w4"].shape[1]
    n_t = pl.cdiv(npts_a, rt)
    c2 = lambda b, t: (0, 0)

    in_specs = [
        pl.BlockSpec((1, rt, dim), lambda b, t: (b, t, 0)),     # x tile
        pl.BlockSpec((1, 1, c0p), lambda b, t: (b, 0, 0)),      # per-batch cond term
        pl.BlockSpec(en["w00"].shape, c2),
        pl.BlockSpec(en["w1"].shape, c2), pl.BlockSpec(en["b1"].shape, c2),
        pl.BlockSpec(en["w2"].shape, c2), pl.BlockSpec(en["b2"].shape, c2),
        pl.BlockSpec(en["w3"].shape, c2), pl.BlockSpec(en["b3"].shape, c2),
        pl.BlockSpec(en["w4"].shape, c2), pl.BlockSpec(en["b4"].shape, c2),
    ]
    kern = functools.partial(_encoder_kernel, rt=rt, npts=npts)
    return pl.pallas_call(
        kern,
        out_shape=jax.ShapeDtypeStruct((bs, 1, nlp), jnp.float32),
        grid=(bs, n_t),
        in_specs=in_specs,
        out_specs=pl.BlockSpec((1, 1, nlp), lambda b, t: (b, 0, 0)),
        scratch_shapes=[pltpu.VMEM((1, nlp), jnp.float32)],
        compiler_params=pltpu.CompilerParams(
            dimension_semantics=("parallel", "arbitrary"),   # bs shards across TCs
            vmem_limit_bytes=VMEM_LIMIT),
    )(x3, cond3, en["w00"], en["w1"], en["b1"], en["w2"], en["b2"],
      en["w3"], en["b3"], en["w4"], en["b4"])


# ----------------------------------------------------------------------------
# Kernel 2: pooled lin1..lin3 epilogue, batched over bs (M=bs, single launch)
# ----------------------------------------------------------------------------
def _lin_kernel(g_ref, l1w_ref, l1b_ref, l2w_ref, l2b_ref, l3w_ref, l3b_ref,
                z_ref):
    bf16 = jnp.bfloat16
    g = g_ref[...]
    g = _lrelu(jnp.dot(g.astype(bf16), l1w_ref[...],
                       preferred_element_type=jnp.float32) + l1b_ref[...])
    g = _lrelu(jnp.dot(g.astype(bf16), l2w_ref[...],
                       preferred_element_type=jnp.float32) + l2b_ref[...])
    z_ref[...] = jnp.dot(g.astype(bf16), l3w_ref[...],
                         preferred_element_type=jnp.float32) + l3b_ref[...]


def _lin_call(g, en):
    bs, nlp = g.shape

    def full(shape):
        return pl.BlockSpec(shape, lambda: tuple(0 for _ in shape))

    return pl.pallas_call(
        _lin_kernel,
        out_shape=jax.ShapeDtypeStruct((bs, nlp), jnp.float32),
        in_specs=[full(g.shape),
                  full(en["l1w"].shape), full(en["l1b"].shape),
                  full(en["l2w"].shape), full(en["l2b"].shape),
                  full(en["l3w"].shape), full(en["l3b"].shape)],
        out_specs=full((bs, nlp)),
        compiler_params=pltpu.CompilerParams(vmem_limit_bytes=VMEM_LIMIT),
    )(g, en["l1w"], en["l1b"], en["l2w"], en["l2b"], en["l3w"], en["l3b"])


# ----------------------------------------------------------------------------
# Kernel 3: fused Atlasnet decoder (all primitives, one kernel)
#   grid = (primitive, batch, sample-tiles); per-primitive weights resident
#   (bf16, ~2.9 MB/primitive -> default double-buffering is fine under 48 MiB).
#   Patch term computed in-kernel; output emitted transposed & lane-dense.
# ----------------------------------------------------------------------------
def _decoder_kernel(patch_ref, lt_ref, w10_ref,
                    w2_ref, b2_ref,
                    wl0_ref, bl0_ref, wl1_ref, bl1_ref,
                    wl2_ref, bl2_ref, wl3_ref, bl3_ref,
                    wlt_ref, blt_ref, o_ref):
    bf16 = jnp.bfloat16
    # Fused conv10(patch) + conv11(latent) term (patch term no longer staged in HBM).
    h = (jnp.dot(patch_ref[0], w10_ref[0], preferred_element_type=jnp.float32)
         + lt_ref[0, 0])
    h = _lrelu(h)
    h = _lrelu(jnp.dot(h.astype(bf16), w2_ref[0],
                       preferred_element_type=jnp.float32) + b2_ref[0])
    h = _lrelu(jnp.dot(h.astype(bf16), wl0_ref[0],
                       preferred_element_type=jnp.float32) + bl0_ref[0])
    h = _lrelu(jnp.dot(h.astype(bf16), wl1_ref[0],
                       preferred_element_type=jnp.float32) + bl1_ref[0])
    h = _lrelu(jnp.dot(h.astype(bf16), wl2_ref[0],
                       preferred_element_type=jnp.float32) + bl2_ref[0])
    h = _lrelu(jnp.dot(h.astype(bf16), wl3_ref[0],
                       preferred_element_type=jnp.float32) + bl3_ref[0])
    # Last layer as an NT matmul:  (8, hid) . (rt, hid)^T -> (8, rt)
    # so the sample axis lands on lanes (lane-dense, unmasked stores) and only
    # 8 (not 128) output channels ever hit HBM.
    y_t = jax.lax.dot_general(
        wlt_ref[0], h.astype(bf16),
        dimension_numbers=(((1,), (1,)), ((), ())),
        preferred_element_type=jnp.float32) + blt_ref[0]
    o_ref[0, 0] = 2.0 * jnp.tanh(y_t)


def _decoder_call(patch, lt4, de, rt):
    nfps, nsamp, dim = patch.shape
    bs = lt4.shape[1]
    lsp = lt4.shape[3]
    hp = de["w2"].shape[2]
    n_t = pl.cdiv(nsamp, rt)
    cw = lambda i, b, t: (i, 0, 0)

    in_specs = [
        pl.BlockSpec((1, rt, dim), lambda i, b, t: (i, t, 0)),       # patch tile
        pl.BlockSpec((1, 1, 1, lsp), lambda i, b, t: (i, b, 0, 0)),  # latent term
        pl.BlockSpec((1, dim, lsp), cw),                             # w10
        pl.BlockSpec((1, lsp, hp), cw), pl.BlockSpec((1, 1, hp), cw),
        pl.BlockSpec((1, hp, hp), cw), pl.BlockSpec((1, 1, hp), cw),
        pl.BlockSpec((1, hp, hp), cw), pl.BlockSpec((1, 1, hp), cw),
        pl.BlockSpec((1, hp, hp), cw), pl.BlockSpec((1, 1, hp), cw),
        pl.BlockSpec((1, hp, hp), cw), pl.BlockSpec((1, 1, hp), cw),
        pl.BlockSpec((1, 8, hp), cw), pl.BlockSpec((1, 8, 1), cw),   # transposed last
    ]
    return pl.pallas_call(
        _decoder_kernel,
        out_shape=jax.ShapeDtypeStruct((nfps, bs, 8, nsamp), jnp.float32),
        grid=(nfps, bs, n_t),
        in_specs=in_specs,
        out_specs=pl.BlockSpec((1, 1, 8, rt), lambda i, b, t: (i, b, 0, t)),
        compiler_params=pltpu.CompilerParams(
            dimension_semantics=("parallel", "parallel", "parallel"),
            vmem_limit_bytes=VMEM_LIMIT),
    )(patch, lt4, de["w10"],
      de["w2"], de["b2"],
      de["wl0"], de["bl0"], de["wl1"], de["bl1"],
      de["wl2"], de["bl2"], de["wl3"], de["bl3"],
      de["wlast_t"], de["blast_t"])


# ----------------------------------------------------------------------------
# Model forward (glue around the Pallas kernels)
# ----------------------------------------------------------------------------
def baseline_forward(params, gt_abscloth, cores, body, *, nfps, nsample, dim):
    del cores  # `cores` is not used in Baseline.forward
    en, de = params["en"], params["de"]
    bs, npts, _ = gt_abscloth.shape
    nlatent = 512 + 8 * nfps

    # ---- encoder ----
    # Tiny per-batch cond GEMM: leave it to XLA (launch-overhead bound otherwise).
    cond = jnp.dot(body, en["w01"]) + en["b0"]                # (bs, C0p)
    cond3 = cond[:, None, :]

    rt_e = _pick_row_tile(npts)
    gmax = _encoder_call(gt_abscloth, cond3, en, rt_e, npts)  # (bs, 1, NLp)
    zfull = _lin_call(gmax[:, 0, :], en)                      # (bs, NLp)
    z = zfull[:, :nlatent]                                    # (bs, nlatent)

    # ---- decoder ----
    latent = jnp.concatenate([z, body], axis=1)               # (bs, latent_size)
    # Tiny per-primitive latent-term GEMM: also XLA.
    lt = jnp.einsum("bl,ilo->ibo", latent, de["w11"]) + de["b10_11"]  # (nfps,bs,LSp)
    lt4 = lt[:, :, None, :]                                   # (nfps, bs, 1, LSp)

    rt_d = nsample if nsample <= ROW_TILE_TARGET else ROW_TILE_TARGET
    out_t = _decoder_call(de["patch"], lt4, de, rt_d)         # (nfps, bs, 8, nsample)
    out = out_t[:, :, :dim, :]                                # (nfps, bs, dim, nsample)
    rec = jnp.transpose(out, (1, 2, 0, 3)).reshape(bs, dim, 1, nfps * nsample)
    return rec, z.reshape(bs, nlatent, 1)


# ----------------------------------------------------------------------------
# Deterministic parameter init (PyTorch shapes) + packing to kernel layout
# ----------------------------------------------------------------------------
def _init_conv(key, cout, cin):
    kw, kb = jax.random.split(key)
    bound = 1.0 / (cin ** 0.5)
    w = jax.random.uniform(kw, (cout, cin), minval=-bound, maxval=bound,
                           dtype=jnp.float32)
    b = jax.random.uniform(kb, (cout,), minval=-bound, maxval=bound,
                           dtype=jnp.float32)
    return w, b


def init_params(key, nfps, nsample, dim):
    latent_g, latent_l, latent_body = 512, 8, 226 - 9          # latent_body = 217
    hidden = 512
    nlatent = latent_g + latent_l * nfps
    latent_size = latent_body + nlatent
    keys = iter(jax.random.split(key, 9 + nfps * 9 + 4))

    en = {}
    for name, co, ci in [("conv00", latent_body, dim),
                         ("conv01", latent_body, latent_body),
                         ("conv1", 256, latent_body), ("conv2", 256, 256),
                         ("conv3", nlatent, 256), ("conv4", nlatent, nlatent),
                         ("lin1", nlatent, nlatent), ("lin2", nlatent, nlatent),
                         ("lin3", nlatent, nlatent)]:
        w, b = _init_conv(next(keys), co, ci)
        en[name + "_w"], en[name + "_b"] = w, b

    de = []
    for _ in range(nfps):
        p = {}
        for name, co, ci in [("conv10", latent_size, dim),
                             ("conv11", latent_size, latent_size),
                             ("conv2", hidden, latent_size),
                             ("convl0", hidden, hidden), ("convl1", hidden, hidden),
                             ("convl2", hidden, hidden), ("convl3", hidden, hidden),
                             ("last", dim, hidden)]:
            w, b = _init_conv(next(keys), co, ci)
            p[name + "_w"], p[name + "_b"] = w, b
        # Atlasnet patch parameter: (1, dim, 1, nb_pts_in_primitive) ~ U(-1, 1)
        p["patch"] = jax.random.uniform(next(keys), (nsample, dim),
                                        minval=-1.0, maxval=1.0, dtype=jnp.float32)
        de.append(p)
    # weights_init only touches BatchNorm layers; there are none -> no-op.
    return {"en": en, "de": de}


def pack_params(raw, *, nfps, dim):
    """Pre-transpose to (Cin, Cout), zero-pad to lane-dense widths, cast hot-loop
    weights to bf16 (biases / first K=dim layers stay f32)."""
    bf16 = jnp.bfloat16
    latent_body = raw["en"]["conv01_w"].shape[0]               # 217
    nlatent = raw["en"]["conv3_w"].shape[0]                    # 512 + 8*nfps
    latent_size = latent_body + nlatent
    hidden = raw["de"][0]["conv2_w"].shape[0]                  # 512
    c0p = _pad_up(latent_body, LANE)
    nlp = _pad_up(nlatent, LANE)
    lsp = _pad_up(latent_size, LANE)
    hp = _pad_up(hidden, LANE)

    r = raw["en"]
    en = {
        # first layer (K=dim) + cond GEMM stay f32
        "w00": _pad2(r["conv00_w"].T, dim, c0p),
        "w01": _pad2(r["conv01_w"].T, latent_body, c0p),
        "b0": _pad2((r["conv00_b"] + r["conv01_b"]).reshape(1, -1), 1, c0p),
        # hot-loop weights bf16, biases f32
        "w1": _pad2(r["conv1_w"].T, c0p, 256).astype(bf16),
        "b1": r["conv1_b"].reshape(1, -1),
        "w2": _pad2(r["conv2_w"].T, 256, 256).astype(bf16),
        "b2": r["conv2_b"].reshape(1, -1),
        "w3": _pad2(r["conv3_w"].T, 256, nlp).astype(bf16),
        "b3": _pad2(r["conv3_b"].reshape(1, -1), 1, nlp),
        "w4": _pad2(r["conv4_w"].T, nlp, nlp).astype(bf16),
        "b4": _pad2(r["conv4_b"].reshape(1, -1), 1, nlp),
        "l1w": _pad2(r["lin1_w"].T, nlp, nlp).astype(bf16),
        "l1b": _pad2(r["lin1_b"].reshape(1, -1), 1, nlp),
        "l2w": _pad2(r["lin2_w"].T, nlp, nlp).astype(bf16),
        "l2b": _pad2(r["lin2_b"].reshape(1, -1), 1, nlp),
        "l3w": _pad2(r["lin3_w"].T, nlp, nlp).astype(bf16),
        "l3b": _pad2(r["lin3_b"].reshape(1, -1), 1, nlp),
    }

    def stack(fn):
        return jnp.stack([fn(p) for p in raw["de"]], axis=0)

    de = {
        "w10": stack(lambda p: _pad2(p["conv10_w"].T, dim, lsp)),            # f32
        "w11": stack(lambda p: _pad2(p["conv11_w"].T, latent_size, lsp)),    # f32 (XLA)
        "b10_11": stack(lambda p: _pad2(
            (p["conv10_b"] + p["conv11_b"]).reshape(1, -1), 1, lsp)),
        "w2": stack(lambda p: _pad2(p["conv2_w"].T, lsp, hp)).astype(bf16),
        "b2": stack(lambda p: _pad2(p["conv2_b"].reshape(1, -1), 1, hp)),
        # Last layer stored already transposed (out-ch on sublanes, padded 3->8)
        # so the kernel emits a lane-dense (8, rt) tile via an NT matmul.
        "wlast_t": stack(lambda p: _pad2(p["last_w"], 8, hp)).astype(bf16),
        "blast_t": stack(lambda p: _pad2(p["last_b"].reshape(-1, 1), 8, 1)),
        "patch": stack(lambda p: p["patch"]),
    }
    for k in range(4):
        de[f"wl{k}"] = stack(lambda p, k=k: _pad2(p[f"convl{k}_w"].T, hp, hp)).astype(bf16)
        de[f"bl{k}"] = stack(lambda p, k=k: _pad2(p[f"convl{k}_b"].reshape(1, -1), 1, hp))
    return {"en": en, "de": de}


# ----------------------------------------------------------------------------
if __name__ == "__main__":
    nfps, nsample, nr, dim = 2, 8, 2, 3
    bs, npts = 2, 16
    latent_body = 226 - 9

    key = jax.random.PRNGKey(0)
    kp, kx, kbody, kcores = jax.random.split(key, 4)

    raw = init_params(kp, nfps, nsample, dim)
    params = pack_params(raw, nfps=nfps, dim=dim)

    gt_abscloth = jax.random.normal(kx, (bs, npts, dim), dtype=jnp.float32)
    body = jax.random.normal(kbody, (bs, latent_body), dtype=jnp.float32)
    cores = jax.random.normal(kcores, (bs, nfps, dim), dtype=jnp.float32)  # unused

    fwd = jax.jit(functools.partial(baseline_forward,
                                    nfps=nfps, nsample=nsample, dim=dim))
    rec, z = fwd(params, gt_abscloth, cores, body)
    jax.block_until_ready((rec, z))

    assert rec.shape == (bs, dim, 1, nfps * nsample), rec.shape
    assert z.shape == (bs, 512 + 8 * nfps, 1), z.shape
    print("KERNEL_OK")
</pallas_src>

<mosaic_0001>
module attributes {stable_mosaic.version = 11 : i64} {
  func.func @_lin_kernel(%arg0: memref<2x640xf32, #tpu.memory_space<vmem>>, %arg1: memref<640x640xbf16, #tpu.memory_space<vmem>>, %arg2: memref<1x640xf32, #tpu.memory_space<vmem>>, %arg3: memref<640x640xbf16, #tpu.memory_space<vmem>>, %arg4: memref<1x640xf32, #tpu.memory_space<vmem>>, %arg5: memref<640x640xbf16, #tpu.memory_space<vmem>>, %arg6: memref<1x640xf32, #tpu.memory_space<vmem>>, %arg7: memref<2x640xf32, #tpu.memory_space<vmem>>) attributes {dimension_semantics = [], scalar_prefetch = 0 : i64, scratch_operands = 0 : i64, tpu.core_type = #tpu.core_type<tc>} {
    %c0 = arith.constant 0 : index
    %c0_0 = arith.constant 0 : index
    %0 = vector.load %arg0[%c0, %c0_0] : memref<2x640xf32, #tpu.memory_space<vmem>>, vector<2x640xf32>
    %1 = arith.truncf %0 : vector<2x640xf32> to vector<2x640xbf16>
    %c0_1 = arith.constant 0 : index
    %c0_2 = arith.constant 0 : index
    %2 = vector.load %arg1[%c0_1, %c0_2] : memref<640x640xbf16, #tpu.memory_space<vmem>>, vector<640x640xbf16>
    %cst = arith.constant dense<0.000000e+00> : vector<2x640xf32>
    %3 = tpu.matmul %1, %2, %cst {dimension_numbers = #tpu.dot_dimension_numbers<[1], [0], [0], [1], [0, 0, 1, 1], [], []>} : vector<2x640xbf16>, vector<640x640xbf16>, vector<2x640xf32> -> vector<2x640xf32>
    %c0_3 = arith.constant 0 : index
    %c0_4 = arith.constant 0 : index
    %4 = vector.load %arg2[%c0_3, %c0_4] : memref<1x640xf32, #tpu.memory_space<vmem>>, vector<1x640xf32>
    %5 = vector.broadcast %4 : vector<1x640xf32> to vector<2x640xf32>
    %6 = arith.addf %3, %5 : vector<2x640xf32>
    %cst_5 = arith.constant 0.000000e+00 : f32
    %7 = vector.broadcast %cst_5 : f32 to vector<2x640xf32>
    %8 = arith.cmpf ogt, %6, %7 : vector<2x640xf32>
    %cst_6 = arith.constant 0.00999999977 : f32
    %9 = vector.broadcast %cst_6 : f32 to vector<2x640xf32>
    %10 = arith.mulf %9, %6 : vector<2x640xf32>
    %11 = arith.select %8, %6, %10 : vector<2x640xi1>, vector<2x640xf32>
    %12 = arith.truncf %11 : vector<2x640xf32> to vector<2x640xbf16>
    %c0_7 = arith.constant 0 : index
    %c0_8 = arith.constant 0 : index
    %13 = vector.load %arg3[%c0_7, %c0_8] : memref<640x640xbf16, #tpu.memory_space<vmem>>, vector<640x640xbf16>
    %cst_9 = arith.constant dense<0.000000e+00> : vector<2x640xf32>
    %14 = tpu.matmul %12, %13, %cst_9 {dimension_numbers = #tpu.dot_dimension_numbers<[1], [0], [0], [1], [0, 0, 1, 1], [], []>} : vector<2x640xbf16>, vector<640x640xbf16>, vector<2x640xf32> -> vector<2x640xf32>
    %c0_10 = arith.constant 0 : index
    %c0_11 = arith.constant 0 : index
    %15 = vector.load %arg4[%c0_10, %c0_11] : memref<1x640xf32, #tpu.memory_space<vmem>>, vector<1x640xf32>
    %16 = vector.broadcast %15 : vector<1x640xf32> to vector<2x640xf32>
    %17 = arith.addf %14, %16 : vector<2x640xf32>
    %cst_12 = arith.constant 0.000000e+00 : f32
    %18 = vector.broadcast %cst_12 : f32 to vector<2x640xf32>
    %19 = arith.cmpf ogt, %17, %18 : vector<2x640xf32>
    %cst_13 = arith.constant 0.00999999977 : f32
    %20 = vector.broadcast %cst_13 : f32 to vector<2x640xf32>
    %21 = arith.mulf %20, %17 : vector<2x640xf32>
    %22 = arith.select %19, %17, %21 : vector<2x640xi1>, vector<2x640xf32>
    %23 = arith.truncf %22 : vector<2x640xf32> to vector<2x640xbf16>
    %c0_14 = arith.constant 0 : index
    %c0_15 = arith.constant 0 : index
    %24 = vector.load %arg5[%c0_14, %c0_15] : memref<640x640xbf16, #tpu.memory_space<vmem>>, vector<640x640xbf16>
    %cst_16 = arith.constant dense<0.000000e+00> : vector<2x640xf32>
    %25 = tpu.matmul %23, %24, %cst_16 {dimension_numbers = #tpu.dot_dimension_numbers<[1], [0], [0], [1], [0, 0, 1, 1], [], []>} : vector<2x640xbf16>, vector<640x640xbf16>, vector<2x640xf32> -> vector<2x640xf32>
    %c0_17 = arith.constant 0 : index
    %c0_18 = arith.constant 0 : index
    %26 = vector.load %arg6[%c0_17, %c0_18] : memref<1x640xf32, #tpu.memory_space<vmem>>, vector<1x640xf32>
    %27 = vector.broadcast %26 : vector<1x640xf32> to vector<2x640xf32>
    %28 = arith.addf %25, %27 : vector<2x640xf32>
    %c0_19 = arith.constant 0 : index
    %c0_20 = arith.constant 0 : index
    %29 = vector.load %arg7[%c0_19, %c0_20] : memref<2x640xf32, #tpu.memory_space<vmem>>, vector<2x640xf32>
    tpu.vector_store %arg7[%c0_19, %c0_20], %28 {strides = array<i32>} : memref<2x640xf32, #tpu.memory_space<vmem>>, vector<2x640xf32>,
    return
  }
}

module attributes {stable_mosaic.version = 11 : i64} {
  func.func @_encoder_kernel(%arg0: i32, %arg1: i32, %arg2: memref<1x16x3xf32, #tpu.memory_space<vmem>>, %arg3: memref<1x1x256xf32, #tpu.memory_space<vmem>>, %arg4: memref<3x256xf32, #tpu.memory_space<vmem>>, %arg5: memref<256x256xbf16, #tpu.memory_space<vmem>>, %arg6: memref<1x256xf32, #tpu.memory_space<vmem>>, %arg7: memref<256x256xbf16, #tpu.memory_space<vmem>>, %arg8: memref<1x256xf32, #tpu.memory_space<vmem>>, %arg9: memref<256x640xbf16, #tpu.memory_space<vmem>>, %arg10: memref<1x640xf32, #tpu.memory_space<vmem>>, %arg11: memref<640x640xbf16, #tpu.memory_space<vmem>>, %arg12: memref<1x640xf32, #tpu.memory_space<vmem>>, %arg13: memref<1x1x640xf32, #tpu.memory_space<vmem>>, %arg14: memref<1x640xf32, #tpu.memory_space<vmem>>) attributes {dimension_semantics = [#tpu.dimension_semantics<parallel>, #tpu.dimension_semantics<arbitrary>], iteration_bounds = array<i64: 2, 1>, scalar_prefetch = 0 : i64, scratch_operands = 1 : i64, tpu.core_type = #tpu.core_type<tc>, window_params = [{transform_indices = @transform_0, window_bounds = array<i64: 1, 16, 3>}, {transform_indices = @transform_1, window_bounds = array<i64: 1, 1, 256>}, {pipeline_mode = #tpu.pipeline_mode<synchronous>, transform_indices = @transform_2, window_bounds = array<i64: 3, 256>}, {pipeline_mode = #tpu.pipeline_mode<synchronous>, transform_indices = @transform_3, window_bounds = array<i64: 256, 256>}, {pipeline_mode = #tpu.pipeline_mode<synchronous>, transform_indices = @transform_4, window_bounds = array<i64: 1, 256>}, {pipeline_mode = #tpu.pipeline_mode<synchronous>, transform_indices = @transform_5, window_bounds = array<i64: 256, 256>}, {pipeline_mode = #tpu.pipeline_mode<synchronous>, transform_indices = @transform_6, window_bounds = array<i64: 1, 256>}, {pipeline_mode = #tpu.pipeline_mode<synchronous>, transform_indices = @transform_7, window_bounds = array<i64: 256, 640>}, {pipeline_mode = #tpu.pipeline_mode<synchronous>, transform_indices = @transform_8, window_bounds = array<i64: 1, 640>}, {pipeline_mode = #tpu.pipeline_mode<synchronous>, transform_indices = @transform_9, window_bounds = array<i64: 640, 640>}, {pipeline_mode = #tpu.pipeline_mode<synchronous>, transform_indices = @transform_10, window_bounds = array<i64: 1, 640>}, {transform_indices = @transform_11, window_bounds = array<i64: 1, 1, 640>}]} {
    %c0 = arith.constant 0 : index
    %c0_0 = arith.constant 0 : index
    %c0_1 = arith.constant 0 : index
    %0 = vector.load %arg2[%c0, %c0_0, %c0_1] : memref<1x16x3xf32, #tpu.memory_space<vmem>>, vector<1x16x3xf32>
    %1 = vector.shape_cast %0 : vector<1x16x3xf32> to vector<16x3xf32>
    %c0_2 = arith.constant 0 : index
    %c0_3 = arith.constant 0 : index
    %2 = vector.load %arg4[%c0_2, %c0_3] : memref<3x256xf32, #tpu.memory_space<vmem>>, vector<3x256xf32>
    %cst = arith.constant dense<0.000000e+00> : vector<16x256xf32>
    %3 = tpu.matmul %1, %2, %cst {dimension_numbers = #tpu.dot_dimension_numbers<[1], [0], [0], [1], [0, 0, 1, 1], [], []>} : vector<16x3xf32>, vector<3x256xf32>, vector<16x256xf32> -> vector<16x256xf32>
    %c0_4 = arith.constant 0 : index
    %c0_5 = arith.constant 0 : index
    %c0_6 = arith.constant 0 : index
    %4 = vector.load %arg3[%c0_4, %c0_5, %c0_6] : memref<1x1x256xf32, #tpu.memory_space<vmem>>, vector<1x1x256xf32>
    %5 = vector.shape_cast %4 : vector<1x1x256xf32> to vector<1x256xf32>
    %6 = vector.broadcast %5 : vector<1x256xf32> to vector<16x256xf32>
    %7 = arith.addf %3, %6 : vector<16x256xf32>
    %cst_7 = arith.constant 0.000000e+00 : f32
    %8 = vector.broadcast %cst_7 : f32 to vector<16x256xf32>
    %9 = arith.cmpf ogt, %7, %8 : vector<16x256xf32>
    %cst_8 = arith.constant 0.00999999977 : f32
    %10 = vector.broadcast %cst_8 : f32 to vector<16x256xf32>
    %11 = arith.mulf %10, %7 : vector<16x256xf32>
    %12 = arith.select %9, %7, %11 : vector<16x256xi1>, vector<16x256xf32>
    %13 = arith.truncf %12 : vector<16x256xf32> to vector<16x256xbf16>
    %c0_9 = arith.constant 0 : index
    %c0_10 = arith.constant 0 : index
    %14 = vector.load %arg5[%c0_9, %c0_10] : memref<256x256xbf16, #tpu.memory_space<vmem>>, vector<256x256xbf16>
    %cst_11 = arith.constant dense<0.000000e+00> : vector<16x256xf32>
    %15 = tpu.matmul %13, %14, %cst_11 {dimension_numbers = #tpu.dot_dimension_numbers<[1], [0], [0], [1], [0, 0, 1, 1], [], []>} : vector<16x256xbf16>, vector<256x256xbf16>, vector<16x256xf32> -> vector<16x256xf32>
    %c0_12 = arith.constant 0 : index
    %c0_13 = arith.constant 0 : index
    %16 = vector.load %arg6[%c0_12, %c0_13] : memref<1x256xf32, #tpu.memory_space<vmem>>, vector<1x256xf32>
    %17 = vector.broadcast %16 : vector<1x256xf32> to vector<16x256xf32>
    %18 = arith.addf %15, %17 : vector<16x256xf32>
    %cst_14 = arith.constant 0.000000e+00 : f32
    %19 = vector.broadcast %cst_14 : f32 to vector<16x256xf32>
    %20 = arith.cmpf ogt, %18, %19 : vector<16x256xf32>
    %cst_15 = arith.constant 0.00999999977 : f32
    %21 = vector.broadcast %cst_15 : f32 to vector<16x256xf32>
    %22 = arith.mulf %21, %18 : vector<16x256xf32>
    %23 = arith.select %20, %18, %22 : vector<16x256xi1>, vector<16x256xf32>
    %24 = arith.truncf %23 : vector<16x256xf32> to vector<16x256xbf16>
    %c0_16 = arith.constant 0 : index
    %c0_17 = arith.constant 0 : index
    %25 = vector.load %arg7[%c0_16, %c0_17] : memref<256x256xbf16, #tpu.memory_space<vmem>>, vector<256x256xbf16>
    %cst_18 = arith.constant dense<0.000000e+00> : vector<16x256xf32>
    %26 = tpu.matmul %24, %25, %cst_18 {dimension_numbers = #tpu.dot_dimension_numbers<[1], [0], [0], [1], [0, 0, 1, 1], [], []>} : vector<16x256xbf16>, vector<256x256xbf16>, vector<16x256xf32> -> vector<16x256xf32>
    %c0_19 = arith.constant 0 : index
    %c0_20 = arith.constant 0 : index
    %27 = vector.load %arg8[%c0_19, %c0_20] : memref<1x256xf32, #tpu.memory_space<vmem>>, vector<1x256xf32>
    %28 = vector.broadcast %27 : vector<1x256xf32> to vector<16x256xf32>
    %29 = arith.addf %26, %28 : vector<16x256xf32>
    %cst_21 = arith.constant 0.000000e+00 : f32
    %30 = vector.broadcast %cst_21 : f32 to vector<16x256xf32>
    %31 = arith.cmpf ogt, %29, %30 : vector<16x256xf32>
    %cst_22 = arith.constant 0.00999999977 : f32
    %32 = vector.broadcast %cst_22 : f32 to vector<16x256xf32>
    %33 = arith.mulf %32, %29 : vector<16x256xf32>
    %34 = arith.select %31, %29, %33 : vector<16x256xi1>, vector<16x256xf32>
    %35 = arith.truncf %34 : vector<16x256xf32> to vector<16x256xbf16>
    %c0_23 = arith.constant 0 : index
    %c0_24 = arith.constant 0 : index
    %36 = vector.load %arg9[%c0_23, %c0_24] : memref<256x640xbf16, #tpu.memory_space<vmem>>, vector<256x640xbf16>
    %cst_25 = arith.constant dense<0.000000e+00> : vector<16x640xf32>
    %37 = tpu.matmul %35, %36, %cst_25 {dimension_numbers = #tpu.dot_dimension_numbers<[1], [0], [0], [1], [0, 0, 1, 1], [], []>} : vector<16x256xbf16>, vector<256x640xbf16>, vector<16x640xf32> -> vector<16x640xf32>
    %c0_26 = arith.constant 0 : index
    %c0_27 = arith.constant 0 : index
    %38 = vector.load %arg10[%c0_26, %c0_27] : memref<1x640xf32, #tpu.memory_space<vmem>>, vector<1x640xf32>
    %39 = vector.broadcast %38 : vector<1x640xf32> to vector<16x640xf32>
    %40 = arith.addf %37, %39 : vector<16x640xf32>
    %cst_28 = arith.constant 0.000000e+00 : f32
    %41 = vector.broadcast %cst_28 : f32 to vector<16x640xf32>
    %42 = arith.cmpf ogt, %40, %41 : vector<16x640xf32>
    %cst_29 = arith.constant 0.00999999977 : f32
    %43 = vector.broadcast %cst_29 : f32 to vector<16x640xf32>
    %44 = arith.mulf %43, %40 : vector<16x640xf32>
    %45 = arith.select %42, %40, %44 : vector<16x640xi1>, vector<16x640xf32>
    %46 = arith.truncf %45 : vector<16x640xf32> to vector<16x640xbf16>
    %c0_30 = arith.constant 0 : index
    %c0_31 = arith.constant 0 : index
    %47 = vector.load %arg11[%c0_30, %c0_31] : memref<640x640xbf16, #tpu.memory_space<vmem>>, vector<640x640xbf16>
    %cst_32 = arith.constant dense<0.000000e+00> : vector<16x640xf32>
    %48 = tpu.matmul %46, %47, %cst_32 {dimension_numbers = #tpu.dot_dimension_numbers<[1], [0], [0], [1], [0, 0, 1, 1], [], []>} : vector<16x640xbf16>, vector<640x640xbf16>, vector<16x640xf32> -> vector<16x640xf32>
    %c0_33 = arith.constant 0 : index
    %c0_34 = arith.constant 0 : index
    %49 = vector.load %arg12[%c0_33, %c0_34] : memref<1x640xf32, #tpu.memory_space<vmem>>, vector<1x640xf32>
    %50 = vector.broadcast %49 : vector<1x640xf32> to vector<16x640xf32>
    %51 = arith.addf %48, %50 : vector<16x640xf32>
    %cst_35 = arith.constant dense<0xFF800000> : vector<640xf32>
    %52 = vector.multi_reduction <maximumf>, %51, %cst_35 [0] : vector<16x640xf32> to vector<640xf32>
    %53 = vector.shape_cast %52 : vector<640xf32> to vector<1x640xf32>
    %c0_i32 = arith.constant 0 : i32
    %54 = arith.cmpi eq, %arg1, %c0_i32 : i32
    %55 = arith.extui %54 : i1 to i32
    %c0_i32_36 = arith.constant 0 : i32
    %56 = arith.cmpi ne, %55, %c0_i32_36 : i32
    scf.if %56 {
      %cst_43 = arith.constant 0xFF800000 : f32
      %63 = vector.broadcast %cst_43 : f32 to vector<1x640xf32>
      %c0_44 = arith.constant 0 : index
      %c0_45 = arith.constant 0 : index
      %64 = vector.load %arg14[%c0_44, %c0_45] : memref<1x640xf32, #tpu.memory_space<vmem>>, vector<1x640xf32>
      tpu.vector_store %arg14[%c0_44, %c0_45], %63 {strides = array<i32>} : memref<1x640xf32, #tpu.memory_space<vmem>>, vector<1x640xf32>,
    } else {
    }
    %c0_37 = arith.constant 0 : index
    %c0_38 = arith.constant 0 : index
    %57 = vector.load %arg14[%c0_37, %c0_38] : memref<1x640xf32, #tpu.memory_space<vmem>>, vector<1x640xf32>
    %58 = arith.maximumf %57, %53 : vector<1x640xf32>
    %c0_39 = arith.constant 0 : index
    %c0_40 = arith.constant 0 : index
    %59 = vector.load %arg14[%c0_39, %c0_40] : memref<1x640xf32, #tpu.memory_space<vmem>>, vector<1x640xf32>
    tpu.vector_store %arg14[%c0_39, %c0_40], %58 {strides = array<i32>} : memref<1x640xf32, #tpu.memory_space<vmem>>, vector<1x640xf32>,
    %c0_i32_41 = arith.constant 0 : i32
    %60 = arith.cmpi eq, %arg1, %c0_i32_41 : i32
    %61 = arith.extui %60 : i1 to i32
    %c0_i32_42 = arith.constant 0 : i32
    %62 = arith.cmpi ne, %61, %c0_i32_42 : i32
    scf.if %62 {
      %c0_43 = arith.constant 0 : index
      %c0_44 = arith.constant 0 : index
      %63 = vector.load %arg14[%c0_43, %c0_44] : memref<1x640xf32, #tpu.memory_space<vmem>>, vector<1x640xf32>
      %c0_45 = arith.constant 0 : index
      %c0_46 = arith.constant 0 : index
      %c0_47 = arith.constant 0 : index
      %64 = vector.load %arg13[%c0_45, %c0_46, %c0_47] : memref<1x1x640xf32, #tpu.memory_space<vmem>>, vector<1x1x640xf32>
      %65 = vector.shape_cast %64 : vector<1x1x640xf32> to vector<1x640xf32>
      %66 = vector.shape_cast %63 : vector<1x640xf32> to vector<1x1x640xf32>
      tpu.vector_store %arg13[%c0_45, %c0_46, %c0_47], %66 {strides = array<i32>} : memref<1x1x640xf32, #tpu.memory_space<vmem>>, vector<1x1x640xf32>,
    } else {
    }
    return
  }
  func.func @transform_0(%arg0: i32, %arg1: i32) -> (i32, i32, i32) {
    %c0_i32 = arith.constant 0 : i32
    %c0_i32_0 = arith.constant 0 : i32
    return %arg0, %arg1, %c0_i32 : i32, i32, i32
  }
  func.func @transform_1(%arg0: i32, %arg1: i32) -> (i32, i32, i32) {
    %c0_i32 = arith.constant 0 : i32
    %c0_i32_0 = arith.constant 0 : i32
    %c0_i32_1 = arith.constant 0 : i32
    return %arg0, %c0_i32, %c0_i32_0 : i32, i32, i32
  }
  func.func @transform_2(%arg0: i32, %arg1: i32) -> (i32, i32) {
    %c0_i32 = arith.constant 0 : i32
    %c0_i32_0 = arith.constant 0 : i32
    %c0_i32_1 = arith.constant 0 : i32
    return %c0_i32, %c0_i32_0 : i32, i32
  }
  func.func @transform_3(%arg0: i32, %arg1: i32) -> (i32, i32) {
    %c0_i32 = arith.constant 0 : i32
    %c0_i32_0 = arith.constant 0 : i32
    %c0_i32_1 = arith.constant 0 : i32
    return %c0_i32, %c0_i32_0 : i32, i32
  }
  func.func @transform_4(%arg0: i32, %arg1: i32) -> (i32, i32) {
    %c0_i32 = arith.constant 0 : i32
    %c0_i32_0 = arith.constant 0 : i32
    %c0_i32_1 = arith.constant 0 : i32
    return %c0_i32, %c0_i32_0 : i32, i32
  }
  func.func @transform_5(%arg0: i32, %arg1: i32) -> (i32, i32) {
    %c0_i32 = arith.constant 0 : i32
    %c0_i32_0 = arith.constant 0 : i32
    %c0_i32_1 = arith.constant 0 : i32
    return %c0_i32, %c0_i32_0 : i32, i32
  }
  func.func @transform_6(%arg0: i32, %arg1: i32) -> (i32, i32) {
    %c0_i32 = arith.constant 0 : i32
    %c0_i32_0 = arith.constant 0 : i32
    %c0_i32_1 = arith.constant 0 : i32
    return %c0_i32, %c0_i32_0 : i32, i32
  }
  func.func @transform_7(%arg0: i32, %arg1: i32) -> (i32, i32) {
    %c0_i32 = arith.constant 0 : i32
    %c0_i32_0 = arith.constant 0 : i32
    %c0_i32_1 = arith.constant 0 : i32
    return %c0_i32, %c0_i32_0 : i32, i32
  }
  func.func @transform_8(%arg0: i32, %arg1: i32) -> (i32, i32) {
    %c0_i32 = arith.constant 0 : i32
    %c0_i32_0 = arith.constant 0 : i32
    %c0_i32_1 = arith.constant 0 : i32
    return %c0_i32, %c0_i32_0 : i32, i32
  }
  func.func @transform_9(%arg0: i32, %arg1: i32) -> (i32, i32) {
    %c0_i32 = arith.constant 0 : i32
    %c0_i32_0 = arith.constant 0 : i32
    %c0_i32_1 = arith.constant 0 : i32
    return %c0_i32, %c0_i32_0 : i32, i32
  }
  func.func @transform_10(%arg0: i32, %arg1: i32) -> (i32, i32) {
    %c0_i32 = arith.constant 0 : i32
    %c0_i32_0 = arith.constant 0 : i32
    %c0_i32_1 = arith.constant 0 : i32
    return %c0_i32, %c0_i32_0 : i32, i32
  }
  func.func @transform_11(%arg0: i32, %arg1: i32) -> (i32, i32, i32) {
    %c0_i32 = arith.constant 0 : i32
    %c0_i32_0 = arith.constant 0 : i32
    %c0_i32_1 = arith.constant 0 : i32
    return %arg0, %c0_i32, %c0_i32_0 : i32, i32, i32
  }
}

module attributes {stable_mosaic.version = 11 : i64} {
  func.func @_decoder_kernel(%arg0: i32, %arg1: i32, %arg2: i32, %arg3: memref<1x8x3xf32, #tpu.memory_space<vmem>>, %arg4: memref<1x1x1x768xf32, #tpu.memory_space<vmem>>, %arg5: memref<1x3x768xf32, #tpu.memory_space<vmem>>, %arg6: memref<1x768x512xbf16, #tpu.memory_space<vmem>>, %arg7: memref<1x1x512xf32, #tpu.memory_space<vmem>>, %arg8: memref<1x512x512xbf16, #tpu.memory_space<vmem>>, %arg9: memref<1x1x512xf32, #tpu.memory_space<vmem>>, %arg10: memref<1x512x512xbf16, #tpu.memory_space<vmem>>, %arg11: memref<1x1x512xf32, #tpu.memory_space<vmem>>, %arg12: memref<1x512x512xbf16, #tpu.memory_space<vmem>>, %arg13: memref<1x1x512xf32, #tpu.memory_space<vmem>>, %arg14: memref<1x512x512xbf16, #tpu.memory_space<vmem>>, %arg15: memref<1x1x512xf32, #tpu.memory_space<vmem>>, %arg16: memref<1x8x512xbf16, #tpu.memory_space<vmem>>, %arg17: memref<1x8x1xf32, #tpu.memory_space<vmem>>, %arg18: memref<1x1x8x8xf32, #tpu.memory_space<vmem>>) attributes {dimension_semantics = [#tpu.dimension_semantics<parallel>, #tpu.dimension_semantics<parallel>, #tpu.dimension_semantics<parallel>], iteration_bounds = array<i64: 2, 2, 1>, scalar_prefetch = 0 : i64, scratch_operands = 0 : i64, tpu.core_type = #tpu.core_type<tc>, window_params = [{transform_indices = @transform_0, window_bounds = array<i64: 1, 8, 3>}, {transform_indices = @transform_1, window_bounds = array<i64: 1, 1, 1, 768>}, {transform_indices = @transform_2, window_bounds = array<i64: 1, 3, 768>}, {transform_indices = @transform_3, window_bounds = array<i64: 1, 768, 512>}, {transform_indices = @transform_4, window_bounds = array<i64: 1, 1, 512>}, {transform_indices = @transform_5, window_bounds = array<i64: 1, 512, 512>}, {transform_indices = @transform_6, window_bounds = array<i64: 1, 1, 512>}, {transform_indices = @transform_7, window_bounds = array<i64: 1, 512, 512>}, {transform_indices = @transform_8, window_bounds = array<i64: 1, 1, 512>}, {transform_indices = @transform_9, window_bounds = array<i64: 1, 512, 512>}, {transform_indices = @transform_10, window_bounds = array<i64: 1, 1, 512>}, {transform_indices = @transform_11, window_bounds = array<i64: 1, 512, 512>}, {transform_indices = @transform_12, window_bounds = array<i64: 1, 1, 512>}, {transform_indices = @transform_13, window_bounds = array<i64: 1, 8, 512>}, {transform_indices = @transform_14, window_bounds = array<i64: 1, 8, 1>}, {transform_indices = @transform_15, window_bounds = array<i64: 1, 1, 8, 8>}]} {
    %c0 = arith.constant 0 : index
    %c0_0 = arith.constant 0 : index
    %c0_1 = arith.constant 0 : index
    %0 = vector.load %arg3[%c0, %c0_0, %c0_1] : memref<1x8x3xf32, #tpu.memory_space<vmem>>, vector<1x8x3xf32>
    %1 = vector.shape_cast %0 : vector<1x8x3xf32> to vector<8x3xf32>
    %c0_2 = arith.constant 0 : index
    %c0_3 = arith.constant 0 : index
    %c0_4 = arith.constant 0 : index
    %2 = vector.load %arg5[%c0_2, %c0_3, %c0_4] : memref<1x3x768xf32, #tpu.memory_space<vmem>>, vector<1x3x768xf32>
    %3 = vector.shape_cast %2 : vector<1x3x768xf32> to vector<3x768xf32>
    %cst = arith.constant dense<0.000000e+00> : vector<8x768xf32>
    %4 = tpu.matmul %1, %3, %cst {dimension_numbers = #tpu.dot_dimension_numbers<[1], [0], [0], [1], [0, 0, 1, 1], [], []>} : vector<8x3xf32>, vector<3x768xf32>, vector<8x768xf32> -> vector<8x768xf32>
    %c0_5 = arith.constant 0 : index
    %c0_6 = arith.constant 0 : index
    %c0_7 = arith.constant 0 : index
    %c0_8 = arith.constant 0 : index
    %5 = vector.load %arg4[%c0_5, %c0_6, %c0_7, %c0_8] : memref<1x1x1x768xf32, #tpu.memory_space<vmem>>, vector<1x1x1x768xf32>
    %6 = vector.shape_cast %5 : vector<1x1x1x768xf32> to vector<1x768xf32>
    %7 = vector.broadcast %6 : vector<1x768xf32> to vector<8x768xf32>
    %8 = arith.addf %4, %7 : vector<8x768xf32>
    %cst_9 = arith.constant 0.000000e+00 : f32
    %9 = vector.broadcast %cst_9 : f32 to vector<8x768xf32>
    %10 = arith.cmpf ogt, %8, %9 : vector<8x768xf32>
    %cst_10 = arith.constant 0.00999999977 : f32
    %11 = vector.broadcast %cst_10 : f32 to vector<8x768xf32>
    %12 = arith.mulf %11, %8 : vector<8x768xf32>
    %13 = arith.select %10, %8, %12 : vector<8x768xi1>, vector<8x768xf32>
    %14 = arith.truncf %13 : vector<8x768xf32> to vector<8x768xbf16>
    %c0_11 = arith.constant 0 : index
    %c0_12 = arith.constant 0 : index
    %c0_13 = arith.constant 0 : index
    %15 = vector.load %arg6[%c0_11, %c0_12, %c0_13] : memref<1x768x512xbf16, #tpu.memory_space<vmem>>, vector<1x768x512xbf16>
    %16 = vector.shape_cast %15 : vector<1x768x512xbf16> to vector<768x512xbf16>
    %cst_14 = arith.constant dense<0.000000e+00> : vector<8x512xf32>
    %17 = tpu.matmul %14, %16, %cst_14 {dimension_numbers = #tpu.dot_dimension_numbers<[1], [0], [0], [1], [0, 0, 1, 1], [], []>} : vector<8x768xbf16>, vector<768x512xbf16>, vector<8x512xf32> -> vector<8x512xf32>
    %c0_15 = arith.constant 0 : index
    %c0_16 = arith.constant 0 : index
    %c0_17 = arith.constant 0 : index
    %18 = vector.load %arg7[%c0_15, %c0_16, %c0_17] : memref<1x1x512xf32, #tpu.memory_space<vmem>>, vector<1x1x512xf32>
    %19 = vector.shape_cast %18 : vector<1x1x512xf32> to vector<1x512xf32>
    %20 = vector.broadcast %19 : vector<1x512xf32> to vector<8x512xf32>
    %21 = arith.addf %17, %20 : vector<8x512xf32>
    %cst_18 = arith.constant 0.000000e+00 : f32
    %22 = vector.broadcast %cst_18 : f32 to vector<8x512xf32>
    %23 = arith.cmpf ogt, %21, %22 : vector<8x512xf32>
    %cst_19 = arith.constant 0.00999999977 : f32
    %24 = vector.broadcast %cst_19 : f32 to vector<8x512xf32>
    %25 = arith.mulf %24, %21 : vector<8x512xf32>
    %26 = arith.select %23, %21, %25 : vector<8x512xi1>, vector<8x512xf32>
    %27 = arith.truncf %26 : vector<8x512xf32> to vector<8x512xbf16>
    %c0_20 = arith.constant 0 : index
    %c0_21 = arith.constant 0 : index
    %c0_22 = arith.constant 0 : index
    %28 = vector.load %arg8[%c0_20, %c0_21, %c0_22] : memref<1x512x512xbf16, #tpu.memory_space<vmem>>, vector<1x512x512xbf16>
    %29 = vector.shape_cast %28 : vector<1x512x512xbf16> to vector<512x512xbf16>
    %cst_23 = arith.constant dense<0.000000e+00> : vector<8x512xf32>
    %30 = tpu.matmul %27, %29, %cst_23 {dimension_numbers = #tpu.dot_dimension_numbers<[1], [0], [0], [1], [0, 0, 1, 1], [], []>} : vector<8x512xbf16>, vector<512x512xbf16>, vector<8x512xf32> -> vector<8x512xf32>
    %c0_24 = arith.constant 0 : index
    %c0_25 = arith.constant 0 : index
    %c0_26 = arith.constant 0 : index
    %31 = vector.load %arg9[%c0_24, %c0_25, %c0_26] : memref<1x1x512xf32, #tpu.memory_space<vmem>>, vector<1x1x512xf32>
    %32 = vector.shape_cast %31 : vector<1x1x512xf32> to vector<1x512xf32>
    %33 = vector.broadcast %32 : vector<1x512xf32> to vector<8x512xf32>
    %34 = arith.addf %30, %33 : vector<8x512xf32>
    %cst_27 = arith.constant 0.000000e+00 : f32
    %35 = vector.broadcast %cst_27 : f32 to vector<8x512xf32>
    %36 = arith.cmpf ogt, %34, %35 : vector<8x512xf32>
    %cst_28 = arith.constant 0.00999999977 : f32
    %37 = vector.broadcast %cst_28 : f32 to vector<8x512xf32>
    %38 = arith.mulf %37, %34 : vector<8x512xf32>
    %39 = arith.select %36, %34, %38 : vector<8x512xi1>, vector<8x512xf32>
    %40 = arith.truncf %39 : vector<8x512xf32> to vector<8x512xbf16>
    %c0_29 = arith.constant 0 : index
    %c0_30 = arith.constant 0 : index
    %c0_31 = arith.constant 0 : index
    %41 = vector.load %arg10[%c0_29, %c0_30, %c0_31] : memref<1x512x512xbf16, #tpu.memory_space<vmem>>, vector<1x512x512xbf16>
    %42 = vector.shape_cast %41 : vector<1x512x512xbf16> to vector<512x512xbf16>
    %cst_32 = arith.constant dense<0.000000e+00> : vector<8x512xf32>
    %43 = tpu.matmul %40, %42, %cst_32 {dimension_numbers = #tpu.dot_dimension_numbers<[1], [0], [0], [1], [0, 0, 1, 1], [], []>} : vector<8x512xbf16>, vector<512x512xbf16>, vector<8x512xf32> -> vector<8x512xf32>
    %c0_33 = arith.constant 0 : index
    %c0_34 = arith.constant 0 : index
    %c0_35 = arith.constant 0 : index
    %44 = vector.load %arg11[%c0_33, %c0_34, %c0_35] : memref<1x1x512xf32, #tpu.memory_space<vmem>>, vector<1x1x512xf32>
    %45 = vector.shape_cast %44 : vector<1x1x512xf32> to vector<1x512xf32>
    %46 = vector.broadcast %45 : vector<1x512xf32> to vector<8x512xf32>
    %47 = arith.addf %43, %46 : vector<8x512xf32>
    %cst_36 = arith.constant 0.000000e+00 : f32
    %48 = vector.broadcast %cst_36 : f32 to vector<8x512xf32>
    %49 = arith.cmpf ogt, %47, %48 : vector<8x512xf32>
    %cst_37 = arith.constant 0.00999999977 : f32
    %50 = vector.broadcast %cst_37 : f32 to vector<8x512xf32>
    %51 = arith.mulf %50, %47 : vector<8x512xf32>
    %52 = arith.select %49, %47, %51 : vector<8x512xi1>, vector<8x512xf32>
    %53 = arith.truncf %52 : vector<8x512xf32> to vector<8x512xbf16>
    %c0_38 = arith.constant 0 : index
    %c0_39 = arith.constant 0 : index
    %c0_40 = arith.constant 0 : index
    %54 = vector.load %arg12[%c0_38, %c0_39, %c0_40] : memref<1x512x512xbf16, #tpu.memory_space<vmem>>, vector<1x512x512xbf16>
    %55 = vector.shape_cast %54 : vector<1x512x512xbf16> to vector<512x512xbf16>
    %cst_41 = arith.constant dense<0.000000e+00> : vector<8x512xf32>
    %56 = tpu.matmul %53, %55, %cst_41 {dimension_numbers = #tpu.dot_dimension_numbers<[1], [0], [0], [1], [0, 0, 1, 1], [], []>} : vector<8x512xbf16>, vector<512x512xbf16>, vector<8x512xf32> -> vector<8x512xf32>
    %c0_42 = arith.constant 0 : index
    %c0_43 = arith.constant 0 : index
    %c0_44 = arith.constant 0 : index
    %57 = vector.load %arg13[%c0_42, %c0_43, %c0_44] : memref<1x1x512xf32, #tpu.memory_space<vmem>>, vector<1x1x512xf32>
    %58 = vector.shape_cast %57 : vector<1x1x512xf32> to vector<1x512xf32>
    %59 = vector.broadcast %58 : vector<1x512xf32> to vector<8x512xf32>
    %60 = arith.addf %56, %59 : vector<8x512xf32>
    %cst_45 = arith.constant 0.000000e+00 : f32
    %61 = vector.broadcast %cst_45 : f32 to vector<8x512xf32>
    %62 = arith.cmpf ogt, %60, %61 : vector<8x512xf32>
    %cst_46 = arith.constant 0.00999999977 : f32
    %63 = vector.broadcast %cst_46 : f32 to vector<8x512xf32>
    %64 = arith.mulf %63, %60 : vector<8x512xf32>
    %65 = arith.select %62, %60, %64 : vector<8x512xi1>, vector<8x512xf32>
    %66 = arith.truncf %65 : vector<8x512xf32> to vector<8x512xbf16>
    %c0_47 = arith.constant 0 : index
    %c0_48 = arith.constant 0 : index
    %c0_49 = arith.constant 0 : index
    %67 = vector.load %arg14[%c0_47, %c0_48, %c0_49] : memref<1x512x512xbf16, #tpu.memory_space<vmem>>, vector<1x512x512xbf16>
    %68 = vector.shape_cast %67 : vector<1x512x512xbf16> to vector<512x512xbf16>
    %cst_50 = arith.constant dense<0.000000e+00> : vector<8x512xf32>
    %69 = tpu.matmul %66, %68, %cst_50 {dimension_numbers = #tpu.dot_dimension_numbers<[1], [0], [0], [1], [0, 0, 1, 1], [], []>} : vector<8x512xbf16>, vector<512x512xbf16>, vector<8x512xf32> -> vector<8x512xf32>
    %c0_51 = arith.constant 0 : index
    %c0_52 = arith.constant 0 : index
    %c0_53 = arith.constant 0 : index
    %70 = vector.load %arg15[%c0_51, %c0_52, %c0_53] : memref<1x1x512xf32, #tpu.memory_space<vmem>>, vector<1x1x512xf32>
    %71 = vector.shape_cast %70 : vector<1x1x512xf32> to vector<1x512xf32>
    %72 = vector.broadcast %71 : vector<1x512xf32> to vector<8x512xf32>
    %73 = arith.addf %69, %72 : vector<8x512xf32>
    %cst_54 = arith.constant 0.000000e+00 : f32
    %74 = vector.broadcast %cst_54 : f32 to vector<8x512xf32>
    %75 = arith.cmpf ogt, %73, %74 : vector<8x512xf32>
    %cst_55 = arith.constant 0.00999999977 : f32
    %76 = vector.broadcast %cst_55 : f32 to vector<8x512xf32>
    %77 = arith.mulf %76, %73 : vector<8x512xf32>
    %78 = arith.select %75, %73, %77 : vector<8x512xi1>, vector<8x512xf32>
    %c0_56 = arith.constant 0 : index
    %c0_57 = arith.constant 0 : index
    %c0_58 = arith.constant 0 : index
    %79 = vector.load %arg16[%c0_56, %c0_57, %c0_58] : memref<1x8x512xbf16, #tpu.memory_space<vmem>>, vector<1x8x512xbf16>
    %80 = vector.shape_cast %79 : vector<1x8x512xbf16> to vector<8x512xbf16>
    %81 = arith.truncf %78 : vector<8x512xf32> to vector<8x512xbf16>
    %cst_59 = arith.constant dense<0.000000e+00> : vector<8x8xf32>
    %82 = tpu.matmul %80, %81, %cst_59 {dimension_numbers = #tpu.dot_dimension_numbers<[1], [1], [0], [0], [0, 0, 1, 0], [], []>} : vector<8x512xbf16>, vector<8x512xbf16>, vector<8x8xf32> -> vector<8x8xf32>
    %c0_60 = arith.constant 0 : index
    %c0_61 = arith.constant 0 : index
    %c0_62 = arith.constant 0 : index
    %83 = vector.load %arg17[%c0_60, %c0_61, %c0_62] : memref<1x8x1xf32, #tpu.memory_space<vmem>>, vector<1x8x1xf32>
    %84 = vector.shape_cast %83 : vector<1x8x1xf32> to vector<8x1xf32>
    %85 = vector.broadcast %84 : vector<8x1xf32> to vector<8x8xf32>
    %86 = arith.addf %82, %85 : vector<8x8xf32>
    %87 = math.tanh %86 : vector<8x8xf32>
    %cst_63 = arith.constant 2.000000e+00 : f32
    %88 = vector.broadcast %cst_63 : f32 to vector<8x8xf32>
    %89 = arith.mulf %88, %87 : vector<8x8xf32>
    %c0_64 = arith.constant 0 : index
    %c0_65 = arith.constant 0 : index
    %c0_66 = arith.constant 0 : index
    %c0_67 = arith.constant 0 : index
    %90 = vector.load %arg18[%c0_64, %c0_65, %c0_66, %c0_67] : memref<1x1x8x8xf32, #tpu.memory_space<vmem>>, vector<1x1x8x8xf32>
    %91 = vector.shape_cast %90 : vector<1x1x8x8xf32> to vector<8x8xf32>
    %92 = vector.shape_cast %89 : vector<8x8xf32> to vector<1x1x8x8xf32>
    tpu.vector_store %arg18[%c0_64, %c0_65, %c0_66, %c0_67], %92 {strides = array<i32>} : memref<1x1x8x8xf32, #tpu.memory_space<vmem>>, vector<1x1x8x8xf32>,
    return
  }
  func.func @transform_0(%arg0: i32, %arg1: i32, %arg2: i32) -> (i32, i32, i32) {
    %c0_i32 = arith.constant 0 : i32
    %c0_i32_0 = arith.constant 0 : i32
    return %arg0, %arg2, %c0_i32 : i32, i32, i32
  }
  func.func @transform_1(%arg0: i32, %arg1: i32, %arg2: i32) -> (i32, i32, i32, i32) {
    %c0_i32 = arith.constant 0 : i32
    %c0_i32_0 = arith.constant 0 : i32
    %c0_i32_1 = arith.constant 0 : i32
    return %arg0, %arg1, %c0_i32, %c0_i32_0 : i32, i32, i32, i32
  }
  func.func @transform_2(%arg0: i32, %arg1: i32, %arg2: i32) -> (i32, i32, i32) {
    %c0_i32 = arith.constant 0 : i32
    %c0_i32_0 = arith.constant 0 : i32
    %c0_i32_1 = arith.constant 0 : i32
    return %arg0, %c0_i32, %c0_i32_0 : i32, i32, i32
  }
  func.func @transform_3(%arg0: i32, %arg1: i32, %arg2: i32) -> (i32, i32, i32) {
    %c0_i32 = arith.constant 0 : i32
    %c0_i32_0 = arith.constant 0 : i32
    %c0_i32_1 = arith.constant 0 : i32
    return %arg0, %c0_i32, %c0_i32_0 : i32, i32, i32
  }
  func.func @transform_4(%arg0: i32, %arg1: i32, %arg2: i32) -> (i32, i32, i32) {
    %c0_i32 = arith.constant 0 : i32
    %c0_i32_0 = arith.constant 0 : i32
    %c0_i32_1 = arith.constant 0 : i32
    return %arg0, %c0_i32, %c0_i32_0 : i32, i32, i32
  }
  func.func @transform_5(%arg0: i32, %arg1: i32, %arg2: i32) -> (i32, i32, i32) {
    %c0_i32 = arith.constant 0 : i32
    %c0_i32_0 = arith.constant 0 : i32
    %c0_i32_1 = arith.constant 0 : i32
    return %arg0, %c0_i32, %c0_i32_0 : i32, i32, i32
  }
  func.func @transform_6(%arg0: i32, %arg1: i32, %arg2: i32) -> (i32, i32, i32) {
    %c0_i32 = arith.constant 0 : i32
    %c0_i32_0 = arith.constant 0 : i32
    %c0_i32_1 = arith.constant 0 : i32
    return %arg0, %c0_i32, %c0_i32_0 : i32, i32, i32
  }
  func.func @transform_7(%arg0: i32, %arg1: i32, %arg2: i32) -> (i32, i32, i32) {
    %c0_i32 = arith.constant 0 : i32
    %c0_i32_0 = arith.constant 0 : i32
    %c0_i32_1 = arith.constant 0 : i32
    return %arg0, %c0_i32, %c0_i32_0 : i32, i32, i32
  }
  func.func @transform_8(%arg0: i32, %arg1: i32, %arg2: i32) -> (i32, i32, i32) {
    %c0_i32 = arith.constant 0 : i32
    %c0_i32_0 = arith.constant 0 : i32
    %c0_i32_1 = arith.constant 0 : i32
    return %arg0, %c0_i32, %c0_i32_0 : i32, i32, i32
  }
  func.func @transform_9(%arg0: i32, %arg1: i32, %arg2: i32) -> (i32, i32, i32) {
    %c0_i32 = arith.constant 0 : i32
    %c0_i32_0 = arith.constant 0 : i32
    %c0_i32_1 = arith.constant 0 : i32
    return %arg0, %c0_i32, %c0_i32_0 : i32, i32, i32
  }
  func.func @transform_10(%arg0: i32, %arg1: i32, %arg2: i32) -> (i32, i32, i32) {
    %c0_i32 = arith.constant 0 : i32
    %c0_i32_0 = arith.constant 0 : i32
    %c0_i32_1 = arith.constant 0 : i32
    return %arg0, %c0_i32, %c0_i32_0 : i32, i32, i32
  }
  func.func @transform_11(%arg0: i32, %arg1: i32, %arg2: i32) -> (i32, i32, i32) {
    %c0_i32 = arith.constant 0 : i32
    %c0_i32_0 = arith.constant 0 : i32
    %c0_i32_1 = arith.constant 0 : i32
    return %arg0, %c0_i32, %c0_i32_0 : i32, i32, i32
  }
  func.func @transform_12(%arg0: i32, %arg1: i32, %arg2: i32) -> (i32, i32, i32) {
    %c0_i32 = arith.constant 0 : i32
    %c0_i32_0 = arith.constant 0 : i32
    %c0_i32_1 = arith.constant 0 : i32
    return %arg0, %c0_i32, %c0_i32_0 : i32, i32, i32
  }
  func.func @transform_13(%arg0: i32, %arg1: i32, %arg2: i32) -> (i32, i32, i32) {
    %c0_i32 = arith.constant 0 : i32
    %c0_i32_0 = arith.constant 0 : i32
    %c0_i32_1 = arith.constant 0 : i32
    return %arg0, %c0_i32, %c0_i32_0 : i32, i32, i32
  }
  func.func @transform_14(%arg0: i32, %arg1: i32, %arg2: i32) -> (i32, i32, i32) {
    %c0_i32 = arith.constant 0 : i32
    %c0_i32_0 = arith.constant 0 : i32
    %c0_i32_1 = arith.constant 0 : i32
    return %arg0, %c0_i32, %c0_i32_0 : i32, i32, i32
  }
  func.func @transform_15(%arg0: i32, %arg1: i32, %arg2: i32) -> (i32, i32, i32, i32) {
    %c0_i32 = arith.constant 0 : i32
    %c0_i32_0 = arith.constant 0 : i32
    return %arg0, %arg1, %c0_i32, %arg2 : i32, i32, i32, i32
  }
}

</mosaic_0001>

<bundles_post_ra>
// kernel: baseline_forward.3
= control target key start
LH: loop header
LB: loop body
LE: loop exit
PB: predicated region body
PF: predicated region fallthrough
CT: control target
= control target key end

     0   :  { %s5705_s0 = inlined_call_operand.vmem [shape: f32[2,16,3], index: 0, kind: input, shape index: {}]   ;;  %s5706_s1 = inlined_call_operand.vmem [shape: f32[2,1,256], index: 1, kind: input, shape index: {}]   ;;  %s5707_s2 = inlined_call_operand.hbm [shape: f32[3,256], index: 2, kind: input, shape index: {}]   ;;  %s5708_s3 = inlined_call_operand.hbm [shape: bf16[256,256], index: 3, kind: input, shape index: {}]   ;;  %s5709_s4 = inlined_call_operand.hbm [shape: f32[1,256], index: 4, kind: input, shape index: {}]   ;;  %s5710_s5 = inlined_call_operand.hbm [shape: bf16[256,256], index: 5, kind: input, shape index: {}]   ;;  %s5711_s6 = inlined_call_operand.hbm [shape: f32[1,256], index: 6, kind: input, shape index: {}]   ;;  %s5712_s7 = inlined_call_operand.hbm [shape: bf16[256,640], index: 7, kind: input, shape index: {}]   ;;  %s5713_s8 = inlined_call_operand.hbm [shape: f32[1,640], index: 8, kind: input, shape index: {}]   ;;  %s5714_s9 = inlined_call_operand.hbm [shape: bf16[640,640], index: 9, kind: input, shape index: {}]   ;;  %s5715_s10 = inlined_call_operand.hbm [shape: f32[1,640], index: 10, kind: input, shape index: {}]   ;;  %s5716_s11 = inlined_call_operand.vmem [shape: f32[2,1,640], index: 11, kind: output, shape index: {}]  }
   0x1   :  { %5721 = sst [smem:[#allocation23_spill]] %s5708_s3 }
   0x2   :  { %5722 = sst [smem:[#allocation24_spill]] %s5716_s11 }
   0x3   :  { %16 = vsyncpa [#allocation4], 0 }
   0x4   :  { %17 = vsyncpa [#allocation6], 0 }
   0x5   :  { %18 = vsyncpa [#allocation9], 0 }
   0x6   :  { %19 = vsyncpa [#allocation12], 0 }
   0x7   :  { %20 = vsyncpa [#allocation15], 0  ;;  %s5336_s17 = smov 0   ;;  %s5338_s18 = smov 0  }
   0x8   :  { %s5340_s19 = smov 0  }
   0x9 LB: > { %5723 = sst [smem:[#allocation22_spill]] %s5256_s19  ;;  %s5258_s20 = smov [#allocation5]   ;;  %s5256_s19 = sphi %s5340_s19, %s5737_s19   ;;  %s5252_s18 = sphi %s5338_s18, %s5736_s18   ;;  %s5248_s17 = sphi %s5336_s17, %s5735_s17  }
   0xa   : > { %s335_s21 = sshll.u32 %s5258_s20, 4  ;;  %s3852_s22 = sadd.s32 4294967295, %s5256_s19   ;;  %s5358_s21 = int_to_ptr.vmem [resolvable:$true] %s335_s21 }
   0xb   : > { %p3854_p0 = scmp.ge.s32.totalorder %s5256_s19, 1  ;;  %p312_p1 = scmp.lt.s32.totalorder %s5256_s19, 3 }
   0xc   : > { %p5354_p2 = scmp.eq.s32.totalorder %s3852_s22, 0  ;;  %s5259_s25 = smov [#allocation8]  }
   0xd   : > { %p5360_p3 = pnand %p3854_p0, %p312_p1  ;;  %s359_s26 = sshll.u32 %s5259_s25, 4  ;;  %s5366_s26 = int_to_ptr.vmem [resolvable:$true] %s359_s26 }
   0xe   : > { %s5724_s23 = scalar_select %p5354_p2, 1, 0 }
   0xf   : > { %s5725_s24 = scalar_select %p5360_p3, 1, 0 }
  0x10   : > { %p4385_p4 = pneg %p5360_p3  ;;  %s5260_s28 = smov [#allocation11]  }
  0x11   : > { %s383_s29 = sshll.u32 %s5260_s28, 4  ;;  %s5727_s3 = sld [smem:[#allocation23_spill]]  ;;  %s5374_s29 = int_to_ptr.vmem [resolvable:$true] %s383_s29 }
  0x12   : > { %p5370_p5 = pnand %p5354_p2, %p4385_p4 }
  0x14   : > { %p5384_p7 = pneg %p5370_p5 }
  0x17   : > { %s4962_s13 = scalar_lea.hbm %s5727_s3, 4096 }
  0x18   : > { %p4963_p6 = scmp.ne.s32.totalorder %s5727_s3, %s4962_s13  ;;  %p4969_p10 = scmp.lt.u32.totalorder %s4962_s13, %s5727_s3 }
  0x1a   : > { %p4965_p8 = pnand %p5384_p7, %p4963_p6 }
  0x1c   : > { %p4966_p9 = pneg %p4965_p8 }
  0x1e   : > { %p4971_p11 = pnand %p4969_p10, %p4966_p9 }
  0x20   : > { %4974 = shalt.err (!%p4971_p11)
}
  0x21   : > { %s4975_s25 = scalar_lea.vmem %s5358_s21, 4096  ;;  %p4983_p1 = scmp.lt.s32.totalorder %s5358_s21, %s5358_s21 }
  0x22   : > { %p4976_p12 = scmp.ne.s32.totalorder %s5358_s21, %s4975_s25  ;;  %p4984_p4 = scmp.lt.s32.totalorder %s4975_s25, %s4975_s25 }
  0x24   : > { %p4978_p13 = pnand %p4976_p12, %p5384_p7  ;;  %p4985_p6 = por %p4984_p4, %p4983_p1 }
  0x26   : > { %p4979_p0 = pneg %p4978_p13 }
  0x28   : > { %p4986_p8 = pnand %p4985_p6, %p4979_p0 }
  0x2a   : > { %4989 = shalt.err (!%p4986_p8)
}
  0x2b   : > { %s5261_s28 = smov 128   ;;  %s5262_s30 = smov 8  }
  0x2c   : > { %4391 = dma.hbm_to_vmem [thread:$0]  (!%p5370_p5), %s5727_s3, 4096, %s5358_s21, [#allocation6], %s5261_s28, %s5261_s28, %s5262_s30  }
  0x2d   : > { %s4990_s20 = scalar_lea.hbm %s5710_s5, 4096 }
  0x2e   : > { %p4991_p9 = scmp.ne.s32.totalorder %s5710_s5, %s4990_s20  ;;  %p4997_p12 = scmp.lt.u32.totalorder %s4990_s20, %s5710_s5 }
  0x30   : > { %p4993_p10 = pnand %p4991_p9, %p5384_p7 }
  0x32   : > { %p4994_p11 = pneg %p4993_p10 }
  0x34   : > { %p4999_p13 = pnand %p4997_p12, %p4994_p11 }
  0x36   : > { %5002 = shalt.err (!%p4999_p13)
}
  0x37   : > { %s5003_s21 = scalar_lea.vmem %s5366_s26, 4096  ;;  %p5011_p6 = scmp.lt.s32.totalorder %s5366_s26, %s5366_s26 }
  0x38   : > { %p5004_p0 = scmp.ne.s32.totalorder %s5366_s26, %s5003_s21  ;;  %p5012_p8 = scmp.lt.s32.totalorder %s5003_s21, %s5003_s21 }
  0x3a   : > { %p5006_p1 = pnand %p5004_p0, %p5384_p7  ;;  %p5013_p9 = por %p5012_p8, %p5011_p6 }
  0x3c   : > { %p5007_p4 = pneg %p5006_p1 }
  0x3e   : > { %p5014_p10 = pnand %p5013_p9, %p5007_p4 }
  0x40   : > { %5017 = shalt.err (!%p5014_p10)
}
  0x41   : > { %4397 = dma.hbm_to_vmem [thread:$0]  (!%p5370_p5), %s5710_s5, 4096, %s5366_s26, [#allocation9], %s5261_s28, %s5261_s28, %s5262_s30  }
  0x42   : > { %s5018_s14 = scalar_lea.hbm %s5712_s7, 10240 }
  0x43   : > { %p5019_p11 = scmp.ne.s32.totalorder %s5712_s7, %s5018_s14  ;;  %p5025_p0 = scmp.lt.u32.totalorder %s5018_s14, %s5712_s7 }
  0x45   : > { %p5021_p12 = pnand %p5019_p11, %p5384_p7 }
  0x47   : > { %p5022_p13 = pneg %p5021_p12 }
  0x49   : > { %p5027_p1 = pnand %p5025_p0, %p5022_p13 }
  0x4b   : > { %5030 = shalt.err (!%p5027_p1)
}
  0x4c   : > { %s5031_s26 = scalar_lea.vmem %s5374_s29, 10240  ;;  %p5039_p9 = scmp.lt.s32.totalorder %s5374_s29, %s5374_s29 }
  0x4d   : > { %p5032_p4 = scmp.ne.s32.totalorder %s5374_s29, %s5031_s26  ;;  %p5040_p10 = scmp.lt.s32.totalorder %s5031_s26, %s5031_s26 }
  0x4f   : > { %p5034_p6 = pnand %p5032_p4, %p5384_p7  ;;  %p5041_p11 = por %p5040_p10, %p5039_p9 }
  0x51   : > { %p5035_p8 = pneg %p5034_p6 }
  0x53   : > { %p5042_p12 = pnand %p5041_p11, %p5035_p8 }
  0x55   : > { %5045 = shalt.err (!%p5042_p12)
}
  0x56   : > { %s5263_s28 = smov 320   ;;  %s5264_s30 = smov 20  }
  0x57   : > { %4403 = dma.hbm_to_vmem [thread:$0]  (!%p5370_p5), %s5712_s7, 10240, %s5374_s29, [#allocation12], %s5263_s28, %s5263_s28, %s5264_s30  }
  0x58   : > { %s5265_s19 = smov [#allocation14]   ;;  %s5046_s15 = scalar_lea.hbm %s5714_s9, 25600 }
  0x59   : > { %s407_s12 = sshll.u32 %s5265_s19, 4  ;;  %p5047_p13 = scmp.ne.s32.totalorder %s5714_s9, %s5046_s15  ;;  %s408_s12 = int_to_ptr.vmem [resolvable:$true] %s407_s12 }
  0x5a   : > { %p5053_p4 = scmp.lt.u32.totalorder %s5046_s15, %s5714_s9 }
  0x5b   : > { %p5049_p0 = pnand %p5047_p13, %p5384_p7 }
  0x5d   : > { %p5050_p1 = pneg %p5049_p0 }
  0x5f   : > { %p5055_p6 = pnand %p5053_p4, %p5050_p1 }
  0x61   : > { %5058 = shalt.err (!%p5055_p6)
}
  0x62   : > { %s5059_s29 = scalar_lea.vmem %s408_s12, 25600  ;;  %p5067_p11 = scmp.lt.s32.totalorder %s408_s12, %s408_s12 }
  0x63   : > { %p5060_p8 = scmp.ne.s32.totalorder %s408_s12, %s5059_s29  ;;  %p5068_p12 = scmp.lt.s32.totalorder %s5059_s29, %s5059_s29 }
  0x65   : > { %p5062_p9 = pnand %p5060_p8, %p5384_p7  ;;  %p5069_p2 = por %p5068_p12, %p5067_p11 }
  0x67   : > { %p5063_p10 = pneg %p5062_p9 }
  0x69   : > { %p5070_p3 = pnand %p5069_p2, %p5063_p10 }
  0x6b   : > { %5073 = shalt.err (!%p5070_p3)
}
  0x6c   : > { %4409 = dma.hbm_to_vmem [thread:$0]  (!%p5370_p5), %s5714_s9, 25600, %s408_s12, [#allocation15], %s5263_s28, %s5263_s28, %s5264_s30  }
  0x6d   : > { %s38_s19 = sadd.s32 1, %s5252_s18  ;;  %s5266_s13 = smov [#allocation3]  }
  0x6e   : > { %p40_p13 = scmp.ge.s32.totalorder %s38_s19, 2  ;;  %s325_s14 = sshll.u32 %s5266_s13, 4  ;;  %s326_s14 = int_to_ptr.vmem [resolvable:$true] %s325_s14 }
  0x6f   : > { %s5267_s15 = smov [#allocation7]   ;;  %s5074_s26 = scalar_lea.hbm %s5707_s2, 128 }
  0x70   : > { %s5739_s19 = smov (%p40_p13, %s38_s19), 0  ;;  %s349_s20 = sshll.u32 %s5267_s15, 4  ;;  %s350_s20 = int_to_ptr.vmem [resolvable:$true] %s349_s20 }
  0x71   : > { %p5075_p2 = scmp.ne.s32.totalorder %s5707_s2, %s5074_s26  ;;  %p5081_p1 = scmp.lt.u32.totalorder %s5074_s26, %s5707_s2 }
  0x73   : > { %p5077_p3 = pnand %p5075_p2, %p5384_p7 }
  0x75   : > { %p5078_p0 = pneg %p5077_p3 }
  0x77   : > { %p5083_p4 = pnand %p5081_p1, %p5078_p0 }
  0x79   : > { %5086 = shalt.err (!%p5083_p4)
}
  0x7a   : > { %s5087_s12 = scalar_lea.vmem %s326_s14, 128  ;;  %p5095_p10 = scmp.lt.s32.totalorder %s326_s14, %s326_s14 }
  0x7b   : > { %p5088_p6 = scmp.ne.s32.totalorder %s326_s14, %s5087_s12  ;;  %p5096_p11 = scmp.lt.s32.totalorder %s5087_s12, %s5087_s12 }
  0x7d   : > { %p5090_p8 = pnand %p5088_p6, %p5384_p7  ;;  %p5097_p12 = por %p5096_p11, %p5095_p10 }
  0x7f   : > { %p5091_p9 = pneg %p5090_p8 }
  0x81   : > { %p5098_p13 = pnand %p5097_p12, %p5091_p9 }
  0x83   : > { %5101 = shalt.err (!%p5098_p13)
}
  0x84   : > { %4388 = dma.hbm_to_vmem [thread:$0]  (!%p5370_p5), %s5707_s2, 128, %s326_s14, [#allocation4]  }
  0x85   : > { %s5102_s15 = scalar_lea.hbm %s5709_s4, 32 }
  0x86   : > { %p5103_p2 = scmp.ne.s32.totalorder %s5709_s4, %s5102_s15  ;;  %p5109_p1 = scmp.lt.u32.totalorder %s5102_s15, %s5709_s4 }
  0x88   : > { %p5105_p3 = pnand %p5103_p2, %p5384_p7 }
  0x8a   : > { %p5106_p0 = pneg %p5105_p3 }
  0x8c   : > { %p5111_p4 = pnand %p5109_p1, %p5106_p0 }
  0x8e   : > { %5114 = shalt.err (!%p5111_p4)
}
  0x8f   : > { %s5115_s28 = scalar_lea.vmem %s350_s20, 32  ;;  %p5123_p10 = scmp.lt.s32.totalorder %s350_s20, %s350_s20 }
  0x90   : > { %p5116_p6 = scmp.ne.s32.totalorder %s350_s20, %s5115_s28  ;;  %p5124_p11 = scmp.lt.s32.totalorder %s5115_s28, %s5115_s28 }
  0x92   : > { %p5118_p8 = pnand %p5116_p6, %p5384_p7  ;;  %p5125_p12 = por %p5124_p11, %p5123_p10 }
  0x94   : > { %p5119_p9 = pneg %p5118_p8 }
  0x96   : > { %p5126_p13 = pnand %p5125_p12, %p5119_p9 }
  0x98   : > { %5129 = shalt.err (!%p5126_p13)
}
  0x99   : > { %4394 = dma.hbm_to_vmem [thread:$0]  (!%p5370_p5), %s5709_s4, 32, %s350_s20, [#allocation6]  }
  0x9a   : > { %s5268_s12 = smov [#allocation10]   ;;  %s5269_s21 = smov [#allocation13]  }
  0x9b   : > { %s373_s3 = sshll.u32 %s5268_s12, 4  ;;  %s397_s11 = sshll.u32 %s5269_s21, 4  ;;  %s374_s3 = int_to_ptr.vmem [resolvable:$true] %s373_s3  ;;  %s398_s11 = int_to_ptr.vmem [resolvable:$true] %s397_s11 }
  0x9c   : > { %s5130_s22 = scalar_lea.hbm %s5711_s6, 32 }
  0x9d   : > { %p5131_p2 = scmp.ne.s32.totalorder %s5711_s6, %s5130_s22  ;;  %p5137_p1 = scmp.lt.u32.totalorder %s5130_s22, %s5711_s6 }
  0x9f   : > { %p5133_p3 = pnand %p5131_p2, %p5384_p7 }
  0xa1   : > { %p5134_p0 = pneg %p5133_p3 }
  0xa3   : > { %p5139_p4 = pnand %p5137_p1, %p5134_p0 }
  0xa5   : > { %5142 = shalt.err (!%p5139_p4)
}
  0xa6   : > { %s5143_s20 = scalar_lea.vmem %s374_s3, 32  ;;  %p5151_p10 = scmp.lt.s32.totalorder %s374_s3, %s374_s3 }
  0xa7   : > { %p5144_p6 = scmp.ne.s32.totalorder %s374_s3, %s5143_s20  ;;  %p5152_p11 = scmp.lt.s32.totalorder %s5143_s20, %s5143_s20 }
  0xa9   : > { %p5146_p8 = pnand %p5144_p6, %p5384_p7  ;;  %p5153_p12 = por %p5152_p11, %p5151_p10 }
  0xab   : > { %p5147_p9 = pneg %p5146_p8 }
  0xad   : > { %p5154_p13 = pnand %p5153_p12, %p5147_p9 }
  0xaf   : > { %5157 = shalt.err (!%p5154_p13)
}
  0xb0   : > { %4400 = dma.hbm_to_vmem [thread:$0]  (!%p5370_p5), %s5711_s6, 32, %s374_s3, [#allocation9]  }
  0xb1   : > { %s5158_s13 = scalar_lea.hbm %s5713_s8, 80 }
  0xb2   : > { %p5159_p2 = scmp.ne.s32.totalorder %s5713_s8, %s5158_s13  ;;  %p5165_p1 = scmp.lt.u32.totalorder %s5158_s13, %s5713_s8 }
  0xb4   : > { %p5161_p3 = pnand %p5159_p2, %p5384_p7 }
  0xb6   : > { %p5162_p0 = pneg %p5161_p3 }
  0xb8   : > { %p5167_p4 = pnand %p5165_p1, %p5162_p0 }
  0xba   : > { %5170 = shalt.err (!%p5167_p4)
}
  0xbb   : > { %s5171_s29 = scalar_lea.vmem %s398_s11, 80  ;;  %s5178_s3 = scalar_lea.vmem %s398_s11, 96 }
  0xbc   : > { %p5172_p6 = scmp.ne.s32.totalorder %s398_s11, %s5171_s29  ;;  %p5179_p10 = scmp.lt.s32.totalorder %s398_s11, %s398_s11 }
  0xbd   : > { %p5180_p11 = scmp.lt.s32.totalorder %s5178_s3, %s5171_s29 }
  0xbe   : > { %p5174_p8 = pnand %p5172_p6, %p5384_p7 }
  0xbf   : > { %p5181_p12 = por %p5180_p11, %p5179_p10 }
  0xc0   : > { %p5175_p9 = pneg %p5174_p8 }
  0xc2   : > { %p5182_p13 = pnand %p5181_p12, %p5175_p9 }
  0xc4   : > { %5185 = shalt.err (!%p5182_p13)
}
  0xc5   : > { %4406 = dma.hbm_to_vmem [thread:$0]  (!%p5370_p5), %s5713_s8, 80, %s398_s11, [#allocation12]  }
  0xc6   : > { %s5270_s14 = smov [#allocation16]   ;;  %s5186_s13 = scalar_lea.hbm %s5715_s10, 80 }
  0xc7   : > { %s421_s30 = sshll.u32 %s5270_s14, 4  ;;  %p5187_p2 = scmp.ne.s32.totalorder %s5715_s10, %s5186_s13  ;;  %s422_s30 = int_to_ptr.vmem [resolvable:$true] %s421_s30 }
  0xc8   : > { %p5193_p1 = scmp.lt.u32.totalorder %s5186_s13, %s5715_s10 }
  0xc9   : > { %p5189_p3 = pnand %p5187_p2, %p5384_p7 }
  0xcb   : > { %p5190_p0 = pneg %p5189_p3 }
  0xcd   : > { %p5195_p4 = pnand %p5193_p1, %p5190_p0 }
  0xcf   : > { %5198 = shalt.err (!%p5195_p4)
}
  0xd0   : > { %s5199_s11 = scalar_lea.vmem %s422_s30, 80  ;;  %s5206_s29 = scalar_lea.vmem %s422_s30, 96 }
  0xd1   : > { %p5200_p6 = scmp.ne.s32.totalorder %s422_s30, %s5199_s11  ;;  %p5207_p10 = scmp.lt.s32.totalorder %s422_s30, %s422_s30 }
  0xd2   : > { %p5208_p11 = scmp.lt.s32.totalorder %s5206_s29, %s5199_s11 }
  0xd3   : > { %p5202_p8 = pnand %p5200_p6, %p5384_p7 }
  0xd4   : > { %p5209_p12 = por %p5208_p11, %p5207_p10 }
  0xd5   : > { %p5203_p9 = pneg %p5202_p8 }
  0xd7   : > { %p5210_p13 = pnand %p5209_p12, %p5203_p9 }
  0xd9   : > { %5213 = shalt.err (!%p5210_p13)
}
  0xda   : > { %4412 = dma.hbm_to_vmem [thread:$0]  (!%p5370_p5), %s5715_s10, 80, %s422_s30, [#allocation15]  }
  0xdb   : > { %p5729_p2 = scmp.ne.s32.totalorder %s5725_s24, 0 }
  0xdc   : > { %p5730_p3 = scmp.ne.s32.totalorder (!%p5729_p2), %s5724_s23, 0 }
  0xdd   : > { %454 = sbr.rel (%p5729_p2) target bundleno = 1546 (0x60a), region = 64 }
  0xe4   : > { %5227 = dma.done.wait (%p5730_p3), [#allocation4], 128  }
  0xe5   : > { %5229 = vsyncadd (%p5730_p3), [#allocation4], 4294967168 }
  0xe6   : > { %5231 = dma.done.wait (%p5730_p3), [#allocation6], 4128  }
  0xe7   : > { %5233 = vsyncadd (%p5730_p3), [#allocation6], 4294963168 }
  0xe8   : > { %5235 = dma.done.wait (%p5730_p3), [#allocation9], 4128  }
  0xe9   : > { %5237 = vsyncadd (%p5730_p3), [#allocation9], 4294963168 }
  0xea   : > { %5239 = dma.done.wait (%p5730_p3), [#allocation12], 10320  }
  0xeb   : > { %5241 = vsyncadd (%p5730_p3), [#allocation12], 4294956976 }
  0xec   : > { %5243 = dma.done.wait (%p5730_p3), [#allocation15], 25680  }
  0xed   : > { %5245 = vsyncadd (%p5730_p3), [#allocation15], 4294941616  ;;  %p534_p5 = scmp.lt.s32.totalorder %s5248_s17, 1  ;;  %v5271_v0 = vmov 0.0   ;;  %v554_v1 = vld [vmem:[#allocation3] sm:$0x77]  ;;  %v557_v63 = vlaneseq }
  0xee   : > { %645 = vmatprep.mubr.f32.mxu0 %v5271_v0  ;;  %vm576_vm0 = vcmask 1042432   ;;  %v568_v3 = vcombine.high %v554_v1, %v554_v1  ;;  %v4474_v4 = vld [vmem:[#allocation5 + $0x4] ss:$8 sps:$4 sm:$0xff]   ;;  %vm569_vm1 = vcmask 23552   ;;  %v4476_v5 = vld [vmem:[#allocation5] ss:$8 sps:$4 sm:$0xff]  }
  0xef   : > { %s5741_s17 = smov (!%p534_p5, %s5248_s17), 1  ;;  %876 = vmatprep.subr.bf16.mxu1 %v4474_v4  ;;  %v4477_v6 = vld [vmem:[#allocation5 + $0x14] ss:$8 sps:$4 sm:$0xff]   ;;  %v4479_v7 = vld [vmem:[#allocation5 + $0x10] ss:$8 sps:$4 sm:$0xff]   ;;  %s5733_s22 = sld [smem:[#allocation24_spill]] }
  0xf0   : > { %s4228_s24 = sshll.u32 %s5741_s17, 4  ;;  %3878 = vmatprep.subr.msk.mxu0 %vm576_vm0, %v568_v3  ;;  %877 = vmatpush1.bf16.msra.mxu1 %v4476_v5  ;;  %v4480_v8 = vld [vmem:[#allocation5 + $0x24] ss:$8 sps:$4 sm:$0xff]   ;;  %v4482_v10 = vld [vmem:[#allocation5 + $0x20] ss:$8 sps:$4 sm:$0xff]   ;;  %s3877_s23 = sshll.u32 %s5741_s17, 1 }
  0xf1   : > { %s541_s20 = scalar_lea.vmem %s5705_s0, %s4228_s24  ;;  %3879 = vmatpush1.msk.msra.mxu0 %vm576_vm0, %v554_v1  ;;  %878 = vmatprep.subr.bf16.mxu1 %v4477_v6  ;;  %v4483_v11 = vld [vmem:[#allocation5 + $0x34] ss:$8 sps:$4 sm:$0xff]   ;;  %v4485_v12 = vld [vmem:[#allocation5 + $0x30] ss:$8 sps:$4 sm:$0xff]   ;;  %v4486_v13 = vld [vmem:[#allocation5 + $0x44] ss:$8 sps:$4 sm:$0xff]   ;;  %s546_s12 = scalar_lea.vmem %s5706_s1, %s3877_s23 }
  0xf2   : > { %v552_v2 = vld [vmem:[%s541_s20] sm:$0xff]  ;;  %v553_v9 = vld [vmem:[%s541_s20 + $0x8] sm:$0xff]  ;;  %v4492_v17 = vld [vmem:[#allocation5 + $0x64] ss:$8 sps:$4 sm:$0xff]   ;;  %v5596_v1 = vshrl.u32 %v557_v63, 7  ;;  %s4348_s21 = smul.u32 5, %s5741_s17 }
  0xf3   : > { %3880 = vmatmul.mubr.msk.f32.vlgmr.msra.gmra.mrb[0].mxu0 %vm569_vm1, %v552_v2  ;;  %v4488_v14 = vld [vmem:[#allocation5 + $0x40] ss:$8 sps:$4 sm:$0xff]   ;;  %v4489_v15 = vld [vmem:[#allocation5 + $0x54] ss:$8 sps:$4 sm:$0xff]   ;;  %v4491_v16 = vld [vmem:[#allocation5 + $0x50] ss:$8 sps:$4 sm:$0xff]  }
  0xf4   : > { %651 = vmatprep.mubr.f32.mxu0 %v5271_v0  ;;  %879 = vmatpush1.bf16.msra.mxu1 %v4479_v7  ;;  %v4494_v18 = vld [vmem:[#allocation5 + $0x60] ss:$8 sps:$4 sm:$0xff]   ;;  %v4495_v19 = vld [vmem:[#allocation5 + $0x74] ss:$8 sps:$4 sm:$0xff]   ;;  %v4497_v20 = vld [vmem:[#allocation5 + $0x70] ss:$8 sps:$4 sm:$0xff]  }
  0xf5   : > { %880 = vmatprep.subr.bf16.mxu1 %v4480_v8  ;;  %v4498_v21 = vld [vmem:[#allocation5 + $0x84] ss:$8 sps:$4 sm:$0xff]   ;;  %v4500_v22 = vld [vmem:[#allocation5 + $0x80] ss:$8 sps:$4 sm:$0xff]   ;;  %v4501_v23 = vld [vmem:[#allocation5 + $0x94] ss:$8 sps:$4 sm:$0xff]   ;;  %s550_s25 = scalar_lea.vmem %s5733_s22, %s4348_s21 }
  0xf6   : > { %v4503_v24 = vld [vmem:[#allocation5 + $0x90] ss:$8 sps:$4 sm:$0xff]   ;;  %v4504_v25 = vld [vmem:[#allocation5 + $0xa4] ss:$8 sps:$4 sm:$0xff]   ;;  %v4506_v26 = vld [vmem:[#allocation5 + $0xa0] ss:$8 sps:$4 sm:$0xff]  }
  0xf7   : > { %3881 = vmatmul.mubr.msk.f32.gmra.mrb[2].mxu0 %vm569_vm1, %v553_v9  ;;  %v4507_v27 = vld [vmem:[#allocation5 + $0xb4] ss:$8 sps:$4 sm:$0xff]   ;;  %v4509_v28 = vld [vmem:[#allocation5 + $0xb0] ss:$8 sps:$4 sm:$0xff]   ;;  %v4510_v29 = vld [vmem:[#allocation5 + $0xc4] ss:$8 sps:$4 sm:$0xff]  }
  0xf8   : > { %881 = vmatpush1.bf16.msra.mxu1 %v4482_v10  ;;  %v4512_v30 = vld [vmem:[#allocation5 + $0xc0] ss:$8 sps:$4 sm:$0xff]   ;;  %v4513_v31 = vld [vmem:[#allocation5 + $0xd4] ss:$8 sps:$4 sm:$0xff]   ;;  %v4515_v32 = vld [vmem:[#allocation5 + $0xd0] ss:$8 sps:$4 sm:$0xff]  }
  0xf9   : > { %882 = vmatprep.subr.bf16.mxu1 %v4483_v11  ;;  %v4516_v33 = vld [vmem:[#allocation5 + $0xe4] ss:$8 sps:$4 sm:$0xff]   ;;  %v4518_v34 = vld [vmem:[#allocation5 + $0xe0] ss:$8 sps:$4 sm:$0xff]   ;;  %v4519_v35 = vld [vmem:[#allocation5 + $0xf4] ss:$8 sps:$4 sm:$0xff]  }
  0xfa   : > { %v4521_v36 = vld [vmem:[#allocation5 + $0xf0] ss:$8 sps:$4 sm:$0xff]   ;;  %v4522_v37 = vld [vmem:[#allocation8] ss:$8 sps:$4 sm:$0xff]   ;;  %v5602_v2 = vsub.s32 0, %v5596_v1  ;;  %v5605_v4 = vsub.s32 1, %v5596_v1 }
  0xfb   : > { %v4524_v38 = vld [vmem:[#allocation8 + $0x4] ss:$8 sps:$4 sm:$0xff]   ;;  %v4527_v39 = vld [vmem:[#allocation8 + $0x14] ss:$8 sps:$4 sm:$0xff]   ;;  %v4525_v40 = vld [vmem:[#allocation8 + $0x10] ss:$8 sps:$4 sm:$0xff]  }
  0xfc   : > { %883 = vmatpush1.bf16.msra.mxu1 %v4485_v12  ;;  %1137 = vmatprep.subr.bf16.mxu0 %v4524_v38  ;;  %v4530_v41 = vld [vmem:[#allocation8 + $0x24] ss:$8 sps:$4 sm:$0xff]   ;;  %v4528_v42 = vld [vmem:[#allocation8 + $0x20] ss:$8 sps:$4 sm:$0xff]   ;;  %v4533_v43 = vld [vmem:[#allocation8 + $0x34] ss:$8 sps:$4 sm:$0xff]  }
  0xfd   : > { %884 = vmatprep.subr.bf16.mxu1 %v4486_v13  ;;  %1138 = vmatpush1.bf16.msra.mxu0 %v4522_v37  ;;  %v4531_v44 = vld [vmem:[#allocation8 + $0x30] ss:$8 sps:$4 sm:$0xff]   ;;  %v4536_v45 = vld [vmem:[#allocation8 + $0x44] ss:$8 sps:$4 sm:$0xff]   ;;  %v4534_v46 = vld [vmem:[#allocation8 + $0x40] ss:$8 sps:$4 sm:$0xff]  }
  0xfe   : > { %1139 = vmatprep.subr.bf16.mxu0 %v4527_v39  ;;  %v4539_v47 = vld [vmem:[#allocation8 + $0x54] ss:$8 sps:$4 sm:$0xff]   ;;  %v4537_v48 = vld [vmem:[#allocation8 + $0x50] ss:$8 sps:$4 sm:$0xff]   ;;  %v4542_v49 = vld [vmem:[#allocation8 + $0x64] ss:$8 sps:$4 sm:$0xff]  }
  0xff   : > { %v4540_v50 = vld [vmem:[#allocation8 + $0x60] ss:$8 sps:$4 sm:$0xff]   ;;  %v4545_v51 = vld [vmem:[#allocation8 + $0x74] ss:$8 sps:$4 sm:$0xff]   ;;  %v4543_v52 = vld [vmem:[#allocation8 + $0x70] ss:$8 sps:$4 sm:$0xff]  }
 0x100   : > { %885 = vmatpush1.bf16.msra.mxu1 %v4488_v14  ;;  %v4548_v53 = vld [vmem:[#allocation8 + $0x84] ss:$8 sps:$4 sm:$0xff]   ;;  %v4546_v54 = vld [vmem:[#allocation8 + $0x80] ss:$8 sps:$4 sm:$0xff]   ;;  %v4551_v55 = vld [vmem:[#allocation8 + $0x94] ss:$8 sps:$4 sm:$0xff]  }
 0x101   : > { %886 = vmatprep.subr.bf16.mxu1 %v4489_v15  ;;  %1140 = vmatpush1.bf16.msra.mxu0 %v4525_v40  ;;  %v4549_v56 = vld [vmem:[#allocation8 + $0x90] ss:$8 sps:$4 sm:$0xff]   ;;  %v4554_v57 = vld [vmem:[#allocation8 + $0xa4] ss:$8 sps:$4 sm:$0xff]   ;;  %v4552_v58 = vld [vmem:[#allocation8 + $0xa0] ss:$8 sps:$4 sm:$0xff]  }
 0x102   : > { %1141 = vmatprep.subr.bf16.mxu0 %v4530_v41  ;;  %v4557_v59 = vld [vmem:[#allocation8 + $0xb4] ss:$8 sps:$4 sm:$0xff]   ;;  %v4555_v60 = vld [vmem:[#allocation8 + $0xb0] ss:$8 sps:$4 sm:$0xff]   ;;  %v4560_v61 = vld [vmem:[#allocation8 + $0xc4] ss:$8 sps:$4 sm:$0xff]  }
 0x103   : > { %v4558_v62 = vld [vmem:[#allocation8 + $0xc0] ss:$8 sps:$4 sm:$0xff]   ;;  %v555_v3 = vld [vmem:[%s546_s12] sm:$0x3] }
 0x104   : > { %887 = vmatpush1.bf16.msra.mxu1 %v4491_v16  ;;  %v560_v5 = vrot.slane %v555_v3, %v5602_v2  ;;  %v564_v6 = vrot.slane %v555_v3, %v5605_v4  ;;  %v4582_v37 = vld [vmem:[#allocation11 + $0x50] ss:$20 sps:$4 sm:$0xff]   ;;  %v4588_v39 = vld [vmem:[#allocation11 + $0x78] ss:$20 sps:$4 sm:$0xff]   ;;  %v4594_v41 = vld [vmem:[#allocation11 + $0xa0] ss:$20 sps:$4 sm:$0xff]  }
 0x105   : > { %888 = vmatprep.subr.bf16.mxu1 %v4492_v17  ;;  %1142 = vmatpush1.bf16.msra.mxu0 %v4528_v42  ;;  %v4590_v38 = vld [vmem:[#allocation11 + $0x7c] ss:$20 sps:$4 sm:$0xff]   ;;  %v4596_v40 = vld [vmem:[#allocation11 + $0xa4] ss:$20 sps:$4 sm:$0xff]   ;;  %v4602_v42 = vld [vmem:[#allocation11 + $0xcc] ss:$20 sps:$4 sm:$0xff]  }
 0x106   : > { %1143 = vmatprep.subr.bf16.mxu0 %v4533_v43  ;;  %v4600_v43 = vld [vmem:[#allocation11 + $0xc8] ss:$20 sps:$4 sm:$0xff]  }
 0x108   : > { %889 = vmatpush1.bf16.msra.mxu1 %v4494_v18 }
 0x109   : > { %890 = vmatprep.subr.bf16.mxu1 %v4495_v19  ;;  %1144 = vmatpush1.bf16.msra.mxu0 %v4531_v44  ;;  %v4608_v44 = vld [vmem:[#allocation11 + $0xf4] ss:$20 sps:$4 sm:$0xff]  }
 0x10a   : > { %1145 = vmatprep.subr.bf16.mxu0 %v4536_v45  ;;  %v4606_v45 = vld [vmem:[#allocation11 + $0xf0] ss:$20 sps:$4 sm:$0xff]  }
 0x10c   : > { %891 = vmatpush1.bf16.msra.mxu1 %v4497_v20 }
 0x10d   : > { %892 = vmatprep.subr.bf16.mxu1 %v4498_v21  ;;  %1146 = vmatpush1.bf16.msra.mxu0 %v4534_v46  ;;  %v4614_v46 = vld [vmem:[#allocation11 + $0x11c] ss:$20 sps:$4 sm:$0xff]  }
 0x10e   : > { %1147 = vmatprep.subr.bf16.mxu0 %v4539_v47  ;;  %v4612_v47 = vld [vmem:[#allocation11 + $0x118] ss:$20 sps:$4 sm:$0xff]  }
 0x110   : > { %893 = vmatpush1.bf16.msra.mxu1 %v4500_v22 }
 0x111   : > { %894 = vmatprep.subr.bf16.mxu1 %v4501_v23  ;;  %1148 = vmatpush1.bf16.msra.mxu0 %v4537_v48  ;;  %v4620_v48 = vld [vmem:[#allocation11 + $0x144] ss:$20 sps:$4 sm:$0xff]  }
 0x112   : > { %1149 = vmatprep.subr.bf16.mxu0 %v4542_v49  ;;  %v4618_v49 = vld [vmem:[#allocation11 + $0x140] ss:$20 sps:$4 sm:$0xff]  }
 0x114   : > { %895 = vmatpush1.bf16.msra.mxu1 %v4503_v24 }
 0x115   : > { %896 = vmatprep.subr.bf16.mxu1 %v4504_v25  ;;  %1150 = vmatpush1.bf16.msra.mxu0 %v4540_v50  ;;  %v4563_v25 = vld [vmem:[#allocation8 + $0xd4] ss:$8 sps:$4 sm:$0xff]   ;;  %v4626_v50 = vld [vmem:[#allocation11 + $0x16c] ss:$20 sps:$4 sm:$0xff]  }
 0x116   : > { %1151 = vmatprep.subr.bf16.mxu0 %v4545_v51  ;;  %v4624_v51 = vld [vmem:[#allocation11 + $0x168] ss:$20 sps:$4 sm:$0xff]  }
 0x118   : > { %897 = vmatpush1.bf16.msra.mxu1 %v4506_v26  ;;  %v4561_v26 = vld [vmem:[#allocation8 + $0xd0] ss:$8 sps:$4 sm:$0xff]  }
 0x119   : > { %898 = vmatprep.subr.bf16.mxu1 %v4507_v27  ;;  %1152 = vmatpush1.bf16.msra.mxu0 %v4543_v52  ;;  %v4566_v27 = vld [vmem:[#allocation8 + $0xe4] ss:$8 sps:$4 sm:$0xff]  }
 0x11a   : > { %1153 = vmatprep.subr.bf16.mxu0 %v4548_v53  ;;  %v4632_v52 = vld [vmem:[#allocation11 + $0x194] ss:$20 sps:$4 sm:$0xff]   ;;  %v4630_v53 = vld [vmem:[#allocation11 + $0x190] ss:$20 sps:$4 sm:$0xff]  }
 0x11c   : > { %899 = vmatpush1.bf16.msra.mxu1 %v4509_v28  ;;  %v4564_v28 = vld [vmem:[#allocation8 + $0xe0] ss:$8 sps:$4 sm:$0xff]  }
 0x11d   : > { %900 = vmatprep.subr.bf16.mxu1 %v4510_v29  ;;  %1154 = vmatpush1.bf16.msra.mxu0 %v4546_v54  ;;  %v4569_v29 = vld [vmem:[#allocation8 + $0xf4] ss:$8 sps:$4 sm:$0xff]  }
 0x11e   : > { %1155 = vmatprep.subr.bf16.mxu0 %v4551_v55  ;;  %v4638_v54 = vld [vmem:[#allocation11 + $0x1bc] ss:$20 sps:$4 sm:$0xff]   ;;  %v4636_v55 = vld [vmem:[#allocation11 + $0x1b8] ss:$20 sps:$4 sm:$0xff]  }
 0x120   : > { %901 = vmatpush1.bf16.msra.mxu1 %v4512_v30  ;;  %v4567_v30 = vld [vmem:[#allocation8 + $0xf0] ss:$8 sps:$4 sm:$0xff]  }
 0x121   : > { %902 = vmatprep.subr.bf16.mxu1 %v4513_v31  ;;  %1156 = vmatpush1.bf16.msra.mxu0 %v4549_v56  ;;  %v4570_v31 = vld [vmem:[#allocation11] ss:$20 sps:$4 sm:$0xff]   ;;  %v4644_v56 = vld [vmem:[#allocation11 + $0x1e4] ss:$20 sps:$4 sm:$0xff]  }
 0x122   : > { %1157 = vmatprep.subr.bf16.mxu0 %v4554_v57  ;;  %v4642_v57 = vld [vmem:[#allocation11 + $0x1e0] ss:$20 sps:$4 sm:$0xff]  }
 0x124   : > { %903 = vmatpush1.bf16.msra.mxu1 %v4515_v32  ;;  %v4572_v32 = vld [vmem:[#allocation11 + $0x4] ss:$20 sps:$4 sm:$0xff]  }
 0x125   : > { %904 = vmatprep.subr.bf16.mxu1 %v4516_v33  ;;  %1158 = vmatpush1.bf16.msra.mxu0 %v4552_v58  ;;  %v4575_v33 = vld [vmem:[#allocation11 + $0xc] ss:$20 sps:$4 sm:$0xff]  }
 0x126   : > { %1159 = vmatprep.subr.bf16.mxu0 %v4557_v59  ;;  %v4650_v58 = vld [vmem:[#allocation11 + $0x20c] ss:$20 sps:$4 sm:$0xff]   ;;  %v4648_v59 = vld [vmem:[#allocation11 + $0x208] ss:$20 sps:$4 sm:$0xff]  }
 0x128   : > { %905 = vmatpush1.bf16.msra.mxu1 %v4518_v34  ;;  %v4578_v34 = vld [vmem:[#allocation11 + $0x2c] ss:$20 sps:$4 sm:$0xff]  }
 0x129   : > { %906 = vmatprep.subr.bf16.mxu1 %v4519_v35  ;;  %1160 = vmatpush1.bf16.msra.mxu0 %v4555_v60  ;;  %v4576_v35 = vld [vmem:[#allocation11 + $0x28] ss:$20 sps:$4 sm:$0xff]  }
 0x12a   : > { %1161 = vmatprep.subr.bf16.mxu0 %v4560_v61  ;;  %v704_v60 = vld [vmem:[#allocation7] sm:$0x3] }
 0x12b   : > { %v709_v61 = vrot.slane %v704_v60, %v5602_v2 }
 0x12c   : > { %907 = vmatpush1.bf16.msra.mxu1 %v4521_v36  ;;  %v4584_v36 = vld [vmem:[#allocation11 + $0x54] ss:$20 sps:$4 sm:$0xff]  }
 0x12d   : > { %1162 = vmatpush1.bf16.msra.mxu0 %v4558_v62  ;;  %1733 = vmatprep.subr.bf16.mxu1 %v4572_v32  ;;  %v713_v62 = vrot.slane %v704_v60, %v5605_v4  ;;  %v4603_v32 = vld [vmem:[#allocation11 + $0xd0] ss:$20 sps:$4 sm:$0xff]  }
 0x12e   : > { %1163 = vmatprep.subr.bf16.mxu0 %v4563_v25  ;;  %v4587_v25 = vld [vmem:[#allocation11 + $0x5c] ss:$20 sps:$4 sm:$0xff]  }
 0x131   : > { %1164 = vmatpush1.bf16.msra.mxu0 %v4561_v26  ;;  %v4585_v26 = vld [vmem:[#allocation11 + $0x58] ss:$20 sps:$4 sm:$0xff]  }
 0x132   : > { %1165 = vmatprep.subr.bf16.mxu0 %v4566_v27  ;;  %v4593_v27 = vld [vmem:[#allocation11 + $0x84] ss:$20 sps:$4 sm:$0xff]  }
 0x135   : > { %1166 = vmatpush1.bf16.msra.mxu0 %v4564_v28  ;;  %v4591_v28 = vld [vmem:[#allocation11 + $0x80] ss:$20 sps:$4 sm:$0xff]  }
 0x136   : > { %1167 = vmatprep.subr.bf16.mxu0 %v4569_v29  ;;  %v4599_v29 = vld [vmem:[#allocation11 + $0xac] ss:$20 sps:$4 sm:$0xff]  }
 0x139   : > { %1168 = vmatpush1.bf16.msra.mxu0 %v4567_v30  ;;  %v4597_v30 = vld [vmem:[#allocation11 + $0xa8] ss:$20 sps:$4 sm:$0xff]  }
 0x13a   : > { %1776 = vmatprep.subr.bf16.mxu0 %v4575_v33  ;;  %v4611_v33 = vld [vmem:[#allocation11 + $0xfc] ss:$20 sps:$4 sm:$0xff]  }
 0x1c6   : > { %v647_v7 = vpop.f32.mrb[0].mxu0 }
 0x1c7   : > { %v648_v8 = vadd.f32 %v647_v7, %v560_v5  ;;  %v649_v9 = vpop.f32.mrb[1].mxu0 }
 0x1c8   : > { %v650_v10 = vadd.f32 %v649_v9, %v564_v6 }
 0x1c9   : > { %v662_v12 = vmul.f32 0.01, %v648_v8  ;;  %vm658_vm2 = vcmp.gt.f32.partialorder %v648_v8, 0.0 }
 0x1ca   : > { %v653_v11 = vpop.f32.mrb[2].mxu0  ;;  %v663_v15 = vmul.f32 0.01, %v650_v10  ;;  %vm659_vm4 = vcmp.gt.f32.partialorder %v650_v10, 0.0 }
 0x1cb   : > { %v654_v13 = vadd.f32 %v653_v11, %v560_v5  ;;  %v655_v14 = vpop.f32.mrb[3].mxu0  ;;  %v666_v19 = vsel %vm658_vm2, %v648_v8, %v662_v12 }
 0x1cc   : > { %v656_v16 = vadd.f32 %v655_v14, %v564_v6  ;;  %v667_v21 = vsel %vm659_vm4, %v650_v10, %v663_v15 }
 0x1cd   : > { %vm660_vm3 = vcmp.gt.f32.partialorder %v654_v13, 0.0  ;;  %v664_v17 = vmul.f32 0.01, %v654_v13 }
 0x1ce   : > { %v665_v18 = vmul.f32 0.01, %v656_v16  ;;  %vm661_vm5 = vcmp.gt.f32.partialorder %v656_v16, 0.0 }
 0x1cf   : > { %v668_v20 = vsel %vm660_vm3, %v654_v13, %v664_v17 }
 0x1d0   : > { %v669_v22 = vsel %vm661_vm5, %v656_v16, %v665_v18  ;;  %v670_v23 = vpack.c.bf16 %v668_v20, %v666_v19 }
 0x1d1   : > { %v671_v24 = vpack.c.bf16 %v669_v22, %v667_v21  ;;  %v4573_v22 = vld [vmem:[#allocation11 + $0x8] ss:$20 sps:$4 sm:$0xff]  }
 0x1d3   : > { %908 = vmatprep.mubr.bf16.mxu1 %v671_v24  ;;  %v4579_v24 = vld [vmem:[#allocation11 + $0x30] ss:$20 sps:$4 sm:$0xff]  }
 0x1d4   : > { %909 = vmatmul.mubr.bf16.vlgmr.msra.gmra.mrb[0].mxu1 %v670_v23  ;;  %v4581_v23 = vld [vmem:[#allocation11 + $0x34] ss:$20 sps:$4 sm:$0xff]  }
 0x1d5   : > { %1734 = vmatpush1.bf16.msra.mxu1 %v4570_v31  ;;  %v4605_v31 = vld [vmem:[#allocation11 + $0xd4] ss:$20 sps:$4 sm:$0xff]  }
 0x1d6   : > { %1735 = vmatprep.subr.bf16.mxu1 %v4578_v34  ;;  %v4609_v34 = vld [vmem:[#allocation11 + $0xf8] ss:$20 sps:$4 sm:$0xff]  }
 0x1d9   : > { %1736 = vmatpush1.bf16.msra.mxu1 %v4576_v35  ;;  %v4617_v35 = vld [vmem:[#allocation11 + $0x124] ss:$20 sps:$4 sm:$0xff]  }
 0x1da   : > { %1737 = vmatprep.subr.bf16.mxu1 %v4584_v36  ;;  %v4615_v36 = vld [vmem:[#allocation11 + $0x120] ss:$20 sps:$4 sm:$0xff]  }
 0x1dd   : > { %1738 = vmatpush1.bf16.msra.mxu1 %v4582_v37  ;;  %v4623_v37 = vld [vmem:[#allocation11 + $0x14c] ss:$20 sps:$4 sm:$0xff]  }
 0x1de   : > { %1739 = vmatprep.subr.bf16.mxu1 %v4590_v38  ;;  %v4621_v38 = vld [vmem:[#allocation11 + $0x148] ss:$20 sps:$4 sm:$0xff]  }
 0x1e1   : > { %1740 = vmatpush1.bf16.msra.mxu1 %v4588_v39  ;;  %v4629_v39 = vld [vmem:[#allocation11 + $0x174] ss:$20 sps:$4 sm:$0xff]  }
 0x1e2   : > { %1741 = vmatprep.subr.bf16.mxu1 %v4596_v40  ;;  %v4627_v40 = vld [vmem:[#allocation11 + $0x170] ss:$20 sps:$4 sm:$0xff]  }
 0x1e5   : > { %1742 = vmatpush1.bf16.msra.mxu1 %v4594_v41  ;;  %v4635_v41 = vld [vmem:[#allocation11 + $0x19c] ss:$20 sps:$4 sm:$0xff]  }
 0x1e6   : > { %1743 = vmatprep.subr.bf16.mxu1 %v4602_v42  ;;  %v4633_v42 = vld [vmem:[#allocation11 + $0x198] ss:$20 sps:$4 sm:$0xff]  }
 0x1e9   : > { %1744 = vmatpush1.bf16.msra.mxu1 %v4600_v43  ;;  %v4641_v43 = vld [vmem:[#allocation11 + $0x1c4] ss:$20 sps:$4 sm:$0xff]  }
 0x1ea   : > { %1745 = vmatprep.subr.bf16.mxu1 %v4608_v44  ;;  %v4639_v44 = vld [vmem:[#allocation11 + $0x1c0] ss:$20 sps:$4 sm:$0xff]  }
 0x1ed   : > { %1746 = vmatpush1.bf16.msra.mxu1 %v4606_v45  ;;  %v4647_v45 = vld [vmem:[#allocation11 + $0x1ec] ss:$20 sps:$4 sm:$0xff]  }
 0x1ee   : > { %1747 = vmatprep.subr.bf16.mxu1 %v4614_v46  ;;  %v4645_v46 = vld [vmem:[#allocation11 + $0x1e8] ss:$20 sps:$4 sm:$0xff]  }
 0x1f1   : > { %1748 = vmatpush1.bf16.msra.mxu1 %v4612_v47  ;;  %v4653_v47 = vld [vmem:[#allocation11 + $0x214] ss:$20 sps:$4 sm:$0xff]  }
 0x1f2   : > { %1749 = vmatprep.subr.bf16.mxu1 %v4620_v48  ;;  %v4651_v48 = vld [vmem:[#allocation11 + $0x210] ss:$20 sps:$4 sm:$0xff]  }
 0x1f5   : > { %1750 = vmatpush1.bf16.msra.mxu1 %v4618_v49  ;;  %v4656_v49 = vld [vmem:[#allocation11 + $0x234] ss:$20 sps:$4 sm:$0xff]  }
 0x1f6   : > { %1751 = vmatprep.subr.bf16.mxu1 %v4626_v50  ;;  %v4654_v50 = vld [vmem:[#allocation11 + $0x230] ss:$20 sps:$4 sm:$0xff]  }
 0x1f9   : > { %1752 = vmatpush1.bf16.msra.mxu1 %v4624_v51  ;;  %v4659_v51 = vld [vmem:[#allocation11 + $0x23c] ss:$20 sps:$4 sm:$0xff]  }
 0x1fa   : > { %1753 = vmatprep.subr.bf16.mxu1 %v4632_v52  ;;  %v4657_v52 = vld [vmem:[#allocation11 + $0x238] ss:$20 sps:$4 sm:$0xff]  }
 0x1fd   : > { %1754 = vmatpush1.bf16.msra.mxu1 %v4630_v53  ;;  %v4662_v53 = vld [vmem:[#allocation11 + $0x25c] ss:$20 sps:$4 sm:$0xff]  }
 0x1fe   : > { %1755 = vmatprep.subr.bf16.mxu1 %v4638_v54  ;;  %v4660_v54 = vld [vmem:[#allocation11 + $0x258] ss:$20 sps:$4 sm:$0xff]  }
 0x201   : > { %1756 = vmatpush1.bf16.msra.mxu1 %v4636_v55  ;;  %v4665_v55 = vld [vmem:[#allocation11 + $0x264] ss:$20 sps:$4 sm:$0xff]  }
 0x202   : > { %1757 = vmatprep.subr.bf16.mxu1 %v4644_v56  ;;  %v4663_v56 = vld [vmem:[#allocation11 + $0x260] ss:$20 sps:$4 sm:$0xff]  }
 0x205   : > { %1758 = vmatpush1.bf16.msra.mxu1 %v4642_v57  ;;  %v4666_v57 = vld [vmem:[#allocation11 + $0x150] ss:$20 sps:$4 sm:$0xff]  }
 0x206   : > { %1759 = vmatprep.subr.bf16.mxu1 %v4650_v58  ;;  %v4684_v58 = vld [vmem:[#allocation14 + $0x4] ss:$20 sps:$4 sm:$0xff]  }
 0x209   : > { %1760 = vmatpush1.bf16.msra.mxu1 %v4648_v59  ;;  %v965_v59 = vld [vmem:[#allocation10] sm:$0x3] }
 0x20a   : > { %1761 = vmatprep.subr.bf16.mxu1 %v4656_v49  ;;  %v970_v60 = vrot.slane %v965_v59, %v5602_v2  ;;  %v4681_v49 = vld [vmem:[#allocation11 + $0x128] ss:$20 sps:$4 sm:$0xff]  }
 0x20d   : > { %1762 = vmatpush1.bf16.msra.mxu1 %v4654_v50  ;;  %v4687_v50 = vld [vmem:[#allocation14 + $0xc] ss:$20 sps:$4 sm:$0xff]  }
 0x20e   : > { %1763 = vmatprep.subr.bf16.mxu1 %v4662_v53  ;;  %v4685_v53 = vld [vmem:[#allocation14 + $0x8] ss:$20 sps:$4 sm:$0xff]  }
 0x211   : > { %1764 = vmatpush1.bf16.msra.mxu1 %v4660_v54  ;;  %v4693_v54 = vld [vmem:[#allocation14 + $0x34] ss:$20 sps:$4 sm:$0xff]  }
 0x212   : > { %4229 = vmatprep.subr.bf16.mxu1 %v4666_v57  ;;  %v4691_v57 = vld [vmem:[#allocation14 + $0x30] ss:$20 sps:$4 sm:$0xff]  }
 0x2a7   : > { %v910_v3 = vpop.f32.mrb[0].mxu1 }
 0x2a8   : > { %v911_v5 = vadd.f32 %v910_v3, %v709_v61  ;;  %v912_v6 = vpop.f32.mrb[1].mxu1 }
 0x2a9   : > { %v913_v7 = vadd.f32 %v912_v6, %v713_v62  ;;  %v914_v8 = vpop.f32.mrb[2].mxu1 }
 0x2aa   : > { %v923_v9 = vmul.f32 0.01, %v911_v5  ;;  %v915_v10 = vadd.f32 %v914_v8, %v709_v61  ;;  %v916_v11 = vpop.f32.mrb[3].mxu1  ;;  %vm919_vm6 = vcmp.gt.f32.partialorder %v911_v5, 0.0  ;;  %v974_v61 = vrot.slane %v965_v59, %v5605_v4  ;;  %v4736_v59 = vld [vmem:[#allocation14 + $0x168] ss:$20 sps:$4 sm:$0xff]  }
 0x2ab   : > { %v924_v12 = vmul.f32 0.01, %v913_v7  ;;  %v917_v13 = vadd.f32 %v916_v11, %v713_v62  ;;  %vm920_vm7 = vcmp.gt.f32.partialorder %v913_v7, 0.0 }
 0x2ac   : > { %vm921_vm8 = vcmp.gt.f32.partialorder %v915_v10, 0.0  ;;  %v925_v14 = vmul.f32 0.01, %v915_v10  ;;  %v927_v16 = vsel %vm919_vm6, %v911_v5, %v923_v9 }
 0x2ad   : > { %vm922_vm9 = vcmp.gt.f32.partialorder %v917_v13, 0.0  ;;  %v926_v15 = vmul.f32 0.01, %v917_v13  ;;  %v928_v19 = vsel %vm920_vm7, %v913_v7, %v924_v12 }
 0x2ae   : > { %v929_v17 = vsel %vm921_vm8, %v915_v10, %v925_v14  ;;  %vm5273_vm8 = vmmov 0  }
 0x2af   : > { %v931_v18 = vpack.c.bf16 %v929_v17, %v927_v16  ;;  %v930_v20 = vsel %vm922_vm9, %v917_v13, %v926_v15  ;;  %vm5673_vm9 = vcmp.lt.s32.totalorder %v557_v63, 640 }
 0x2b0   : > { %v932_v21 = vpack.c.bf16 %v930_v20, %v928_v19 }
 0x2b2   : > { %1169 = vmatprep.mubr.bf16.mxu0 %v932_v21  ;;  %v4667_v21 = vld [vmem:[#allocation11 + $0x10] ss:$20 sps:$4 sm:$0xff]  }
 0x2b3   : > { %1170 = vmatmul.mubr.bf16.vlgmr.msra.gmra.mrb[4].mxu0 %v931_v18 }
 0x2b4   : > { %1777 = vmatpush1.bf16.msra.mxu0 %v4573_v22  ;;  %v4668_v22 = vld [vmem:[#allocation11 + $0x178] ss:$20 sps:$4 sm:$0xff]  }
 0x2b5   : > { %1778 = vmatprep.subr.bf16.mxu0 %v4581_v23  ;;  %v4682_v23 = vld [vmem:[#allocation14] ss:$20 sps:$4 sm:$0xff]  }
 0x2b8   : > { %1779 = vmatpush1.bf16.msra.mxu0 %v4579_v24  ;;  %v4690_v24 = vld [vmem:[#allocation14 + $0x2c] ss:$20 sps:$4 sm:$0xff]  }
 0x2b9   : > { %1780 = vmatprep.subr.bf16.mxu0 %v4587_v25  ;;  %v4669_v25 = vld [vmem:[#allocation11 + $0x38] ss:$20 sps:$4 sm:$0xff]  }
 0x2bc   : > { %1781 = vmatpush1.bf16.msra.mxu0 %v4585_v26  ;;  %v4670_v26 = vld [vmem:[#allocation11 + $0x1a0] ss:$20 sps:$4 sm:$0xff]  }
 0x2bd   : > { %1782 = vmatprep.subr.bf16.mxu0 %v4593_v27  ;;  %v4688_v27 = vld [vmem:[#allocation14 + $0x28] ss:$20 sps:$4 sm:$0xff]  }
 0x2c0   : > { %1783 = vmatpush1.bf16.msra.mxu0 %v4591_v28  ;;  %v4696_v28 = vld [vmem:[#allocation14 + $0x54] ss:$20 sps:$4 sm:$0xff]  }
 0x2c1   : > { %1784 = vmatprep.subr.bf16.mxu0 %v4599_v29  ;;  %v4671_v29 = vld [vmem:[#allocation11 + $0x60] ss:$20 sps:$4 sm:$0xff]  }
 0x2c4   : > { %1785 = vmatpush1.bf16.msra.mxu0 %v4597_v30  ;;  %v4672_v30 = vld [vmem:[#allocation11 + $0x1c8] ss:$20 sps:$4 sm:$0xff]  }
 0x2c5   : > { %1786 = vmatprep.subr.bf16.mxu0 %v4605_v31  ;;  %v4694_v31 = vld [vmem:[#allocation14 + $0x50] ss:$20 sps:$4 sm:$0xff]  }
 0x2c8   : > { %1787 = vmatpush1.bf16.msra.mxu0 %v4603_v32  ;;  %v4702_v32 = vld [vmem:[#allocation14 + $0x7c] ss:$20 sps:$4 sm:$0xff]  }
 0x2c9   : > { %1788 = vmatprep.subr.bf16.mxu0 %v4611_v33  ;;  %v4673_v33 = vld [vmem:[#allocation11 + $0x88] ss:$20 sps:$4 sm:$0xff]  }
 0x2cc   : > { %1789 = vmatpush1.bf16.msra.mxu0 %v4609_v34  ;;  %v4674_v34 = vld [vmem:[#allocation11 + $0x1f0] ss:$20 sps:$4 sm:$0xff]  }
 0x2cd   : > { %1790 = vmatprep.subr.bf16.mxu0 %v4617_v35  ;;  %v4700_v35 = vld [vmem:[#allocation14 + $0x78] ss:$20 sps:$4 sm:$0xff]  }
 0x2d0   : > { %1791 = vmatpush1.bf16.msra.mxu0 %v4615_v36  ;;  %v4708_v36 = vld [vmem:[#allocation14 + $0xa4] ss:$20 sps:$4 sm:$0xff]  }
 0x2d1   : > { %1792 = vmatprep.subr.bf16.mxu0 %v4623_v37  ;;  %v4675_v37 = vld [vmem:[#allocation11 + $0xb0] ss:$20 sps:$4 sm:$0xff]  }
 0x2d4   : > { %1793 = vmatpush1.bf16.msra.mxu0 %v4621_v38  ;;  %v4676_v38 = vld [vmem:[#allocation11 + $0x218] ss:$20 sps:$4 sm:$0xff]  }
 0x2d5   : > { %1794 = vmatprep.subr.bf16.mxu0 %v4629_v39  ;;  %v4706_v39 = vld [vmem:[#allocation14 + $0xa0] ss:$20 sps:$4 sm:$0xff]  }
 0x2d8   : > { %1795 = vmatpush1.bf16.msra.mxu0 %v4627_v40  ;;  %v4714_v40 = vld [vmem:[#allocation14 + $0xcc] ss:$20 sps:$4 sm:$0xff]  }
 0x2d9   : > { %1796 = vmatprep.subr.bf16.mxu0 %v4635_v41  ;;  %v4677_v41 = vld [vmem:[#allocation11 + $0xd8] ss:$20 sps:$4 sm:$0xff]  }
 0x2dc   : > { %1797 = vmatpush1.bf16.msra.mxu0 %v4633_v42  ;;  %v4678_v42 = vld [vmem:[#allocation11 + $0x240] ss:$20 sps:$4 sm:$0xff]  }
 0x2dd   : > { %1798 = vmatprep.subr.bf16.mxu0 %v4641_v43  ;;  %v4712_v43 = vld [vmem:[#allocation14 + $0xc8] ss:$20 sps:$4 sm:$0xff]  }
 0x2e0   : > { %1799 = vmatpush1.bf16.msra.mxu0 %v4639_v44  ;;  %v4720_v44 = vld [vmem:[#allocation14 + $0xf4] ss:$20 sps:$4 sm:$0xff]  }
 0x2e1   : > { %1800 = vmatprep.subr.bf16.mxu0 %v4647_v45  ;;  %v4679_v45 = vld [vmem:[#allocation11 + $0x100] ss:$20 sps:$4 sm:$0xff]  }
 0x2e4   : > { %1801 = vmatpush1.bf16.msra.mxu0 %v4645_v46  ;;  %v4680_v46 = vld [vmem:[#allocation11 + $0x268] ss:$20 sps:$4 sm:$0xff]  }
 0x2e5   : > { %1802 = vmatprep.subr.bf16.mxu0 %v4653_v47  ;;  %v4718_v47 = vld [vmem:[#allocation14 + $0xf0] ss:$20 sps:$4 sm:$0xff]  }
 0x2e8   : > { %1803 = vmatpush1.bf16.msra.mxu0 %v4651_v48  ;;  %v4726_v48 = vld [vmem:[#allocation14 + $0x11c] ss:$20 sps:$4 sm:$0xff]  }
 0x2e9   : > { %1804 = vmatprep.subr.bf16.mxu0 %v4659_v51  ;;  %v4724_v51 = vld [vmem:[#allocation14 + $0x118] ss:$20 sps:$4 sm:$0xff]  }
 0x2ec   : > { %1805 = vmatpush1.bf16.msra.mxu0 %v4657_v52  ;;  %v4732_v52 = vld [vmem:[#allocation14 + $0x144] ss:$20 sps:$4 sm:$0xff]  }
 0x2ed   : > { %1806 = vmatprep.subr.bf16.mxu0 %v4665_v55  ;;  %v4730_v55 = vld [vmem:[#allocation14 + $0x140] ss:$20 sps:$4 sm:$0xff]  }
 0x2f0   : > { %1807 = vmatpush1.bf16.msra.mxu0 %v4663_v56  ;;  %v4738_v56 = vld [vmem:[#allocation14 + $0x16c] ss:$20 sps:$4 sm:$0xff]  }
 0x2f1   : > { %3202 = vmatprep.subr.bf16.mxu0 %v4684_v58  ;;  %v4699_v58 = vld [vmem:[#allocation14 + $0x5c] ss:$20 sps:$4 sm:$0xff]  }
 0x386   : > { %v1171_v62 = vpop.f32.mrb[4].mxu0 }
 0x387   : > { %v1172_v3 = vadd.f32 %v1171_v62, %v970_v60  ;;  %v1173_v5 = vpop.f32.mrb[5].mxu0  ;;  %v4705_v62 = vld [vmem:[#allocation14 + $0x84] ss:$20 sps:$4 sm:$0xff]  }
 0x388   : > { %v1174_v6 = vadd.f32 %v1173_v5, %v974_v61  ;;  %v1175_v7 = vpop.f32.mrb[6].mxu0  ;;  %v4750_v5 = vld [vmem:[#allocation14 + $0x1bc] ss:$20 sps:$4 sm:$0xff]  }
 0x389   : > { %v1184_v8 = vmul.f32 0.01, %v1172_v3  ;;  %v1176_v9 = vadd.f32 %v1175_v7, %v970_v60  ;;  %v1177_v10 = vpop.f32.mrb[7].mxu0  ;;  %vm1180_vm10 = vcmp.gt.f32.partialorder %v1172_v3, 0.0  ;;  %v4744_v60 = vld [vmem:[#allocation14 + $0x194] ss:$20 sps:$4 sm:$0xff]  }
 0x38a   : > { %v1185_v11 = vmul.f32 0.01, %v1174_v6  ;;  %v1178_v12 = vadd.f32 %v1177_v10, %v974_v61  ;;  %vm1181_vm11 = vcmp.gt.f32.partialorder %v1174_v6, 0.0  ;;  %v4697_v61 = vld [vmem:[#allocation14 + $0x58] ss:$20 sps:$4 sm:$0xff]  }
 0x38b   : > { %vm1182_vm12 = vcmp.gt.f32.partialorder %v1176_v9, 0.0  ;;  %v1186_v13 = vmul.f32 0.01, %v1176_v9  ;;  %v1188_v15 = vsel %vm1180_vm10, %v1172_v3, %v1184_v8  ;;  %v4742_v3 = vld [vmem:[#allocation14 + $0x190] ss:$20 sps:$4 sm:$0xff]  }
 0x38c   : > { %vm1183_vm13 = vcmp.gt.f32.partialorder %v1178_v12, 0.0  ;;  %v1187_v14 = vmul.f32 0.01, %v1178_v12  ;;  %v1189_v18 = vsel %vm1181_vm11, %v1174_v6, %v1185_v11  ;;  %v4703_v6 = vld [vmem:[#allocation14 + $0x80] ss:$20 sps:$4 sm:$0xff]  }
 0x38d   : > { %v1190_v16 = vsel %vm1182_vm12, %v1176_v9, %v1186_v13  ;;  %v4711_v7 = vld [vmem:[#allocation14 + $0xac] ss:$20 sps:$4 sm:$0xff]   ;;  %v4756_v9 = vld [vmem:[#allocation14 + $0x1e4] ss:$20 sps:$4 sm:$0xff]   ;;  %v4709_v10 = vld [vmem:[#allocation14 + $0xa8] ss:$20 sps:$4 sm:$0xff]  }
 0x38e   : > { %v5613_v17 = vpack.c.bf16 %v1190_v16, %v1188_v15  ;;  %v1191_v19 = vsel %vm1183_vm13, %v1178_v12, %v1187_v14  ;;  %v4748_v8 = vld [vmem:[#allocation14 + $0x1b8] ss:$20 sps:$4 sm:$0xff]   ;;  %v4717_v11 = vld [vmem:[#allocation14 + $0xd4] ss:$20 sps:$4 sm:$0xff]   ;;  %v4715_v14 = vld [vmem:[#allocation14 + $0xd0] ss:$20 sps:$4 sm:$0xff]  }
 0x38f   : > { %v1193_v20 = vpack.c.bf16 %v1191_v19, %v1189_v18  ;;  %v4754_v12 = vld [vmem:[#allocation14 + $0x1e0] ss:$20 sps:$4 sm:$0xff]   ;;  %v4723_v15 = vld [vmem:[#allocation14 + $0xfc] ss:$20 sps:$4 sm:$0xff]   ;;  %v4729_v18 = vld [vmem:[#allocation14 + $0x124] ss:$20 sps:$4 sm:$0xff]  }
 0x390   : > { %v4762_v13 = vld [vmem:[#allocation14 + $0x20c] ss:$20 sps:$4 sm:$0xff]   ;;  %v4760_v16 = vld [vmem:[#allocation14 + $0x208] ss:$20 sps:$4 sm:$0xff]  }
 0x391   : > { %1765 = vmatprep.mubr.bf16.mxu1 %v1193_v20  ;;  %1808 = vmatprep.mubr.bf16.mxu0 %v1193_v20  ;;  %v4727_v19 = vld [vmem:[#allocation14 + $0x120] ss:$20 sps:$4 sm:$0xff]  }
 0x392   : > { %1766 = vmatmul.mubr.bf16.vlgmr.msra.gmra.mrb[4].mxu1 %v5613_v17  ;;  %1809 = vmatmul.mubr.bf16.vlgmr.msra.gmra.mrb[8].mxu0 %v5613_v17 }
 0x393   : > { %4230 = vmatpush3.bf16.msra.mxu1 %v4667_v21  ;;  %1851 = vmatprep.mubr.bf16.mxu1 %v1193_v20  ;;  %v4735_v20 = vld [vmem:[#allocation14 + $0x14c] ss:$20 sps:$4 sm:$0xff]   ;;  %v4733_v21 = vld [vmem:[#allocation14 + $0x148] ss:$20 sps:$4 sm:$0xff]  }
 0x394   : > { %4231 = vmatprep.subr.bf16.mxu1 %v4668_v22  ;;  %3203 = vmatpush1.bf16.msra.mxu0 %v4682_v23  ;;  %v4741_v22 = vld [vmem:[#allocation14 + $0x174] ss:$20 sps:$4 sm:$0xff]   ;;  %v4739_v23 = vld [vmem:[#allocation14 + $0x170] ss:$20 sps:$4 sm:$0xff]  }
 0x395   : > { %3204 = vmatprep.subr.bf16.mxu0 %v4690_v24  ;;  %v4747_v24 = vld [vmem:[#allocation14 + $0x19c] ss:$20 sps:$4 sm:$0xff]  }
 0x397   : > { %4232 = vmatpush3.bf16.msra.mxu1 %v4669_v25  ;;  %v4745_v25 = vld [vmem:[#allocation14 + $0x198] ss:$20 sps:$4 sm:$0xff]  }
 0x398   : > { %4233 = vmatprep.subr.bf16.mxu1 %v4670_v26  ;;  %3205 = vmatpush1.bf16.msra.mxu0 %v4688_v27  ;;  %v4753_v26 = vld [vmem:[#allocation14 + $0x1c4] ss:$20 sps:$4 sm:$0xff]   ;;  %v4751_v27 = vld [vmem:[#allocation14 + $0x1c0] ss:$20 sps:$4 sm:$0xff]  }
 0x399   : > { %3206 = vmatprep.subr.bf16.mxu0 %v4696_v28  ;;  %v4759_v28 = vld [vmem:[#allocation14 + $0x1ec] ss:$20 sps:$4 sm:$0xff]  }
 0x39b   : > { %4234 = vmatpush3.bf16.msra.mxu1 %v4671_v29  ;;  %v4757_v29 = vld [vmem:[#allocation14 + $0x1e8] ss:$20 sps:$4 sm:$0xff]  }
 0x39c   : > { %4235 = vmatprep.subr.bf16.mxu1 %v4672_v30  ;;  %3207 = vmatpush1.bf16.msra.mxu0 %v4694_v31  ;;  %v4765_v30 = vld [vmem:[#allocation14 + $0x214] ss:$20 sps:$4 sm:$0xff]   ;;  %v4763_v31 = vld [vmem:[#allocation14 + $0x210] ss:$20 sps:$4 sm:$0xff]  }
 0x39d   : > { %3208 = vmatprep.subr.bf16.mxu0 %v4702_v32  ;;  %v4768_v32 = vld [vmem:[#allocation14 + $0x234] ss:$20 sps:$4 sm:$0xff]  }
 0x39f   : > { %4236 = vmatpush3.bf16.msra.mxu1 %v4673_v33  ;;  %v4771_v33 = vld [vmem:[#allocation14 + $0x23c] ss:$20 sps:$4 sm:$0xff]  }
 0x3a0   : > { %4237 = vmatprep.subr.bf16.mxu1 %v4674_v34  ;;  %3209 = vmatpush1.bf16.msra.mxu0 %v4700_v35  ;;  %v4766_v34 = vld [vmem:[#allocation14 + $0x230] ss:$20 sps:$4 sm:$0xff]   ;;  %v4769_v35 = vld [vmem:[#allocation14 + $0x238] ss:$20 sps:$4 sm:$0xff]  }
 0x3a1   : > { %3210 = vmatprep.subr.bf16.mxu0 %v4708_v36  ;;  %v4774_v36 = vld [vmem:[#allocation14 + $0x25c] ss:$20 sps:$4 sm:$0xff]  }
 0x3a3   : > { %4238 = vmatpush3.bf16.msra.mxu1 %v4675_v37  ;;  %v4777_v37 = vld [vmem:[#allocation14 + $0x264] ss:$20 sps:$4 sm:$0xff]  }
 0x3a4   : > { %4239 = vmatprep.subr.bf16.mxu1 %v4676_v38  ;;  %3211 = vmatpush1.bf16.msra.mxu0 %v4706_v39  ;;  %v4772_v38 = vld [vmem:[#allocation14 + $0x258] ss:$20 sps:$4 sm:$0xff]   ;;  %v4775_v39 = vld [vmem:[#allocation14 + $0x260] ss:$20 sps:$4 sm:$0xff]  }
 0x3a5   : > { %3212 = vmatprep.subr.bf16.mxu0 %v4714_v40  ;;  %v4780_v40 = vld [vmem:[#allocation14 + $0x284] ss:$20 sps:$4 sm:$0xff]  }
 0x3a7   : > { %4240 = vmatpush3.bf16.msra.mxu1 %v4677_v41  ;;  %v4783_v41 = vld [vmem:[#allocation14 + $0x28c] ss:$20 sps:$4 sm:$0xff]  }
 0x3a8   : > { %4241 = vmatprep.subr.bf16.mxu1 %v4678_v42  ;;  %3213 = vmatpush1.bf16.msra.mxu0 %v4712_v43  ;;  %v1302_v42 = vsub.s32 2, %v5596_v1  ;;  %v5619_v43 = vld [vmem:[#allocation13] sm:$0x1f] }
 0x3a9   : > { %3214 = vmatprep.subr.bf16.mxu0 %v4720_v44  ;;  %v1306_v44 = vsub.s32 3, %v5596_v1 }
 0x3ab   : > { %4242 = vmatpush3.bf16.msra.mxu1 %v4679_v45  ;;  %v1295_v45 = vrot.slane %v5619_v43, %v5602_v2 }
 0x3ac   : > { %4243 = vmatprep.subr.bf16.mxu1 %v4680_v46  ;;  %3215 = vmatpush1.bf16.msra.mxu0 %v4718_v47  ;;  %v1303_v46 = vrot.slane %v5619_v43, %v1302_v42  ;;  %v1299_v47 = vrot.slane %v5619_v43, %v5605_v4 }
 0x3ad   : > { %3216 = vmatprep.subr.bf16.mxu0 %v4726_v48  ;;  %v1307_v48 = vrot.slane %v5619_v43, %v1306_v44 }
 0x3af   : > { %4244 = vmatpush3.bf16.msra.mxu1 %v4681_v49 }
 0x3b0   : > { %3331 = vmatprep.subr.bf16.mxu1 %v4687_v50  ;;  %3217 = vmatpush1.bf16.msra.mxu0 %v4724_v51 }
 0x3b1   : > { %3218 = vmatprep.subr.bf16.mxu0 %v4732_v52 }
 0x3b2   : > { %1852 = vmatmul.mubr.bf16.vlgmr.msra.gmra.mrb[8].mxu1 %v5613_v17  ;;  %v4721_v17 = vld [vmem:[#allocation14 + $0xf8] ss:$20 sps:$4 sm:$0xff]  }
 0x3b3   : > { %3332 = vmatpush1.bf16.msra.mxu1 %v4685_v53 }
 0x3b4   : > { %3333 = vmatprep.subr.bf16.mxu1 %v4693_v54  ;;  %3219 = vmatpush1.bf16.msra.mxu0 %v4730_v55 }
 0x3b5   : > { %3220 = vmatprep.subr.bf16.mxu0 %v4738_v56 }
 0x3b7   : > { %3334 = vmatpush1.bf16.msra.mxu1 %v4691_v57 }
 0x3b8   : > { %3335 = vmatprep.subr.bf16.mxu1 %v4699_v58  ;;  %3221 = vmatpush1.bf16.msra.mxu0 %v4736_v59 }
 0x3b9   : > { %3222 = vmatprep.subr.bf16.mxu0 %v4744_v60 }
 0x3bb   : > { %3336 = vmatpush1.bf16.msra.mxu1 %v4697_v61 }
 0x3bc   : > { %3337 = vmatprep.subr.bf16.mxu1 %v4705_v62  ;;  %3223 = vmatpush1.bf16.msra.mxu0 %v4742_v3 }
 0x3bd   : > { %3224 = vmatprep.subr.bf16.mxu0 %v4750_v5 }
 0x3bf   : > { %3338 = vmatpush1.bf16.msra.mxu1 %v4703_v6 }
 0x3c0   : > { %3339 = vmatprep.subr.bf16.mxu1 %v4711_v7  ;;  %3225 = vmatpush1.bf16.msra.mxu0 %v4748_v8 }
 0x3c1   : > { %3226 = vmatprep.subr.bf16.mxu0 %v4756_v9 }
 0x3c3   : > { %3340 = vmatpush1.bf16.msra.mxu1 %v4709_v10 }
 0x3c4   : > { %3341 = vmatprep.subr.bf16.mxu1 %v4717_v11  ;;  %3227 = vmatpush1.bf16.msra.mxu0 %v4754_v12 }
 0x3c5   : > { %3228 = vmatprep.subr.bf16.mxu0 %v4762_v13 }
 0x3c7   : > { %3342 = vmatpush1.bf16.msra.mxu1 %v4715_v14 }
 0x3c8   : > { %3343 = vmatprep.subr.bf16.mxu1 %v4723_v15  ;;  %3229 = vmatpush1.bf16.msra.mxu0 %v4760_v16 }
 0x3c9   : > { %3230 = vmatprep.subr.bf16.mxu0 %v4768_v32  ;;  %v4792_v32 = vld [vmem:[#allocation14 + $0x2d4] ss:$20 sps:$4 sm:$0xff]  }
 0x3cb   : > { %3344 = vmatpush1.bf16.msra.mxu1 %v4721_v17 }
 0x3cc   : > { %3345 = vmatprep.subr.bf16.mxu1 %v4729_v18  ;;  %3231 = vmatpush1.bf16.msra.mxu0 %v4766_v34  ;;  %v4790_v34 = vld [vmem:[#allocation14 + $0x2d0] ss:$20 sps:$4 sm:$0xff]  }
 0x3cd   : > { %3232 = vmatprep.subr.bf16.mxu0 %v4774_v36  ;;  %v4798_v36 = vld [vmem:[#allocation14 + $0x2fc] ss:$20 sps:$4 sm:$0xff]  }
 0x3cf   : > { %3346 = vmatpush1.bf16.msra.mxu1 %v4727_v19 }
 0x3d0   : > { %3347 = vmatprep.subr.bf16.mxu1 %v4735_v20  ;;  %3233 = vmatpush1.bf16.msra.mxu0 %v4772_v38  ;;  %v4796_v38 = vld [vmem:[#allocation14 + $0x2f8] ss:$20 sps:$4 sm:$0xff]  }
 0x3d1   : > { %3245 = vmatprep.subr.bf16.mxu0 %v4780_v40  ;;  %v4804_v40 = vld [vmem:[#allocation14 + $0x324] ss:$20 sps:$4 sm:$0xff]  }
 0x3d3   : > { %3348 = vmatpush1.bf16.msra.mxu1 %v4733_v21 }
 0x3d4   : > { %3349 = vmatprep.subr.bf16.mxu1 %v4741_v22 }
 0x3d7   : > { %3350 = vmatpush1.bf16.msra.mxu1 %v4739_v23 }
 0x3d8   : > { %3351 = vmatprep.subr.bf16.mxu1 %v4747_v24 }
 0x3db   : > { %3352 = vmatpush1.bf16.msra.mxu1 %v4745_v25  ;;  %v4778_v25 = vld [vmem:[#allocation14 + $0x280] ss:$20 sps:$4 sm:$0xff]  }
 0x3dc   : > { %3353 = vmatprep.subr.bf16.mxu1 %v4753_v26  ;;  %v4781_v26 = vld [vmem:[#allocation14 + $0x288] ss:$20 sps:$4 sm:$0xff]  }
 0x3df   : > { %3354 = vmatpush1.bf16.msra.mxu1 %v4751_v27 }
 0x3e0   : > { %3355 = vmatprep.subr.bf16.mxu1 %v4759_v28  ;;  %v4786_v28 = vld [vmem:[#allocation14 + $0x2ac] ss:$20 sps:$4 sm:$0xff]  }
 0x3e3   : > { %3356 = vmatpush1.bf16.msra.mxu1 %v4757_v29  ;;  %v4789_v29 = vld [vmem:[#allocation14 + $0x2b4] ss:$20 sps:$4 sm:$0xff]  }
 0x3e4   : > { %3357 = vmatprep.subr.bf16.mxu1 %v4765_v30  ;;  %v4784_v30 = vld [vmem:[#allocation14 + $0x2a8] ss:$20 sps:$4 sm:$0xff]  }
 0x3e7   : > { %3358 = vmatpush1.bf16.msra.mxu1 %v4763_v31  ;;  %v4787_v31 = vld [vmem:[#allocation14 + $0x2b0] ss:$20 sps:$4 sm:$0xff]  }
 0x3e8   : > { %3359 = vmatprep.subr.bf16.mxu1 %v4771_v33  ;;  %v4795_v33 = vld [vmem:[#allocation14 + $0x2dc] ss:$20 sps:$4 sm:$0xff]  }
 0x3eb   : > { %3360 = vmatpush1.bf16.msra.mxu1 %v4769_v35  ;;  %v4793_v35 = vld [vmem:[#allocation14 + $0x2d8] ss:$20 sps:$4 sm:$0xff]  }
 0x3ec   : > { %3361 = vmatprep.subr.bf16.mxu1 %v4777_v37  ;;  %v4801_v37 = vld [vmem:[#allocation14 + $0x304] ss:$20 sps:$4 sm:$0xff]  }
 0x3ef   : > { %3362 = vmatpush1.bf16.msra.mxu1 %v4775_v39  ;;  %v4799_v39 = vld [vmem:[#allocation14 + $0x300] ss:$20 sps:$4 sm:$0xff]  }
 0x3f0   : > { %3374 = vmatprep.subr.bf16.mxu1 %v4783_v41  ;;  %v4807_v41 = vld [vmem:[#allocation14 + $0x32c] ss:$20 sps:$4 sm:$0xff]  }
 0x465   : > { %v1767_v49 = vpop.f32.mrb[4].mxu1  ;;  %v1810_v50 = vpop.f32.mrb[8].mxu0 }
 0x466   : > { %v1768_v51 = vadd.f32 %v1767_v49, %v1295_v45  ;;  %v1811_v52 = vadd.f32 %v1810_v50, %v1303_v46  ;;  %v1769_v53 = vpop.f32.mrb[5].mxu1  ;;  %v1812_v54 = vpop.f32.mrb[9].mxu0  ;;  %v1310_v49 = vsub.s32 4, %v5596_v1  ;;  %v4808_v50 = vld [vmem:[#allocation14 + $0x348] ss:$20 sps:$4 sm:$0xff]  }
 0x467   : > { %v1770_v55 = vadd.f32 %v1769_v53, %v1299_v47  ;;  %v1813_v56 = vadd.f32 %v1812_v54, %v1307_v48  ;;  %v1771_v57 = vpop.f32.mrb[6].mxu1  ;;  %v1814_v58 = vpop.f32.mrb[10].mxu0  ;;  %v4816_v54 = vld [vmem:[#allocation14 + $0x374] ss:$20 sps:$4 sm:$0xff]  }
 0x468   : > { %vm1860_vm14 = vcmp.gt.f32.partialorder %v1768_v51, 0.0  ;;  %v1870_v59 = vmul.f32 0.01, %v1768_v51  ;;  %vm1862_vm15 = vcmp.gt.f32.partialorder %v1811_v52, 0.0  ;;  %v1872_v60 = vmul.f32 0.01, %v1811_v52 }
 0x469   : > { %vm1861_vm0 = vcmp.gt.f32.partialorder %v1770_v55, 0.0  ;;  %v1871_v61 = vmul.f32 0.01, %v1770_v55  ;;  %vm1863_vm1 = vcmp.gt.f32.partialorder %v1813_v56, 0.0  ;;  %v1873_v62 = vmul.f32 0.01, %v1813_v56 }
 0x46a   : > { %v1772_v3 = vadd.f32 %v1771_v57, %v1295_v45  ;;  %v1815_v5 = vadd.f32 %v1814_v58, %v1303_v46  ;;  %v1773_v6 = vpop.f32.mrb[7].mxu1  ;;  %v1816_v7 = vpop.f32.mrb[11].mxu0  ;;  %v1880_v8 = vsel %vm1860_vm14, %v1768_v51, %v1870_v59  ;;  %v1882_v9 = vsel %vm1862_vm15, %v1811_v52, %v1872_v60  ;;  %v4802_v45 = vld [vmem:[#allocation14 + $0x320] ss:$20 sps:$4 sm:$0xff]   ;;  %v4805_v46 = vld [vmem:[#allocation14 + $0x328] ss:$20 sps:$4 sm:$0xff]  }
 0x46b   : > { %v1774_v10 = vadd.f32 %v1773_v6, %v1299_v47  ;;  %v1817_v11 = vadd.f32 %v1816_v7, %v1307_v48  ;;  %v1881_v18 = vsel %vm1861_vm0, %v1770_v55, %v1871_v61  ;;  %v1883_v19 = vsel %vm1863_vm1, %v1813_v56, %v1873_v62  ;;  %v4810_v47 = vld [vmem:[#allocation14 + $0x34c] ss:$20 sps:$4 sm:$0xff]   ;;  %v4813_v48 = vld [vmem:[#allocation14 + $0x354] ss:$20 sps:$4 sm:$0xff]   ;;  %v4811_v51 = vld [vmem:[#allocation14 + $0x350] ss:$20 sps:$4 sm:$0xff]  }
 0x46c   : > { %vm1865_vm2 = vcmp.gt.f32.partialorder %v1772_v3, 0.0  ;;  %v1875_v12 = vmul.f32 0.01, %v1772_v3  ;;  %vm1867_vm3 = vcmp.gt.f32.partialorder %v1815_v5, 0.0  ;;  %v1877_v13 = vmul.f32 0.01, %v1815_v5 }
 0x46d   : > { %vm1866_vm4 = vcmp.gt.f32.partialorder %v1774_v10, 0.0  ;;  %v1876_v14 = vmul.f32 0.01, %v1774_v10  ;;  %vm1868_vm5 = vcmp.gt.f32.partialorder %v1817_v11, 0.0  ;;  %v1878_v15 = vmul.f32 0.01, %v1817_v11 }
 0x46e   : > { %v1885_v16 = vsel %vm1865_vm2, %v1772_v3, %v1875_v12  ;;  %v1887_v17 = vsel %vm1867_vm3, %v1815_v5, %v1877_v13  ;;  %v1311_v53 = vrot.slane %v5619_v43, %v1310_v49  ;;  %v4819_v55 = vld [vmem:[#allocation14 + $0x37c] ss:$20 sps:$4 sm:$0xff]   ;;  %v4817_v61 = vld [vmem:[#allocation14 + $0x378] ss:$20 sps:$4 sm:$0xff]   ;;  %v4823_v43 = vld [vmem:[#allocation14 + $0x3a0] ss:$20 sps:$4 sm:$0xff]  }
 0x46f   : > { %v5634_v20 = vpack.c.bf16 %v1885_v16, %v1880_v8  ;;  %v5636_v21 = vpack.c.bf16 %v1887_v17, %v1882_v9  ;;  %v1886_v22 = vsel %vm1866_vm4, %v1774_v10, %v1876_v14  ;;  %v1888_v23 = vsel %vm1868_vm5, %v1817_v11, %v1878_v15  ;;  %v4814_v60 = vld [vmem:[#allocation14 + $0x370] ss:$20 sps:$4 sm:$0xff]   ;;  %v4820_v9 = vld [vmem:[#allocation14 + $0x398] ss:$20 sps:$4 sm:$0xff]   ;;  %v4826_v15 = vld [vmem:[#allocation14 + $0x3c0] ss:$20 sps:$4 sm:$0xff]  }
 0x470   : > { %v5638_v24 = vpack.c.bf16 %v1886_v22, %v1881_v18  ;;  %v5640_v27 = vpack.c.bf16 %v1888_v23, %v1883_v19  ;;  %v4822_v5 = vld [vmem:[#allocation14 + $0x39c] ss:$20 sps:$4 sm:$0xff]   ;;  %v4825_v6 = vld [vmem:[#allocation14 + $0x3a4] ss:$20 sps:$4 sm:$0xff]   ;;  %v4831_v12 = vld [vmem:[#allocation14 + $0x3cc] ss:$20 sps:$4 sm:$0xff]  }
 0x471   : > { %v4828_v10 = vld [vmem:[#allocation14 + $0x3c4] ss:$20 sps:$4 sm:$0xff]   ;;  %v4829_v16 = vld [vmem:[#allocation14 + $0x3c8] ss:$20 sps:$4 sm:$0xff]   ;;  %v4834_v18 = vld [vmem:[#allocation14 + $0x3ec] ss:$20 sps:$4 sm:$0xff]  }
 0x472   : > { %3234 = vmatprep.mubr.bf16.mxu0 %v5638_v24  ;;  %3363 = vmatprep.mubr.bf16.mxu1 %v5638_v24  ;;  %v4837_v19 = vld [vmem:[#allocation14 + $0x3f4] ss:$20 sps:$4 sm:$0xff]   ;;  %v4835_v23 = vld [vmem:[#allocation14 + $0x3f0] ss:$20 sps:$4 sm:$0xff]  }
 0x473   : > { %3235 = vmatmul.mubr.bf16.vlgmr.msra.gmra.mrb[12].mxu0 %v5634_v20  ;;  %3364 = vmatmul.mubr.bf16.vlgmr.msra.gmra.mrb[12].mxu1 %v5634_v20  ;;  %v4832_v22 = vld [vmem:[#allocation14 + $0x3e8] ss:$20 sps:$4 sm:$0xff]  }
 0x474   : > { %3246 = vmatpush1.bf16.msra.mxu0 %v4778_v25  ;;  %3375 = vmatpush1.bf16.msra.mxu1 %v4781_v26  ;;  %v4840_v25 = vld [vmem:[#allocation14 + $0x414] ss:$20 sps:$4 sm:$0xff]   ;;  %v4843_v26 = vld [vmem:[#allocation14 + $0x41c] ss:$20 sps:$4 sm:$0xff]  }
 0x475   : > { %3277 = vmatprep.mubr.bf16.mxu0 %v5640_v27  ;;  %3406 = vmatprep.mubr.bf16.mxu1 %v5640_v27 }
 0x476   : > { %3247 = vmatprep.subr.bf16.mxu0 %v4786_v28  ;;  %3376 = vmatprep.subr.bf16.mxu1 %v4789_v29  ;;  %v4838_v28 = vld [vmem:[#allocation14 + $0x410] ss:$20 sps:$4 sm:$0xff]   ;;  %v4841_v29 = vld [vmem:[#allocation14 + $0x418] ss:$20 sps:$4 sm:$0xff]  }
 0x478   : > { %3248 = vmatpush1.bf16.msra.mxu0 %v4784_v30  ;;  %3377 = vmatpush1.bf16.msra.mxu1 %v4787_v31  ;;  %v4846_v30 = vld [vmem:[#allocation14 + $0x43c] ss:$20 sps:$4 sm:$0xff]   ;;  %v4849_v31 = vld [vmem:[#allocation14 + $0x444] ss:$20 sps:$4 sm:$0xff]  }
 0x479   : > { %3249 = vmatprep.subr.bf16.mxu0 %v4792_v32  ;;  %3378 = vmatprep.subr.bf16.mxu1 %v4795_v33  ;;  %v4844_v32 = vld [vmem:[#allocation14 + $0x438] ss:$20 sps:$4 sm:$0xff]   ;;  %v4847_v33 = vld [vmem:[#allocation14 + $0x440] ss:$20 sps:$4 sm:$0xff]  }
 0x47c   : > { %3250 = vmatpush1.bf16.msra.mxu0 %v4790_v34  ;;  %3379 = vmatpush1.bf16.msra.mxu1 %v4793_v35  ;;  %v4852_v34 = vld [vmem:[#allocation14 + $0x464] ss:$20 sps:$4 sm:$0xff]   ;;  %v4855_v35 = vld [vmem:[#allocation14 + $0x46c] ss:$20 sps:$4 sm:$0xff]  }
 0x47d   : > { %3251 = vmatprep.subr.bf16.mxu0 %v4798_v36  ;;  %3380 = vmatprep.subr.bf16.mxu1 %v4801_v37  ;;  %v4850_v36 = vld [vmem:[#allocation14 + $0x460] ss:$20 sps:$4 sm:$0xff]   ;;  %v4853_v37 = vld [vmem:[#allocation14 + $0x468] ss:$20 sps:$4 sm:$0xff]  }
 0x480   : > { %3252 = vmatpush1.bf16.msra.mxu0 %v4796_v38  ;;  %3381 = vmatpush1.bf16.msra.mxu1 %v4799_v39  ;;  %v4858_v38 = vld [vmem:[#allocation14 + $0x48c] ss:$20 sps:$4 sm:$0xff]   ;;  %v4861_v39 = vld [vmem:[#allocation14 + $0x494] ss:$20 sps:$4 sm:$0xff]  }
 0x481   : > { %3253 = vmatprep.subr.bf16.mxu0 %v4804_v40  ;;  %3382 = vmatprep.subr.bf16.mxu1 %v4807_v41  ;;  %v4856_v40 = vld [vmem:[#allocation14 + $0x488] ss:$20 sps:$4 sm:$0xff]   ;;  %v4859_v41 = vld [vmem:[#allocation14 + $0x490] ss:$20 sps:$4 sm:$0xff]  }
 0x484   : > { %3254 = vmatpush1.bf16.msra.mxu0 %v4802_v45  ;;  %3383 = vmatpush1.bf16.msra.mxu1 %v4805_v46  ;;  %v4864_v45 = vld [vmem:[#allocation14 + $0x4b4] ss:$20 sps:$4 sm:$0xff]   ;;  %v4867_v46 = vld [vmem:[#allocation14 + $0x4bc] ss:$20 sps:$4 sm:$0xff]  }
 0x485   : > { %v4245_v52 = vpop.f32.mrb[8].mxu1  ;;  %3255 = vmatprep.subr.bf16.mxu0 %v4810_v47  ;;  %3384 = vmatprep.subr.bf16.mxu1 %v4813_v48  ;;  %v4862_v47 = vld [vmem:[#allocation14 + $0x4b0] ss:$20 sps:$4 sm:$0xff]   ;;  %v4865_v48 = vld [vmem:[#allocation14 + $0x4b8] ss:$20 sps:$4 sm:$0xff]  }
 0x486   : > { %v4246_v56 = vpop.f32.mrb[9].mxu1 }
 0x487   : > { %v4247_v57 = vadd.f32 %v4246_v56, %v4245_v52  ;;  %v4248_v58 = vpop.f32.mrb[10].mxu1  ;;  %v4868_v52 = vld [vmem:[#allocation14 + $0x4d8] ss:$20 sps:$4 sm:$0xff]   ;;  %v4874_v56 = vld [vmem:[#allocation14 + $0x500] ss:$20 sps:$4 sm:$0xff]  }
 0x488   : > { %3256 = vmatpush1.bf16.msra.mxu0 %v4808_v50  ;;  %3385 = vmatpush1.bf16.msra.mxu1 %v4811_v51  ;;  %v4249_v59 = vpop.f32.mrb[11].mxu1  ;;  %v4870_v50 = vld [vmem:[#allocation14 + $0x4dc] ss:$20 sps:$4 sm:$0xff]   ;;  %v4873_v51 = vld [vmem:[#allocation14 + $0x4e4] ss:$20 sps:$4 sm:$0xff]  }
 0x489   : > { %v1854_v62 = vadd.f32 %v4247_v57, %v1311_v53  ;;  %v4250_v3 = vadd.f32 %v4249_v59, %v4248_v58  ;;  %3257 = vmatprep.subr.bf16.mxu0 %v4816_v54  ;;  %3386 = vmatprep.subr.bf16.mxu1 %v4819_v55  ;;  %v4876_v54 = vld [vmem:[#allocation14 + $0x504] ss:$20 sps:$4 sm:$0xff]   ;;  %v4879_v55 = vld [vmem:[#allocation14 + $0x50c] ss:$20 sps:$4 sm:$0xff]   ;;  %v4877_v57 = vld [vmem:[#allocation14 + $0x508] ss:$20 sps:$4 sm:$0xff]  }
 0x48a   : > { %v4882_v58 = vld [vmem:[#allocation14 + $0x52c] ss:$20 sps:$4 sm:$0xff]   ;;  %v4885_v59 = vld [vmem:[#allocation14 + $0x534] ss:$20 sps:$4 sm:$0xff]  }
 0x48b   : > { %v1874_v7 = vmul.f32 0.01, %v1854_v62  ;;  %v1857_v8 = vadd.f32 %v4250_v3, %v1311_v53  ;;  %vm1864_vm6 = vcmp.gt.f32.partialorder %v1854_v62, 0.0  ;;  %v4871_v53 = vld [vmem:[#allocation14 + $0x4e0] ss:$20 sps:$4 sm:$0xff]  }
 0x48c   : > { %3258 = vmatpush1.bf16.msra.mxu0 %v4814_v60  ;;  %3387 = vmatpush1.bf16.msra.mxu1 %v4817_v61  ;;  %v4880_v60 = vld [vmem:[#allocation14 + $0x528] ss:$20 sps:$4 sm:$0xff]   ;;  %v4883_v61 = vld [vmem:[#allocation14 + $0x530] ss:$20 sps:$4 sm:$0xff]  }
 0x48d   : > { %vm1869_vm7 = vcmp.gt.f32.partialorder %v1857_v8, 0.0  ;;  %v1879_v11 = vmul.f32 0.01, %v1857_v8  ;;  %3259 = vmatprep.subr.bf16.mxu0 %v4822_v5  ;;  %3388 = vmatprep.subr.bf16.mxu1 %v4825_v6  ;;  %v1884_v13 = vsel %vm1864_vm6, %v1854_v62, %v1874_v7  ;;  %v4888_v62 = vld [vmem:[#allocation14 + $0x554] ss:$20 sps:$4 sm:$0xff]   ;;  %v5272_v5 = vmov 0  }
 0x48e   : > { %v4891_v3 = vld [vmem:[#allocation14 + $0x55c] ss:$20 sps:$4 sm:$0xff]   ;;  %v4889_v7 = vld [vmem:[#allocation14 + $0x558] ss:$20 sps:$4 sm:$0xff]  }
 0x48f   : > { %v1889_v14 = vsel %vm1869_vm7, %v1857_v8, %v1879_v11  ;;  %v4886_v6 = vld [vmem:[#allocation14 + $0x550] ss:$20 sps:$4 sm:$0xff]  }
 0x490   : > { %3260 = vmatpush1.bf16.msra.mxu0 %v4820_v9  ;;  %3389 = vmatpush1.bf16.msra.mxu1 %v4823_v43  ;;  %v5652_v17 = vpack.c.bf16 %v1889_v14, %v1884_v13  ;;  %v4894_v8 = vld [vmem:[#allocation14 + $0x57c] ss:$20 sps:$4 sm:$0xff]   ;;  %v4897_v9 = vld [vmem:[#allocation14 + $0x584] ss:$20 sps:$4 sm:$0xff]   ;;  %v4898_v13 = vld [vmem:[#allocation14 + $0x5a0] ss:$20 sps:$4 sm:$0xff]  }
 0x491   : > { %3261 = vmatprep.subr.bf16.mxu0 %v4828_v10  ;;  %3390 = vmatprep.subr.bf16.mxu1 %v4831_v12  ;;  %v4892_v43 = vld [vmem:[#allocation14 + $0x578] ss:$20 sps:$4 sm:$0xff]   ;;  %v4895_v10 = vld [vmem:[#allocation14 + $0x580] ss:$20 sps:$4 sm:$0xff]   ;;  %v4901_v14 = vld [vmem:[#allocation14 + $0x5a8] ss:$20 sps:$4 sm:$0xff]  }
 0x492   : > { %v4900_v11 = vld [vmem:[#allocation14 + $0x5a4] ss:$20 sps:$4 sm:$0xff]   ;;  %v4903_v12 = vld [vmem:[#allocation14 + $0x5ac] ss:$20 sps:$4 sm:$0xff]  }
 0x494   : > { %3262 = vmatpush1.bf16.msra.mxu0 %v4826_v15  ;;  %3391 = vmatpush1.bf16.msra.mxu1 %v4829_v16  ;;  %v4906_v15 = vld [vmem:[#allocation14 + $0x5cc] ss:$20 sps:$4 sm:$0xff]   ;;  %v4909_v16 = vld [vmem:[#allocation14 + $0x5d4] ss:$20 sps:$4 sm:$0xff]  }
 0x495   : > { %3263 = vmatprep.subr.bf16.mxu0 %v4834_v18  ;;  %3392 = vmatprep.subr.bf16.mxu1 %v4837_v19  ;;  %v4904_v18 = vld [vmem:[#allocation14 + $0x5c8] ss:$20 sps:$4 sm:$0xff]   ;;  %v4907_v19 = vld [vmem:[#allocation14 + $0x5d0] ss:$20 sps:$4 sm:$0xff]  }
 0x498   : > { %3264 = vmatpush1.bf16.msra.mxu0 %v4832_v22  ;;  %3393 = vmatpush1.bf16.msra.mxu1 %v4835_v23  ;;  %v4912_v22 = vld [vmem:[#allocation14 + $0x5f4] ss:$20 sps:$4 sm:$0xff]   ;;  %v4915_v23 = vld [vmem:[#allocation14 + $0x5fc] ss:$20 sps:$4 sm:$0xff]  }
 0x499   : > { %3265 = vmatprep.subr.bf16.mxu0 %v4840_v25  ;;  %3394 = vmatprep.subr.bf16.mxu1 %v4843_v26  ;;  %v4910_v25 = vld [vmem:[#allocation14 + $0x5f0] ss:$20 sps:$4 sm:$0xff]   ;;  %v4913_v26 = vld [vmem:[#allocation14 + $0x5f8] ss:$20 sps:$4 sm:$0xff]  }
 0x49c   : > { %3266 = vmatpush1.bf16.msra.mxu0 %v4838_v28  ;;  %3395 = vmatpush1.bf16.msra.mxu1 %v4841_v29  ;;  %v4918_v28 = vld [vmem:[#allocation14 + $0x61c] ss:$20 sps:$4 sm:$0xff]   ;;  %v4921_v29 = vld [vmem:[#allocation14 + $0x624] ss:$20 sps:$4 sm:$0xff]  }
 0x49d   : > { %3267 = vmatprep.subr.bf16.mxu0 %v4846_v30  ;;  %3396 = vmatprep.subr.bf16.mxu1 %v4849_v31  ;;  %v4916_v30 = vld [vmem:[#allocation14 + $0x618] ss:$20 sps:$4 sm:$0xff]   ;;  %v4919_v31 = vld [vmem:[#allocation14 + $0x620] ss:$20 sps:$4 sm:$0xff]  }
 0x4a0   : > { %3268 = vmatpush1.bf16.msra.mxu0 %v4844_v32  ;;  %3397 = vmatpush1.bf16.msra.mxu1 %v4847_v33  ;;  %v4922_v32 = vld [vmem:[#allocation14 + $0x150] ss:$20 sps:$4 sm:$0xff]  }
 0x4a1   : > { %3269 = vmatprep.subr.bf16.mxu0 %v4852_v34  ;;  %3398 = vmatprep.subr.bf16.mxu1 %v4855_v35  ;;  %v4923_v33 = vld [vmem:[#allocation14 + $0x3d0] ss:$20 sps:$4 sm:$0xff]  }
 0x4a2   : > { %v4924_v34 = vld [vmem:[#allocation14 + $0x10] ss:$20 sps:$4 sm:$0xff]  }
 0x4a3   : > { %v4925_v35 = vld [vmem:[#allocation14 + $0x290] ss:$20 sps:$4 sm:$0xff]  }
 0x4a4   : > { %3270 = vmatpush1.bf16.msra.mxu0 %v4850_v36  ;;  %3399 = vmatpush1.bf16.msra.mxu1 %v4853_v37  ;;  %v4926_v36 = vld [vmem:[#allocation14 + $0x178] ss:$20 sps:$4 sm:$0xff]  }
 0x4a5   : > { %3271 = vmatprep.subr.bf16.mxu0 %v4858_v38  ;;  %3400 = vmatprep.subr.bf16.mxu1 %v4861_v39  ;;  %v4927_v37 = vld [vmem:[#allocation14 + $0x3f8] ss:$20 sps:$4 sm:$0xff]  }
 0x4a6   : > { %v4928_v38 = vld [vmem:[#allocation14 + $0x38] ss:$20 sps:$4 sm:$0xff]  }
 0x4a7   : > { %v4929_v39 = vld [vmem:[#allocation14 + $0x2b8] ss:$20 sps:$4 sm:$0xff]  }
 0x4a8   : > { %3272 = vmatpush1.bf16.msra.mxu0 %v4856_v40  ;;  %3401 = vmatpush1.bf16.msra.mxu1 %v4859_v41  ;;  %v4930_v40 = vld [vmem:[#allocation14 + $0x1a0] ss:$20 sps:$4 sm:$0xff]  }
 0x4a9   : > { %3273 = vmatprep.subr.bf16.mxu0 %v4864_v45  ;;  %3402 = vmatprep.subr.bf16.mxu1 %v4867_v46  ;;  %v4931_v41 = vld [vmem:[#allocation14 + $0x420] ss:$20 sps:$4 sm:$0xff]  }
 0x4aa   : > { %v4932_v45 = vld [vmem:[#allocation14 + $0x60] ss:$20 sps:$4 sm:$0xff]  }
 0x4ab   : > { %v4933_v46 = vld [vmem:[#allocation14 + $0x2e0] ss:$20 sps:$4 sm:$0xff]  }
 0x4ac   : > { %3274 = vmatpush1.bf16.msra.mxu0 %v4862_v47  ;;  %3403 = vmatpush1.bf16.msra.mxu1 %v4865_v48  ;;  %v4934_v47 = vld [vmem:[#allocation14 + $0x1c8] ss:$20 sps:$4 sm:$0xff]  }
 0x4ad   : > { %3275 = vmatprep.subr.bf16.mxu0 %v4870_v50  ;;  %3404 = vmatprep.subr.bf16.mxu1 %v4873_v51  ;;  %v4935_v48 = vld [vmem:[#allocation14 + $0x448] ss:$20 sps:$4 sm:$0xff]   ;;  %v4938_v51 = vld [vmem:[#allocation14 + $0x1f0] ss:$20 sps:$4 sm:$0xff]  }
 0x4ae   : > { %v4936_v50 = vld [vmem:[#allocation14 + $0x88] ss:$20 sps:$4 sm:$0xff]  }
 0x4b0   : > { %3276 = vmatpush1.bf16.msra.mxu0 %v4868_v52  ;;  %3405 = vmatpush1.bf16.msra.mxu1 %v4871_v53  ;;  %v4940_v52 = vld [vmem:[#allocation14 + $0xb0] ss:$20 sps:$4 sm:$0xff]  }
 0x4b1   : > { %3288 = vmatprep.subr.bf16.mxu0 %v4876_v54  ;;  %3417 = vmatprep.subr.bf16.mxu1 %v4879_v55  ;;  %v4941_v53 = vld [vmem:[#allocation14 + $0x330] ss:$20 sps:$4 sm:$0xff]   ;;  %v4942_v54 = vld [vmem:[#allocation14 + $0x218] ss:$20 sps:$4 sm:$0xff]  }
 0x4b2   : > { %v4943_v55 = vld [vmem:[#allocation14 + $0x498] ss:$20 sps:$4 sm:$0xff]  }
 0x4b3   : > { %3278 = vmatmul.mubr.bf16.vlgmr.msra.gmra.mrb[12].mxu0 %v5636_v21  ;;  %3407 = vmatmul.mubr.bf16.vlgmr.msra.gmra.mrb[12].mxu1 %v5636_v21 }
 0x4b4   : > { %3289 = vmatpush1.bf16.msra.mxu0 %v4874_v56  ;;  %3418 = vmatpush1.bf16.msra.mxu1 %v4877_v57  ;;  %v4944_v56 = vld [vmem:[#allocation14 + $0xd8] ss:$20 sps:$4 sm:$0xff]  }
 0x4b5   : > { %3290 = vmatprep.subr.bf16.mxu0 %v4882_v58  ;;  %3419 = vmatprep.subr.bf16.mxu1 %v4885_v59  ;;  %v4945_v57 = vld [vmem:[#allocation14 + $0x358] ss:$20 sps:$4 sm:$0xff]   ;;  %v4946_v58 = vld [vmem:[#allocation14 + $0x240] ss:$20 sps:$4 sm:$0xff]  }
 0x4b6   : > { %3320 = vmatprep.mubr.bf16.mxu0 %v5272_v5  ;;  %3449 = vmatprep.mubr.bf16.mxu1 %v5272_v5  ;;  %v4947_v59 = vld [vmem:[#allocation14 + $0x4c0] ss:$20 sps:$4 sm:$0xff]   ;;  %v4952_v5 = vld [vmem:[#allocation14 + $0x128] ss:$20 sps:$4 sm:$0xff]  }
 0x4b8   : > { %3291 = vmatpush1.bf16.msra.mxu0 %v4880_v60  ;;  %3420 = vmatpush1.bf16.msra.mxu1 %v4883_v61  ;;  %v4948_v60 = vld [vmem:[#allocation14 + $0x100] ss:$20 sps:$4 sm:$0xff]  }
 0x4b9   : > { %3292 = vmatprep.subr.bf16.mxu0 %v4888_v62  ;;  %3421 = vmatprep.subr.bf16.mxu1 %v4891_v3  ;;  %v4949_v61 = vld [vmem:[#allocation14 + $0x380] ss:$20 sps:$4 sm:$0xff]   ;;  %v4950_v62 = vld [vmem:[#allocation14 + $0x268] ss:$20 sps:$4 sm:$0xff]  }
 0x4ba   : > { %v4951_v3 = vld [vmem:[#allocation14 + $0x4e8] ss:$20 sps:$4 sm:$0xff]  }
 0x4bc   : > { %3293 = vmatpush1.bf16.msra.mxu0 %v4886_v6  ;;  %3422 = vmatpush1.bf16.msra.mxu1 %v4889_v7  ;;  %v4953_v6 = vld [vmem:[#allocation14 + $0x3a8] ss:$20 sps:$4 sm:$0xff]   ;;  %v4954_v7 = vld [vmem:[#allocation14 + $0x510] ss:$20 sps:$4 sm:$0xff]  }
 0x4bd   : > { %3294 = vmatprep.subr.bf16.mxu0 %v4894_v8  ;;  %3423 = vmatprep.subr.bf16.mxu1 %v4897_v9  ;;  %v4955_v8 = vld [vmem:[#allocation14 + $0x538] ss:$20 sps:$4 sm:$0xff]   ;;  %v4956_v9 = vld [vmem:[#allocation14 + $0x560] ss:$20 sps:$4 sm:$0xff]  }
 0x4c0   : > { %3295 = vmatpush1.bf16.msra.mxu0 %v4892_v43  ;;  %3424 = vmatpush1.bf16.msra.mxu1 %v4895_v10  ;;  %v4957_v43 = vld [vmem:[#allocation14 + $0x588] ss:$20 sps:$4 sm:$0xff]   ;;  %v4958_v10 = vld [vmem:[#allocation14 + $0x5b0] ss:$20 sps:$4 sm:$0xff]  }
 0x4c1   : > { %3296 = vmatprep.subr.bf16.mxu0 %v4900_v11  ;;  %3425 = vmatprep.subr.bf16.mxu1 %v4903_v12  ;;  %v4961_v11 = vld [vmem:[#allocation14 + $0x628] ss:$20 sps:$4 sm:$0xff]  }
 0x4c4   : > { %3297 = vmatpush1.bf16.msra.mxu0 %v4898_v13  ;;  %3426 = vmatpush1.bf16.msra.mxu1 %v4901_v14  ;;  %v5274_v13 = vmov -inf   ;;  %v2135_v14 = vld [vmem:[#allocation16] sm:$0x1f] }
 0x4c5   : > { %3298 = vmatprep.subr.bf16.mxu0 %v4906_v15  ;;  %3427 = vmatprep.subr.bf16.mxu1 %v4909_v16  ;;  %3626 = vst.msk [vmem:[#allocation2] sm:$0x1f] %vm5673_vm9, %v5274_v13  ;;  %v2140_v15 = vrot.slane %v2135_v14, %v5602_v2  ;;  %v2148_v16 = vrot.slane %v2135_v14, %v1302_v42 }
 0x4c6   : > { %v2152_v63 = vrot.slane %v2135_v14, %v1306_v44 }
 0x4c8   : > { %3299 = vmatpush1.bf16.msra.mxu0 %v4904_v18  ;;  %3428 = vmatpush1.bf16.msra.mxu1 %v4907_v19  ;;  %v2144_v19 = vrot.slane %v2135_v14, %v5605_v4 }
 0x4c9   : > { %3300 = vmatprep.subr.bf16.mxu0 %v4912_v22  ;;  %3429 = vmatprep.subr.bf16.mxu1 %v4915_v23 }
 0x4cc   : > { %3301 = vmatpush1.bf16.msra.mxu0 %v4910_v25  ;;  %3430 = vmatpush1.bf16.msra.mxu1 %v4913_v26 }
 0x4cd   : > { %3302 = vmatprep.subr.bf16.mxu0 %v4918_v28  ;;  %3431 = vmatprep.subr.bf16.mxu1 %v4921_v29 }
 0x4d0   : > { %3303 = vmatpush1.bf16.msra.mxu0 %v4916_v30  ;;  %3432 = vmatpush1.bf16.msra.mxu1 %v4919_v31 }
 0x4d1   : > { %4251 = vmatprep.subr.bf16.mxu0 %v4922_v32  ;;  %4273 = vmatprep.subr.bf16.mxu1 %v4923_v33 }
 0x4d3   : > { %3321 = vmatmul.mubr.bf16.vlgmr.msra.gmra.mrb[12].mxu0 %v5652_v17  ;;  %3450 = vmatmul.mubr.bf16.vlgmr.msra.gmra.mrb[12].mxu1 %v5652_v17 }
 0x4d4   : > { %4252 = vmatpush3.bf16.msra.mxu0 %v4924_v34  ;;  %3492 = vmatprep.mubr.bf16.mxu0 %v5638_v24  ;;  %v4937_v24 = vld [vmem:[#allocation14 + $0x308] ss:$20 sps:$4 sm:$0xff]  }
 0x4d5   : > { %4274 = vmatpush3.bf16.msra.mxu1 %v4925_v35  ;;  %3533 = vmatprep.mubr.bf16.mxu1 %v5640_v27  ;;  %v4939_v27 = vld [vmem:[#allocation14 + $0x470] ss:$20 sps:$4 sm:$0xff]  }
 0x4d6   : > { %4253 = vmatprep.subr.bf16.mxu0 %v4926_v36  ;;  %4275 = vmatprep.subr.bf16.mxu1 %v4927_v37 }
 0x4d8   : > { %4254 = vmatpush3.bf16.msra.mxu0 %v4928_v38 }
 0x4d9   : > { %4276 = vmatpush3.bf16.msra.mxu1 %v4929_v39  ;;  %4255 = vmatprep.subr.bf16.mxu0 %v4930_v40 }
 0x4da   : > { %4277 = vmatprep.subr.bf16.mxu1 %v4931_v41 }
 0x4dc   : > { %4256 = vmatpush3.bf16.msra.mxu0 %v4932_v45 }
 0x4dd   : > { %4278 = vmatpush3.bf16.msra.mxu1 %v4933_v46  ;;  %4257 = vmatprep.subr.bf16.mxu0 %v4934_v47  ;;  %v5275_v47 = vmov 1966171168  }
 0x4de   : > { %4279 = vmatprep.subr.bf16.mxu1 %v4935_v48  ;;  %v3636_v48 = vunpack.c.l.s4 %v5275_v47 }
 0x4e0   : > { %4258 = vmatpush3.bf16.msra.mxu0 %v4936_v50 }
 0x4e1   : > { %4280 = vmatpush3.bf16.msra.mxu1 %v4937_v24  ;;  %4259 = vmatprep.subr.bf16.mxu0 %v4938_v51 }
 0x4e2   : > { %4281 = vmatprep.subr.bf16.mxu1 %v4939_v27 }
 0x4e4   : > { %4260 = vmatpush3.bf16.msra.mxu0 %v4940_v52 }
 0x4e5   : > { %4282 = vmatpush3.bf16.msra.mxu1 %v4941_v53  ;;  %4261 = vmatprep.subr.bf16.mxu0 %v4942_v54 }
 0x4e6   : > { %4283 = vmatprep.subr.bf16.mxu1 %v4943_v55 }
 0x4e8   : > { %4262 = vmatpush3.bf16.msra.mxu0 %v4944_v56  ;;  %v3637_v56 = vunpack.c.0.s8 %v3636_v48 }
 0x4e9   : > { %4284 = vmatpush3.bf16.msra.mxu1 %v4945_v57  ;;  %4263 = vmatprep.subr.bf16.mxu0 %v4946_v58 }
 0x4ea   : > { %4285 = vmatprep.subr.bf16.mxu1 %v4947_v59 }
 0x4ec   : > { %4264 = vmatpush3.bf16.msra.mxu0 %v4948_v60 }
 0x4ed   : > { %4286 = vmatpush3.bf16.msra.mxu1 %v4949_v61  ;;  %4265 = vmatprep.subr.bf16.mxu0 %v4950_v62 }
 0x4ee   : > { %4287 = vmatprep.subr.bf16.mxu1 %v4951_v3 }
 0x4f0   : > { %4266 = vmatpush3.bf16.msra.mxu0 %v4952_v5 }
 0x4f1   : > { %4288 = vmatpush3.bf16.msra.mxu1 %v4953_v6  ;;  %4304 = vmatprep.subr.bf16.mxu0 %v5271_v0  ;;  %v3640_v6 = vsub.s32 %v3637_v56, %v5596_v1 }
 0x4f3   : > { %3493 = vmatmul.mubr.bf16.vlgmr.msra.gmra.mrb[16].mxu0 %v5634_v20  ;;  %v4959_v20 = vld [vmem:[#allocation14 + $0x5d8] ss:$20 sps:$4 sm:$0xff]  }
 0x4f4   : > { %3534 = vmatmul.mubr.bf16.vlgmr.msra.gmra.mrb[16].mxu1 %v5636_v21  ;;  %4305 = vmatpush3.bf16.msra.mxu0 %v4954_v7  ;;  %v4960_v21 = vld [vmem:[#allocation14 + $0x600] ss:$20 sps:$4 sm:$0xff]  }
 0x4f5   : > { %4306 = vmatprep.subr.bf16.mxu0 %v5271_v0  ;;  %4320 = vmatprep.mubr.msk.bf16.mxu0 %vm5273_vm8, %v5271_v0 }
 0x4f8   : > { %4307 = vmatpush3.bf16.msra.mxu0 %v4955_v8 }
 0x4f9   : > { %4308 = vmatprep.subr.bf16.mxu0 %v5271_v0 }
 0x4fc   : > { %4309 = vmatpush3.bf16.msra.mxu0 %v4956_v9 }
 0x4fd   : > { %4310 = vmatprep.subr.bf16.mxu0 %v5271_v0 }
 0x500   : > { %4311 = vmatpush3.bf16.msra.mxu0 %v4957_v43 }
 0x501   : > { %4312 = vmatprep.subr.bf16.mxu0 %v5271_v0 }
 0x504   : > { %4313 = vmatpush3.bf16.msra.mxu0 %v4958_v10 }
 0x505   : > { %4314 = vmatprep.subr.bf16.mxu0 %v5271_v0 }
 0x508   : > { %4315 = vmatpush3.bf16.msra.mxu0 %v4959_v20 }
 0x509   : > { %4316 = vmatprep.subr.bf16.mxu0 %v5271_v0 }
 0x50c   : > { %4317 = vmatpush3.bf16.msra.mxu0 %v4960_v21 }
 0x50d   : > { %4318 = vmatprep.subr.bf16.mxu0 %v5271_v0 }
 0x510   : > { %4319 = vmatpush3.bf16.msra.mxu0 %v4961_v11  ;;  %v2156_v11 = vrot.slane %v2135_v14, %v1310_v49 }
 0x513   : > { %4321 = vmatmul.mubr.bf16.vlgmr.msra.gmra.mrb[20].mxu0 %v5652_v17 }
 0x5a6   : > { %v3322_v18 = vpop.f32.mrb[12].mxu0  ;;  %v3451_v0 = vpop.f32.mrb[12].mxu1 }
 0x5a7   : > { %v3324_v17 = vpop.f32.mrb[13].mxu0  ;;  %v3453_v22 = vpop.f32.mrb[13].mxu1  ;;  %v4324_v26 = vadd.f32 %v3322_v18, %v2140_v15  ;;  %v4328_v28 = vadd.f32 %v3451_v0, %v2148_v16 }
 0x5a8   : > { %v3326_v23 = vpop.f32.mrb[14].mxu0  ;;  %v3455_v25 = vpop.f32.mrb[14].mxu1  ;;  %v4325_v32 = vadd.f32 %v3324_v17, %v2144_v19  ;;  %v4329_v33 = vadd.f32 %v3453_v22, %v2152_v63 }
 0x5a9   : > { %v4326_v29 = vadd.f32 %v3326_v23, %v2140_v15  ;;  %v4330_v30 = vadd.f32 %v3455_v25, %v2148_v16  ;;  %v3328_v31 = vpop.f32.mrb[15].mxu0  ;;  %v3457_v2 = vpop.f32.mrb[15].mxu1 }
 0x5aa   : > { %v4327_v42 = vadd.f32 %v3328_v31, %v2144_v19  ;;  %v4331_v34 = vadd.f32 %v3457_v2, %v2152_v63 }
 0x5ab   : > { %v3583_v35 = vmax.f32 %v4324_v26, %v4326_v29  ;;  %v3597_v36 = vmax.f32 %v4328_v28, %v4330_v30 }
 0x5ac   : > { %v3590_v4 = vmax.f32 %v4325_v32, %v4327_v42  ;;  %v3604_v37 = vmax.f32 %v4329_v33, %v4331_v34 }
 0x5ad   : > { %v3584_v38 = vrot.slane %v3583_v35, 4  ;;  %v3598_v44 = vrot.slane %v3597_v36, 4 }
 0x5ae   : > { %v3591_v39 = vrot.slane %v3590_v4, 4  ;;  %v3605_v40 = vrot.slane %v3604_v37, 4 }
 0x5af   : > { %v3585_v41 = vmax.f32 %v3583_v35, %v3584_v38  ;;  %v3599_v45 = vmax.f32 %v3597_v36, %v3598_v44 }
 0x5b0   : > { %v3592_v46 = vmax.f32 %v3590_v4, %v3591_v39  ;;  %v3606_v50 = vmax.f32 %v3604_v37, %v3605_v40  ;;  %v3627_v40 = vld [vmem:[#allocation2] sm:$0x1f] }
 0x5b1   : > { %v3586_v24 = vrot.slane %v3585_v41, 2  ;;  %v3600_v51 = vrot.slane %v3599_v45, 2 }
 0x5b2   : > { %v3593_v27 = vrot.slane %v3592_v46, 2  ;;  %v3607_v52 = vrot.slane %v3606_v50, 2 }
 0x5b3   : > { %v3587_v53 = vmax.f32 %v3585_v41, %v3586_v24  ;;  %v3601_v54 = vmax.f32 %v3599_v45, %v3600_v51 }
 0x5b4   : > { %v3594_v55 = vmax.f32 %v3592_v46, %v3593_v27  ;;  %v3608_v57 = vmax.f32 %v3606_v50, %v3607_v52 }
 0x5b5   : > { %v3588_v58 = vrot.slane %v3587_v53, 1  ;;  %v3602_v59 = vrot.slane %v3601_v54, 1 }
 0x5b6   : > { %v3595_v60 = vrot.slane %v3594_v55, 1  ;;  %v3609_v61 = vrot.slane %v3608_v57, 1 }
 0x5b7   : > { %v3589_v62 = vmax.f32 %v3587_v53, %v3588_v58  ;;  %v3603_v3 = vmax.f32 %v3601_v54, %v3602_v59 }
 0x5b8   : > { %v3596_v5 = vmax.f32 %v3594_v55, %v3595_v60  ;;  %v3610_v7 = vmax.f32 %v3608_v57, %v3609_v61 }
 0x5ba   : > { %v3633_v8 = vcombine.low %v3589_v62, %v3596_v5  ;;  %v3634_v9 = vcombine.low %v3603_v3, %v3610_v7 }
 0x5bc   : > { %v3641_v43 = vrot.slane %v3633_v8, %v3640_v6  ;;  %v3648_v10 = vrot.slane %v3634_v9, %v3640_v6 }
 0x5be   : > { %v3656_v20 = vcombine.low %v3641_v43, %v3648_v10 }
 0x5c0   : > { %v3663_v44 = vrot.slane %v3656_v20, %v3640_v6 }
 0x5c6   : > { %v4267_v21 = vpop.f32.mrb[16].mxu0 }
 0x5c7   : > { %v4289_v13 = vpop.f32.mrb[16].mxu1  ;;  %v4268_v15 = vpop.f32.mrb[17].mxu0 }
 0x5c8   : > { %v4269_v16 = vadd.f32 %v4268_v15, %v4267_v21  ;;  %v4290_v18 = vpop.f32.mrb[17].mxu1  ;;  %v4270_v0 = vpop.f32.mrb[18].mxu0 }
 0x5c9   : > { %v4291_v19 = vadd.f32 %v4290_v18, %v4289_v13  ;;  %v4292_v63 = vpop.f32.mrb[18].mxu1  ;;  %v4271_v17 = vpop.f32.mrb[19].mxu0 }
 0x5ca   : > { %v3495_v22 = vadd.f32 %v4269_v16, %v2156_v11  ;;  %v4272_v23 = vadd.f32 %v4271_v17, %v4270_v0  ;;  %v4293_v25 = vpop.f32.mrb[19].mxu1 }
 0x5cb   : > { %v4294_v26 = vadd.f32 %v4293_v25, %v4292_v63 }
 0x5cc   : > { %v3498_v28 = vadd.f32 %v4272_v23, %v2156_v11  ;;  %v3536_v29 = vadd.f32 %v4291_v19, %v3495_v22 }
 0x5ce   : > { %v3539_v30 = vadd.f32 %v4294_v26, %v3498_v28 }
 0x5e6   : > { %v3576_v31 = vpop.f32.mrb[20].mxu0 }
 0x5e7   : > { %v3577_v2 = vadd.f32 %v3576_v31, %v3536_v29  ;;  %v4322_v32 = vpop.f32.mrb[21].mxu0 }
 0x5e8   : > { %v3579_v1 = vpop.f32.mrb[22].mxu0 }
 0x5e9   : > { %v3580_v49 = vadd.f32 %v3579_v1, %v3539_v30  ;;  %v4323_v14 = vpop.f32.mrb[23].mxu0 }
 0x5eb   : > { %v3611_v33 = vmax.f32 %v3577_v2, %v3580_v49 }
 0x5ed   : > { %v3612_v42 = vrot.slane %v3611_v33, 4 }
 0x5ef   : > { %v3613_v34 = vmax.f32 %v3611_v33, %v3612_v42 }
 0x5f1   : > { %v3614_v35 = vrot.slane %v3613_v34, 2 }
 0x5f3   : > { %v3615_v36 = vmax.f32 %v3613_v34, %v3614_v35 }
 0x5f5   : > { %v3616_v4 = vrot.slane %v3615_v36, 1 }
 0x5f7   : > { %v3617_v37 = vmax.f32 %v3615_v36, %v3616_v4 }
 0x5f9   : > { %v3655_v38 = vrot.slane %v3617_v37, %v3640_v6 }
 0x5fb   : > { %v3670_v39 = vrot.slane %v3655_v38, %v3640_v6 }
 0x5fd   : > { %v3671_v41 = vcombine.low %v3663_v44, %v3670_v39 }
 0x5ff   : > { %v3673_v45 = vmax.f32 %v3627_v40, %v3671_v41 }
 0x601   : > { %3678 = vst.msk [vmem:[#allocation2] sm:$0x1f] %vm5673_vm9, %v3673_v45 }
 0x608   : > { %v3682_v46 = vld [vmem:[#allocation2] sm:$0x1f] }
 0x609   : > { %3683 = vst.msk [vmem:[%s550_s25] sm:$0x1f] %vm5673_vm9, %v3682_v46 }
 0x60a PF: > { %s5734_s26 = sld [smem:[#allocation22_spill]]  ;;  %s5735_s17 = smov %s5252_s18 }
 0x60b   : > { %s5736_s18 = smov %s5739_s19 }
 0x610   : > { %s26_s11 = sadd.s32 1, %s5734_s26  }
 0x611   : > { %p23_p7 = scmp.ge.s32.totalorder %s26_s11, 4   ;;  %s5737_s19 = smov %s26_s11 }
 0x613   :  { %25 = sbr.rel (!%p23_p7) target bundleno = 9 (0x9), region = 142 }
 0x61a   :  { %3703 = vsyncpa [#allocation4], 1 }
 0x61b   :  { %3705 = vsyncpa [#allocation4 + $0x1], 1 }
 0x61c   :  { %3706 = vsyncpa [#allocation6], 1 }
 0x61d   :  { %3707 = vsyncpa [#allocation9], 1 }
 0x61e   :  { %3708 = vsyncpa [#allocation12], 1 }
 0x61f   :  { %3709 = vsyncpa [#allocation15], 1 }

// kernel: baseline_forward.4
= control target key start
LH: loop header
LB: loop body
LE: loop exit
PB: predicated region body
PF: predicated region fallthrough
CT: control target
= control target key end

     0   :  { %12 = vsyncpa [#allocation3], 0  ;;  %s7446_s0 = inlined_call_operand.vmem [shape: f32[2,640], index: 0, kind: input, shape index: {}]   ;;  %s7447_s1 = inlined_call_operand.hbm [shape: bf16[640,640], index: 1, kind: input, shape index: {}]   ;;  %s7448_s2 = inlined_call_operand.hbm [shape: f32[1,640], index: 2, kind: input, shape index: {}]   ;;  %s7449_s3 = inlined_call_operand.hbm [shape: bf16[640,640], index: 3, kind: input, shape index: {}]   ;;  %s7450_s4 = inlined_call_operand.hbm [shape: f32[1,640], index: 4, kind: input, shape index: {}]   ;;  %s7451_s5 = inlined_call_operand.hbm [shape: bf16[640,640], index: 5, kind: input, shape index: {}]   ;;  %s7452_s6 = inlined_call_operand.hbm [shape: f32[1,640], index: 6, kind: input, shape index: {}]   ;;  %s7453_s7 = inlined_call_operand.vmem [shape: f32[2,640], index: 7, kind: output, shape index: {}]  }
   0x1   :  { %13 = vsyncpa [#allocation5], 0 }
   0x2   :  { %14 = vsyncpa [#allocation8], 0 }
   0x3   :  { %15 = vsyncpa [#allocation11], 0  ;;  %s7115_s24 = smov [#allocation4]   ;;  %s7116_s26 = smov [#allocation7]  }
   0x4   :  { %s36_s25 = sshll.u32 %s7115_s24, 4  ;;  %s58_s27 = sshll.u32 %s7116_s26, 4  ;;  %s37_s25 = int_to_ptr.vmem [resolvable:$true] %s36_s25  ;;  %s59_s27 = int_to_ptr.vmem [resolvable:$true] %s58_s27 }
   0x5   :  { %s6975_s30 = scalar_lea.hbm %s7448_s2, 80 }
   0x6   :  { %p6976_p0 = scmp.ne.s32.totalorder %s7448_s2, %s6975_s30  ;;  %p6979_p1 = scmp.lt.u32.totalorder %s6975_s30, %s7448_s2 }
   0x8   :  { %p6981_p2 = pnand %p6979_p1, %p6976_p0 }
   0xa   :  { %6984 = shalt.err (!%p6981_p2)
}
   0xb   :  { %s6985_s12 = scalar_lea.vmem %s37_s25, 80  ;;  %s6989_s13 = scalar_lea.vmem %s37_s25, 96 }
   0xc   :  { %p6986_p3 = scmp.ne.s32.totalorder %s37_s25, %s6985_s12  ;;  %p6990_p4 = scmp.lt.s32.totalorder %s37_s25, %s37_s25 }
   0xd   :  { %p6991_p5 = scmp.lt.s32.totalorder %s6989_s13, %s6985_s12 }
   0xf   :  { %p6992_p6 = por %p6991_p5, %p6990_p4 }
  0x11   :  { %p6993_p7 = pnand %p6992_p6, %p6986_p3 }
  0x13   :  { %6996 = shalt.err (!%p6993_p7)
}
  0x14   :  { %39 = dma.hbm_to_vmem [thread:$0]  %s7448_s2, 80, %s37_s25, [#allocation5]  }
  0x15   :  { %s6997_s18 = scalar_lea.hbm %s7450_s4, 80 }
  0x16   :  { %p6998_p8 = scmp.ne.s32.totalorder %s7450_s4, %s6997_s18  ;;  %p7001_p9 = scmp.lt.u32.totalorder %s6997_s18, %s7450_s4 }
  0x18   :  { %p7003_p10 = pnand %p7001_p9, %p6998_p8 }
  0x1a   :  { %7006 = shalt.err (!%p7003_p10)
}
  0x1b   :  { %s7007_s23 = scalar_lea.vmem %s59_s27, 80  ;;  %s7011_s24 = scalar_lea.vmem %s59_s27, 96 }
  0x1c   :  { %p7008_p11 = scmp.ne.s32.totalorder %s59_s27, %s7007_s23  ;;  %p7012_p12 = scmp.lt.s32.totalorder %s59_s27, %s59_s27 }
  0x1d   :  { %p7013_p13 = scmp.lt.s32.totalorder %s7011_s24, %s7007_s23 }
  0x1f   :  { %p7014_p0 = por %p7013_p13, %p7012_p12 }
  0x21   :  { %p7015_p1 = pnand %p7014_p0, %p7008_p11 }
  0x23   :  { %7018 = shalt.err (!%p7015_p1)
}
  0x24   :  { %61 = dma.hbm_to_vmem [thread:$0]  %s7450_s4, 80, %s59_s27, [#allocation8]  }
  0x25   :  { %s7117_s26 = smov [#allocation2]   ;;  %s7019_s8 = scalar_lea.hbm %s7447_s1, 25600 }
  0x26   :  { %s23_s28 = sshll.u32 %s7117_s26, 4  ;;  %p7020_p2 = scmp.ne.s32.totalorder %s7447_s1, %s7019_s8  ;;  %s24_s28 = int_to_ptr.vmem [resolvable:$true] %s23_s28 }
  0x27   :  { %p7023_p3 = scmp.lt.u32.totalorder %s7019_s8, %s7447_s1 }
  0x29   :  { %p7025_p4 = pnand %p7023_p3, %p7020_p2 }
  0x2b   :  { %7028 = shalt.err (!%p7025_p4)
}
  0x2c   :  { %s7029_s13 = scalar_lea.vmem %s24_s28, 25600  ;;  %p7034_p6 = scmp.lt.s32.totalorder %s24_s28, %s24_s28 }
  0x2d   :  { %p7030_p5 = scmp.ne.s32.totalorder %s24_s28, %s7029_s13  ;;  %p7035_p7 = scmp.lt.s32.totalorder %s7029_s13, %s7029_s13 }
  0x2f   :  { %p7036_p8 = por %p7035_p7, %p7034_p6 }
  0x31   :  { %p7037_p9 = pnand %p7036_p8, %p7030_p5 }
  0x33   :  { %7040 = shalt.err (!%p7037_p9)
}
  0x34   :  { %s7118_s4 = smov 320   ;;  %s7119_s27 = smov 20  }
  0x35   :  { %29 = dma.hbm_to_vmem [thread:$0]  %s7447_s1, 25600, %s24_s28, [#allocation3], %s7118_s4, %s7118_s4, %s7119_s27  }
  0x36   :  { %s7120_s16 = smov [#allocation6]   ;;  %s7121_s18 = smov [#allocation9]  }
  0x37   :  { %s45_s17 = sshll.u32 %s7120_s16, 4  ;;  %s67_s19 = sshll.u32 %s7121_s18, 4  ;;  %s46_s17 = int_to_ptr.vmem [resolvable:$true] %s45_s17  ;;  %s68_s19 = int_to_ptr.vmem [resolvable:$true] %s67_s19 }
  0x38   :  { %s7041_s22 = scalar_lea.hbm %s7449_s3, 25600 }
  0x39   :  { %p7042_p10 = scmp.ne.s32.totalorder %s7449_s3, %s7041_s22  ;;  %p7045_p11 = scmp.lt.u32.totalorder %s7041_s22, %s7449_s3 }
  0x3b   :  { %p7047_p12 = pnand %p7045_p11, %p7042_p10 }
  0x3d   :  { %7050 = shalt.err (!%p7047_p12)
}
  0x3e   :  { %s7051_s1 = scalar_lea.vmem %s46_s17, 25600  ;;  %p7056_p0 = scmp.lt.s32.totalorder %s46_s17, %s46_s17 }
  0x3f   :  { %p7052_p13 = scmp.ne.s32.totalorder %s46_s17, %s7051_s1  ;;  %p7057_p1 = scmp.lt.s32.totalorder %s7051_s1, %s7051_s1 }
  0x41   :  { %p7058_p2 = por %p7057_p1, %p7056_p0 }
  0x43   :  { %p7059_p3 = pnand %p7058_p2, %p7052_p13 }
  0x45   :  { %7062 = shalt.err (!%p7059_p3)
}
  0x46   :  { %51 = dma.hbm_to_vmem [thread:$0]  %s7449_s3, 25600, %s46_s17, [#allocation5], %s7118_s4, %s7118_s4, %s7119_s27  }
  0x47   :  { %s7063_s8 = scalar_lea.hbm %s7451_s5, 25600 }
  0x48   :  { %p7064_p4 = scmp.ne.s32.totalorder %s7451_s5, %s7063_s8  ;;  %p7067_p5 = scmp.lt.u32.totalorder %s7063_s8, %s7451_s5 }
  0x4a   :  { %p7069_p6 = pnand %p7067_p5, %p7064_p4 }
  0x4c   :  { %7072 = shalt.err (!%p7069_p6)
}
  0x4d   :  { %s7073_s13 = scalar_lea.vmem %s68_s19, 25600  ;;  %p7078_p8 = scmp.lt.s32.totalorder %s68_s19, %s68_s19 }
  0x4e   :  { %p7074_p7 = scmp.ne.s32.totalorder %s68_s19, %s7073_s13  ;;  %p7079_p9 = scmp.lt.s32.totalorder %s7073_s13, %s7073_s13 }
  0x50   :  { %p7080_p10 = por %p7079_p9, %p7078_p8 }
  0x52   :  { %p7081_p11 = pnand %p7080_p10, %p7074_p7 }
  0x54   :  { %7084 = shalt.err (!%p7081_p11)
}
  0x55   :  { %73 = dma.hbm_to_vmem [thread:$0]  %s7451_s5, 25600, %s68_s19, [#allocation8], %s7118_s4, %s7118_s4, %s7119_s27  }
  0x56   :  { %s7122_s15 = smov [#allocation10]   ;;  %s7085_s20 = scalar_lea.hbm %s7452_s6, 80 }
  0x57   :  { %s80_s16 = sshll.u32 %s7122_s15, 4  ;;  %p7086_p12 = scmp.ne.s32.totalorder %s7452_s6, %s7085_s20  ;;  %s81_s16 = int_to_ptr.vmem [resolvable:$true] %s80_s16 }
  0x58   :  { %p7089_p13 = scmp.lt.u32.totalorder %s7085_s20, %s7452_s6 }
  0x5a   :  { %p7091_p0 = pnand %p7089_p13, %p7086_p12 }
  0x5c   :  { %7094 = shalt.err (!%p7091_p0)
}
  0x5d   :  { %s7095_s2 = scalar_lea.vmem %s81_s16, 80  ;;  %s7099_s5 = scalar_lea.vmem %s81_s16, 96 }
  0x5e   :  { %p7096_p1 = scmp.ne.s32.totalorder %s81_s16, %s7095_s2  ;;  %p7100_p2 = scmp.lt.s32.totalorder %s81_s16, %s81_s16 }
  0x5f   :  { %p7101_p3 = scmp.lt.s32.totalorder %s7099_s5, %s7095_s2 }
  0x61   :  { %p7102_p4 = por %p7101_p3, %p7100_p2 }
  0x63   :  { %p7103_p5 = pnand %p7102_p4, %p7096_p1 }
  0x65   :  { %7106 = shalt.err (!%p7103_p5)
}
  0x66   :  { %83 = dma.hbm_to_vmem [thread:$0]  %s7452_s6, 80, %s81_s16, [#allocation11]  }
  0x67   :  { %7107 = dma.done.wait [#allocation3], 25600  }
  0x68   :  { %7108 = vsyncadd [#allocation3], 4294941696 }
  0x69   :  { %7109 = dma.done.wait [#allocation5], 25680  }
  0x6a   :  { %7110 = vsyncadd [#allocation5], 4294941616 }
  0x6b   :  { %7111 = dma.done.wait [#allocation8], 25680  }
  0x6c   :  { %7112 = vsyncadd [#allocation8], 4294941616 }
  0x6d   :  { %7113 = dma.done.wait [#allocation11], 80  }
  0x6e   :  { %7114 = vsyncadd [#allocation11], 4294967216  ;;  %v6134_v0 = vld [vmem:[#allocation2 + $0x4] ss:$20 sps:$4 sm:$0xff]   ;;  %v6136_v1 = vld [vmem:[#allocation2 + $0xc] ss:$20 sps:$4 sm:$0xff]   ;;  %v111_v38 = vlaneseq }
  0x6f   :  { %1448 = vmatprep.subr.bf16.mxu0 %v6134_v0  ;;  %v6138_v2 = vld [vmem:[#allocation2] ss:$20 sps:$4 sm:$0xff]   ;;  %v6139_v3 = vld [vmem:[#allocation2 + $0x8] ss:$20 sps:$4 sm:$0xff]   ;;  %1571 = vmatprep.subr.bf16.mxu1 %v6136_v1  ;;  %v6145_v7 = vld [vmem:[#allocation2 + $0x30] ss:$20 sps:$4 sm:$0xff]  }
  0x70   :  { %v6140_v4 = vld [vmem:[#allocation2 + $0x2c] ss:$20 sps:$4 sm:$0xff]   ;;  %1449 = vmatpush1.bf16.msra.mxu0 %v6138_v2  ;;  %1572 = vmatpush1.bf16.msra.mxu1 %v6139_v3  ;;  %v6142_v5 = vld [vmem:[#allocation2 + $0x34] ss:$20 sps:$4 sm:$0xff]   ;;  %v6148_v9 = vld [vmem:[#allocation2 + $0x5c] ss:$20 sps:$4 sm:$0xff]  }
  0x71   :  { %v6144_v6 = vld [vmem:[#allocation2 + $0x28] ss:$20 sps:$4 sm:$0xff]   ;;  %1450 = vmatprep.subr.bf16.mxu0 %v6140_v4  ;;  %1573 = vmatprep.subr.bf16.mxu1 %v6142_v5  ;;  %v6150_v10 = vld [vmem:[#allocation2 + $0x50] ss:$20 sps:$4 sm:$0xff]   ;;  %v6151_v11 = vld [vmem:[#allocation2 + $0x58] ss:$20 sps:$4 sm:$0xff]  }
  0x72   :  { %v6146_v8 = vld [vmem:[#allocation2 + $0x54] ss:$20 sps:$4 sm:$0xff]   ;;  %v6152_v12 = vld [vmem:[#allocation2 + $0x7c] ss:$20 sps:$4 sm:$0xff]   ;;  %v6154_v13 = vld [vmem:[#allocation2 + $0x84] ss:$20 sps:$4 sm:$0xff]  }
  0x73   :  { %v6156_v14 = vld [vmem:[#allocation2 + $0x78] ss:$20 sps:$4 sm:$0xff]   ;;  %v6157_v15 = vld [vmem:[#allocation2 + $0x80] ss:$20 sps:$4 sm:$0xff]   ;;  %v6163_v19 = vld [vmem:[#allocation2 + $0xa8] ss:$20 sps:$4 sm:$0xff]  }
  0x74   :  { %1451 = vmatpush1.bf16.msra.mxu0 %v6144_v6  ;;  %1574 = vmatpush1.bf16.msra.mxu1 %v6145_v7  ;;  %v6158_v16 = vld [vmem:[#allocation2 + $0xa4] ss:$20 sps:$4 sm:$0xff]   ;;  %v6160_v17 = vld [vmem:[#allocation2 + $0xac] ss:$20 sps:$4 sm:$0xff]   ;;  %v6166_v21 = vld [vmem:[#allocation2 + $0xd4] ss:$20 sps:$4 sm:$0xff]  }
  0x75   :  { %1452 = vmatprep.subr.bf16.mxu0 %v6146_v8  ;;  %1575 = vmatprep.subr.bf16.mxu1 %v6148_v9  ;;  %v6162_v18 = vld [vmem:[#allocation2 + $0xa0] ss:$20 sps:$4 sm:$0xff]   ;;  %v6168_v22 = vld [vmem:[#allocation2 + $0xc8] ss:$20 sps:$4 sm:$0xff]   ;;  %v6169_v23 = vld [vmem:[#allocation2 + $0xd0] ss:$20 sps:$4 sm:$0xff]  }
  0x76   :  { %v6164_v20 = vld [vmem:[#allocation2 + $0xcc] ss:$20 sps:$4 sm:$0xff]   ;;  %v6170_v24 = vld [vmem:[#allocation2 + $0xf4] ss:$20 sps:$4 sm:$0xff]   ;;  %v6172_v25 = vld [vmem:[#allocation2 + $0xfc] ss:$20 sps:$4 sm:$0xff]  }
  0x77   :  { %v6174_v26 = vld [vmem:[#allocation2 + $0xf0] ss:$20 sps:$4 sm:$0xff]   ;;  %v6175_v27 = vld [vmem:[#allocation2 + $0xf8] ss:$20 sps:$4 sm:$0xff]   ;;  %v6181_v31 = vld [vmem:[#allocation2 + $0x120] ss:$20 sps:$4 sm:$0xff]  }
  0x78   :  { %1453 = vmatpush1.bf16.msra.mxu0 %v6150_v10  ;;  %1576 = vmatpush1.bf16.msra.mxu1 %v6151_v11  ;;  %v6176_v28 = vld [vmem:[#allocation2 + $0x11c] ss:$20 sps:$4 sm:$0xff]   ;;  %v6178_v29 = vld [vmem:[#allocation2 + $0x124] ss:$20 sps:$4 sm:$0xff]   ;;  %v6184_v33 = vld [vmem:[#allocation2 + $0x14c] ss:$20 sps:$4 sm:$0xff]  }
  0x79   :  { %1454 = vmatprep.subr.bf16.mxu0 %v6152_v12  ;;  %1577 = vmatprep.subr.bf16.mxu1 %v6154_v13  ;;  %v6180_v30 = vld [vmem:[#allocation2 + $0x118] ss:$20 sps:$4 sm:$0xff]   ;;  %v6186_v34 = vld [vmem:[#allocation2 + $0x140] ss:$20 sps:$4 sm:$0xff]   ;;  %v6187_v35 = vld [vmem:[#allocation2 + $0x148] ss:$20 sps:$4 sm:$0xff]  }
  0x7a   :  { %v6182_v32 = vld [vmem:[#allocation2 + $0x144] ss:$20 sps:$4 sm:$0xff]   ;;  %v7123_v36 = vmov 1983009808   ;;  %v6188_v39 = vld [vmem:[#allocation2 + $0x16c] ss:$20 sps:$4 sm:$0xff]  }
  0x7b   :  { %v109_v37 = vunpack.c.l.s4 %v7123_v36  ;;  %v6190_v40 = vld [vmem:[#allocation2 + $0x174] ss:$20 sps:$4 sm:$0xff]   ;;  %v7248_v43 = vshrl.u32 %v111_v38, 7  ;;  %v6193_v44 = vld [vmem:[#allocation2 + $0x170] ss:$20 sps:$4 sm:$0xff]   ;;  %vm7126_vm0 = vmmov 0  }
  0x7c   :  { %1455 = vmatpush1.bf16.msra.mxu0 %v6156_v14  ;;  %1578 = vmatpush1.bf16.msra.mxu1 %v6157_v15  ;;  %v6192_v41 = vld [vmem:[#allocation2 + $0x168] ss:$20 sps:$4 sm:$0xff]   ;;  %v6198_v47 = vld [vmem:[#allocation2 + $0x190] ss:$20 sps:$4 sm:$0xff]   ;;  %v6199_v48 = vld [vmem:[#allocation2 + $0x198] ss:$20 sps:$4 sm:$0xff]  }
  0x7d   :  { %1456 = vmatprep.subr.bf16.mxu0 %v6158_v16  ;;  %1579 = vmatprep.subr.bf16.mxu1 %v6160_v17  ;;  %v110_v42 = vunpack.c.0.s8 %v109_v37  ;;  %v6194_v45 = vld [vmem:[#allocation2 + $0x194] ss:$20 sps:$4 sm:$0xff]   ;;  %v6196_v46 = vld [vmem:[#allocation2 + $0x19c] ss:$20 sps:$4 sm:$0xff]   ;;  %v6202_v51 = vld [vmem:[#allocation2 + $0x1c4] ss:$20 sps:$4 sm:$0xff]  }
  0x7e   :  { %v6200_v50 = vld [vmem:[#allocation2 + $0x1bc] ss:$20 sps:$4 sm:$0xff]   ;;  %v103_v52 = vld [vmem:[%s7446_s0] sm:$0xff]  ;;  %v6204_v53 = vld [vmem:[#allocation2 + $0x1b8] ss:$20 sps:$4 sm:$0xff]  }
  0x7f   :  { %v7251_v49 = vsub.s32 %v110_v42, %v7248_v43  ;;  %v6205_v55 = vld [vmem:[#allocation2 + $0x1c0] ss:$20 sps:$4 sm:$0xff]   ;;  %v6206_v56 = vld [vmem:[#allocation2 + $0x1e4] ss:$20 sps:$4 sm:$0xff]   ;;  %v6211_v61 = vld [vmem:[#allocation2 + $0x1e8] ss:$20 sps:$4 sm:$0xff]   ;;  %v107_v4 = vcombine.high %v103_v52, %v103_v52 }
  0x80   :  { %1457 = vmatpush1.bf16.msra.mxu0 %v6162_v18  ;;  %1580 = vmatpush1.bf16.msra.mxu1 %v6163_v19  ;;  %v6208_v57 = vld [vmem:[#allocation2 + $0x1ec] ss:$20 sps:$4 sm:$0xff]   ;;  %v6214_v63 = vld [vmem:[#allocation2 + $0x214] ss:$20 sps:$4 sm:$0xff]   ;;  %v6217_v1 = vld [vmem:[#allocation2 + $0x210] ss:$20 sps:$4 sm:$0xff]  }
  0x81   :  { %1458 = vmatprep.subr.bf16.mxu0 %v6164_v20  ;;  %1581 = vmatprep.subr.bf16.mxu1 %v6166_v21  ;;  %v114_v54 = vrot.slane %v103_v52, %v7251_v49  ;;  %v6210_v59 = vld [vmem:[#allocation2 + $0x1e0] ss:$20 sps:$4 sm:$0xff]   ;;  %v6216_v0 = vld [vmem:[#allocation2 + $0x208] ss:$20 sps:$4 sm:$0xff]   ;;  %v6222_v5 = vld [vmem:[#allocation2 + $0x230] ss:$20 sps:$4 sm:$0xff]   ;;  %v7262_v9 = vrot.slane %v107_v4, %v7251_v49 }
  0x82   :  { %v6212_v62 = vld [vmem:[#allocation2 + $0x20c] ss:$20 sps:$4 sm:$0xff]   ;;  %v6218_v2 = vld [vmem:[#allocation2 + $0x234] ss:$20 sps:$4 sm:$0xff]   ;;  %v6220_v3 = vld [vmem:[#allocation2 + $0x23c] ss:$20 sps:$4 sm:$0xff]  }
  0x83   :  { %v122_v58 = vcombine.high %v114_v54, %v114_v54  ;;  %v6223_v6 = vld [vmem:[#allocation2 + $0x238] ss:$20 sps:$4 sm:$0xff]   ;;  %v6224_v7 = vld [vmem:[#allocation2 + $0x25c] ss:$20 sps:$4 sm:$0xff]   ;;  %v6229_v11 = vld [vmem:[#allocation2 + $0x260] ss:$20 sps:$4 sm:$0xff]   ;;  %v123_v14 = vcombine.high %v7262_v9, %v7262_v9  ;;  %v7266_v16 = vpack.c.bf16 %v114_v54, %v114_v54 }
  0x84   :  { %1459 = vmatpush1.bf16.msra.mxu0 %v6168_v22  ;;  %1582 = vmatpush1.bf16.msra.mxu1 %v6169_v23  ;;  %v6226_v8 = vld [vmem:[#allocation2 + $0x264] ss:$20 sps:$4 sm:$0xff]   ;;  %v6235_v13 = vld [vmem:[#allocation2 + $0x28c] ss:$20 sps:$4 sm:$0xff]   ;;  %v6233_v17 = vld [vmem:[#allocation2 + $0x288] ss:$20 sps:$4 sm:$0xff]  }
  0x85   :  { %1460 = vmatprep.subr.bf16.mxu0 %v6170_v24  ;;  %1583 = vmatprep.subr.bf16.mxu1 %v6172_v25  ;;  %v7257_v60 = vpack.c.bf16 %v122_v58, %v122_v58  ;;  %v6228_v10 = vld [vmem:[#allocation2 + $0x258] ss:$20 sps:$4 sm:$0xff]   ;;  %v6230_v15 = vld [vmem:[#allocation2 + $0x280] ss:$20 sps:$4 sm:$0xff]   ;;  %v7268_v20 = vpack.c.bf16 %v123_v14, %v123_v14  ;;  %v6236_v21 = vld [vmem:[#allocation2 + $0x2a8] ss:$20 sps:$4 sm:$0xff]  }
  0x86   :  { %v6232_v12 = vld [vmem:[#allocation2 + $0x284] ss:$20 sps:$4 sm:$0xff]   ;;  %v6238_v18 = vld [vmem:[#allocation2 + $0x2ac] ss:$20 sps:$4 sm:$0xff]   ;;  %v6241_v19 = vld [vmem:[#allocation2 + $0x2b4] ss:$20 sps:$4 sm:$0xff]  }
  0x87   :  { %1480 = vmatprep.mubr.bf16.mxu0 %v7257_v60  ;;  %1603 = vmatprep.mubr.bf16.mxu1 %v7257_v60  ;;  %v6239_v22 = vld [vmem:[#allocation2 + $0x2b0] ss:$20 sps:$4 sm:$0xff]   ;;  %v6244_v23 = vld [vmem:[#allocation2 + $0x2d4] ss:$20 sps:$4 sm:$0xff]   ;;  %v6269_v42 = vld [vmem:[#allocation2 + $0x378] ss:$20 sps:$4 sm:$0xff]  }
  0x88   :  { %1461 = vmatpush1.bf16.msra.mxu0 %v6174_v26  ;;  %1584 = vmatpush1.bf16.msra.mxu1 %v6175_v27  ;;  %v6247_v24 = vld [vmem:[#allocation2 + $0x2dc] ss:$20 sps:$4 sm:$0xff]   ;;  %v6245_v26 = vld [vmem:[#allocation2 + $0x2d8] ss:$20 sps:$4 sm:$0xff]   ;;  %v6265_v36 = vld [vmem:[#allocation2 + $0x354] ss:$20 sps:$4 sm:$0xff]  }
  0x89   :  { %1462 = vmatprep.subr.bf16.mxu0 %v6176_v28  ;;  %1585 = vmatprep.subr.bf16.mxu1 %v6178_v29  ;;  %v6242_v25 = vld [vmem:[#allocation2 + $0x2d0] ss:$20 sps:$4 sm:$0xff]   ;;  %v6248_v29 = vld [vmem:[#allocation2 + $0x2f8] ss:$20 sps:$4 sm:$0xff]   ;;  %v6260_v37 = vld [vmem:[#allocation2 + $0x348] ss:$20 sps:$4 sm:$0xff]  }
  0x8a   :  { %v6250_v27 = vld [vmem:[#allocation2 + $0x2fc] ss:$20 sps:$4 sm:$0xff]   ;;  %v6253_v28 = vld [vmem:[#allocation2 + $0x304] ss:$20 sps:$4 sm:$0xff]   ;;  %v6289_v54 = vld [vmem:[#allocation2 + $0x3f4] ss:$20 sps:$4 sm:$0xff]  }
  0x8b   :  { %v6263_v38 = vld [vmem:[#allocation2 + $0x350] ss:$20 sps:$4 sm:$0xff]   ;;  %v6281_v52 = vld [vmem:[#allocation2 + $0x3c8] ss:$20 sps:$4 sm:$0xff]   ;;  %v6302_v4 = vld [vmem:[#allocation2 + $0x460] ss:$20 sps:$4 sm:$0xff]  }
  0x8c   :  { %1463 = vmatpush1.bf16.msra.mxu0 %v6180_v30  ;;  %1586 = vmatpush1.bf16.msra.mxu1 %v6181_v31  ;;  %v6251_v30 = vld [vmem:[#allocation2 + $0x300] ss:$20 sps:$4 sm:$0xff]   ;;  %v6256_v31 = vld [vmem:[#allocation2 + $0x324] ss:$20 sps:$4 sm:$0xff]   ;;  %v6295_v58 = vld [vmem:[#allocation2 + $0x41c] ss:$20 sps:$4 sm:$0xff]  }
  0x8d   :  { %1464 = vmatprep.subr.bf16.mxu0 %v6182_v32  ;;  %1587 = vmatprep.subr.bf16.mxu1 %v6184_v33  ;;  %v6259_v32 = vld [vmem:[#allocation2 + $0x32c] ss:$20 sps:$4 sm:$0xff]  }
  0x8e   :  { %v6254_v33 = vld [vmem:[#allocation2 + $0x320] ss:$20 sps:$4 sm:$0xff]   ;;  %v6317_v14 = vld [vmem:[#allocation2 + $0x4b8] ss:$20 sps:$4 sm:$0xff]  }
  0x90   :  { %1465 = vmatpush1.bf16.msra.mxu0 %v6186_v34  ;;  %1588 = vmatpush1.bf16.msra.mxu1 %v6187_v35  ;;  %v6257_v34 = vld [vmem:[#allocation2 + $0x328] ss:$20 sps:$4 sm:$0xff]   ;;  %v6262_v35 = vld [vmem:[#allocation2 + $0x34c] ss:$20 sps:$4 sm:$0xff]  }
  0x91   :  { %1466 = vmatprep.subr.bf16.mxu0 %v6188_v39  ;;  %1589 = vmatprep.subr.bf16.mxu1 %v6190_v40  ;;  %v6268_v39 = vld [vmem:[#allocation2 + $0x374] ss:$20 sps:$4 sm:$0xff]   ;;  %v6271_v40 = vld [vmem:[#allocation2 + $0x37c] ss:$20 sps:$4 sm:$0xff]  }
  0x94   :  { %1467 = vmatpush1.bf16.msra.mxu0 %v6192_v41  ;;  %1590 = vmatpush1.bf16.msra.mxu1 %v6193_v44  ;;  %v6266_v41 = vld [vmem:[#allocation2 + $0x370] ss:$20 sps:$4 sm:$0xff]  }
  0x95   :  { %1468 = vmatprep.subr.bf16.mxu0 %v6194_v45  ;;  %1591 = vmatprep.subr.bf16.mxu1 %v6196_v46  ;;  %v6274_v44 = vld [vmem:[#allocation2 + $0x39c] ss:$20 sps:$4 sm:$0xff]   ;;  %v6277_v45 = vld [vmem:[#allocation2 + $0x3a4] ss:$20 sps:$4 sm:$0xff]  }
  0x96   :  { %v6272_v46 = vld [vmem:[#allocation2 + $0x398] ss:$20 sps:$4 sm:$0xff]  }
  0x98   :  { %1469 = vmatpush1.bf16.msra.mxu0 %v6198_v47  ;;  %1592 = vmatpush1.bf16.msra.mxu1 %v6199_v48  ;;  %v6275_v47 = vld [vmem:[#allocation2 + $0x3a0] ss:$20 sps:$4 sm:$0xff]   ;;  %v6280_v48 = vld [vmem:[#allocation2 + $0x3c4] ss:$20 sps:$4 sm:$0xff]  }
  0x99   :  { %1470 = vmatprep.subr.bf16.mxu0 %v6200_v50  ;;  %1593 = vmatprep.subr.bf16.mxu1 %v6202_v51  ;;  %v6283_v50 = vld [vmem:[#allocation2 + $0x3cc] ss:$20 sps:$4 sm:$0xff]  }
  0x9a   :  { %v6278_v51 = vld [vmem:[#allocation2 + $0x3c0] ss:$20 sps:$4 sm:$0xff]  }
  0x9c   :  { %1471 = vmatpush1.bf16.msra.mxu0 %v6204_v53  ;;  %1594 = vmatpush1.bf16.msra.mxu1 %v6205_v55  ;;  %v6286_v53 = vld [vmem:[#allocation2 + $0x3ec] ss:$20 sps:$4 sm:$0xff]   ;;  %v6284_v55 = vld [vmem:[#allocation2 + $0x3e8] ss:$20 sps:$4 sm:$0xff]  }
  0x9d   :  { %1472 = vmatprep.subr.bf16.mxu0 %v6206_v56  ;;  %1595 = vmatprep.subr.bf16.mxu1 %v6208_v57  ;;  %v6287_v56 = vld [vmem:[#allocation2 + $0x3f0] ss:$20 sps:$4 sm:$0xff]   ;;  %v6292_v57 = vld [vmem:[#allocation2 + $0x414] ss:$20 sps:$4 sm:$0xff]  }
  0xa0   :  { %1473 = vmatpush1.bf16.msra.mxu0 %v6210_v59  ;;  %1596 = vmatpush1.bf16.msra.mxu1 %v6211_v61  ;;  %v6290_v59 = vld [vmem:[#allocation2 + $0x410] ss:$20 sps:$4 sm:$0xff]   ;;  %v6293_v61 = vld [vmem:[#allocation2 + $0x418] ss:$20 sps:$4 sm:$0xff]  }
  0xa1   :  { %1474 = vmatprep.subr.bf16.mxu0 %v6212_v62  ;;  %1597 = vmatprep.subr.bf16.mxu1 %v6214_v63  ;;  %v6298_v62 = vld [vmem:[#allocation2 + $0x43c] ss:$20 sps:$4 sm:$0xff]   ;;  %v6301_v63 = vld [vmem:[#allocation2 + $0x444] ss:$20 sps:$4 sm:$0xff]  }
  0xa4   :  { %1475 = vmatpush1.bf16.msra.mxu0 %v6216_v0  ;;  %1598 = vmatpush1.bf16.msra.mxu1 %v6217_v1  ;;  %v6296_v0 = vld [vmem:[#allocation2 + $0x438] ss:$20 sps:$4 sm:$0xff]   ;;  %v6299_v1 = vld [vmem:[#allocation2 + $0x440] ss:$20 sps:$4 sm:$0xff]  }
  0xa5   :  { %1476 = vmatprep.subr.bf16.mxu0 %v6218_v2  ;;  %1599 = vmatprep.subr.bf16.mxu1 %v6220_v3  ;;  %v6304_v2 = vld [vmem:[#allocation2 + $0x464] ss:$20 sps:$4 sm:$0xff]   ;;  %v6307_v3 = vld [vmem:[#allocation2 + $0x46c] ss:$20 sps:$4 sm:$0xff]  }
  0xa8   :  { %1477 = vmatpush1.bf16.msra.mxu0 %v6222_v5  ;;  %1600 = vmatpush1.bf16.msra.mxu1 %v6223_v6  ;;  %v6305_v5 = vld [vmem:[#allocation2 + $0x468] ss:$20 sps:$4 sm:$0xff]   ;;  %v6310_v6 = vld [vmem:[#allocation2 + $0x48c] ss:$20 sps:$4 sm:$0xff]  }
  0xa9   :  { %1478 = vmatprep.subr.bf16.mxu0 %v6224_v7  ;;  %1601 = vmatprep.subr.bf16.mxu1 %v6226_v8  ;;  %v6313_v7 = vld [vmem:[#allocation2 + $0x494] ss:$20 sps:$4 sm:$0xff]  }
  0xaa   :  { %v6308_v8 = vld [vmem:[#allocation2 + $0x488] ss:$20 sps:$4 sm:$0xff]  }
  0xac   :  { %1479 = vmatpush1.bf16.msra.mxu0 %v6228_v10  ;;  %1602 = vmatpush1.bf16.msra.mxu1 %v6229_v11  ;;  %v6311_v10 = vld [vmem:[#allocation2 + $0x490] ss:$20 sps:$4 sm:$0xff]   ;;  %v6316_v11 = vld [vmem:[#allocation2 + $0x4b4] ss:$20 sps:$4 sm:$0xff]  }
  0xad   :  { %1489 = vmatprep.subr.bf16.mxu0 %v6232_v12  ;;  %1612 = vmatprep.subr.bf16.mxu1 %v6235_v13  ;;  %v6319_v12 = vld [vmem:[#allocation2 + $0x4bc] ss:$20 sps:$4 sm:$0xff]  }
  0xae   :  { %v6314_v13 = vld [vmem:[#allocation2 + $0x4b0] ss:$20 sps:$4 sm:$0xff]  }
  0xaf   :  { %1481 = vmatmul.mubr.bf16.vlgmr.msra.gmra.mrb[0].mxu0 %v7266_v16  ;;  %1604 = vmatmul.mubr.bf16.vlgmr.msra.gmra.mrb[0].mxu1 %v7266_v16 }
  0xb0   :  { %1490 = vmatpush1.bf16.msra.mxu0 %v6230_v15  ;;  %1613 = vmatpush1.bf16.msra.mxu1 %v6233_v17  ;;  %v6322_v15 = vld [vmem:[#allocation2 + $0x4dc] ss:$20 sps:$4 sm:$0xff]   ;;  %v6325_v17 = vld [vmem:[#allocation2 + $0x4e4] ss:$20 sps:$4 sm:$0xff]  }
  0xb1   :  { %1491 = vmatprep.subr.bf16.mxu0 %v6238_v18  ;;  %1614 = vmatprep.subr.bf16.mxu1 %v6241_v19  ;;  %v6320_v18 = vld [vmem:[#allocation2 + $0x4d8] ss:$20 sps:$4 sm:$0xff]   ;;  %v6323_v19 = vld [vmem:[#allocation2 + $0x4e0] ss:$20 sps:$4 sm:$0xff]  }
  0xb2   :  { %1521 = vmatprep.mubr.bf16.mxu0 %v7268_v20  ;;  %1644 = vmatprep.mubr.bf16.mxu1 %v7268_v20 }
  0xb4   :  { %1492 = vmatpush1.bf16.msra.mxu0 %v6236_v21  ;;  %1615 = vmatpush1.bf16.msra.mxu1 %v6239_v22  ;;  %v6329_v21 = vld [vmem:[#allocation2 + $0x504] ss:$20 sps:$4 sm:$0xff]   ;;  %v6332_v22 = vld [vmem:[#allocation2 + $0x50c] ss:$20 sps:$4 sm:$0xff]  }
  0xb5   :  { %1493 = vmatprep.subr.bf16.mxu0 %v6244_v23  ;;  %1616 = vmatprep.subr.bf16.mxu1 %v6247_v24  ;;  %v6327_v23 = vld [vmem:[#allocation2 + $0x500] ss:$20 sps:$4 sm:$0xff]   ;;  %v6330_v24 = vld [vmem:[#allocation2 + $0x508] ss:$20 sps:$4 sm:$0xff]  }
  0xb8   :  { %1494 = vmatpush1.bf16.msra.mxu0 %v6242_v25  ;;  %1617 = vmatpush1.bf16.msra.mxu1 %v6245_v26  ;;  %v7276_v25 = vpack.c.bf16 %v7262_v9, %v7262_v9  ;;  %v6335_v26 = vld [vmem:[#allocation2 + $0x52c] ss:$20 sps:$4 sm:$0xff]   ;;  %v6339_v9 = vld [vmem:[#allocation2 + $0x550] ss:$20 sps:$4 sm:$0xff]  }
  0xb9   :  { %1495 = vmatprep.subr.bf16.mxu0 %v6250_v27  ;;  %1618 = vmatprep.subr.bf16.mxu1 %v6253_v28  ;;  %v6338_v27 = vld [vmem:[#allocation2 + $0x534] ss:$20 sps:$4 sm:$0xff]  }
  0xba   :  { %v6333_v28 = vld [vmem:[#allocation2 + $0x528] ss:$20 sps:$4 sm:$0xff]  }
  0xbc   :  { %1496 = vmatpush1.bf16.msra.mxu0 %v6248_v29  ;;  %1619 = vmatpush1.bf16.msra.mxu1 %v6251_v30  ;;  %v6336_v29 = vld [vmem:[#allocation2 + $0x530] ss:$20 sps:$4 sm:$0xff]   ;;  %v6341_v30 = vld [vmem:[#allocation2 + $0x554] ss:$20 sps:$4 sm:$0xff]  }
  0xbd   :  { %1497 = vmatprep.subr.bf16.mxu0 %v6256_v31  ;;  %1620 = vmatprep.subr.bf16.mxu1 %v6259_v32  ;;  %v6344_v31 = vld [vmem:[#allocation2 + $0x55c] ss:$20 sps:$4 sm:$0xff]   ;;  %v7124_v32 = vmov 0  }
  0xc0   :  { %1498 = vmatpush1.bf16.msra.mxu0 %v6254_v33  ;;  %1621 = vmatpush1.bf16.msra.mxu1 %v6257_v34  ;;  %v6342_v33 = vld [vmem:[#allocation2 + $0x558] ss:$20 sps:$4 sm:$0xff]   ;;  %v6347_v34 = vld [vmem:[#allocation2 + $0x57c] ss:$20 sps:$4 sm:$0xff]  }
  0xc1   :  { %1499 = vmatprep.subr.bf16.mxu0 %v6262_v35  ;;  %1622 = vmatprep.subr.bf16.mxu1 %v6265_v36  ;;  %v6350_v35 = vld [vmem:[#allocation2 + $0x584] ss:$20 sps:$4 sm:$0xff]  }
  0xc2   :  { %v6345_v36 = vld [vmem:[#allocation2 + $0x578] ss:$20 sps:$4 sm:$0xff]  }
  0xc4   :  { %1500 = vmatpush1.bf16.msra.mxu0 %v6260_v37  ;;  %1623 = vmatpush1.bf16.msra.mxu1 %v6263_v38  ;;  %v6348_v37 = vld [vmem:[#allocation2 + $0x580] ss:$20 sps:$4 sm:$0xff]   ;;  %v6353_v38 = vld [vmem:[#allocation2 + $0x5a4] ss:$20 sps:$4 sm:$0xff]  }
  0xc5   :  { %1501 = vmatprep.subr.bf16.mxu0 %v6268_v39  ;;  %1624 = vmatprep.subr.bf16.mxu1 %v6271_v40  ;;  %v6356_v39 = vld [vmem:[#allocation2 + $0x5ac] ss:$20 sps:$4 sm:$0xff]  }
  0xc6   :  { %v6351_v40 = vld [vmem:[#allocation2 + $0x5a0] ss:$20 sps:$4 sm:$0xff]  }
  0xc8   :  { %1502 = vmatpush1.bf16.msra.mxu0 %v6266_v41  ;;  %1625 = vmatpush1.bf16.msra.mxu1 %v6269_v42  ;;  %v6354_v41 = vld [vmem:[#allocation2 + $0x5a8] ss:$20 sps:$4 sm:$0xff]   ;;  %v6359_v42 = vld [vmem:[#allocation2 + $0x5cc] ss:$20 sps:$4 sm:$0xff]  }
  0xc9   :  { %1503 = vmatprep.subr.bf16.mxu0 %v6274_v44  ;;  %1626 = vmatprep.subr.bf16.mxu1 %v6277_v45  ;;  %v6362_v44 = vld [vmem:[#allocation2 + $0x5d4] ss:$20 sps:$4 sm:$0xff]  }
  0xca   :  { %v6357_v45 = vld [vmem:[#allocation2 + $0x5c8] ss:$20 sps:$4 sm:$0xff]  }
  0xcc   :  { %1504 = vmatpush1.bf16.msra.mxu0 %v6272_v46  ;;  %1627 = vmatpush1.bf16.msra.mxu1 %v6275_v47  ;;  %v6360_v46 = vld [vmem:[#allocation2 + $0x5d0] ss:$20 sps:$4 sm:$0xff]   ;;  %v6365_v47 = vld [vmem:[#allocation2 + $0x5f4] ss:$20 sps:$4 sm:$0xff]  }
  0xcd   :  { %1505 = vmatprep.subr.bf16.mxu0 %v6280_v48  ;;  %1628 = vmatprep.subr.bf16.mxu1 %v6283_v50  ;;  %v6368_v48 = vld [vmem:[#allocation2 + $0x5fc] ss:$20 sps:$4 sm:$0xff]  }
  0xce   :  { %v6363_v50 = vld [vmem:[#allocation2 + $0x5f0] ss:$20 sps:$4 sm:$0xff]  }
  0xd0   :  { %1506 = vmatpush1.bf16.msra.mxu0 %v6278_v51  ;;  %1629 = vmatpush1.bf16.msra.mxu1 %v6281_v52  ;;  %v6366_v51 = vld [vmem:[#allocation2 + $0x5f8] ss:$20 sps:$4 sm:$0xff]   ;;  %v6371_v52 = vld [vmem:[#allocation2 + $0x61c] ss:$20 sps:$4 sm:$0xff]  }
  0xd1   :  { %1507 = vmatprep.subr.bf16.mxu0 %v6286_v53  ;;  %1630 = vmatprep.subr.bf16.mxu1 %v6289_v54  ;;  %v6374_v53 = vld [vmem:[#allocation2 + $0x624] ss:$20 sps:$4 sm:$0xff]  }
  0xd2   :  { %v6369_v54 = vld [vmem:[#allocation2 + $0x618] ss:$20 sps:$4 sm:$0xff]  }
  0xd4   :  { %1508 = vmatpush1.bf16.msra.mxu0 %v6284_v55  ;;  %1631 = vmatpush1.bf16.msra.mxu1 %v6287_v56  ;;  %v5241_v55 = vld.sshfl [vmem:[%s7446_s0 + $0x8] sm:$0x3 pattern:$0x76325410]  ;;  %v6372_v56 = vld [vmem:[#allocation2 + $0x620] ss:$20 sps:$4 sm:$0xff]  }
  0xd5   :  { %1509 = vmatprep.subr.bf16.mxu0 %v6292_v57  ;;  %1632 = vmatprep.subr.bf16.mxu1 %v6295_v58  ;;  %v6375_v57 = vld [vmem:[#allocation2 + $0x150] ss:$20 sps:$4 sm:$0xff]  }
  0xd6   :  { %v6389_v58 = vld [vmem:[#allocation2 + $0x3d0] ss:$20 sps:$4 sm:$0xff]  }
  0xd8   :  { %1510 = vmatpush1.bf16.msra.mxu0 %v6290_v59  ;;  %1633 = vmatpush1.bf16.msra.mxu1 %v6293_v61  ;;  %v7285_v59 = vpack.c.bf16 %v5241_v55, %v5241_v55  ;;  %v6376_v61 = vld [vmem:[#allocation2 + $0x10] ss:$20 sps:$4 sm:$0xff]   ;;  %v6465_v55 = vld [vmem:[#allocation6 + $0x144] ss:$20 sps:$4 sm:$0xff]  }
  0xd9   :  { %1511 = vmatprep.subr.bf16.mxu0 %v6298_v62  ;;  %1634 = vmatprep.subr.bf16.mxu1 %v6301_v63  ;;  %v6377_v62 = vld [vmem:[#allocation2 + $0x178] ss:$20 sps:$4 sm:$0xff]   ;;  %v6391_v63 = vld [vmem:[#allocation2 + $0x290] ss:$20 sps:$4 sm:$0xff]  }
  0xdc   :  { %1512 = vmatpush1.bf16.msra.mxu0 %v6296_v0  ;;  %1635 = vmatpush1.bf16.msra.mxu1 %v6299_v1  ;;  %v6393_v0 = vld [vmem:[#allocation2 + $0x3f8] ss:$20 sps:$4 sm:$0xff]  }
  0xdd   :  { %1513 = vmatprep.subr.bf16.mxu0 %v6304_v2  ;;  %1636 = vmatprep.subr.bf16.mxu1 %v6307_v3  ;;  %v6378_v1 = vld [vmem:[#allocation2 + $0x38] ss:$20 sps:$4 sm:$0xff]   ;;  %v6379_v2 = vld [vmem:[#allocation2 + $0x1a0] ss:$20 sps:$4 sm:$0xff]  }
  0xde   :  { %v6394_v3 = vld [vmem:[#allocation2 + $0x2b8] ss:$20 sps:$4 sm:$0xff]  }
  0xe0   :  { %1514 = vmatpush1.bf16.msra.mxu0 %v6302_v4  ;;  %1637 = vmatpush1.bf16.msra.mxu1 %v6305_v5  ;;  %v6396_v4 = vld [vmem:[#allocation2 + $0x420] ss:$20 sps:$4 sm:$0xff]  }
  0xe1   :  { %1515 = vmatprep.subr.bf16.mxu0 %v6310_v6  ;;  %1638 = vmatprep.subr.bf16.mxu1 %v6313_v7  ;;  %v6380_v5 = vld [vmem:[#allocation2 + $0x60] ss:$20 sps:$4 sm:$0xff]   ;;  %v6381_v6 = vld [vmem:[#allocation2 + $0x1c8] ss:$20 sps:$4 sm:$0xff]  }
  0xe2   :  { %v6397_v7 = vld [vmem:[#allocation2 + $0x2e0] ss:$20 sps:$4 sm:$0xff]  }
  0xe4   :  { %1516 = vmatpush1.bf16.msra.mxu0 %v6308_v8  ;;  %1639 = vmatpush1.bf16.msra.mxu1 %v6311_v10  ;;  %v6399_v8 = vld [vmem:[#allocation2 + $0x448] ss:$20 sps:$4 sm:$0xff]  }
  0xe5   :  { %1517 = vmatprep.subr.bf16.mxu0 %v6316_v11  ;;  %1640 = vmatprep.subr.bf16.mxu1 %v6319_v12  ;;  %v6382_v10 = vld [vmem:[#allocation2 + $0x88] ss:$20 sps:$4 sm:$0xff]   ;;  %v6383_v11 = vld [vmem:[#allocation2 + $0x1f0] ss:$20 sps:$4 sm:$0xff]  }
  0xe6   :  { %v6400_v12 = vld [vmem:[#allocation2 + $0x308] ss:$20 sps:$4 sm:$0xff]  }
  0xe8   :  { %1518 = vmatpush1.bf16.msra.mxu0 %v6314_v13  ;;  %1641 = vmatpush1.bf16.msra.mxu1 %v6317_v14  ;;  %v6402_v13 = vld [vmem:[#allocation2 + $0x470] ss:$20 sps:$4 sm:$0xff]  }
  0xe9   :  { %1519 = vmatprep.subr.bf16.mxu0 %v6322_v15  ;;  %1642 = vmatprep.subr.bf16.mxu1 %v6325_v17  ;;  %v6384_v14 = vld [vmem:[#allocation2 + $0xb0] ss:$20 sps:$4 sm:$0xff]   ;;  %v6405_v15 = vld [vmem:[#allocation2 + $0x498] ss:$20 sps:$4 sm:$0xff]  }
  0xea   :  { %v6386_v17 = vld [vmem:[#allocation2 + $0xd8] ss:$20 sps:$4 sm:$0xff]  }
  0xec   :  { %1520 = vmatpush1.bf16.msra.mxu0 %v6320_v18  ;;  %1643 = vmatpush1.bf16.msra.mxu1 %v6323_v19  ;;  %v6387_v18 = vld [vmem:[#allocation2 + $0x240] ss:$20 sps:$4 sm:$0xff]   ;;  %v6406_v19 = vld [vmem:[#allocation2 + $0x358] ss:$20 sps:$4 sm:$0xff]  }
  0xed   :  { %1530 = vmatprep.subr.bf16.mxu0 %v6329_v21  ;;  %1653 = vmatprep.subr.bf16.mxu1 %v6332_v22  ;;  %v6408_v21 = vld [vmem:[#allocation2 + $0x4c0] ss:$20 sps:$4 sm:$0xff]  }
  0xee   :  { %v6388_v22 = vld [vmem:[#allocation2 + $0x100] ss:$20 sps:$4 sm:$0xff]  }
  0xef   :  { %1522 = vmatmul.mubr.bf16.vlgmr.msra.gmra.mrb[0].mxu0 %v7276_v25  ;;  %1645 = vmatmul.mubr.bf16.vlgmr.msra.gmra.mrb[0].mxu1 %v7276_v25 }
  0xf0   :  { %1531 = vmatpush1.bf16.msra.mxu0 %v6327_v23  ;;  %1654 = vmatpush1.bf16.msra.mxu1 %v6330_v24  ;;  %v6390_v23 = vld [vmem:[#allocation2 + $0x268] ss:$20 sps:$4 sm:$0xff]   ;;  %v6409_v24 = vld [vmem:[#allocation2 + $0x380] ss:$20 sps:$4 sm:$0xff]  }
  0xf1   :  { %1532 = vmatprep.subr.bf16.mxu0 %v6335_v26  ;;  %1655 = vmatprep.subr.bf16.mxu1 %v6338_v27  ;;  %v6411_v26 = vld [vmem:[#allocation2 + $0x4e8] ss:$20 sps:$4 sm:$0xff]  }
  0xf2   :  { %1562 = vmatprep.mubr.bf16.mxu0 %v7124_v32  ;;  %1685 = vmatprep.mubr.bf16.mxu1 %v7124_v32  ;;  %v6392_v27 = vld [vmem:[#allocation2 + $0x128] ss:$20 sps:$4 sm:$0xff]  }
  0xf4   :  { %1533 = vmatpush1.bf16.msra.mxu0 %v6333_v28  ;;  %1656 = vmatpush1.bf16.msra.mxu1 %v6336_v29  ;;  %v6412_v28 = vld [vmem:[#allocation2 + $0x3a8] ss:$20 sps:$4 sm:$0xff]  }
  0xf5   :  { %1534 = vmatprep.subr.bf16.mxu0 %v6341_v30  ;;  %1657 = vmatprep.subr.bf16.mxu1 %v6344_v31  ;;  %v6417_v29 = vld [vmem:[#allocation6 + $0x4] ss:$20 sps:$4 sm:$0xff]   ;;  %v6395_v30 = vld [vmem:[#allocation2 + $0x510] ss:$20 sps:$4 sm:$0xff]  }
  0xf6   :  { %v6415_v31 = vld [vmem:[#allocation6] ss:$20 sps:$4 sm:$0xff]  }
  0xf8   :  { %1535 = vmatpush1.bf16.msra.mxu0 %v6339_v9  ;;  %1658 = vmatpush1.bf16.msra.mxu1 %v6342_v33  ;;  %v6423_v9 = vld [vmem:[#allocation6 + $0x2c] ss:$20 sps:$4 sm:$0xff]   ;;  %v7125_v33 = vmov 0.0  }
  0xf9   :  { %1536 = vmatprep.subr.bf16.mxu0 %v6347_v34  ;;  %1659 = vmatprep.subr.bf16.mxu1 %v6350_v35  ;;  %v6398_v34 = vld [vmem:[#allocation2 + $0x538] ss:$20 sps:$4 sm:$0xff]  }
  0xfa   :  { %v6421_v35 = vld [vmem:[#allocation6 + $0x28] ss:$20 sps:$4 sm:$0xff]  }
  0xfc   :  { %1537 = vmatpush1.bf16.msra.mxu0 %v6345_v36  ;;  %1660 = vmatpush1.bf16.msra.mxu1 %v6348_v37  ;;  %v6429_v36 = vld [vmem:[#allocation6 + $0x54] ss:$20 sps:$4 sm:$0xff]   ;;  %v6401_v37 = vld [vmem:[#allocation2 + $0x560] ss:$20 sps:$4 sm:$0xff]  }
  0xfd   :  { %1538 = vmatprep.subr.bf16.mxu0 %v6353_v38  ;;  %1661 = vmatprep.subr.bf16.mxu1 %v6356_v39  ;;  %v6427_v38 = vld [vmem:[#allocation6 + $0x50] ss:$20 sps:$4 sm:$0xff]  }
  0xfe   :  { %v6435_v39 = vld [vmem:[#allocation6 + $0x7c] ss:$20 sps:$4 sm:$0xff]  }
 0x100   :  { %1539 = vmatpush1.bf16.msra.mxu0 %v6351_v40  ;;  %1662 = vmatpush1.bf16.msra.mxu1 %v6354_v41  ;;  %v6441_v40 = vld [vmem:[#allocation6 + $0xa4] ss:$20 sps:$4 sm:$0xff]   ;;  %v6407_v41 = vld [vmem:[#allocation2 + $0x5b0] ss:$20 sps:$4 sm:$0xff]  }
 0x101   :  { %1540 = vmatprep.subr.bf16.mxu0 %v6359_v42  ;;  %1663 = vmatprep.subr.bf16.mxu1 %v6362_v44  ;;  %v6439_v42 = vld [vmem:[#allocation6 + $0xa0] ss:$20 sps:$4 sm:$0xff]  }
 0x102   :  { %v6447_v44 = vld [vmem:[#allocation6 + $0xcc] ss:$20 sps:$4 sm:$0xff]  }
 0x104   :  { %1541 = vmatpush1.bf16.msra.mxu0 %v6357_v45  ;;  %1664 = vmatpush1.bf16.msra.mxu1 %v6360_v46  ;;  %v6410_v45 = vld [vmem:[#allocation2 + $0x5d8] ss:$20 sps:$4 sm:$0xff]  }
 0x105   :  { %1542 = vmatprep.subr.bf16.mxu0 %v6365_v47  ;;  %1665 = vmatprep.subr.bf16.mxu1 %v6368_v48  ;;  %v6445_v46 = vld [vmem:[#allocation6 + $0xc8] ss:$20 sps:$4 sm:$0xff]  }
 0x106   :  { %v6453_v47 = vld [vmem:[#allocation6 + $0xf4] ss:$20 sps:$4 sm:$0xff]   ;;  %v6413_v48 = vld [vmem:[#allocation2 + $0x600] ss:$20 sps:$4 sm:$0xff]  }
 0x108   :  { %1543 = vmatpush1.bf16.msra.mxu0 %v6363_v50  ;;  %1666 = vmatpush1.bf16.msra.mxu1 %v6366_v51  ;;  %v6451_v50 = vld [vmem:[#allocation6 + $0xf0] ss:$20 sps:$4 sm:$0xff]  }
 0x109   :  { %1544 = vmatprep.subr.bf16.mxu0 %v6371_v52  ;;  %1667 = vmatprep.subr.bf16.mxu1 %v6374_v53  ;;  %v6459_v51 = vld [vmem:[#allocation6 + $0x11c] ss:$20 sps:$4 sm:$0xff]   ;;  %v6414_v52 = vld [vmem:[#allocation2 + $0x628] ss:$20 sps:$4 sm:$0xff]  }
 0x10a   :  { %v6420_v53 = vld [vmem:[#allocation6 + $0xc] ss:$20 sps:$4 sm:$0xff]  }
 0x10c   :  { %1545 = vmatpush1.bf16.msra.mxu0 %v6369_v54  ;;  %1668 = vmatpush1.bf16.msra.mxu1 %v6372_v56  ;;  %v6457_v54 = vld [vmem:[#allocation6 + $0x118] ss:$20 sps:$4 sm:$0xff]   ;;  %v6418_v56 = vld [vmem:[#allocation6 + $0x8] ss:$20 sps:$4 sm:$0xff]  }
 0x10d   :  { %5843 = vmatprep.subr.bf16.mxu0 %v6375_v57  ;;  %5865 = vmatprep.subr.bf16.mxu1 %v6389_v58  ;;  %v6426_v57 = vld [vmem:[#allocation6 + $0x34] ss:$20 sps:$4 sm:$0xff]  }
 0x10e   :  { %v6463_v58 = vld [vmem:[#allocation6 + $0x140] ss:$20 sps:$4 sm:$0xff]  }
 0x10f   :  { %1563 = vmatmul.mubr.bf16.vlgmr.msra.gmra.mrb[0].mxu0 %v7285_v59  ;;  %1686 = vmatmul.mubr.bf16.vlgmr.msra.gmra.mrb[0].mxu1 %v7285_v59 }
 0x110   :  { %5844 = vmatpush3.bf16.msra.mxu0 %v6376_v61  ;;  %5866 = vmatpush3.bf16.msra.mxu1 %v6391_v63  ;;  %v6471_v61 = vld [vmem:[#allocation6 + $0x16c] ss:$20 sps:$4 sm:$0xff]   ;;  %v6432_v63 = vld [vmem:[#allocation6 + $0x5c] ss:$20 sps:$4 sm:$0xff]  }
 0x111   :  { %5845 = vmatprep.subr.bf16.mxu0 %v6377_v62  ;;  %5867 = vmatprep.subr.bf16.mxu1 %v6393_v0  ;;  %v6424_v62 = vld [vmem:[#allocation6 + $0x30] ss:$20 sps:$4 sm:$0xff]   ;;  %v6469_v0 = vld [vmem:[#allocation6 + $0x168] ss:$20 sps:$4 sm:$0xff]  }
 0x112   :  { %1726 = vmatprep.mubr.bf16.mxu0 %v7257_v60  ;;  %1766 = vmatprep.mubr.bf16.mxu1 %v7268_v20  ;;  %v6385_v60 = vld [vmem:[#allocation2 + $0x218] ss:$20 sps:$4 sm:$0xff]   ;;  %v6403_v20 = vld [vmem:[#allocation2 + $0x330] ss:$20 sps:$4 sm:$0xff]  }
 0x114   :  { %5846 = vmatpush3.bf16.msra.mxu0 %v6378_v1  ;;  %5868 = vmatpush3.bf16.msra.mxu1 %v6394_v3  ;;  %v6477_v1 = vld [vmem:[#allocation6 + $0x194] ss:$20 sps:$4 sm:$0xff]   ;;  %v6438_v3 = vld [vmem:[#allocation6 + $0x84] ss:$20 sps:$4 sm:$0xff]  }
 0x115   :  { %5847 = vmatprep.subr.bf16.mxu0 %v6379_v2  ;;  %5869 = vmatprep.subr.bf16.mxu1 %v6396_v4  ;;  %v6430_v2 = vld [vmem:[#allocation6 + $0x58] ss:$20 sps:$4 sm:$0xff]   ;;  %v6475_v4 = vld [vmem:[#allocation6 + $0x190] ss:$20 sps:$4 sm:$0xff]  }
 0x118   :  { %5848 = vmatpush3.bf16.msra.mxu0 %v6380_v5  ;;  %5870 = vmatpush3.bf16.msra.mxu1 %v6397_v7  ;;  %v6483_v5 = vld [vmem:[#allocation6 + $0x1bc] ss:$20 sps:$4 sm:$0xff]   ;;  %v6444_v7 = vld [vmem:[#allocation6 + $0xac] ss:$20 sps:$4 sm:$0xff]  }
 0x119   :  { %5849 = vmatprep.subr.bf16.mxu0 %v6381_v6  ;;  %5871 = vmatprep.subr.bf16.mxu1 %v6399_v8  ;;  %v6436_v6 = vld [vmem:[#allocation6 + $0x80] ss:$20 sps:$4 sm:$0xff]   ;;  %v6481_v8 = vld [vmem:[#allocation6 + $0x1b8] ss:$20 sps:$4 sm:$0xff]  }
 0x11c   :  { %5850 = vmatpush3.bf16.msra.mxu0 %v6382_v10  ;;  %5872 = vmatpush3.bf16.msra.mxu1 %v6400_v12  ;;  %v6442_v10 = vld [vmem:[#allocation6 + $0xa8] ss:$20 sps:$4 sm:$0xff]   ;;  %v6487_v12 = vld [vmem:[#allocation6 + $0x1e0] ss:$20 sps:$4 sm:$0xff]  }
 0x11d   :  { %5851 = vmatprep.subr.bf16.mxu0 %v6383_v11  ;;  %5873 = vmatprep.subr.bf16.mxu1 %v6402_v13  ;;  %v6450_v11 = vld [vmem:[#allocation6 + $0xd4] ss:$20 sps:$4 sm:$0xff]   ;;  %v6495_v13 = vld [vmem:[#allocation6 + $0x20c] ss:$20 sps:$4 sm:$0xff]  }
 0x120   :  { %5852 = vmatpush3.bf16.msra.mxu0 %v6384_v14  ;;  %5874 = vmatpush3.bf16.msra.mxu1 %v6403_v20  ;;  %v6448_v14 = vld [vmem:[#allocation6 + $0xd0] ss:$20 sps:$4 sm:$0xff]   ;;  %v6493_v20 = vld [vmem:[#allocation6 + $0x208] ss:$20 sps:$4 sm:$0xff]  }
 0x121   :  { %5853 = vmatprep.subr.bf16.mxu0 %v6385_v60  ;;  %5875 = vmatprep.subr.bf16.mxu1 %v6405_v15  ;;  %v6456_v60 = vld [vmem:[#allocation6 + $0xfc] ss:$20 sps:$4 sm:$0xff]   ;;  %v6454_v15 = vld [vmem:[#allocation6 + $0xf8] ss:$20 sps:$4 sm:$0xff]  }
 0x124   :  { %5854 = vmatpush3.bf16.msra.mxu0 %v6386_v17  ;;  %5876 = vmatpush3.bf16.msra.mxu1 %v6406_v19  ;;  %v6501_v17 = vld [vmem:[#allocation6 + $0x234] ss:$20 sps:$4 sm:$0xff]   ;;  %v6499_v19 = vld [vmem:[#allocation6 + $0x230] ss:$20 sps:$4 sm:$0xff]  }
 0x125   :  { %5855 = vmatprep.subr.bf16.mxu0 %v6387_v18  ;;  %5877 = vmatprep.subr.bf16.mxu1 %v6408_v21  ;;  %v6462_v18 = vld [vmem:[#allocation6 + $0x124] ss:$20 sps:$4 sm:$0xff]   ;;  %v6460_v21 = vld [vmem:[#allocation6 + $0x120] ss:$20 sps:$4 sm:$0xff]  }
 0x128   :  { %5856 = vmatpush3.bf16.msra.mxu0 %v6388_v22  ;;  %5878 = vmatpush3.bf16.msra.mxu1 %v6409_v24  ;;  %v6507_v22 = vld [vmem:[#allocation6 + $0x25c] ss:$20 sps:$4 sm:$0xff]   ;;  %v6505_v24 = vld [vmem:[#allocation6 + $0x258] ss:$20 sps:$4 sm:$0xff]  }
 0x129   :  { %5857 = vmatprep.subr.bf16.mxu0 %v6390_v23  ;;  %5879 = vmatprep.subr.bf16.mxu1 %v6411_v26  ;;  %v6468_v23 = vld [vmem:[#allocation6 + $0x14c] ss:$20 sps:$4 sm:$0xff]   ;;  %v6466_v26 = vld [vmem:[#allocation6 + $0x148] ss:$20 sps:$4 sm:$0xff]  }
 0x12c   :  { %5858 = vmatpush3.bf16.msra.mxu0 %v6392_v27  ;;  %5880 = vmatpush3.bf16.msra.mxu1 %v6412_v28  ;;  %v6513_v27 = vld [vmem:[#allocation6 + $0x284] ss:$20 sps:$4 sm:$0xff]   ;;  %v6474_v28 = vld [vmem:[#allocation6 + $0x174] ss:$20 sps:$4 sm:$0xff]  }
 0x12d   :  { %6002 = vmatprep.subr.bf16.mxu0 %v7125_v33  ;;  %3141 = vmatprep.subr.bf16.mxu1 %v6417_v29  ;;  %v6472_v29 = vld [vmem:[#allocation6 + $0x170] ss:$20 sps:$4 sm:$0xff]  }
 0x12f   :  { %1727 = vmatmul.mubr.bf16.vlgmr.msra.gmra.mrb[4].mxu0 %v7266_v16  ;;  %1767 = vmatmul.mubr.bf16.vlgmr.msra.gmra.mrb[4].mxu1 %v7276_v25  ;;  %v6404_v16 = vld [vmem:[#allocation2 + $0x588] ss:$20 sps:$4 sm:$0xff]  }
 0x130   :  { %6003 = vmatpush3.bf16.msra.mxu0 %v6395_v30  ;;  %6018 = vmatprep.mubr.msk.bf16.mxu0 %vm7126_vm0, %v7125_v33  ;;  %v6433_v25 = vld [vmem:[#allocation6 + $0x78] ss:$20 sps:$4 sm:$0xff]   ;;  %v6480_v30 = vld [vmem:[#allocation6 + $0x19c] ss:$20 sps:$4 sm:$0xff]  }
 0x131   :  { %6004 = vmatprep.subr.bf16.mxu0 %v7125_v33  ;;  %3142 = vmatpush1.bf16.msra.mxu1 %v6415_v31  ;;  %v6478_v31 = vld [vmem:[#allocation6 + $0x198] ss:$20 sps:$4 sm:$0xff]  }
 0x132   :  { %3143 = vmatprep.subr.bf16.mxu1 %v6423_v9  ;;  %v6486_v9 = vld [vmem:[#allocation6 + $0x1c4] ss:$20 sps:$4 sm:$0xff]  }
 0x134   :  { %6005 = vmatpush3.bf16.msra.mxu0 %v6398_v34  ;;  %v6484_v34 = vld [vmem:[#allocation6 + $0x1c0] ss:$20 sps:$4 sm:$0xff]  }
 0x135   :  { %6006 = vmatprep.subr.bf16.mxu0 %v7125_v33  ;;  %3144 = vmatpush1.bf16.msra.mxu1 %v6421_v35  ;;  %v6492_v35 = vld [vmem:[#allocation6 + $0x1ec] ss:$20 sps:$4 sm:$0xff]  }
 0x136   :  { %3145 = vmatprep.subr.bf16.mxu1 %v6429_v36  ;;  %v6490_v36 = vld [vmem:[#allocation6 + $0x1e8] ss:$20 sps:$4 sm:$0xff]  }
 0x138   :  { %6007 = vmatpush3.bf16.msra.mxu0 %v6401_v37  ;;  %v6498_v37 = vld [vmem:[#allocation6 + $0x214] ss:$20 sps:$4 sm:$0xff]  }
 0x139   :  { %6008 = vmatprep.subr.bf16.mxu0 %v7125_v33  ;;  %3146 = vmatpush1.bf16.msra.mxu1 %v6427_v38  ;;  %v6496_v38 = vld [vmem:[#allocation6 + $0x210] ss:$20 sps:$4 sm:$0xff]  }
 0x13a   :  { %3147 = vmatprep.subr.bf16.mxu1 %v6435_v39  ;;  %v6504_v39 = vld [vmem:[#allocation6 + $0x23c] ss:$20 sps:$4 sm:$0xff]  }
 0x13c   :  { %6009 = vmatpush3.bf16.msra.mxu0 %v6404_v16  ;;  %v6502_v16 = vld [vmem:[#allocation6 + $0x238] ss:$20 sps:$4 sm:$0xff]  }
 0x13d   :  { %6010 = vmatprep.subr.bf16.mxu0 %v7125_v33  ;;  %3148 = vmatpush1.bf16.msra.mxu1 %v6433_v25  ;;  %v6510_v25 = vld [vmem:[#allocation6 + $0x264] ss:$20 sps:$4 sm:$0xff]  }
 0x13e   :  { %3149 = vmatprep.subr.bf16.mxu1 %v6441_v40  ;;  %v6508_v40 = vld [vmem:[#allocation6 + $0x260] ss:$20 sps:$4 sm:$0xff]  }
 0x140   :  { %6011 = vmatpush3.bf16.msra.mxu0 %v6407_v41  ;;  %v6516_v41 = vld [vmem:[#allocation6 + $0x28c] ss:$20 sps:$4 sm:$0xff]  }
 0x141   :  { %6012 = vmatprep.subr.bf16.mxu0 %v7125_v33  ;;  %3150 = vmatpush1.bf16.msra.mxu1 %v6439_v42  ;;  %v7305_v42 = vsub.s32 0, %v7248_v43 }
 0x142   :  { %3151 = vmatprep.subr.bf16.mxu1 %v6447_v44  ;;  %v7307_v44 = vld [vmem:[#allocation4] sm:$0x1f] }
 0x144   :  { %6013 = vmatpush3.bf16.msra.mxu0 %v6410_v45  ;;  %v7310_v45 = vsub.s32 1, %v7248_v43 }
 0x145   :  { %6014 = vmatprep.subr.bf16.mxu0 %v7125_v33  ;;  %3152 = vmatpush1.bf16.msra.mxu1 %v6445_v46  ;;  %v7313_v46 = vsub.s32 3, %v7248_v43 }
 0x146   :  { %3153 = vmatprep.subr.bf16.mxu1 %v6453_v47  ;;  %v386_v47 = vrot.slane %v7307_v44, %v7305_v42 }
 0x148   :  { %6015 = vmatpush3.bf16.msra.mxu0 %v6413_v48  ;;  %v390_v48 = vrot.slane %v7307_v44, %v7310_v45 }
 0x149   :  { %6016 = vmatprep.subr.bf16.mxu0 %v7125_v33  ;;  %3154 = vmatpush1.bf16.msra.mxu1 %v6451_v50  ;;  %v398_v50 = vrot.slane %v7307_v44, %v7313_v46 }
 0x14a   :  { %3155 = vmatprep.subr.bf16.mxu1 %v6459_v51 }
 0x14c   :  { %6017 = vmatpush3.bf16.msra.mxu0 %v6414_v52 }
 0x14d   :  { %3264 = vmatprep.subr.bf16.mxu0 %v6420_v53  ;;  %3156 = vmatpush1.bf16.msra.mxu1 %v6457_v54 }
 0x14e   :  { %3157 = vmatprep.subr.bf16.mxu1 %v6465_v55 }
 0x14f   :  { %6019 = vmatmul.mubr.bf16.vlgmr.msra.gmra.mrb[8].mxu0 %v7285_v59  ;;  %v6489_v59 = vld [vmem:[#allocation6 + $0x1e4] ss:$20 sps:$4 sm:$0xff]  }
 0x150   :  { %3265 = vmatpush1.bf16.msra.mxu0 %v6418_v56 }
 0x151   :  { %3266 = vmatprep.subr.bf16.mxu0 %v6426_v57  ;;  %3158 = vmatpush1.bf16.msra.mxu1 %v6463_v58 }
 0x152   :  { %3159 = vmatprep.subr.bf16.mxu1 %v6471_v61 }
 0x154   :  { %3267 = vmatpush1.bf16.msra.mxu0 %v6424_v62 }
 0x155   :  { %3268 = vmatprep.subr.bf16.mxu0 %v6432_v63  ;;  %3160 = vmatpush1.bf16.msra.mxu1 %v6469_v0 }
 0x156   :  { %3161 = vmatprep.subr.bf16.mxu1 %v6477_v1 }
 0x158   :  { %3269 = vmatpush1.bf16.msra.mxu0 %v6430_v2 }
 0x159   :  { %3270 = vmatprep.subr.bf16.mxu0 %v6438_v3  ;;  %3162 = vmatpush1.bf16.msra.mxu1 %v6475_v4 }
 0x15a   :  { %3163 = vmatprep.subr.bf16.mxu1 %v6483_v5 }
 0x15c   :  { %3271 = vmatpush1.bf16.msra.mxu0 %v6436_v6  ;;  %v6511_v6 = vld [vmem:[#allocation6 + $0x280] ss:$20 sps:$4 sm:$0xff]  }
 0x15d   :  { %3272 = vmatprep.subr.bf16.mxu0 %v6444_v7  ;;  %3164 = vmatpush1.bf16.msra.mxu1 %v6481_v8  ;;  %v6514_v7 = vld [vmem:[#allocation6 + $0x288] ss:$20 sps:$4 sm:$0xff]  }
 0x15e   :  { %3165 = vmatprep.subr.bf16.mxu1 %v6489_v59 }
 0x160   :  { %3273 = vmatpush1.bf16.msra.mxu0 %v6442_v10  ;;  %v6519_v10 = vld [vmem:[#allocation6 + $0x2ac] ss:$20 sps:$4 sm:$0xff]  }
 0x161   :  { %3274 = vmatprep.subr.bf16.mxu0 %v6450_v11  ;;  %3166 = vmatpush1.bf16.msra.mxu1 %v6487_v12  ;;  %v6522_v11 = vld [vmem:[#allocation6 + $0x2b4] ss:$20 sps:$4 sm:$0xff]  }
 0x162   :  { %3167 = vmatprep.subr.bf16.mxu1 %v6495_v13  ;;  %v6517_v13 = vld [vmem:[#allocation6 + $0x2a8] ss:$20 sps:$4 sm:$0xff]  }
 0x164   :  { %3275 = vmatpush1.bf16.msra.mxu0 %v6448_v14  ;;  %v6520_v14 = vld [vmem:[#allocation6 + $0x2b0] ss:$20 sps:$4 sm:$0xff]  }
 0x165   :  { %3276 = vmatprep.subr.bf16.mxu0 %v6456_v60  ;;  %3168 = vmatpush1.bf16.msra.mxu1 %v6493_v20  ;;  %v6525_v60 = vld [vmem:[#allocation6 + $0x2d4] ss:$20 sps:$4 sm:$0xff]   ;;  %v6528_v20 = vld [vmem:[#allocation6 + $0x2dc] ss:$20 sps:$4 sm:$0xff]  }
 0x166   :  { %3169 = vmatprep.subr.bf16.mxu1 %v6501_v17  ;;  %v6526_v17 = vld [vmem:[#allocation6 + $0x2d8] ss:$20 sps:$4 sm:$0xff]  }
 0x168   :  { %3277 = vmatpush1.bf16.msra.mxu0 %v6454_v15  ;;  %v6523_v15 = vld [vmem:[#allocation6 + $0x2d0] ss:$20 sps:$4 sm:$0xff]  }
 0x169   :  { %3278 = vmatprep.subr.bf16.mxu0 %v6462_v18  ;;  %3170 = vmatpush1.bf16.msra.mxu1 %v6499_v19  ;;  %v6531_v18 = vld [vmem:[#allocation6 + $0x2fc] ss:$20 sps:$4 sm:$0xff]   ;;  %v6534_v19 = vld [vmem:[#allocation6 + $0x304] ss:$20 sps:$4 sm:$0xff]  }
 0x16a   :  { %3171 = vmatprep.subr.bf16.mxu1 %v6507_v22  ;;  %v6532_v22 = vld [vmem:[#allocation6 + $0x300] ss:$20 sps:$4 sm:$0xff]  }
 0x16c   :  { %3279 = vmatpush1.bf16.msra.mxu0 %v6460_v21  ;;  %v6529_v21 = vld [vmem:[#allocation6 + $0x2f8] ss:$20 sps:$4 sm:$0xff]  }
 0x16d   :  { %3280 = vmatprep.subr.bf16.mxu0 %v6468_v23  ;;  %3172 = vmatpush1.bf16.msra.mxu1 %v6505_v24  ;;  %v6537_v23 = vld [vmem:[#allocation6 + $0x324] ss:$20 sps:$4 sm:$0xff]   ;;  %v6540_v24 = vld [vmem:[#allocation6 + $0x32c] ss:$20 sps:$4 sm:$0xff]  }
 0x16e   :  { %3182 = vmatprep.subr.bf16.mxu1 %v6513_v27  ;;  %v6538_v27 = vld [vmem:[#allocation6 + $0x328] ss:$20 sps:$4 sm:$0xff]  }
 0x170   :  { %3281 = vmatpush1.bf16.msra.mxu0 %v6466_v26  ;;  %v6535_v26 = vld [vmem:[#allocation6 + $0x320] ss:$20 sps:$4 sm:$0xff]  }
 0x171   :  { %3282 = vmatprep.subr.bf16.mxu0 %v6474_v28  ;;  %v6543_v28 = vld [vmem:[#allocation6 + $0x34c] ss:$20 sps:$4 sm:$0xff]  }
 0x174   :  { %3283 = vmatpush1.bf16.msra.mxu0 %v6472_v29  ;;  %v6546_v29 = vld [vmem:[#allocation6 + $0x354] ss:$20 sps:$4 sm:$0xff]  }
 0x175   :  { %3284 = vmatprep.subr.bf16.mxu0 %v6480_v30  ;;  %v6541_v30 = vld [vmem:[#allocation6 + $0x348] ss:$20 sps:$4 sm:$0xff]  }
 0x178   :  { %3285 = vmatpush1.bf16.msra.mxu0 %v6478_v31  ;;  %v6544_v31 = vld [vmem:[#allocation6 + $0x350] ss:$20 sps:$4 sm:$0xff]  }
 0x179   :  { %3286 = vmatprep.subr.bf16.mxu0 %v6486_v9  ;;  %v6549_v9 = vld [vmem:[#allocation6 + $0x374] ss:$20 sps:$4 sm:$0xff]  }
 0x17c   :  { %3287 = vmatpush1.bf16.msra.mxu0 %v6484_v34  ;;  %v6552_v34 = vld [vmem:[#allocation6 + $0x37c] ss:$20 sps:$4 sm:$0xff]  }
 0x17d   :  { %3288 = vmatprep.subr.bf16.mxu0 %v6492_v35  ;;  %v7336_v35 = vsub.s32 4, %v7248_v43 }
 0x180   :  { %3289 = vmatpush1.bf16.msra.mxu0 %v6490_v36  ;;  %v6547_v36 = vld [vmem:[#allocation6 + $0x370] ss:$20 sps:$4 sm:$0xff]  }
 0x181   :  { %3290 = vmatprep.subr.bf16.mxu0 %v6498_v37  ;;  %v6550_v37 = vld [vmem:[#allocation6 + $0x378] ss:$20 sps:$4 sm:$0xff]  }
 0x184   :  { %3291 = vmatpush1.bf16.msra.mxu0 %v6496_v38  ;;  %v6555_v38 = vld [vmem:[#allocation6 + $0x39c] ss:$20 sps:$4 sm:$0xff]  }
 0x185   :  { %3292 = vmatprep.subr.bf16.mxu0 %v6504_v39  ;;  %v6558_v39 = vld [vmem:[#allocation6 + $0x3a4] ss:$20 sps:$4 sm:$0xff]  }
 0x188   :  { %3293 = vmatpush1.bf16.msra.mxu0 %v6502_v16 }
 0x189   :  { %3294 = vmatprep.subr.bf16.mxu0 %v6510_v25  ;;  %v402_v25 = vrot.slane %v7307_v44, %v7336_v35 }
 0x18c   :  { %3295 = vmatpush1.bf16.msra.mxu0 %v6508_v40 }
 0x18d   :  { %3305 = vmatprep.subr.bf16.mxu0 %v6516_v41 }
 0x1e2   :  { %v1564_v51 = vpop.f32.mrb[0].mxu0  ;;  %v7321_v52 = vpop.f32.mrb[0].mxu1 }
 0x1e3   :  { %v6062_v53 = vadd.f32 %v1564_v51, %v386_v47  ;;  %v1566_v54 = vpop.f32.mrb[1].mxu0  ;;  %v1689_v55 = vpop.f32.mrb[1].mxu1 }
 0x1e4   :  { %v6063_v56 = vadd.f32 %v1566_v54, %v390_v48  ;;  %v6065_v57 = vadd.f32 %v1689_v55, %v398_v50  ;;  %v1568_v58 = vpop.f32.mrb[2].mxu0  ;;  %v1691_v61 = vpop.f32.mrb[2].mxu1  ;;  %v6553_v54 = vld [vmem:[#allocation6 + $0x398] ss:$20 sps:$4 sm:$0xff]   ;;  %v6556_v55 = vld [vmem:[#allocation6 + $0x3a0] ss:$20 sps:$4 sm:$0xff]  }
 0x1e5   :  { %vm1814_vm1 = vcmp.gt.f32.partialorder %v6062_v53, 0.0  ;;  %v1819_v62 = vmul.f32 0.01, %v6062_v53  ;;  %v1569_v2 = vpop.f32.mrb[3].mxu0  ;;  %v1692_v3 = vpop.f32.mrb[3].mxu1 }
 0x1e6   :  { %vm1815_vm2 = vcmp.gt.f32.partialorder %v6063_v56, 0.0  ;;  %v1820_v63 = vmul.f32 0.01, %v6063_v56  ;;  %vm1817_vm3 = vcmp.gt.f32.partialorder %v6065_v57, 0.0  ;;  %v1822_v0 = vmul.f32 0.01, %v6065_v57 }
 0x1e7   :  { %v1824_v1 = vsel %vm1814_vm1, %v6062_v53, %v1819_v62  ;;  %v6561_v58 = vld [vmem:[#allocation6 + $0x3c4] ss:$20 sps:$4 sm:$0xff]   ;;  %v6564_v61 = vld [vmem:[#allocation6 + $0x3cc] ss:$20 sps:$4 sm:$0xff]   ;;  %v6570_v3 = vld [vmem:[#allocation6 + $0x3f4] ss:$20 sps:$4 sm:$0xff]  }
 0x1e8   :  { %v1825_v4 = vsel %vm1815_vm2, %v6063_v56, %v1820_v63  ;;  %v1827_v8 = vsel %vm1817_vm3, %v6065_v57, %v1822_v0  ;;  %v7325_v59 = vpack.c.bf16 %v1824_v1, %v1824_v1  ;;  %v6559_v0 = vld [vmem:[#allocation6 + $0x3c0] ss:$20 sps:$4 sm:$0xff]   ;;  %v6562_v1 = vld [vmem:[#allocation6 + $0x3c8] ss:$20 sps:$4 sm:$0xff]  }
 0x1e9   :  { %v7323_v5 = vpack.c.bf16 %v1825_v4, %v1825_v4  ;;  %v7331_v12 = vpack.c.bf16 %v1827_v8, %v1827_v8  ;;  %v6567_v2 = vld [vmem:[#allocation6 + $0x3ec] ss:$20 sps:$4 sm:$0xff]   ;;  %v6565_v4 = vld [vmem:[#allocation6 + $0x3e8] ss:$20 sps:$4 sm:$0xff]  }
 0x1ea   :  { %v6576_v8 = vld [vmem:[#allocation6 + $0x41c] ss:$20 sps:$4 sm:$0xff]  }
 0x1eb   :  { %3173 = vmatprep.mubr.bf16.mxu1 %v7323_v5  ;;  %3296 = vmatprep.mubr.bf16.mxu0 %v7323_v5 }
 0x1ec   :  { %3174 = vmatmul.mubr.bf16.vlgmr.msra.gmra.mrb[8].mxu1 %v7325_v59  ;;  %3297 = vmatmul.mubr.bf16.vlgmr.msra.gmra.mrb[12].mxu0 %v7325_v59 }
 0x1ed   :  { %3183 = vmatpush1.bf16.msra.mxu1 %v6511_v6  ;;  %3306 = vmatpush1.bf16.msra.mxu0 %v6514_v7  ;;  %v6568_v6 = vld [vmem:[#allocation6 + $0x3f0] ss:$20 sps:$4 sm:$0xff]   ;;  %v6573_v7 = vld [vmem:[#allocation6 + $0x414] ss:$20 sps:$4 sm:$0xff]  }
 0x1ee   :  { %3214 = vmatprep.mubr.bf16.mxu1 %v7331_v12  ;;  %3337 = vmatprep.mubr.bf16.mxu0 %v7331_v12 }
 0x1ef   :  { %3184 = vmatprep.subr.bf16.mxu1 %v6519_v10  ;;  %3307 = vmatprep.subr.bf16.mxu0 %v6522_v11  ;;  %v6571_v10 = vld [vmem:[#allocation6 + $0x410] ss:$20 sps:$4 sm:$0xff]   ;;  %v6574_v11 = vld [vmem:[#allocation6 + $0x418] ss:$20 sps:$4 sm:$0xff]  }
 0x1f1   :  { %3185 = vmatpush1.bf16.msra.mxu1 %v6517_v13  ;;  %3308 = vmatpush1.bf16.msra.mxu0 %v6520_v14  ;;  %v6579_v13 = vld [vmem:[#allocation6 + $0x43c] ss:$20 sps:$4 sm:$0xff]   ;;  %v6582_v14 = vld [vmem:[#allocation6 + $0x444] ss:$20 sps:$4 sm:$0xff]  }
 0x1f2   :  { %3186 = vmatprep.subr.bf16.mxu1 %v6525_v60  ;;  %3309 = vmatprep.subr.bf16.mxu0 %v6528_v20  ;;  %v6577_v60 = vld [vmem:[#allocation6 + $0x438] ss:$20 sps:$4 sm:$0xff]   ;;  %v6580_v20 = vld [vmem:[#allocation6 + $0x440] ss:$20 sps:$4 sm:$0xff]  }
 0x1f5   :  { %3187 = vmatpush1.bf16.msra.mxu1 %v6523_v15  ;;  %3310 = vmatpush1.bf16.msra.mxu0 %v6526_v17  ;;  %v6585_v15 = vld [vmem:[#allocation6 + $0x464] ss:$20 sps:$4 sm:$0xff]   ;;  %v6588_v17 = vld [vmem:[#allocation6 + $0x46c] ss:$20 sps:$4 sm:$0xff]  }
 0x1f6   :  { %3188 = vmatprep.subr.bf16.mxu1 %v6531_v18  ;;  %3311 = vmatprep.subr.bf16.mxu0 %v6534_v19  ;;  %v7341_v18 = vsub.s32 2, %v7248_v43  ;;  %v6583_v19 = vld [vmem:[#allocation6 + $0x460] ss:$20 sps:$4 sm:$0xff]   ;;  %v6600_v43 = vld [vmem:[#allocation6 + $0x4bc] ss:$20 sps:$4 sm:$0xff]  }
 0x1f9   :  { %3189 = vmatpush1.bf16.msra.mxu1 %v6529_v21  ;;  %3312 = vmatpush1.bf16.msra.mxu0 %v6532_v22  ;;  %v6586_v21 = vld [vmem:[#allocation6 + $0x468] ss:$20 sps:$4 sm:$0xff]   ;;  %v6591_v22 = vld [vmem:[#allocation6 + $0x48c] ss:$20 sps:$4 sm:$0xff]  }
 0x1fa   :  { %3190 = vmatprep.subr.bf16.mxu1 %v6537_v23  ;;  %3313 = vmatprep.subr.bf16.mxu0 %v6540_v24  ;;  %v6594_v23 = vld [vmem:[#allocation6 + $0x494] ss:$20 sps:$4 sm:$0xff]   ;;  %v394_v24 = vrot.slane %v7307_v44, %v7341_v18 }
 0x1fd   :  { %3191 = vmatpush1.bf16.msra.mxu1 %v6535_v26  ;;  %3314 = vmatpush1.bf16.msra.mxu0 %v6538_v27  ;;  %v6589_v26 = vld [vmem:[#allocation6 + $0x488] ss:$20 sps:$4 sm:$0xff]   ;;  %v6592_v27 = vld [vmem:[#allocation6 + $0x490] ss:$20 sps:$4 sm:$0xff]  }
 0x1fe   :  { %3192 = vmatprep.subr.bf16.mxu1 %v6543_v28  ;;  %3315 = vmatprep.subr.bf16.mxu0 %v6546_v29  ;;  %v6597_v28 = vld [vmem:[#allocation6 + $0x4b4] ss:$20 sps:$4 sm:$0xff]   ;;  %v6064_v29 = vadd.f32 %v7321_v52, %v394_v24  ;;  %v6655_v24 = vld [vmem:[#allocation6 + $0x150] ss:$20 sps:$4 sm:$0xff]  }
 0x200   :  { %v1821_v44 = vmul.f32 0.01, %v6064_v29  ;;  %vm1816_vm4 = vcmp.gt.f32.partialorder %v6064_v29, 0.0 }
 0x201   :  { %3193 = vmatpush1.bf16.msra.mxu1 %v6541_v30  ;;  %3316 = vmatpush1.bf16.msra.mxu0 %v6544_v31  ;;  %v6595_v30 = vld [vmem:[#allocation6 + $0x4b0] ss:$20 sps:$4 sm:$0xff]   ;;  %v6598_v31 = vld [vmem:[#allocation6 + $0x4b8] ss:$20 sps:$4 sm:$0xff]  }
 0x202   :  { %3194 = vmatprep.subr.bf16.mxu1 %v6549_v9  ;;  %3317 = vmatprep.subr.bf16.mxu0 %v6552_v34  ;;  %v5859_v16 = vpop.f32.mrb[4].mxu0  ;;  %v5881_v40 = vpop.f32.mrb[4].mxu1  ;;  %v6603_v9 = vld [vmem:[#allocation6 + $0x4dc] ss:$20 sps:$4 sm:$0xff]   ;;  %v6606_v34 = vld [vmem:[#allocation6 + $0x4e4] ss:$20 sps:$4 sm:$0xff]  }
 0x203   :  { %v5860_v41 = vpop.f32.mrb[5].mxu0  ;;  %v5882_v47 = vpop.f32.mrb[5].mxu1 }
 0x204   :  { %v5861_v48 = vadd.f32 %v5860_v41, %v5859_v16  ;;  %v5862_v50 = vpop.f32.mrb[6].mxu0  ;;  %v5883_v51 = vadd.f32 %v5882_v47, %v5881_v40  ;;  %v5884_v53 = vpop.f32.mrb[6].mxu1  ;;  %v6601_v16 = vld [vmem:[#allocation6 + $0x4d8] ss:$20 sps:$4 sm:$0xff]   ;;  %v1826_v47 = vsel %vm1816_vm4, %v6064_v29, %v1821_v44  ;;  %v6658_v29 = vld [vmem:[#allocation6 + $0x290] ss:$20 sps:$4 sm:$0xff]  }
 0x205   :  { %3195 = vmatpush1.bf16.msra.mxu1 %v6547_v36  ;;  %3318 = vmatpush1.bf16.msra.mxu0 %v6550_v37  ;;  %v5863_v56 = vpop.f32.mrb[7].mxu0  ;;  %v5885_v57 = vpop.f32.mrb[7].mxu1  ;;  %v6609_v40 = vld [vmem:[#allocation6 + $0x504] ss:$20 sps:$4 sm:$0xff]   ;;  %v6612_v41 = vld [vmem:[#allocation6 + $0x50c] ss:$20 sps:$4 sm:$0xff]  }
 0x206   :  { %3196 = vmatprep.subr.bf16.mxu1 %v6555_v38  ;;  %3319 = vmatprep.subr.bf16.mxu0 %v6558_v39  ;;  %v1729_v62 = vadd.f32 %v5861_v48, %v402_v25  ;;  %v6604_v25 = vld [vmem:[#allocation6 + $0x4e0] ss:$20 sps:$4 sm:$0xff]   ;;  %v6610_v50 = vld [vmem:[#allocation6 + $0x508] ss:$20 sps:$4 sm:$0xff]   ;;  %v6616_v56 = vld [vmem:[#allocation6 + $0x530] ss:$20 sps:$4 sm:$0xff]  }
 0x207   :  { %v6607_v48 = vld [vmem:[#allocation6 + $0x500] ss:$20 sps:$4 sm:$0xff]  }
 0x208   :  { %v1769_v63 = vadd.f32 %v5883_v51, %v1729_v62  ;;  %v7348_v51 = vpack.c.bf16 %v1826_v47, %v1826_v47  ;;  %v6615_v53 = vld [vmem:[#allocation6 + $0x52c] ss:$20 sps:$4 sm:$0xff]   ;;  %v6621_v57 = vld [vmem:[#allocation6 + $0x554] ss:$20 sps:$4 sm:$0xff]  }
 0x209   :  { %3197 = vmatpush1.bf16.msra.mxu1 %v6553_v54  ;;  %3320 = vmatpush1.bf16.msra.mxu0 %v6556_v55  ;;  %v6618_v54 = vld [vmem:[#allocation6 + $0x534] ss:$20 sps:$4 sm:$0xff]   ;;  %v6622_v62 = vld [vmem:[#allocation6 + $0x558] ss:$20 sps:$4 sm:$0xff]  }
 0x20a   :  { %3198 = vmatprep.subr.bf16.mxu1 %v6561_v58  ;;  %3321 = vmatprep.subr.bf16.mxu0 %v6564_v61  ;;  %v6613_v55 = vld [vmem:[#allocation6 + $0x528] ss:$20 sps:$4 sm:$0xff]   ;;  %v6619_v61 = vld [vmem:[#allocation6 + $0x550] ss:$20 sps:$4 sm:$0xff]   ;;  %v6664_v44 = vld [vmem:[#allocation6 + $0x420] ss:$20 sps:$4 sm:$0xff]  }
 0x20b   :  { %v6624_v58 = vld [vmem:[#allocation6 + $0x55c] ss:$20 sps:$4 sm:$0xff]   ;;  %v6675_v47 = vld [vmem:[#allocation6 + $0x218] ss:$20 sps:$4 sm:$0xff]  }
 0x20d   :  { %3199 = vmatpush1.bf16.msra.mxu1 %v6559_v0  ;;  %3322 = vmatpush1.bf16.msra.mxu0 %v6562_v1  ;;  %v6630_v0 = vld [vmem:[#allocation6 + $0x584] ss:$20 sps:$4 sm:$0xff]  }
 0x20e   :  { %3200 = vmatprep.subr.bf16.mxu1 %v6567_v2  ;;  %3323 = vmatprep.subr.bf16.mxu0 %v6570_v3  ;;  %v6625_v1 = vld [vmem:[#allocation6 + $0x578] ss:$20 sps:$4 sm:$0xff]   ;;  %v6628_v2 = vld [vmem:[#allocation6 + $0x580] ss:$20 sps:$4 sm:$0xff]  }
 0x20f   :  { %v6633_v3 = vld [vmem:[#allocation6 + $0x5a4] ss:$20 sps:$4 sm:$0xff]  }
 0x211   :  { %3201 = vmatpush1.bf16.msra.mxu1 %v6565_v4  ;;  %3324 = vmatpush1.bf16.msra.mxu0 %v6568_v6  ;;  %v6636_v4 = vld [vmem:[#allocation6 + $0x5ac] ss:$20 sps:$4 sm:$0xff]  }
 0x212   :  { %3202 = vmatprep.subr.bf16.mxu1 %v6573_v7  ;;  %3325 = vmatprep.subr.bf16.mxu0 %v6576_v8  ;;  %v6631_v6 = vld [vmem:[#allocation6 + $0x5a0] ss:$20 sps:$4 sm:$0xff]   ;;  %v6634_v7 = vld [vmem:[#allocation6 + $0x5a8] ss:$20 sps:$4 sm:$0xff]  }
 0x213   :  { %v6639_v8 = vld [vmem:[#allocation6 + $0x5cc] ss:$20 sps:$4 sm:$0xff]  }
 0x215   :  { %3203 = vmatpush1.bf16.msra.mxu1 %v6571_v10  ;;  %3326 = vmatpush1.bf16.msra.mxu0 %v6574_v11  ;;  %v6642_v10 = vld [vmem:[#allocation6 + $0x5d4] ss:$20 sps:$4 sm:$0xff]  }
 0x216   :  { %3204 = vmatprep.subr.bf16.mxu1 %v6579_v13  ;;  %3327 = vmatprep.subr.bf16.mxu0 %v6582_v14  ;;  %v6637_v11 = vld [vmem:[#allocation6 + $0x5c8] ss:$20 sps:$4 sm:$0xff]   ;;  %v6640_v13 = vld [vmem:[#allocation6 + $0x5d0] ss:$20 sps:$4 sm:$0xff]  }
 0x217   :  { %v6645_v14 = vld [vmem:[#allocation6 + $0x5f4] ss:$20 sps:$4 sm:$0xff]  }
 0x219   :  { %3205 = vmatpush1.bf16.msra.mxu1 %v6577_v60  ;;  %3328 = vmatpush1.bf16.msra.mxu0 %v6580_v20  ;;  %v6648_v60 = vld [vmem:[#allocation6 + $0x5fc] ss:$20 sps:$4 sm:$0xff]  }
 0x21a   :  { %3206 = vmatprep.subr.bf16.mxu1 %v6585_v15  ;;  %3329 = vmatprep.subr.bf16.mxu0 %v6588_v17  ;;  %v6643_v20 = vld [vmem:[#allocation6 + $0x5f0] ss:$20 sps:$4 sm:$0xff]   ;;  %v6646_v15 = vld [vmem:[#allocation6 + $0x5f8] ss:$20 sps:$4 sm:$0xff]  }
 0x21b   :  { %v6651_v17 = vld [vmem:[#allocation6 + $0x61c] ss:$20 sps:$4 sm:$0xff]  }
 0x21d   :  { %3207 = vmatpush1.bf16.msra.mxu1 %v6583_v19  ;;  %3330 = vmatpush1.bf16.msra.mxu0 %v6586_v21  ;;  %v6654_v19 = vld [vmem:[#allocation6 + $0x624] ss:$20 sps:$4 sm:$0xff]  }
 0x21e   :  { %3208 = vmatprep.subr.bf16.mxu1 %v6591_v22  ;;  %3331 = vmatprep.subr.bf16.mxu0 %v6594_v23  ;;  %v6649_v22 = vld [vmem:[#allocation6 + $0x618] ss:$20 sps:$4 sm:$0xff]   ;;  %v6652_v23 = vld [vmem:[#allocation6 + $0x620] ss:$20 sps:$4 sm:$0xff]  }
 0x221   :  { %3209 = vmatpush1.bf16.msra.mxu1 %v6589_v26  ;;  %3332 = vmatpush1.bf16.msra.mxu0 %v6592_v27  ;;  %v6656_v26 = vld [vmem:[#allocation6 + $0x3d0] ss:$20 sps:$4 sm:$0xff]  }
 0x222   :  { %3210 = vmatprep.subr.bf16.mxu1 %v6597_v28  ;;  %3333 = vmatprep.subr.bf16.mxu0 %v6600_v43  ;;  %v1808_v36 = vpop.f32.mrb[8].mxu0  ;;  %v6657_v28 = vld [vmem:[#allocation6 + $0x10] ss:$20 sps:$4 sm:$0xff]  }
 0x223   :  { %v7346_v37 = vadd.f32 %v1808_v36, %v1769_v63  ;;  %v6020_v38 = vpop.f32.mrb[9].mxu0  ;;  %v6627_v63 = vld [vmem:[#allocation6 + $0x57c] ss:$20 sps:$4 sm:$0xff]   ;;  %v6663_v36 = vld [vmem:[#allocation6 + $0x1a0] ss:$20 sps:$4 sm:$0xff]  }
 0x224   :  { %v1811_v39 = vpop.f32.mrb[10].mxu0  ;;  %v6666_v38 = vld [vmem:[#allocation6 + $0x2e0] ss:$20 sps:$4 sm:$0xff]  }
 0x225   :  { %3211 = vmatpush1.bf16.msra.mxu1 %v6595_v30  ;;  %3334 = vmatpush1.bf16.msra.mxu0 %v6598_v31  ;;  %v6021_v52 = vpop.f32.mrb[11].mxu0  ;;  %v1823_v21 = vmul.f32 0.01, %v7346_v37  ;;  %vm1818_vm5 = vcmp.gt.f32.partialorder %v7346_v37, 0.0  ;;  %v6659_v30 = vld [vmem:[#allocation6 + $0x178] ss:$20 sps:$4 sm:$0xff]  }
 0x226   :  { %3212 = vmatprep.subr.bf16.mxu1 %v6603_v9  ;;  %3335 = vmatprep.subr.bf16.mxu0 %v6606_v34  ;;  %v6660_v31 = vld [vmem:[#allocation6 + $0x3f8] ss:$20 sps:$4 sm:$0xff]   ;;  %v6667_v39 = vld [vmem:[#allocation6 + $0x1c8] ss:$20 sps:$4 sm:$0xff]   ;;  %v6671_v52 = vld [vmem:[#allocation6 + $0x1f0] ss:$20 sps:$4 sm:$0xff]  }
 0x227   :  { %v1828_v27 = vsel %vm1818_vm5, %v7346_v37, %v1823_v21  ;;  %v6661_v9 = vld [vmem:[#allocation6 + $0x38] ss:$20 sps:$4 sm:$0xff]   ;;  %v6665_v37 = vld [vmem:[#allocation6 + $0x60] ss:$20 sps:$4 sm:$0xff]  }
 0x228   :  { %v7357_v43 = vpack.c.bf16 %v1828_v27, %v1828_v27  ;;  %v6662_v34 = vld [vmem:[#allocation6 + $0x2b8] ss:$20 sps:$4 sm:$0xff]   ;;  %v6693_v21 = vld [vmem:[#allocation6 + $0x600] ss:$20 sps:$4 sm:$0xff]  }
 0x229   :  { %3213 = vmatpush1.bf16.msra.mxu1 %v6601_v16  ;;  %3336 = vmatpush1.bf16.msra.mxu0 %v6604_v25  ;;  %v6668_v16 = vld [vmem:[#allocation6 + $0x448] ss:$20 sps:$4 sm:$0xff]  }
 0x22a   :  { %3223 = vmatprep.subr.bf16.mxu1 %v6609_v40  ;;  %3346 = vmatprep.subr.bf16.mxu0 %v6612_v41  ;;  %v6669_v25 = vld [vmem:[#allocation6 + $0x88] ss:$20 sps:$4 sm:$0xff]   ;;  %v6673_v40 = vld [vmem:[#allocation6 + $0xb0] ss:$20 sps:$4 sm:$0xff]  }
 0x22b   :  { %v6674_v41 = vld [vmem:[#allocation6 + $0x330] ss:$20 sps:$4 sm:$0xff]  }
 0x22c   :  { %3215 = vmatmul.mubr.bf16.vlgmr.msra.gmra.mrb[8].mxu1 %v7348_v51  ;;  %3338 = vmatmul.mubr.bf16.vlgmr.msra.gmra.mrb[12].mxu0 %v7348_v51  ;;  %v6737_v27 = vld [vmem:[#allocation9 + $0x118] ss:$20 sps:$4 sm:$0xff]  }
 0x22d   :  { %3224 = vmatpush1.bf16.msra.mxu1 %v6607_v48  ;;  %3347 = vmatpush1.bf16.msra.mxu0 %v6610_v50  ;;  %v6676_v48 = vld [vmem:[#allocation6 + $0x498] ss:$20 sps:$4 sm:$0xff]  }
 0x22e   :  { %3225 = vmatprep.subr.bf16.mxu1 %v6615_v53  ;;  %3348 = vmatprep.subr.bf16.mxu0 %v6618_v54  ;;  %v6677_v50 = vld [vmem:[#allocation6 + $0xd8] ss:$20 sps:$4 sm:$0xff]   ;;  %v6679_v54 = vld [vmem:[#allocation6 + $0x240] ss:$20 sps:$4 sm:$0xff]  }
 0x22f   :  { %3255 = vmatprep.mubr.bf16.mxu1 %v7124_v32  ;;  %3378 = vmatprep.mubr.bf16.mxu0 %v7124_v32  ;;  %v6678_v53 = vld [vmem:[#allocation6 + $0x358] ss:$20 sps:$4 sm:$0xff]  }
 0x231   :  { %3226 = vmatpush1.bf16.msra.mxu1 %v6613_v55  ;;  %3349 = vmatpush1.bf16.msra.mxu0 %v6616_v56  ;;  %v6680_v55 = vld [vmem:[#allocation6 + $0x4c0] ss:$20 sps:$4 sm:$0xff]  }
 0x232   :  { %3227 = vmatprep.subr.bf16.mxu1 %v6621_v57  ;;  %3350 = vmatprep.subr.bf16.mxu0 %v6624_v58  ;;  %v6681_v56 = vld [vmem:[#allocation6 + $0x100] ss:$20 sps:$4 sm:$0xff]   ;;  %v6683_v58 = vld [vmem:[#allocation6 + $0x268] ss:$20 sps:$4 sm:$0xff]  }
 0x233   :  { %v6682_v57 = vld [vmem:[#allocation6 + $0x380] ss:$20 sps:$4 sm:$0xff]  }
 0x235   :  { %3228 = vmatpush1.bf16.msra.mxu1 %v6619_v61  ;;  %3351 = vmatpush1.bf16.msra.mxu0 %v6622_v62  ;;  %v6684_v61 = vld [vmem:[#allocation6 + $0x4e8] ss:$20 sps:$4 sm:$0xff]  }
 0x236   :  { %3229 = vmatprep.subr.bf16.mxu1 %v6627_v63  ;;  %3352 = vmatprep.subr.bf16.mxu0 %v6630_v0  ;;  %v6685_v62 = vld [vmem:[#allocation6 + $0x128] ss:$20 sps:$4 sm:$0xff]  }
 0x237   :  { %v6686_v63 = vld [vmem:[#allocation6 + $0x3a8] ss:$20 sps:$4 sm:$0xff]  }
 0x238   :  { %v6697_v0 = vld [vmem:[#allocation9 + $0x4] ss:$20 sps:$4 sm:$0xff]  }
 0x239   :  { %3230 = vmatpush1.bf16.msra.mxu1 %v6625_v1  ;;  %3353 = vmatpush1.bf16.msra.mxu0 %v6628_v2  ;;  %v6687_v1 = vld [vmem:[#allocation6 + $0x510] ss:$20 sps:$4 sm:$0xff]  }
 0x23a   :  { %3231 = vmatprep.subr.bf16.mxu1 %v6633_v3  ;;  %3354 = vmatprep.subr.bf16.mxu0 %v6636_v4  ;;  %v6695_v2 = vld [vmem:[#allocation9] ss:$20 sps:$4 sm:$0xff]  }
 0x23b   :  { %v6703_v3 = vld [vmem:[#allocation9 + $0x2c] ss:$20 sps:$4 sm:$0xff]   ;;  %v6688_v4 = vld [vmem:[#allocation6 + $0x538] ss:$20 sps:$4 sm:$0xff]  }
 0x23d   :  { %3232 = vmatpush1.bf16.msra.mxu1 %v6631_v6  ;;  %3355 = vmatpush1.bf16.msra.mxu0 %v6634_v7  ;;  %v6701_v6 = vld [vmem:[#allocation9 + $0x28] ss:$20 sps:$4 sm:$0xff]  }
 0x23e   :  { %3233 = vmatprep.subr.bf16.mxu1 %v6639_v8  ;;  %3356 = vmatprep.subr.bf16.mxu0 %v6642_v10  ;;  %v6709_v7 = vld [vmem:[#allocation9 + $0x54] ss:$20 sps:$4 sm:$0xff]   ;;  %v6689_v8 = vld [vmem:[#allocation6 + $0x560] ss:$20 sps:$4 sm:$0xff]  }
 0x23f   :  { %v6715_v10 = vld [vmem:[#allocation9 + $0x7c] ss:$20 sps:$4 sm:$0xff]  }
 0x241   :  { %3234 = vmatpush1.bf16.msra.mxu1 %v6637_v11  ;;  %3357 = vmatpush1.bf16.msra.mxu0 %v6640_v13  ;;  %v6713_v11 = vld [vmem:[#allocation9 + $0x78] ss:$20 sps:$4 sm:$0xff]  }
 0x242   :  { %3235 = vmatprep.subr.bf16.mxu1 %v6645_v14  ;;  %3358 = vmatprep.subr.bf16.mxu0 %v6648_v60  ;;  %v6721_v13 = vld [vmem:[#allocation9 + $0xa4] ss:$20 sps:$4 sm:$0xff]   ;;  %v6691_v14 = vld [vmem:[#allocation6 + $0x5b0] ss:$20 sps:$4 sm:$0xff]  }
 0x243   :  { %v6719_v60 = vld [vmem:[#allocation9 + $0xa0] ss:$20 sps:$4 sm:$0xff]  }
 0x245   :  { %3236 = vmatpush1.bf16.msra.mxu1 %v6643_v20  ;;  %3359 = vmatpush1.bf16.msra.mxu0 %v6646_v15  ;;  %v6727_v20 = vld [vmem:[#allocation9 + $0xcc] ss:$20 sps:$4 sm:$0xff]   ;;  %v6692_v15 = vld [vmem:[#allocation6 + $0x5d8] ss:$20 sps:$4 sm:$0xff]  }
 0x246   :  { %3237 = vmatprep.subr.bf16.mxu1 %v6651_v17  ;;  %3360 = vmatprep.subr.bf16.mxu0 %v6654_v19  ;;  %v6725_v17 = vld [vmem:[#allocation9 + $0xc8] ss:$20 sps:$4 sm:$0xff]  }
 0x247   :  { %v6733_v19 = vld [vmem:[#allocation9 + $0xf4] ss:$20 sps:$4 sm:$0xff]  }
 0x249   :  { %3238 = vmatpush1.bf16.msra.mxu1 %v6649_v22  ;;  %3361 = vmatpush1.bf16.msra.mxu0 %v6652_v23  ;;  %v6731_v22 = vld [vmem:[#allocation9 + $0xf0] ss:$20 sps:$4 sm:$0xff]  }
 0x24a   :  { %5896 = vmatprep.subr.bf16.mxu1 %v6655_v24  ;;  %5918 = vmatprep.subr.bf16.mxu0 %v6656_v26  ;;  %v6739_v23 = vld [vmem:[#allocation9 + $0x11c] ss:$20 sps:$4 sm:$0xff]   ;;  %v6694_v24 = vld [vmem:[#allocation6 + $0x628] ss:$20 sps:$4 sm:$0xff]  }
 0x24b   :  { %v6700_v26 = vld [vmem:[#allocation9 + $0xc] ss:$20 sps:$4 sm:$0xff]  }
 0x24c   :  { %3256 = vmatmul.mubr.bf16.vlgmr.msra.gmra.mrb[8].mxu1 %v7357_v43  ;;  %3379 = vmatmul.mubr.bf16.vlgmr.msra.gmra.mrb[12].mxu0 %v7357_v43 }
 0x24d   :  { %5897 = vmatpush3.bf16.msra.mxu1 %v6657_v28  ;;  %3419 = vmatprep.mubr.bf16.mxu1 %v7323_v5  ;;  %v6670_v5 = vld [vmem:[#allocation6 + $0x308] ss:$20 sps:$4 sm:$0xff]  }
 0x24e   :  { %5919 = vmatpush3.bf16.msra.mxu0 %v6658_v29  ;;  %3459 = vmatprep.mubr.bf16.mxu0 %v7331_v12  ;;  %v6672_v12 = vld [vmem:[#allocation6 + $0x470] ss:$20 sps:$4 sm:$0xff]   ;;  %v6745_v28 = vld [vmem:[#allocation9 + $0x144] ss:$20 sps:$4 sm:$0xff]  }
 0x24f   :  { %5898 = vmatprep.subr.bf16.mxu1 %v6659_v30  ;;  %5920 = vmatprep.subr.bf16.mxu0 %v6660_v31  ;;  %v6698_v29 = vld [vmem:[#allocation9 + $0x8] ss:$20 sps:$4 sm:$0xff]   ;;  %v6743_v31 = vld [vmem:[#allocation9 + $0x140] ss:$20 sps:$4 sm:$0xff]  }
 0x250   :  { %v6706_v30 = vld [vmem:[#allocation9 + $0x34] ss:$20 sps:$4 sm:$0xff]  }
 0x251   :  { %5899 = vmatpush3.bf16.msra.mxu1 %v6661_v9  ;;  %v6751_v9 = vld [vmem:[#allocation9 + $0x16c] ss:$20 sps:$4 sm:$0xff]  }
 0x252   :  { %5921 = vmatpush3.bf16.msra.mxu0 %v6662_v34  ;;  %5900 = vmatprep.subr.bf16.mxu1 %v6663_v36  ;;  %v6704_v34 = vld [vmem:[#allocation9 + $0x30] ss:$20 sps:$4 sm:$0xff]  }
 0x253   :  { %5922 = vmatprep.subr.bf16.mxu0 %v6664_v44  ;;  %v6712_v36 = vld [vmem:[#allocation9 + $0x5c] ss:$20 sps:$4 sm:$0xff]  }
 0x254   :  { %v6749_v44 = vld [vmem:[#allocation9 + $0x168] ss:$20 sps:$4 sm:$0xff]  }
 0x255   :  { %5901 = vmatpush3.bf16.msra.mxu1 %v6665_v37  ;;  %v6757_v37 = vld [vmem:[#allocation9 + $0x194] ss:$20 sps:$4 sm:$0xff]  }
 0x256   :  { %5923 = vmatpush3.bf16.msra.mxu0 %v6666_v38  ;;  %5902 = vmatprep.subr.bf16.mxu1 %v6667_v39  ;;  %v6710_v38 = vld [vmem:[#allocation9 + $0x58] ss:$20 sps:$4 sm:$0xff]  }
 0x257   :  { %5924 = vmatprep.subr.bf16.mxu0 %v6668_v16  ;;  %v6718_v39 = vld [vmem:[#allocation9 + $0x84] ss:$20 sps:$4 sm:$0xff]  }
 0x258   :  { %v6755_v16 = vld [vmem:[#allocation9 + $0x190] ss:$20 sps:$4 sm:$0xff]  }
 0x259   :  { %5903 = vmatpush3.bf16.msra.mxu1 %v6669_v25  ;;  %v6763_v25 = vld [vmem:[#allocation9 + $0x1bc] ss:$20 sps:$4 sm:$0xff]  }
 0x25a   :  { %5925 = vmatpush3.bf16.msra.mxu0 %v6670_v5  ;;  %5904 = vmatprep.subr.bf16.mxu1 %v6671_v52  ;;  %v6724_v5 = vld [vmem:[#allocation9 + $0xac] ss:$20 sps:$4 sm:$0xff]  }
 0x25b   :  { %5926 = vmatprep.subr.bf16.mxu0 %v6672_v12  ;;  %v6761_v52 = vld [vmem:[#allocation9 + $0x1b8] ss:$20 sps:$4 sm:$0xff]  }
 0x25c   :  { %v6769_v12 = vld [vmem:[#allocation9 + $0x1e4] ss:$20 sps:$4 sm:$0xff]  }
 0x25d   :  { %5905 = vmatpush3.bf16.msra.mxu1 %v6673_v40  ;;  %v6722_v40 = vld [vmem:[#allocation9 + $0xa8] ss:$20 sps:$4 sm:$0xff]  }
 0x25e   :  { %5927 = vmatpush3.bf16.msra.mxu0 %v6674_v41  ;;  %5906 = vmatprep.subr.bf16.mxu1 %v6675_v47  ;;  %v6730_v41 = vld [vmem:[#allocation9 + $0xd4] ss:$20 sps:$4 sm:$0xff]  }
 0x25f   :  { %5928 = vmatprep.subr.bf16.mxu0 %v6676_v48  ;;  %v6767_v47 = vld [vmem:[#allocation9 + $0x1e0] ss:$20 sps:$4 sm:$0xff]  }
 0x260   :  { %v6775_v48 = vld [vmem:[#allocation9 + $0x20c] ss:$20 sps:$4 sm:$0xff]  }
 0x261   :  { %5907 = vmatpush3.bf16.msra.mxu1 %v6677_v50  ;;  %v6728_v50 = vld [vmem:[#allocation9 + $0xd0] ss:$20 sps:$4 sm:$0xff]  }
 0x262   :  { %5929 = vmatpush3.bf16.msra.mxu0 %v6678_v53  ;;  %5908 = vmatprep.subr.bf16.mxu1 %v6679_v54  ;;  %v6736_v53 = vld [vmem:[#allocation9 + $0xfc] ss:$20 sps:$4 sm:$0xff]  }
 0x263   :  { %5930 = vmatprep.subr.bf16.mxu0 %v6680_v55  ;;  %v6773_v54 = vld [vmem:[#allocation9 + $0x208] ss:$20 sps:$4 sm:$0xff]  }
 0x264   :  { %v6781_v55 = vld [vmem:[#allocation9 + $0x234] ss:$20 sps:$4 sm:$0xff]  }
 0x265   :  { %5909 = vmatpush3.bf16.msra.mxu1 %v6681_v56  ;;  %v6734_v56 = vld [vmem:[#allocation9 + $0xf8] ss:$20 sps:$4 sm:$0xff]  }
 0x266   :  { %5931 = vmatpush3.bf16.msra.mxu0 %v6682_v57  ;;  %5910 = vmatprep.subr.bf16.mxu1 %v6683_v58  ;;  %v6742_v57 = vld [vmem:[#allocation9 + $0x124] ss:$20 sps:$4 sm:$0xff]  }
 0x267   :  { %5932 = vmatprep.subr.bf16.mxu0 %v6684_v61  ;;  %v6779_v58 = vld [vmem:[#allocation9 + $0x230] ss:$20 sps:$4 sm:$0xff]  }
 0x268   :  { %v6787_v61 = vld [vmem:[#allocation9 + $0x25c] ss:$20 sps:$4 sm:$0xff]  }
 0x269   :  { %5911 = vmatpush3.bf16.msra.mxu1 %v6685_v62  ;;  %v6740_v62 = vld [vmem:[#allocation9 + $0x120] ss:$20 sps:$4 sm:$0xff]  }
 0x26a   :  { %5933 = vmatpush3.bf16.msra.mxu0 %v6686_v63  ;;  %6022 = vmatprep.subr.bf16.mxu1 %v7125_v33  ;;  %v6748_v63 = vld [vmem:[#allocation9 + $0x14c] ss:$20 sps:$4 sm:$0xff]  }
 0x26b   :  { %4834 = vmatprep.subr.bf16.mxu0 %v6697_v0  ;;  %v6785_v0 = vld [vmem:[#allocation9 + $0x258] ss:$20 sps:$4 sm:$0xff]  }
 0x26c   :  { %3420 = vmatmul.mubr.bf16.vlgmr.msra.gmra.mrb[12].mxu1 %v7325_v59  ;;  %v6707_v59 = vld [vmem:[#allocation9 + $0x50] ss:$20 sps:$4 sm:$0xff]  }
 0x26d   :  { %3460 = vmatmul.mubr.bf16.vlgmr.msra.gmra.mrb[16].mxu0 %v7348_v51  ;;  %6023 = vmatpush3.bf16.msra.mxu1 %v6687_v1  ;;  %v6690_v51 = vld [vmem:[#allocation6 + $0x588] ss:$20 sps:$4 sm:$0xff]  }
 0x26e   :  { %6024 = vmatprep.subr.bf16.mxu1 %v7125_v33  ;;  %6038 = vmatprep.mubr.msk.bf16.mxu1 %vm7126_vm0, %v7125_v33  ;;  %v6793_v1 = vld [vmem:[#allocation9 + $0x284] ss:$20 sps:$4 sm:$0xff]  }
 0x26f   :  { %4835 = vmatpush1.bf16.msra.mxu0 %v6695_v2  ;;  %v6746_v2 = vld [vmem:[#allocation9 + $0x148] ss:$20 sps:$4 sm:$0xff]  }
 0x270   :  { %4836 = vmatprep.subr.bf16.mxu0 %v6703_v3  ;;  %v6754_v3 = vld [vmem:[#allocation9 + $0x174] ss:$20 sps:$4 sm:$0xff]  }
 0x271   :  { %6025 = vmatpush3.bf16.msra.mxu1 %v6688_v4  ;;  %v6752_v4 = vld [vmem:[#allocation9 + $0x170] ss:$20 sps:$4 sm:$0xff]  }
 0x272   :  { %6026 = vmatprep.subr.bf16.mxu1 %v7125_v33 }
 0x273   :  { %4837 = vmatpush1.bf16.msra.mxu0 %v6701_v6  ;;  %v6760_v6 = vld [vmem:[#allocation9 + $0x19c] ss:$20 sps:$4 sm:$0xff]  }
 0x274   :  { %4838 = vmatprep.subr.bf16.mxu0 %v6709_v7  ;;  %v6758_v7 = vld [vmem:[#allocation9 + $0x198] ss:$20 sps:$4 sm:$0xff]  }
 0x275   :  { %6027 = vmatpush3.bf16.msra.mxu1 %v6689_v8  ;;  %v6766_v8 = vld [vmem:[#allocation9 + $0x1c4] ss:$20 sps:$4 sm:$0xff]  }
 0x276   :  { %6028 = vmatprep.subr.bf16.mxu1 %v7125_v33 }
 0x277   :  { %4839 = vmatpush1.bf16.msra.mxu0 %v6707_v59  ;;  %v6764_v59 = vld [vmem:[#allocation9 + $0x1c0] ss:$20 sps:$4 sm:$0xff]  }
 0x278   :  { %4840 = vmatprep.subr.bf16.mxu0 %v6715_v10  ;;  %v6772_v10 = vld [vmem:[#allocation9 + $0x1ec] ss:$20 sps:$4 sm:$0xff]  }
 0x279   :  { %6029 = vmatpush3.bf16.msra.mxu1 %v6690_v51  ;;  %v6770_v51 = vld [vmem:[#allocation9 + $0x1e8] ss:$20 sps:$4 sm:$0xff]  }
 0x27a   :  { %6030 = vmatprep.subr.bf16.mxu1 %v7125_v33 }
 0x27b   :  { %4841 = vmatpush1.bf16.msra.mxu0 %v6713_v11  ;;  %v6778_v11 = vld [vmem:[#allocation9 + $0x214] ss:$20 sps:$4 sm:$0xff]  }
 0x27c   :  { %4842 = vmatprep.subr.bf16.mxu0 %v6721_v13  ;;  %v6776_v13 = vld [vmem:[#allocation9 + $0x210] ss:$20 sps:$4 sm:$0xff]  }
 0x27d   :  { %6031 = vmatpush3.bf16.msra.mxu1 %v6691_v14  ;;  %v6784_v14 = vld [vmem:[#allocation9 + $0x23c] ss:$20 sps:$4 sm:$0xff]  }
 0x27e   :  { %6032 = vmatprep.subr.bf16.mxu1 %v7125_v33 }
 0x27f   :  { %4843 = vmatpush1.bf16.msra.mxu0 %v6719_v60  ;;  %v6782_v60 = vld [vmem:[#allocation9 + $0x238] ss:$20 sps:$4 sm:$0xff]  }
 0x280   :  { %4844 = vmatprep.subr.bf16.mxu0 %v6727_v20  ;;  %v6790_v20 = vld [vmem:[#allocation9 + $0x264] ss:$20 sps:$4 sm:$0xff]  }
 0x281   :  { %6033 = vmatpush3.bf16.msra.mxu1 %v6692_v15  ;;  %v6788_v15 = vld [vmem:[#allocation9 + $0x260] ss:$20 sps:$4 sm:$0xff]  }
 0x282   :  { %6034 = vmatprep.subr.bf16.mxu1 %v7125_v33 }
 0x283   :  { %4845 = vmatpush1.bf16.msra.mxu0 %v6725_v17  ;;  %v6796_v17 = vld [vmem:[#allocation9 + $0x28c] ss:$20 sps:$4 sm:$0xff]  }
 0x284   :  { %4846 = vmatprep.subr.bf16.mxu0 %v6733_v19  ;;  %v7376_v19 = vld [vmem:[#allocation7] sm:$0x1f] }
 0x285   :  { %6035 = vmatpush3.bf16.msra.mxu1 %v6693_v21  ;;  %v2079_v21 = vrot.slane %v7376_v19, %v7305_v42 }
 0x286   :  { %6036 = vmatprep.subr.bf16.mxu1 %v7125_v33 }
 0x287   :  { %4847 = vmatpush1.bf16.msra.mxu0 %v6731_v22  ;;  %v2083_v22 = vrot.slane %v7376_v19, %v7310_v45 }
 0x288   :  { %4848 = vmatprep.subr.bf16.mxu0 %v6739_v23  ;;  %v2091_v23 = vrot.slane %v7376_v19, %v7313_v46 }
 0x289   :  { %6037 = vmatpush3.bf16.msra.mxu1 %v6694_v24 }
 0x28a   :  { %4957 = vmatprep.subr.bf16.mxu1 %v6700_v26 }
 0x28b   :  { %4849 = vmatpush1.bf16.msra.mxu0 %v6737_v27 }
 0x28c   :  { %6039 = vmatmul.mubr.bf16.vlgmr.msra.gmra.mrb[16].mxu1 %v7357_v43  ;;  %4850 = vmatprep.subr.bf16.mxu0 %v6745_v28  ;;  %v6716_v43 = vld [vmem:[#allocation9 + $0x80] ss:$20 sps:$4 sm:$0xff]  }
 0x28d   :  { %4958 = vmatpush1.bf16.msra.mxu1 %v6698_v29 }
 0x28e   :  { %4959 = vmatprep.subr.bf16.mxu1 %v6706_v30 }
 0x28f   :  { %4851 = vmatpush1.bf16.msra.mxu0 %v6743_v31 }
 0x290   :  { %4852 = vmatprep.subr.bf16.mxu0 %v6751_v9 }
 0x291   :  { %4960 = vmatpush1.bf16.msra.mxu1 %v6704_v34 }
 0x292   :  { %4961 = vmatprep.subr.bf16.mxu1 %v6712_v36 }
 0x293   :  { %4853 = vmatpush1.bf16.msra.mxu0 %v6749_v44 }
 0x294   :  { %4854 = vmatprep.subr.bf16.mxu0 %v6757_v37 }
 0x295   :  { %4962 = vmatpush1.bf16.msra.mxu1 %v6710_v38 }
 0x296   :  { %4963 = vmatprep.subr.bf16.mxu1 %v6718_v39 }
 0x297   :  { %4855 = vmatpush1.bf16.msra.mxu0 %v6755_v16 }
 0x298   :  { %4856 = vmatprep.subr.bf16.mxu0 %v6763_v25 }
 0x299   :  { %4964 = vmatpush1.bf16.msra.mxu1 %v6716_v43 }
 0x29a   :  { %4965 = vmatprep.subr.bf16.mxu1 %v6724_v5  ;;  %v6791_v5 = vld [vmem:[#allocation9 + $0x280] ss:$20 sps:$4 sm:$0xff]  }
 0x29b   :  { %4857 = vmatpush1.bf16.msra.mxu0 %v6761_v52  ;;  %v6794_v52 = vld [vmem:[#allocation9 + $0x288] ss:$20 sps:$4 sm:$0xff]  }
 0x29c   :  { %4858 = vmatprep.subr.bf16.mxu0 %v6769_v12 }
 0x29d   :  { %4966 = vmatpush1.bf16.msra.mxu1 %v6722_v40 }
 0x29e   :  { %4967 = vmatprep.subr.bf16.mxu1 %v6730_v41  ;;  %v6799_v41 = vld [vmem:[#allocation9 + $0x2ac] ss:$20 sps:$4 sm:$0xff]  }
 0x29f   :  { %4859 = vmatpush1.bf16.msra.mxu0 %v6767_v47  ;;  %v6802_v47 = vld [vmem:[#allocation9 + $0x2b4] ss:$20 sps:$4 sm:$0xff]  }
 0x2a0   :  { %4860 = vmatprep.subr.bf16.mxu0 %v6775_v48 }
 0x2a1   :  { %4968 = vmatpush1.bf16.msra.mxu1 %v6728_v50  ;;  %v6797_v50 = vld [vmem:[#allocation9 + $0x2a8] ss:$20 sps:$4 sm:$0xff]  }
 0x2a2   :  { %4969 = vmatprep.subr.bf16.mxu1 %v6736_v53  ;;  %v6800_v53 = vld [vmem:[#allocation9 + $0x2b0] ss:$20 sps:$4 sm:$0xff]  }
 0x2a3   :  { %4861 = vmatpush1.bf16.msra.mxu0 %v6773_v54  ;;  %v6805_v54 = vld [vmem:[#allocation9 + $0x2d4] ss:$20 sps:$4 sm:$0xff]  }
 0x2a4   :  { %4862 = vmatprep.subr.bf16.mxu0 %v6781_v55  ;;  %v6808_v55 = vld [vmem:[#allocation9 + $0x2dc] ss:$20 sps:$4 sm:$0xff]  }
 0x2a5   :  { %4970 = vmatpush1.bf16.msra.mxu1 %v6734_v56  ;;  %v6803_v56 = vld [vmem:[#allocation9 + $0x2d0] ss:$20 sps:$4 sm:$0xff]  }
 0x2a6   :  { %4971 = vmatprep.subr.bf16.mxu1 %v6742_v57  ;;  %v6806_v57 = vld [vmem:[#allocation9 + $0x2d8] ss:$20 sps:$4 sm:$0xff]  }
 0x2a7   :  { %4863 = vmatpush1.bf16.msra.mxu0 %v6779_v58  ;;  %v6811_v58 = vld [vmem:[#allocation9 + $0x2fc] ss:$20 sps:$4 sm:$0xff]  }
 0x2a8   :  { %4864 = vmatprep.subr.bf16.mxu0 %v6787_v61  ;;  %v6814_v61 = vld [vmem:[#allocation9 + $0x304] ss:$20 sps:$4 sm:$0xff]  }
 0x2a9   :  { %4972 = vmatpush1.bf16.msra.mxu1 %v6740_v62  ;;  %v6809_v62 = vld [vmem:[#allocation9 + $0x2f8] ss:$20 sps:$4 sm:$0xff]  }
 0x2aa   :  { %4973 = vmatprep.subr.bf16.mxu1 %v6748_v63  ;;  %v6812_v63 = vld [vmem:[#allocation9 + $0x300] ss:$20 sps:$4 sm:$0xff]  }
 0x2ab   :  { %4865 = vmatpush1.bf16.msra.mxu0 %v6785_v0  ;;  %v6817_v0 = vld [vmem:[#allocation9 + $0x324] ss:$20 sps:$4 sm:$0xff]  }
 0x2ac   :  { %4875 = vmatprep.subr.bf16.mxu0 %v6793_v1  ;;  %v6820_v1 = vld [vmem:[#allocation9 + $0x32c] ss:$20 sps:$4 sm:$0xff]  }
 0x2ad   :  { %4974 = vmatpush1.bf16.msra.mxu1 %v6746_v2  ;;  %v6815_v2 = vld [vmem:[#allocation9 + $0x320] ss:$20 sps:$4 sm:$0xff]  }
 0x2ae   :  { %4975 = vmatprep.subr.bf16.mxu1 %v6754_v3  ;;  %v6818_v3 = vld [vmem:[#allocation9 + $0x328] ss:$20 sps:$4 sm:$0xff]  }
 0x2b1   :  { %4976 = vmatpush1.bf16.msra.mxu1 %v6752_v4  ;;  %v6823_v4 = vld [vmem:[#allocation9 + $0x34c] ss:$20 sps:$4 sm:$0xff]  }
 0x2b2   :  { %4977 = vmatprep.subr.bf16.mxu1 %v6760_v6  ;;  %v6826_v6 = vld [vmem:[#allocation9 + $0x354] ss:$20 sps:$4 sm:$0xff]  }
 0x2b5   :  { %4978 = vmatpush1.bf16.msra.mxu1 %v6758_v7  ;;  %v6821_v7 = vld [vmem:[#allocation9 + $0x348] ss:$20 sps:$4 sm:$0xff]  }
 0x2b6   :  { %4979 = vmatprep.subr.bf16.mxu1 %v6766_v8  ;;  %v6824_v8 = vld [vmem:[#allocation9 + $0x350] ss:$20 sps:$4 sm:$0xff]  }
 0x2b9   :  { %4980 = vmatpush1.bf16.msra.mxu1 %v6764_v59  ;;  %v6829_v59 = vld [vmem:[#allocation9 + $0x374] ss:$20 sps:$4 sm:$0xff]  }
 0x2ba   :  { %4981 = vmatprep.subr.bf16.mxu1 %v6772_v10  ;;  %v6832_v10 = vld [vmem:[#allocation9 + $0x37c] ss:$20 sps:$4 sm:$0xff]  }
 0x2bd   :  { %4982 = vmatpush1.bf16.msra.mxu1 %v6770_v51  ;;  %v6827_v51 = vld [vmem:[#allocation9 + $0x370] ss:$20 sps:$4 sm:$0xff]  }
 0x2be   :  { %4983 = vmatprep.subr.bf16.mxu1 %v6778_v11  ;;  %v6830_v11 = vld [vmem:[#allocation9 + $0x378] ss:$20 sps:$4 sm:$0xff]  }
 0x2c1   :  { %4984 = vmatpush1.bf16.msra.mxu1 %v6776_v13 }
 0x2c2   :  { %4985 = vmatprep.subr.bf16.mxu1 %v6784_v14  ;;  %v2095_v14 = vrot.slane %v7376_v19, %v7336_v35 }
 0x2c5   :  { %4986 = vmatpush1.bf16.msra.mxu1 %v6782_v60  ;;  %v6835_v60 = vld [vmem:[#allocation9 + $0x39c] ss:$20 sps:$4 sm:$0xff]  }
 0x2c6   :  { %4987 = vmatprep.subr.bf16.mxu1 %v6790_v20  ;;  %v6838_v20 = vld [vmem:[#allocation9 + $0x3a4] ss:$20 sps:$4 sm:$0xff]  }
 0x2c9   :  { %4988 = vmatpush1.bf16.msra.mxu1 %v6788_v15 }
 0x2ca   :  { %4998 = vmatprep.subr.bf16.mxu1 %v6796_v17 }
 0x31f   :  { %v3257_v24 = vpop.f32.mrb[8].mxu1  ;;  %v7384_v26 = vpop.f32.mrb[12].mxu0 }
 0x320   :  { %v6066_v27 = vadd.f32 %v3257_v24, %v2079_v21  ;;  %v3259_v28 = vpop.f32.mrb[9].mxu1  ;;  %v3382_v29 = vpop.f32.mrb[13].mxu0 }
 0x321   :  { %v6067_v30 = vadd.f32 %v3259_v28, %v2083_v22  ;;  %v6069_v31 = vadd.f32 %v3382_v29, %v2091_v23  ;;  %v3261_v9 = vpop.f32.mrb[10].mxu1  ;;  %v3384_v34 = vpop.f32.mrb[14].mxu0  ;;  %v6833_v29 = vld [vmem:[#allocation9 + $0x398] ss:$20 sps:$4 sm:$0xff]  }
 0x322   :  { %vm3507_vm6 = vcmp.gt.f32.partialorder %v6066_v27, 0.0  ;;  %v3512_v36 = vmul.f32 0.01, %v6066_v27  ;;  %v3262_v39 = vpop.f32.mrb[11].mxu1  ;;  %v3385_v16 = vpop.f32.mrb[15].mxu0 }
 0x323   :  { %vm3508_vm7 = vcmp.gt.f32.partialorder %v6067_v30, 0.0  ;;  %v3513_v44 = vmul.f32 0.01, %v6067_v30  ;;  %vm3510_vm8 = vcmp.gt.f32.partialorder %v6069_v31, 0.0  ;;  %v3515_v37 = vmul.f32 0.01, %v6069_v31 }
 0x324   :  { %v3517_v38 = vsel %vm3507_vm6, %v6066_v27, %v3512_v36  ;;  %v6841_v34 = vld [vmem:[#allocation9 + $0x3c4] ss:$20 sps:$4 sm:$0xff]   ;;  %v6844_v36 = vld [vmem:[#allocation9 + $0x3cc] ss:$20 sps:$4 sm:$0xff]   ;;  %v6850_v16 = vld [vmem:[#allocation9 + $0x3f4] ss:$20 sps:$4 sm:$0xff]  }
 0x325   :  { %v3518_v25 = vsel %vm3508_vm7, %v6067_v30, %v3513_v44  ;;  %v3520_v12 = vsel %vm3510_vm8, %v6069_v31, %v3515_v37  ;;  %v7388_v40 = vpack.c.bf16 %v3517_v38, %v3517_v38  ;;  %v6836_v30 = vld [vmem:[#allocation9 + $0x3a0] ss:$20 sps:$4 sm:$0xff]   ;;  %v6842_v38 = vld [vmem:[#allocation9 + $0x3c8] ss:$20 sps:$4 sm:$0xff]  }
 0x326   :  { %v7386_v43 = vpack.c.bf16 %v3518_v25, %v3518_v25  ;;  %v7394_v48 = vpack.c.bf16 %v3520_v12, %v3520_v12  ;;  %v6839_v37 = vld [vmem:[#allocation9 + $0x3c0] ss:$20 sps:$4 sm:$0xff]   ;;  %v6845_v25 = vld [vmem:[#allocation9 + $0x3e8] ss:$20 sps:$4 sm:$0xff]  }
 0x327   :  { %v6847_v39 = vld [vmem:[#allocation9 + $0x3ec] ss:$20 sps:$4 sm:$0xff]   ;;  %v6856_v12 = vld [vmem:[#allocation9 + $0x41c] ss:$20 sps:$4 sm:$0xff]  }
 0x328   :  { %4866 = vmatprep.mubr.bf16.mxu0 %v7386_v43  ;;  %4989 = vmatprep.mubr.bf16.mxu1 %v7386_v43 }
 0x329   :  { %4867 = vmatmul.mubr.bf16.vlgmr.msra.gmra.mrb[20].mxu0 %v7388_v40  ;;  %4990 = vmatmul.mubr.bf16.vlgmr.msra.gmra.mrb[20].mxu1 %v7388_v40 }
 0x32a   :  { %4876 = vmatpush1.bf16.msra.mxu0 %v6791_v5  ;;  %4999 = vmatpush1.bf16.msra.mxu1 %v6794_v52  ;;  %v6848_v5 = vld [vmem:[#allocation9 + $0x3f0] ss:$20 sps:$4 sm:$0xff]   ;;  %v6853_v52 = vld [vmem:[#allocation9 + $0x414] ss:$20 sps:$4 sm:$0xff]  }
 0x32b   :  { %4907 = vmatprep.mubr.bf16.mxu0 %v7394_v48  ;;  %5030 = vmatprep.mubr.bf16.mxu1 %v7394_v48 }
 0x32c   :  { %4877 = vmatprep.subr.bf16.mxu0 %v6799_v41  ;;  %5000 = vmatprep.subr.bf16.mxu1 %v6802_v47  ;;  %v6851_v41 = vld [vmem:[#allocation9 + $0x410] ss:$20 sps:$4 sm:$0xff]   ;;  %v6854_v47 = vld [vmem:[#allocation9 + $0x418] ss:$20 sps:$4 sm:$0xff]  }
 0x32e   :  { %4878 = vmatpush1.bf16.msra.mxu0 %v6797_v50  ;;  %5001 = vmatpush1.bf16.msra.mxu1 %v6800_v53  ;;  %v6859_v50 = vld [vmem:[#allocation9 + $0x43c] ss:$20 sps:$4 sm:$0xff]   ;;  %v6862_v53 = vld [vmem:[#allocation9 + $0x444] ss:$20 sps:$4 sm:$0xff]  }
 0x32f   :  { %4879 = vmatprep.subr.bf16.mxu0 %v6805_v54  ;;  %5002 = vmatprep.subr.bf16.mxu1 %v6808_v55  ;;  %v6857_v54 = vld [vmem:[#allocation9 + $0x438] ss:$20 sps:$4 sm:$0xff]   ;;  %v6860_v55 = vld [vmem:[#allocation9 + $0x440] ss:$20 sps:$4 sm:$0xff]  }
 0x332   :  { %4880 = vmatpush1.bf16.msra.mxu0 %v6803_v56  ;;  %5003 = vmatpush1.bf16.msra.mxu1 %v6806_v57  ;;  %v6865_v56 = vld [vmem:[#allocation9 + $0x464] ss:$20 sps:$4 sm:$0xff]   ;;  %v6868_v57 = vld [vmem:[#allocation9 + $0x46c] ss:$20 sps:$4 sm:$0xff]  }
 0x333   :  { %4881 = vmatprep.subr.bf16.mxu0 %v6811_v58  ;;  %5004 = vmatprep.subr.bf16.mxu1 %v6814_v61  ;;  %v6863_v58 = vld [vmem:[#allocation9 + $0x460] ss:$20 sps:$4 sm:$0xff]   ;;  %v6866_v61 = vld [vmem:[#allocation9 + $0x468] ss:$20 sps:$4 sm:$0xff]  }
 0x336   :  { %4882 = vmatpush1.bf16.msra.mxu0 %v6809_v62  ;;  %5005 = vmatpush1.bf16.msra.mxu1 %v6812_v63  ;;  %v6871_v62 = vld [vmem:[#allocation9 + $0x48c] ss:$20 sps:$4 sm:$0xff]   ;;  %v6874_v63 = vld [vmem:[#allocation9 + $0x494] ss:$20 sps:$4 sm:$0xff]  }
 0x337   :  { %4883 = vmatprep.subr.bf16.mxu0 %v6817_v0  ;;  %5006 = vmatprep.subr.bf16.mxu1 %v6820_v1  ;;  %v2087_v0 = vrot.slane %v7376_v19, %v7341_v18  ;;  %v6869_v1 = vld [vmem:[#allocation9 + $0x488] ss:$20 sps:$4 sm:$0xff]  }
 0x33a   :  { %4884 = vmatpush1.bf16.msra.mxu0 %v6815_v2  ;;  %5007 = vmatpush1.bf16.msra.mxu1 %v6818_v3  ;;  %v6872_v2 = vld [vmem:[#allocation9 + $0x490] ss:$20 sps:$4 sm:$0xff]   ;;  %v6877_v3 = vld [vmem:[#allocation9 + $0x4b4] ss:$20 sps:$4 sm:$0xff]  }
 0x33b   :  { %4885 = vmatprep.subr.bf16.mxu0 %v6823_v4  ;;  %5008 = vmatprep.subr.bf16.mxu1 %v6826_v6  ;;  %v6880_v4 = vld [vmem:[#allocation9 + $0x4bc] ss:$20 sps:$4 sm:$0xff]   ;;  %v6068_v6 = vadd.f32 %v7384_v26, %v2087_v0  ;;  %v6884_v26 = vld [vmem:[#allocation9 + $0x4e0] ss:$20 sps:$4 sm:$0xff]  }
 0x33c   :  { %v6936_v0 = vld [vmem:[#allocation9 + $0x3d0] ss:$20 sps:$4 sm:$0xff]  }
 0x33d   :  { %v3514_v19 = vmul.f32 0.01, %v6068_v6  ;;  %vm3509_vm9 = vcmp.gt.f32.partialorder %v6068_v6, 0.0 }
 0x33e   :  { %4886 = vmatpush1.bf16.msra.mxu0 %v6821_v7  ;;  %5009 = vmatpush1.bf16.msra.mxu1 %v6824_v8  ;;  %v6875_v7 = vld [vmem:[#allocation9 + $0x4b0] ss:$20 sps:$4 sm:$0xff]   ;;  %v6878_v8 = vld [vmem:[#allocation9 + $0x4b8] ss:$20 sps:$4 sm:$0xff]  }
 0x33f   :  { %v5912_v13 = vpop.f32.mrb[12].mxu1  ;;  %4887 = vmatprep.subr.bf16.mxu0 %v6829_v59  ;;  %5010 = vmatprep.subr.bf16.mxu1 %v6832_v10  ;;  %v6883_v10 = vld [vmem:[#allocation9 + $0x4dc] ss:$20 sps:$4 sm:$0xff]  }
 0x340   :  { %v5934_v15 = vpop.f32.mrb[16].mxu0  ;;  %v5913_v17 = vpop.f32.mrb[13].mxu1 }
 0x341   :  { %v5914_v21 = vadd.f32 %v5913_v17, %v5912_v13  ;;  %v5935_v22 = vpop.f32.mrb[17].mxu0  ;;  %v5915_v23 = vpop.f32.mrb[14].mxu1  ;;  %v6892_v17 = vld [vmem:[#allocation9 + $0x50c] ss:$20 sps:$4 sm:$0xff]  }
 0x342   :  { %v5936_v24 = vadd.f32 %v5935_v22, %v5934_v15  ;;  %v5937_v27 = vpop.f32.mrb[18].mxu0  ;;  %4888 = vmatpush1.bf16.msra.mxu0 %v6827_v51  ;;  %5011 = vmatpush1.bf16.msra.mxu1 %v6830_v11  ;;  %v5916_v28 = vpop.f32.mrb[15].mxu1  ;;  %v6886_v51 = vld [vmem:[#allocation9 + $0x4e4] ss:$20 sps:$4 sm:$0xff]   ;;  %v6887_v22 = vld [vmem:[#allocation9 + $0x500] ss:$20 sps:$4 sm:$0xff]  }
 0x343   :  { %v3422_v31 = vadd.f32 %v5914_v21, %v2095_v14  ;;  %v5938_v9 = vpop.f32.mrb[19].mxu0  ;;  %4889 = vmatprep.subr.bf16.mxu0 %v6835_v60  ;;  %5012 = vmatprep.subr.bf16.mxu1 %v6838_v20  ;;  %v6881_v20 = vld [vmem:[#allocation9 + $0x4d8] ss:$20 sps:$4 sm:$0xff]   ;;  %v3519_v21 = vsel %vm3509_vm9, %v6068_v6, %v3514_v19  ;;  %v6890_v23 = vld [vmem:[#allocation9 + $0x508] ss:$20 sps:$4 sm:$0xff]  }
 0x344   :  { %v6889_v15 = vld [vmem:[#allocation9 + $0x504] ss:$20 sps:$4 sm:$0xff]   ;;  %v6895_v27 = vld [vmem:[#allocation9 + $0x52c] ss:$20 sps:$4 sm:$0xff]   ;;  %v6898_v28 = vld [vmem:[#allocation9 + $0x534] ss:$20 sps:$4 sm:$0xff]  }
 0x345   :  { %v3462_v44 = vadd.f32 %v5936_v24, %v3422_v31  ;;  %v7405_v24 = vpack.c.bf16 %v3519_v21, %v3519_v21  ;;  %v6901_v31 = vld [vmem:[#allocation9 + $0x554] ss:$20 sps:$4 sm:$0xff]   ;;  %v6904_v9 = vld [vmem:[#allocation9 + $0x55c] ss:$20 sps:$4 sm:$0xff]   ;;  %v6939_v6 = vld [vmem:[#allocation9 + $0x178] ss:$20 sps:$4 sm:$0xff]  }
 0x346   :  { %4890 = vmatpush1.bf16.msra.mxu0 %v6833_v29  ;;  %5013 = vmatpush1.bf16.msra.mxu1 %v6836_v30  ;;  %v6893_v29 = vld [vmem:[#allocation9 + $0x528] ss:$20 sps:$4 sm:$0xff]   ;;  %v6896_v30 = vld [vmem:[#allocation9 + $0x530] ss:$20 sps:$4 sm:$0xff]   ;;  %v6945_v19 = vld [vmem:[#allocation9 + $0x60] ss:$20 sps:$4 sm:$0xff]  }
 0x347   :  { %4891 = vmatprep.subr.bf16.mxu0 %v6841_v34  ;;  %5014 = vmatprep.subr.bf16.mxu1 %v6844_v36  ;;  %v6899_v34 = vld [vmem:[#allocation9 + $0x550] ss:$20 sps:$4 sm:$0xff]   ;;  %v6902_v36 = vld [vmem:[#allocation9 + $0x558] ss:$20 sps:$4 sm:$0xff]  }
 0x348   :  { %v6956_v21 = vld [vmem:[#allocation9 + $0x498] ss:$20 sps:$4 sm:$0xff]  }
 0x34a   :  { %4892 = vmatpush1.bf16.msra.mxu0 %v6839_v37  ;;  %5015 = vmatpush1.bf16.msra.mxu1 %v6842_v38  ;;  %v6910_v37 = vld [vmem:[#allocation9 + $0x584] ss:$20 sps:$4 sm:$0xff]  }
 0x34b   :  { %4893 = vmatprep.subr.bf16.mxu0 %v6847_v39  ;;  %5016 = vmatprep.subr.bf16.mxu1 %v6850_v16  ;;  %v6905_v38 = vld [vmem:[#allocation9 + $0x578] ss:$20 sps:$4 sm:$0xff]   ;;  %v6908_v39 = vld [vmem:[#allocation9 + $0x580] ss:$20 sps:$4 sm:$0xff]  }
 0x34c   :  { %v6913_v16 = vld [vmem:[#allocation9 + $0x5a4] ss:$20 sps:$4 sm:$0xff]  }
 0x34e   :  { %4894 = vmatpush1.bf16.msra.mxu0 %v6845_v25  ;;  %5017 = vmatpush1.bf16.msra.mxu1 %v6848_v5  ;;  %v6916_v25 = vld [vmem:[#allocation9 + $0x5ac] ss:$20 sps:$4 sm:$0xff]  }
 0x34f   :  { %4895 = vmatprep.subr.bf16.mxu0 %v6853_v52  ;;  %5018 = vmatprep.subr.bf16.mxu1 %v6856_v12  ;;  %v6911_v5 = vld [vmem:[#allocation9 + $0x5a0] ss:$20 sps:$4 sm:$0xff]  }
 0x350   :  { %v6919_v52 = vld [vmem:[#allocation9 + $0x5cc] ss:$20 sps:$4 sm:$0xff]   ;;  %v6922_v12 = vld [vmem:[#allocation9 + $0x5d4] ss:$20 sps:$4 sm:$0xff]  }
 0x352   :  { %4896 = vmatpush1.bf16.msra.mxu0 %v6851_v41  ;;  %5019 = vmatpush1.bf16.msra.mxu1 %v6854_v47  ;;  %v6917_v41 = vld [vmem:[#allocation9 + $0x5c8] ss:$20 sps:$4 sm:$0xff]   ;;  %v6920_v47 = vld [vmem:[#allocation9 + $0x5d0] ss:$20 sps:$4 sm:$0xff]  }
 0x353   :  { %4897 = vmatprep.subr.bf16.mxu0 %v6859_v50  ;;  %5020 = vmatprep.subr.bf16.mxu1 %v6862_v53  ;;  %v6925_v50 = vld [vmem:[#allocation9 + $0x5f4] ss:$20 sps:$4 sm:$0xff]   ;;  %v6928_v53 = vld [vmem:[#allocation9 + $0x5fc] ss:$20 sps:$4 sm:$0xff]  }
 0x356   :  { %4898 = vmatpush1.bf16.msra.mxu0 %v6857_v54  ;;  %5021 = vmatpush1.bf16.msra.mxu1 %v6860_v55  ;;  %v6923_v54 = vld [vmem:[#allocation9 + $0x5f0] ss:$20 sps:$4 sm:$0xff]   ;;  %v6926_v55 = vld [vmem:[#allocation9 + $0x5f8] ss:$20 sps:$4 sm:$0xff]  }
 0x357   :  { %4899 = vmatprep.subr.bf16.mxu0 %v6865_v56  ;;  %5022 = vmatprep.subr.bf16.mxu1 %v6868_v57  ;;  %v6931_v56 = vld [vmem:[#allocation9 + $0x61c] ss:$20 sps:$4 sm:$0xff]   ;;  %v6934_v57 = vld [vmem:[#allocation9 + $0x624] ss:$20 sps:$4 sm:$0xff]  }
 0x35a   :  { %4900 = vmatpush1.bf16.msra.mxu0 %v6863_v58  ;;  %5023 = vmatpush1.bf16.msra.mxu1 %v6866_v61  ;;  %v6929_v61 = vld [vmem:[#allocation9 + $0x618] ss:$20 sps:$4 sm:$0xff]  }
 0x35b   :  { %4901 = vmatprep.subr.bf16.mxu0 %v6871_v62  ;;  %5024 = vmatprep.subr.bf16.mxu1 %v6874_v63  ;;  %v6932_v62 = vld [vmem:[#allocation9 + $0x620] ss:$20 sps:$4 sm:$0xff]   ;;  %v6935_v63 = vld [vmem:[#allocation9 + $0x150] ss:$20 sps:$4 sm:$0xff]  }
 0x35e   :  { %4902 = vmatpush1.bf16.msra.mxu0 %v6869_v1  ;;  %5025 = vmatpush1.bf16.msra.mxu1 %v6872_v2  ;;  %v6937_v2 = vld [vmem:[#allocation9 + $0x10] ss:$20 sps:$4 sm:$0xff]  }
 0x35f   :  { %v3501_v59 = vpop.f32.mrb[16].mxu1  ;;  %4903 = vmatprep.subr.bf16.mxu0 %v6877_v3  ;;  %5026 = vmatprep.subr.bf16.mxu1 %v6880_v4  ;;  %v6938_v4 = vld [vmem:[#allocation9 + $0x290] ss:$20 sps:$4 sm:$0xff]  }
 0x360   :  { %v7403_v11 = vadd.f32 %v3501_v59, %v3462_v44  ;;  %v6040_v13 = vpop.f32.mrb[17].mxu1  ;;  %v6907_v44 = vld [vmem:[#allocation9 + $0x57c] ss:$20 sps:$4 sm:$0xff]   ;;  %v6942_v59 = vld [vmem:[#allocation9 + $0x2b8] ss:$20 sps:$4 sm:$0xff]  }
 0x361   :  { %v3504_v14 = vpop.f32.mrb[18].mxu1  ;;  %v6947_v13 = vld [vmem:[#allocation9 + $0x1c8] ss:$20 sps:$4 sm:$0xff]  }
 0x362   :  { %4904 = vmatpush1.bf16.msra.mxu0 %v6875_v7  ;;  %5027 = vmatpush1.bf16.msra.mxu1 %v6878_v8  ;;  %v6041_v60 = vpop.f32.mrb[19].mxu1  ;;  %v3516_v58 = vmul.f32 0.01, %v7403_v11  ;;  %vm3511_vm10 = vcmp.gt.f32.partialorder %v7403_v11, 0.0  ;;  %v6940_v7 = vld [vmem:[#allocation9 + $0x3f8] ss:$20 sps:$4 sm:$0xff]  }
 0x363   :  { %4905 = vmatprep.subr.bf16.mxu0 %v6883_v10  ;;  %5028 = vmatprep.subr.bf16.mxu1 %v6886_v51  ;;  %v6941_v8 = vld [vmem:[#allocation9 + $0x38] ss:$20 sps:$4 sm:$0xff]   ;;  %v6943_v10 = vld [vmem:[#allocation9 + $0x1a0] ss:$20 sps:$4 sm:$0xff]   ;;  %v6948_v14 = vld [vmem:[#allocation9 + $0x448] ss:$20 sps:$4 sm:$0xff]  }
 0x364   :  { %v3521_v1 = vsel %vm3511_vm10, %v7403_v11, %v3516_v58  ;;  %v6944_v51 = vld [vmem:[#allocation9 + $0x420] ss:$20 sps:$4 sm:$0xff]   ;;  %v6949_v60 = vld [vmem:[#allocation9 + $0x88] ss:$20 sps:$4 sm:$0xff]  }
 0x365   :  { %v7414_v3 = vpack.c.bf16 %v3521_v1, %v3521_v1  ;;  %v6946_v11 = vld [vmem:[#allocation9 + $0x2e0] ss:$20 sps:$4 sm:$0xff]  }
 0x366   :  { %4906 = vmatpush1.bf16.msra.mxu0 %v6881_v20  ;;  %5029 = vmatpush1.bf16.msra.mxu1 %v6884_v26  ;;  %v6951_v20 = vld [vmem:[#allocation9 + $0x1f0] ss:$20 sps:$4 sm:$0xff]  }
 0x367   :  { %4916 = vmatprep.subr.bf16.mxu0 %v6889_v15  ;;  %5039 = vmatprep.subr.bf16.mxu1 %v6892_v17  ;;  %v6953_v26 = vld [vmem:[#allocation9 + $0xb0] ss:$20 sps:$4 sm:$0xff]   ;;  %v6955_v17 = vld [vmem:[#allocation9 + $0x218] ss:$20 sps:$4 sm:$0xff]  }
 0x368   :  { %v6954_v15 = vld [vmem:[#allocation9 + $0x330] ss:$20 sps:$4 sm:$0xff]  }
 0x369   :  { %4908 = vmatmul.mubr.bf16.vlgmr.msra.gmra.mrb[20].mxu0 %v7405_v24  ;;  %5031 = vmatmul.mubr.bf16.vlgmr.msra.gmra.mrb[20].mxu1 %v7405_v24 }
 0x36a   :  { %4917 = vmatpush1.bf16.msra.mxu0 %v6887_v22  ;;  %5040 = vmatpush1.bf16.msra.mxu1 %v6890_v23  ;;  %v6957_v22 = vld [vmem:[#allocation9 + $0xd8] ss:$20 sps:$4 sm:$0xff]  }
 0x36b   :  { %4918 = vmatprep.subr.bf16.mxu0 %v6895_v27  ;;  %5041 = vmatprep.subr.bf16.mxu1 %v6898_v28  ;;  %v6958_v23 = vld [vmem:[#allocation9 + $0x358] ss:$20 sps:$4 sm:$0xff]   ;;  %v6959_v27 = vld [vmem:[#allocation9 + $0x240] ss:$20 sps:$4 sm:$0xff]  }
 0x36c   :  { %4948 = vmatprep.mubr.bf16.mxu0 %v7124_v32  ;;  %5071 = vmatprep.mubr.bf16.mxu1 %v7124_v32  ;;  %v6914_v32 = vld [vmem:[#allocation9 + $0x5a8] ss:$20 sps:$4 sm:$0xff]   ;;  %v6960_v28 = vld [vmem:[#allocation9 + $0x4c0] ss:$20 sps:$4 sm:$0xff]  }
 0x36e   :  { %4919 = vmatpush1.bf16.msra.mxu0 %v6893_v29  ;;  %5042 = vmatpush1.bf16.msra.mxu1 %v6896_v30  ;;  %v6961_v29 = vld [vmem:[#allocation9 + $0x100] ss:$20 sps:$4 sm:$0xff]  }
 0x36f   :  { %4920 = vmatprep.subr.bf16.mxu0 %v6901_v31  ;;  %5043 = vmatprep.subr.bf16.mxu1 %v6904_v9  ;;  %v6962_v30 = vld [vmem:[#allocation9 + $0x380] ss:$20 sps:$4 sm:$0xff]   ;;  %v6963_v31 = vld [vmem:[#allocation9 + $0x268] ss:$20 sps:$4 sm:$0xff]  }
 0x370   :  { %v6964_v9 = vld [vmem:[#allocation9 + $0x4e8] ss:$20 sps:$4 sm:$0xff]  }
 0x372   :  { %4921 = vmatpush1.bf16.msra.mxu0 %v6899_v34  ;;  %5044 = vmatpush1.bf16.msra.mxu1 %v6902_v36  ;;  %v6965_v34 = vld [vmem:[#allocation9 + $0x128] ss:$20 sps:$4 sm:$0xff]  }
 0x373   :  { %4922 = vmatprep.subr.bf16.mxu0 %v6907_v44  ;;  %5045 = vmatprep.subr.bf16.mxu1 %v6910_v37  ;;  %v6966_v36 = vld [vmem:[#allocation9 + $0x3a8] ss:$20 sps:$4 sm:$0xff]   ;;  %v6967_v44 = vld [vmem:[#allocation9 + $0x510] ss:$20 sps:$4 sm:$0xff]   ;;  %v6968_v37 = vld [vmem:[#allocation9 + $0x538] ss:$20 sps:$4 sm:$0xff]  }
 0x376   :  { %4923 = vmatpush1.bf16.msra.mxu0 %v6905_v38  ;;  %5046 = vmatpush1.bf16.msra.mxu1 %v6908_v39  ;;  %v6969_v38 = vld [vmem:[#allocation9 + $0x560] ss:$20 sps:$4 sm:$0xff]   ;;  %v6970_v39 = vld [vmem:[#allocation9 + $0x588] ss:$20 sps:$4 sm:$0xff]  }
 0x377   :  { %4924 = vmatprep.subr.bf16.mxu0 %v6913_v16  ;;  %5047 = vmatprep.subr.bf16.mxu1 %v6916_v25  ;;  %v6971_v16 = vld [vmem:[#allocation9 + $0x5b0] ss:$20 sps:$4 sm:$0xff]   ;;  %v6974_v25 = vld [vmem:[#allocation9 + $0x628] ss:$20 sps:$4 sm:$0xff]  }
 0x37a   :  { %4925 = vmatpush1.bf16.msra.mxu0 %v6911_v5  ;;  %5048 = vmatpush1.bf16.msra.mxu1 %v6914_v32  ;;  %v3767_v5 = vld [vmem:[#allocation10] sm:$0x1f] }
 0x37b   :  { %4926 = vmatprep.subr.bf16.mxu0 %v6919_v52  ;;  %5049 = vmatprep.subr.bf16.mxu1 %v6922_v12  ;;  %v3772_v32 = vrot.slane %v3767_v5, %v7305_v42  ;;  %v3780_v52 = vrot.slane %v3767_v5, %v7341_v18  ;;  %v3776_v12 = vrot.slane %v3767_v5, %v7310_v45 }
 0x37e   :  { %4927 = vmatpush1.bf16.msra.mxu0 %v6917_v41  ;;  %5050 = vmatpush1.bf16.msra.mxu1 %v6920_v47  ;;  %v3784_v41 = vrot.slane %v3767_v5, %v7313_v46 }
 0x37f   :  { %4928 = vmatprep.subr.bf16.mxu0 %v6925_v50  ;;  %5051 = vmatprep.subr.bf16.mxu1 %v6928_v53 }
 0x382   :  { %4929 = vmatpush1.bf16.msra.mxu0 %v6923_v54  ;;  %5052 = vmatpush1.bf16.msra.mxu1 %v6926_v55 }
 0x383   :  { %4930 = vmatprep.subr.bf16.mxu0 %v6931_v56  ;;  %5053 = vmatprep.subr.bf16.mxu1 %v6934_v57 }
 0x386   :  { %4931 = vmatpush1.bf16.msra.mxu0 %v6929_v61  ;;  %5054 = vmatpush1.bf16.msra.mxu1 %v6932_v62 }
 0x387   :  { %5949 = vmatprep.subr.bf16.mxu0 %v6935_v63  ;;  %5971 = vmatprep.subr.bf16.mxu1 %v6936_v0 }
 0x389   :  { %4949 = vmatmul.mubr.bf16.vlgmr.msra.gmra.mrb[20].mxu0 %v7414_v3  ;;  %5072 = vmatmul.mubr.bf16.vlgmr.msra.gmra.mrb[20].mxu1 %v7414_v3 }
 0x38a   :  { %5950 = vmatpush3.bf16.msra.mxu0 %v6937_v2  ;;  %5112 = vmatprep.mubr.bf16.mxu0 %v7386_v43  ;;  %v6950_v43 = vld [vmem:[#allocation9 + $0x308] ss:$20 sps:$4 sm:$0xff]   ;;  %v3788_v2 = vrot.slane %v3767_v5, %v7336_v35 }
 0x38b   :  { %5972 = vmatpush3.bf16.msra.mxu1 %v6938_v4  ;;  %5152 = vmatprep.mubr.bf16.mxu1 %v7394_v48  ;;  %v6952_v48 = vld [vmem:[#allocation9 + $0x470] ss:$20 sps:$4 sm:$0xff]  }
 0x38c   :  { %5951 = vmatprep.subr.bf16.mxu0 %v6939_v6  ;;  %5973 = vmatprep.subr.bf16.mxu1 %v6940_v7 }
 0x38e   :  { %5952 = vmatpush3.bf16.msra.mxu0 %v6941_v8 }
 0x38f   :  { %5974 = vmatpush3.bf16.msra.mxu1 %v6942_v59  ;;  %5953 = vmatprep.subr.bf16.mxu0 %v6943_v10 }
 0x390   :  { %5975 = vmatprep.subr.bf16.mxu1 %v6944_v51 }
 0x392   :  { %5954 = vmatpush3.bf16.msra.mxu0 %v6945_v19 }
 0x393   :  { %5976 = vmatpush3.bf16.msra.mxu1 %v6946_v11  ;;  %5955 = vmatprep.subr.bf16.mxu0 %v6947_v13 }
 0x394   :  { %5977 = vmatprep.subr.bf16.mxu1 %v6948_v14 }
 0x396   :  { %5956 = vmatpush3.bf16.msra.mxu0 %v6949_v60 }
 0x397   :  { %5978 = vmatpush3.bf16.msra.mxu1 %v6950_v43  ;;  %5957 = vmatprep.subr.bf16.mxu0 %v6951_v20 }
 0x398   :  { %5979 = vmatprep.subr.bf16.mxu1 %v6952_v48 }
 0x39a   :  { %5958 = vmatpush3.bf16.msra.mxu0 %v6953_v26 }
 0x39b   :  { %5980 = vmatpush3.bf16.msra.mxu1 %v6954_v15  ;;  %5959 = vmatprep.subr.bf16.mxu0 %v6955_v17 }
 0x39c   :  { %5981 = vmatprep.subr.bf16.mxu1 %v6956_v21 }
 0x39e   :  { %5960 = vmatpush3.bf16.msra.mxu0 %v6957_v22 }
 0x39f   :  { %5982 = vmatpush3.bf16.msra.mxu1 %v6958_v23  ;;  %5961 = vmatprep.subr.bf16.mxu0 %v6959_v27 }
 0x3a0   :  { %5983 = vmatprep.subr.bf16.mxu1 %v6960_v28 }
 0x3a2   :  { %5962 = vmatpush3.bf16.msra.mxu0 %v6961_v29 }
 0x3a3   :  { %5984 = vmatpush3.bf16.msra.mxu1 %v6962_v30  ;;  %5963 = vmatprep.subr.bf16.mxu0 %v6963_v31 }
 0x3a4   :  { %5985 = vmatprep.subr.bf16.mxu1 %v6964_v9 }
 0x3a6   :  { %5964 = vmatpush3.bf16.msra.mxu0 %v6965_v34 }
 0x3a7   :  { %5986 = vmatpush3.bf16.msra.mxu1 %v6966_v36  ;;  %6042 = vmatprep.subr.bf16.mxu0 %v7125_v33 }
 0x3a9   :  { %5113 = vmatmul.mubr.bf16.vlgmr.msra.gmra.mrb[24].mxu0 %v7388_v40  ;;  %v6972_v40 = vld [vmem:[#allocation9 + $0x5d8] ss:$20 sps:$4 sm:$0xff]  }
 0x3aa   :  { %5153 = vmatmul.mubr.bf16.vlgmr.msra.gmra.mrb[24].mxu1 %v7405_v24  ;;  %6043 = vmatpush3.bf16.msra.mxu0 %v6967_v44  ;;  %v6973_v24 = vld [vmem:[#allocation9 + $0x600] ss:$20 sps:$4 sm:$0xff]  }
 0x3ab   :  { %6044 = vmatprep.subr.bf16.mxu0 %v7125_v33  ;;  %6058 = vmatprep.mubr.msk.bf16.mxu0 %vm7126_vm0, %v7125_v33 }
 0x3ae   :  { %6045 = vmatpush3.bf16.msra.mxu0 %v6968_v37 }
 0x3af   :  { %6046 = vmatprep.subr.bf16.mxu0 %v7125_v33 }
 0x3b2   :  { %6047 = vmatpush3.bf16.msra.mxu0 %v6969_v38 }
 0x3b3   :  { %6048 = vmatprep.subr.bf16.mxu0 %v7125_v33 }
 0x3b6   :  { %6049 = vmatpush3.bf16.msra.mxu0 %v6970_v39 }
 0x3b7   :  { %6050 = vmatprep.subr.bf16.mxu0 %v7125_v33 }
 0x3ba   :  { %6051 = vmatpush3.bf16.msra.mxu0 %v6971_v16 }
 0x3bb   :  { %6052 = vmatprep.subr.bf16.mxu0 %v7125_v33 }
 0x3be   :  { %6053 = vmatpush3.bf16.msra.mxu0 %v6972_v40 }
 0x3bf   :  { %6054 = vmatprep.subr.bf16.mxu0 %v7125_v33 }
 0x3c2   :  { %6055 = vmatpush3.bf16.msra.mxu0 %v6973_v24 }
 0x3c3   :  { %6056 = vmatprep.subr.bf16.mxu0 %v7125_v33 }
 0x3c6   :  { %6057 = vmatpush3.bf16.msra.mxu0 %v6974_v25 }
 0x3c9   :  { %6059 = vmatmul.mubr.bf16.vlgmr.msra.gmra.mrb[28].mxu0 %v7414_v3 }
 0x45c   :  { %v4950_v47 = vpop.f32.mrb[20].mxu0  ;;  %v5073_v50 = vpop.f32.mrb[20].mxu1 }
 0x45d   :  { %v6070_v53 = vadd.f32 %v4950_v47, %v3772_v32  ;;  %v6072_v54 = vadd.f32 %v5073_v50, %v3780_v52  ;;  %v4952_v55 = vpop.f32.mrb[21].mxu0  ;;  %v5075_v56 = vpop.f32.mrb[21].mxu1 }
 0x45e   :  { %v6071_v57 = vadd.f32 %v4952_v55, %v3776_v12  ;;  %v6073_v33 = vadd.f32 %v5075_v56, %v3784_v41  ;;  %v4954_v58 = vpop.f32.mrb[22].mxu0  ;;  %v5077_v61 = vpop.f32.mrb[22].mxu1 }
 0x45f   :  { %v4955_v62 = vpop.f32.mrb[23].mxu0  ;;  %v5078_v63 = vpop.f32.mrb[23].mxu1 }
 0x460   :  { %v5205_v0 = vcombine.low %v6070_v53, %v6071_v57  ;;  %v5206_v42 = vcombine.low %v6072_v54, %v6073_v33 }
 0x462   :  { %v5213_v18 = vrot.slane %v5205_v0, %v7251_v49  ;;  %v5220_v45 = vrot.slane %v5206_v42, %v7251_v49 }
 0x464   :  { %v5221_v1 = vcombine.low %v5213_v18, %v5220_v45 }
 0x466   :  { %5231 = vst [vmem:[%s7453_s7] sm:$0xff] %v5221_v1 }
 0x47c   :  { %v5965_v46 = vpop.f32.mrb[24].mxu0 }
 0x47d   :  { %v5987_v3 = vpop.f32.mrb[24].mxu1  ;;  %v5966_v4 = vpop.f32.mrb[25].mxu0 }
 0x47e   :  { %v5967_v6 = vadd.f32 %v5966_v4, %v5965_v46  ;;  %v5988_v7 = vpop.f32.mrb[25].mxu1  ;;  %v5968_v8 = vpop.f32.mrb[26].mxu0 }
 0x47f   :  { %v5989_v59 = vadd.f32 %v5988_v7, %v5987_v3  ;;  %v5990_v10 = vpop.f32.mrb[26].mxu1  ;;  %v5969_v51 = vpop.f32.mrb[27].mxu0 }
 0x480   :  { %v5115_v19 = vadd.f32 %v5967_v6, %v3788_v2  ;;  %v5991_v11 = vpop.f32.mrb[27].mxu1 }
 0x482   :  { %v5155_v13 = vadd.f32 %v5989_v59, %v5115_v19 }
 0x49c   :  { %v5194_v49 = vpop.f32.mrb[28].mxu0 }
 0x49d   :  { %v5195_v14 = vadd.f32 %v5194_v49, %v5155_v13  ;;  %v6060_v60 = vpop.f32.mrb[29].mxu0 }
 0x49e   :  { %v5197_v43 = vpop.f32.mrb[30].mxu0 }
 0x49f   :  { %5842 = vst.sshfl [vmem:[%s7453_s7 + $0x8] sm:$0x3 pattern:$0x76325410] %v5195_v14  ;;  %v6061_v35 = vpop.f32.mrb[31].mxu0 }
 0x4a0   :  { %5237 = vsyncpa [#allocation3], 1 }
 0x4a1   :  { %5238 = vsyncpa [#allocation5], 1 }
 0x4a2   :  { %5239 = vsyncpa [#allocation8], 1 }
 0x4a3   :  { %5240 = vsyncpa [#allocation11], 1 }

// kernel: baseline_forward.5
= control target key start
LH: loop header
LB: loop body
LE: loop exit
PB: predicated region body
PF: predicated region fallthrough
CT: control target
= control target key end

     0   :  { %s8855_s18 = smov 0   ;;  %s8857_s19 = smov 0   ;;  %s9802_s0 = inlined_call_operand.vmem [shape: f32[2,8,3], index: 0, kind: input, shape index: {}]   ;;  %s9803_s1 = inlined_call_operand.vmem [shape: f32[2,2,1,768], index: 1, kind: input, shape index: {}]   ;;  %s9804_s2 = inlined_call_operand.vmem [shape: f32[2,3,768], index: 2, kind: input, shape index: {}]   ;;  %s9805_s3 = inlined_call_operand.vmem [shape: bf16[2,768,512], index: 3, kind: input, shape index: {}]   ;;  %s9806_s4 = inlined_call_operand.vmem [shape: f32[2,1,512], index: 4, kind: input, shape index: {}]   ;;  %s9807_s5 = inlined_call_operand.vmem [shape: bf16[2,512,512], index: 5, kind: input, shape index: {}]   ;;  %s9808_s6 = inlined_call_operand.vmem [shape: f32[2,1,512], index: 6, kind: input, shape index: {}]   ;;  %s9809_s7 = inlined_call_operand.vmem [shape: bf16[2,512,512], index: 7, kind: input, shape index: {}]   ;;  %s9810_s8 = inlined_call_operand.vmem [shape: f32[2,1,512], index: 8, kind: input, shape index: {}]   ;;  %s9811_s9 = inlined_call_operand.vmem [shape: bf16[2,512,512], index: 9, kind: input, shape index: {}]   ;;  %s9812_s10 = inlined_call_operand.vmem [shape: f32[2,1,512], index: 10, kind: input, shape index: {}]   ;;  %s9813_s11 = inlined_call_operand.vmem [shape: bf16[2,512,512], index: 11, kind: input, shape index: {}]   ;;  %s9814_s12 = inlined_call_operand.vmem [shape: f32[2,1,512], index: 12, kind: input, shape index: {}]   ;;  %s9815_s13 = inlined_call_operand.vmem [shape: bf16[2,8,512], index: 13, kind: input, shape index: {}]   ;;  %s9816_s14 = inlined_call_operand.vmem [shape: f32[2,8,1], index: 14, kind: input, shape index: {}]   ;;  %s9817_s15 = inlined_call_operand.vmem [shape: f32[2,2,8,8], index: 15, kind: output, shape index: {}]  }
   0x1   :  { %9821 = sst [smem:[#allocation6_spill]] %s9802_s0  ;;  %s8859_s20 = smov 0  }
   0x2   :  { %s8861_s21 = smov 0   ;;  %s8863_s22 = smov 0  }
   0x3 LB: > { %9822 = sst [smem:[#allocation2_spill]] %s8763_s20  ;;  %s40_s23 = sadd.s32 1, %s8763_s20  ;;  %s8771_s22 = sphi %s8863_s22, %s25_s22   ;;  %s8767_s21 = sphi %s8861_s21, %s9831_s21   ;;  %s8763_s20 = sphi %s8859_s20, %s9830_s20   ;;  %s8759_s19 = sphi %s8857_s19, %s9829_s19   ;;  %s8755_s18 = sphi %s8855_s18, %s9828_s18  }
   0x4   : > { %9823 = sst [smem:[#allocation3_spill]] %s8767_s21  ;;  %s44_s24 = sadd.s32 1, %s8767_s21 }
   0x5   : > { %p42_p0 = scmp.ge.s32.totalorder %s40_s23, 2  ;;  %p6804_p1 = scmp.ge.s32.totalorder %s8771_s22, 1 }
   0x6   : > { %p603_p2 = scmp.lt.s32.totalorder %s8771_s22, 5 }
   0x7   : > { %s9833_s23 = smov (%p42_p0, %s40_s23), 0  ;;  %s9835_s24 = smov (!%p42_p0, %s44_s24), %s8767_s21 }
   0x8   : > { %9824 = sst [smem:[#allocation4_spill]] %s9833_s23  ;;  %p604_p3 = pnand %p6804_p1, %p603_p2 }
   0x9   : > { %p46_p4 = scmp.ge.s32.totalorder %s9835_s24, 2  ;;  %p726_p5 = scmp.lt.s32.totalorder (!%p604_p3), %s8759_s19, 1  ;;  %v8773_v0 = vmov (!%p604_p3), 0.0   ;;  %vm858_vm0 = vcmask (!%p604_p3), 1042432   ;;  %vm854_vm1 = vcmask (!%p604_p3), 23552  }
   0xa   : > { %607 = sbr.rel (%p604_p3) target bundleno = 1973 (0x7b5), region = 80  ;;  %935 = vmatprep.mubr.f32.mxu0 (!%p604_p3), %v8773_v0  ;;  %1006 = vmatprep.mubr.f32.mxu1 (!%p604_p3), %v8773_v0  ;;  %s9826_s0 = sld [smem:[#allocation6_spill]] (!%p604_p3) }
   0xb   : > { %s9837_s24 = smov (%p46_p4, %s9835_s24), 0  ;;  %p735_p6 = scmp.lt.s32.totalorder (!%p604_p3), %s8755_s18, 1 }
   0xc   : > { %9825 = sst [smem:[#allocation5_spill]] %s9837_s24 }
  0x11   : > { %s9839_s19 = smov (!%p726_p5, %s8759_s19), 1  ;;  %s9841_s18 = smov (!%p735_p6, %s8755_s18), 1 }
  0x12   : > { %s7622_s25 = smul.u32 24, %s9839_s19  ;;  %s8891_s26 = sshll.u32 %s9839_s19, 10 }
  0x13   : > { %s7623_s27 = smul.u32 1536, %s9839_s19  ;;  %s8898_s30 = scalar_lea.vmem %s9807_s5, %s8891_s26 }
  0x14   : > { %s745_s24 = scalar_lea.vmem %s9804_s2, %s7622_s25  ;;  %s9820_s28 = sshll.u32 %s9839_s19, 3 }
  0x15   : > { %s8906_s20 = scalar_lea.vmem %s9805_s3, %s7623_s27  ;;  %v813_v1 = vld [vmem:[%s745_s24] sm:$0x77]  ;;  %v815_v2 = vld [vmem:[%s745_s24 + $0x10] sm:$0x77]  ;;  %v814_v3 = vld [vmem:[%s745_s24 + $0x8] sm:$0x77]  ;;  %s732_s25 = scalar_lea.vmem %s9826_s0, %s9820_s28 }
  0x16   : > { %v851_v4 = vcombine.high %v813_v1, %v813_v1  ;;  %v852_v5 = vcombine.high %v814_v3, %v814_v3  ;;  %v853_v6 = vcombine.high %v815_v2, %v815_v2  ;;  %v812_v7 = vld [vmem:[%s732_s25] sm:$0xff]  ;;  %v7675_v10 = vld [vmem:[%s8906_s20 + $0xc] ss:$16 sps:$4 sm:$0xff]   ;;  %v7673_v12 = vld [vmem:[%s8906_s20 + $0x8] ss:$16 sps:$4 sm:$0xff]   ;;  %s8993_s24 = scalar_lea.vmem %s9809_s7, %s8891_s26  ;;  %s7620_s27 = smul.u32 6, %s9841_s18 }
  0x17   : > { %v7670_v8 = vld [vmem:[%s8906_s20] ss:$16 sps:$4 sm:$0xff]   ;;  %v7672_v9 = vld [vmem:[%s8906_s20 + $0x4] ss:$16 sps:$4 sm:$0xff]   ;;  %v7681_v13 = vld [vmem:[%s8906_s20 + $0x2c] ss:$16 sps:$4 sm:$0xff]   ;;  %s9015_s0 = scalar_lea.vmem %s9811_s9, %s8891_s26 }
  0x18   : > { %6826 = vmatprep.subr.msk.mxu0 %vm858_vm0, %v851_v4  ;;  %6829 = vmatprep.subr.msk.mxu1 %vm858_vm0, %v852_v5  ;;  %v7678_v11 = vld [vmem:[%s8906_s20 + $0x24] ss:$16 sps:$4 sm:$0xff]   ;;  %v7676_v14 = vld [vmem:[%s8906_s20 + $0x20] ss:$16 sps:$4 sm:$0xff]   ;;  %v7679_v16 = vld [vmem:[%s8906_s20 + $0x28] ss:$16 sps:$4 sm:$0xff]  }
  0x19   : > { %6827 = vmatpush1.msk.msra.mxu0 %vm858_vm0, %v813_v1  ;;  %6830 = vmatpush1.msk.msra.mxu1 %vm858_vm0, %v814_v3  ;;  %v7684_v15 = vld [vmem:[%s8906_s20 + $0x44] ss:$16 sps:$4 sm:$0xff]   ;;  %v7687_v17 = vld [vmem:[%s8906_s20 + $0x4c] ss:$16 sps:$4 sm:$0xff]   ;;  %v7682_v18 = vld [vmem:[%s8906_s20 + $0x40] ss:$16 sps:$4 sm:$0xff]  }
  0x1a   : > { %6828 = vmatmul.mubr.msk.f32.vlgmr.msra.gmra.mrb[0].mxu0 %vm854_vm1, %v812_v7  ;;  %6831 = vmatmul.mubr.msk.f32.vlgmr.msra.gmra.mrb[0].mxu1 %vm854_vm1, %v812_v7  ;;  %v7690_v19 = vld [vmem:[%s8906_s20 + $0x64] ss:$16 sps:$4 sm:$0xff]   ;;  %v7685_v20 = vld [vmem:[%s8906_s20 + $0x48] ss:$16 sps:$4 sm:$0xff]   ;;  %v7693_v21 = vld [vmem:[%s8906_s20 + $0x6c] ss:$16 sps:$4 sm:$0xff]  }
  0x1b   : > { %6832 = vmatprep.subr.msk.mxu0 %vm858_vm0, %v853_v6  ;;  %1077 = vmatprep.mubr.f32.mxu0 %v8773_v0  ;;  %v7688_v22 = vld [vmem:[%s8906_s20 + $0x60] ss:$16 sps:$4 sm:$0xff]   ;;  %v7696_v23 = vld [vmem:[%s8906_s20 + $0x84] ss:$16 sps:$4 sm:$0xff]   ;;  %v7691_v24 = vld [vmem:[%s8906_s20 + $0x68] ss:$16 sps:$4 sm:$0xff]  }
  0x1c   : > { %6833 = vmatpush1.msk.msra.mxu0 %vm858_vm0, %v815_v2  ;;  %2282 = vmatprep.subr.bf16.mxu1 %v7672_v9  ;;  %v7699_v25 = vld [vmem:[%s8906_s20 + $0x8c] ss:$16 sps:$4 sm:$0xff]   ;;  %v7694_v26 = vld [vmem:[%s8906_s20 + $0x80] ss:$16 sps:$4 sm:$0xff]   ;;  %v7702_v27 = vld [vmem:[%s8906_s20 + $0xa4] ss:$16 sps:$4 sm:$0xff]  }
  0x1d   : > { %2405 = vmatprep.subr.bf16.mxu0 %v7675_v10  ;;  %2283 = vmatpush1.bf16.msra.mxu1 %v7670_v8  ;;  %v7697_v28 = vld [vmem:[%s8906_s20 + $0x88] ss:$16 sps:$4 sm:$0xff]   ;;  %v7705_v29 = vld [vmem:[%s8906_s20 + $0xac] ss:$16 sps:$4 sm:$0xff]   ;;  %v7700_v30 = vld [vmem:[%s8906_s20 + $0xa0] ss:$16 sps:$4 sm:$0xff]   ;;  %v818_v10 = vlaneseq }
  0x1e   : > { %6834 = vmatmul.mubr.msk.f32.vlgmr.msra.gmra.mrb[2].mxu0 %vm854_vm1, %v812_v7  ;;  %2284 = vmatprep.subr.bf16.mxu1 %v7678_v11  ;;  %v7708_v31 = vld [vmem:[%s8906_s20 + $0xc4] ss:$16 sps:$4 sm:$0xff]   ;;  %v7703_v32 = vld [vmem:[%s8906_s20 + $0xa8] ss:$16 sps:$4 sm:$0xff]   ;;  %v7711_v33 = vld [vmem:[%s8906_s20 + $0xcc] ss:$16 sps:$4 sm:$0xff]  }
  0x1f   : > { %2406 = vmatpush1.bf16.msra.mxu0 %v7673_v12  ;;  %v7706_v34 = vld [vmem:[%s8906_s20 + $0xc0] ss:$16 sps:$4 sm:$0xff]   ;;  %v7714_v35 = vld [vmem:[%s8906_s20 + $0xe4] ss:$16 sps:$4 sm:$0xff]   ;;  %v7709_v36 = vld [vmem:[%s8906_s20 + $0xc8] ss:$16 sps:$4 sm:$0xff]  }
  0x20   : > { %2407 = vmatprep.subr.bf16.mxu0 %v7681_v13  ;;  %v7717_v37 = vld [vmem:[%s8906_s20 + $0xec] ss:$16 sps:$4 sm:$0xff]   ;;  %v7712_v38 = vld [vmem:[%s8906_s20 + $0xe0] ss:$16 sps:$4 sm:$0xff]   ;;  %v7720_v39 = vld [vmem:[%s8906_s20 + $0x104] ss:$16 sps:$4 sm:$0xff]  }
  0x21   : > { %2285 = vmatpush1.bf16.msra.mxu1 %v7676_v14  ;;  %v7715_v40 = vld [vmem:[%s8906_s20 + $0xe8] ss:$16 sps:$4 sm:$0xff]   ;;  %v7723_v41 = vld [vmem:[%s8906_s20 + $0x10c] ss:$16 sps:$4 sm:$0xff]   ;;  %v7718_v42 = vld [vmem:[%s8906_s20 + $0x100] ss:$16 sps:$4 sm:$0xff]  }
  0x22   : > { %2286 = vmatprep.subr.bf16.mxu1 %v7684_v15  ;;  %v7726_v43 = vld [vmem:[%s8906_s20 + $0x124] ss:$16 sps:$4 sm:$0xff]   ;;  %v7721_v44 = vld [vmem:[%s8906_s20 + $0x108] ss:$16 sps:$4 sm:$0xff]   ;;  %v7724_v45 = vld [vmem:[%s8906_s20 + $0x120] ss:$16 sps:$4 sm:$0xff]  }
  0x23   : > { %2408 = vmatpush1.bf16.msra.mxu0 %v7679_v16  ;;  %v7729_v46 = vld [vmem:[%s8906_s20 + $0x12c] ss:$16 sps:$4 sm:$0xff]   ;;  %v7732_v47 = vld [vmem:[%s8906_s20 + $0x144] ss:$16 sps:$4 sm:$0xff]   ;;  %v7727_v48 = vld [vmem:[%s8906_s20 + $0x128] ss:$16 sps:$4 sm:$0xff]  }
  0x24   : > { %2409 = vmatprep.subr.bf16.mxu0 %v7687_v17  ;;  %v7735_v49 = vld [vmem:[%s8906_s20 + $0x14c] ss:$16 sps:$4 sm:$0xff]   ;;  %v7730_v50 = vld [vmem:[%s8906_s20 + $0x140] ss:$16 sps:$4 sm:$0xff]   ;;  %v7738_v51 = vld [vmem:[%s8906_s20 + $0x164] ss:$16 sps:$4 sm:$0xff]  }
  0x25   : > { %2287 = vmatpush1.bf16.msra.mxu1 %v7682_v18  ;;  %v7733_v52 = vld [vmem:[%s8906_s20 + $0x148] ss:$16 sps:$4 sm:$0xff]   ;;  %v7741_v53 = vld [vmem:[%s8906_s20 + $0x16c] ss:$16 sps:$4 sm:$0xff]   ;;  %v7736_v54 = vld [vmem:[%s8906_s20 + $0x160] ss:$16 sps:$4 sm:$0xff]  }
  0x26   : > { %2288 = vmatprep.subr.bf16.mxu1 %v7690_v19  ;;  %v7744_v55 = vld [vmem:[%s8906_s20 + $0x184] ss:$16 sps:$4 sm:$0xff]   ;;  %v7739_v56 = vld [vmem:[%s8906_s20 + $0x168] ss:$16 sps:$4 sm:$0xff]   ;;  %v7747_v57 = vld [vmem:[%s8906_s20 + $0x18c] ss:$16 sps:$4 sm:$0xff]  }
  0x27   : > { %2410 = vmatpush1.bf16.msra.mxu0 %v7685_v20  ;;  %v7742_v58 = vld [vmem:[%s8906_s20 + $0x180] ss:$16 sps:$4 sm:$0xff]   ;;  %v7750_v59 = vld [vmem:[%s8906_s20 + $0x1a4] ss:$16 sps:$4 sm:$0xff]   ;;  %v7745_v60 = vld [vmem:[%s8906_s20 + $0x188] ss:$16 sps:$4 sm:$0xff]  }
  0x28   : > { %2411 = vmatprep.subr.bf16.mxu0 %v7693_v21  ;;  %v7753_v61 = vld [vmem:[%s8906_s20 + $0x1ac] ss:$16 sps:$4 sm:$0xff]   ;;  %v7748_v62 = vld [vmem:[%s8906_s20 + $0x1a0] ss:$16 sps:$4 sm:$0xff]   ;;  %v7751_v63 = vld [vmem:[%s8906_s20 + $0x1a8] ss:$16 sps:$4 sm:$0xff]  }
  0x29   : > { %2289 = vmatpush1.bf16.msra.mxu1 %v7688_v22  ;;  %v7756_v0 = vld [vmem:[%s8906_s20 + $0x1c4] ss:$16 sps:$4 sm:$0xff]   ;;  %v7759_v1 = vld [vmem:[%s8906_s20 + $0x1cc] ss:$16 sps:$4 sm:$0xff]   ;;  %v7754_v2 = vld [vmem:[%s8906_s20 + $0x1c0] ss:$16 sps:$4 sm:$0xff]  }
  0x2a   : > { %2290 = vmatprep.subr.bf16.mxu1 %v7696_v23  ;;  %v7757_v3 = vld [vmem:[%s8906_s20 + $0x1c8] ss:$16 sps:$4 sm:$0xff]   ;;  %v7762_v4 = vld [vmem:[%s8906_s20 + $0x1e4] ss:$16 sps:$4 sm:$0xff]   ;;  %v7765_v5 = vld [vmem:[%s8906_s20 + $0x1ec] ss:$16 sps:$4 sm:$0xff]  }
  0x2b   : > { %2412 = vmatpush1.bf16.msra.mxu0 %v7691_v24  ;;  %v7760_v6 = vld [vmem:[%s8906_s20 + $0x1e0] ss:$16 sps:$4 sm:$0xff]   ;;  %v7763_v7 = vld [vmem:[%s8906_s20 + $0x1e8] ss:$16 sps:$4 sm:$0xff]   ;;  %v7768_v8 = vld [vmem:[%s8906_s20 + $0x204] ss:$16 sps:$4 sm:$0xff]  }
  0x2c   : > { %2413 = vmatprep.subr.bf16.mxu0 %v7699_v25  ;;  %v7771_v9 = vld [vmem:[%s8906_s20 + $0x20c] ss:$16 sps:$4 sm:$0xff]   ;;  %s7621_s17 = smul.u32 12, %s9839_s19  ;;  %v9006_v11 = vshrl.u32 %v818_v10, 7  ;;  %v7823_v10 = vld [vmem:[%s8906_s20 + $0x328] ss:$16 sps:$4 sm:$0xff]  }
  0x2d   : > { %2291 = vmatpush1.bf16.msra.mxu1 %v7694_v26 }
  0x2e   : > { %2292 = vmatprep.subr.bf16.mxu1 %v7702_v27  ;;  %s739_s29 = sadd.s32 %s7621_s17, %s7620_s27  ;;  %v9018_v13 = vsub.s32 0, %v9006_v11  ;;  %v9021_v14 = vsub.s32 1, %v9006_v11  ;;  %v9024_v15 = vsub.s32 3, %v9006_v11 }
  0x2f   : > { %2414 = vmatpush1.bf16.msra.mxu0 %v7697_v28  ;;  %s9004_s28 = scalar_lea.vmem %s9803_s1, %s739_s29  ;;  %s9108_s29 = scalar_lea.vmem %s9813_s11, %s8891_s26 }
  0x30   : > { %2415 = vmatprep.subr.bf16.mxu0 %v7705_v29  ;;  %v9009_v12 = vld [vmem:[%s9004_s28] sm:$0x3f] }
  0x31   : > { %2293 = vmatpush1.bf16.msra.mxu1 %v7700_v30  ;;  %v821_v16 = vrot.slane %v9009_v12, %v9018_v13  ;;  %v825_v17 = vrot.slane %v9009_v12, %v9021_v14  ;;  %v833_v18 = vrot.slane %v9009_v12, %v9024_v15  ;;  %v7766_v30 = vld [vmem:[%s8906_s20 + $0x200] ss:$16 sps:$4 sm:$0xff]  }
  0x32   : > { %2294 = vmatprep.subr.bf16.mxu1 %v7708_v31  ;;  %v7769_v31 = vld [vmem:[%s8906_s20 + $0x208] ss:$16 sps:$4 sm:$0xff]  }
  0x33   : > { %2416 = vmatpush1.bf16.msra.mxu0 %v7703_v32 }
  0x34   : > { %2417 = vmatprep.subr.bf16.mxu0 %v7711_v33 }
  0x35   : > { %2295 = vmatpush1.bf16.msra.mxu1 %v7706_v34  ;;  %v7774_v34 = vld [vmem:[%s8906_s20 + $0x224] ss:$16 sps:$4 sm:$0xff]  }
  0x36   : > { %2296 = vmatprep.subr.bf16.mxu1 %v7714_v35  ;;  %v7777_v35 = vld [vmem:[%s8906_s20 + $0x22c] ss:$16 sps:$4 sm:$0xff]  }
  0x37   : > { %2418 = vmatpush1.bf16.msra.mxu0 %v7709_v36 }
  0x38   : > { %2419 = vmatprep.subr.bf16.mxu0 %v7717_v37 }
  0x39   : > { %2297 = vmatpush1.bf16.msra.mxu1 %v7712_v38 }
  0x3a   : > { %2298 = vmatprep.subr.bf16.mxu1 %v7720_v39 }
  0x3b   : > { %2420 = vmatpush1.bf16.msra.mxu0 %v7715_v40 }
  0x3c   : > { %2421 = vmatprep.subr.bf16.mxu0 %v7723_v41  ;;  %v7772_v41 = vld [vmem:[%s8906_s20 + $0x220] ss:$16 sps:$4 sm:$0xff]  }
  0x3d   : > { %2299 = vmatpush1.bf16.msra.mxu1 %v7718_v42  ;;  %v7775_v42 = vld [vmem:[%s8906_s20 + $0x228] ss:$16 sps:$4 sm:$0xff]  }
  0x3e   : > { %2300 = vmatprep.subr.bf16.mxu1 %v7726_v43  ;;  %v7780_v43 = vld [vmem:[%s8906_s20 + $0x244] ss:$16 sps:$4 sm:$0xff]  }
  0x3f   : > { %2422 = vmatpush1.bf16.msra.mxu0 %v7721_v44  ;;  %v7783_v44 = vld [vmem:[%s8906_s20 + $0x24c] ss:$16 sps:$4 sm:$0xff]  }
  0x40   : > { %2423 = vmatprep.subr.bf16.mxu0 %v7729_v46  ;;  %v7781_v46 = vld [vmem:[%s8906_s20 + $0x248] ss:$16 sps:$4 sm:$0xff]  }
  0x41   : > { %2301 = vmatpush1.bf16.msra.mxu1 %v7724_v45  ;;  %v7778_v45 = vld [vmem:[%s8906_s20 + $0x240] ss:$16 sps:$4 sm:$0xff]  }
  0x42   : > { %2302 = vmatprep.subr.bf16.mxu1 %v7732_v47  ;;  %v7786_v47 = vld [vmem:[%s8906_s20 + $0x264] ss:$16 sps:$4 sm:$0xff]  }
  0x43   : > { %2424 = vmatpush1.bf16.msra.mxu0 %v7727_v48  ;;  %v7789_v48 = vld [vmem:[%s8906_s20 + $0x26c] ss:$16 sps:$4 sm:$0xff]  }
  0x44   : > { %2425 = vmatprep.subr.bf16.mxu0 %v7735_v49  ;;  %v7784_v49 = vld [vmem:[%s8906_s20 + $0x260] ss:$16 sps:$4 sm:$0xff]  }
  0x45   : > { %2303 = vmatpush1.bf16.msra.mxu1 %v7730_v50  ;;  %v7787_v50 = vld [vmem:[%s8906_s20 + $0x268] ss:$16 sps:$4 sm:$0xff]  }
  0x46   : > { %2304 = vmatprep.subr.bf16.mxu1 %v7738_v51  ;;  %v7792_v51 = vld [vmem:[%s8906_s20 + $0x284] ss:$16 sps:$4 sm:$0xff]  }
  0x47   : > { %2426 = vmatpush1.bf16.msra.mxu0 %v7733_v52  ;;  %v7795_v52 = vld [vmem:[%s8906_s20 + $0x28c] ss:$16 sps:$4 sm:$0xff]  }
  0x48   : > { %2427 = vmatprep.subr.bf16.mxu0 %v7741_v53  ;;  %v7790_v53 = vld [vmem:[%s8906_s20 + $0x280] ss:$16 sps:$4 sm:$0xff]  }
  0x49   : > { %2305 = vmatpush1.bf16.msra.mxu1 %v7736_v54  ;;  %v7793_v54 = vld [vmem:[%s8906_s20 + $0x288] ss:$16 sps:$4 sm:$0xff]  }
  0x4a   : > { %2306 = vmatprep.subr.bf16.mxu1 %v7744_v55  ;;  %v7798_v55 = vld [vmem:[%s8906_s20 + $0x2a4] ss:$16 sps:$4 sm:$0xff]  }
  0x4b   : > { %2428 = vmatpush1.bf16.msra.mxu0 %v7739_v56  ;;  %v7801_v56 = vld [vmem:[%s8906_s20 + $0x2ac] ss:$16 sps:$4 sm:$0xff]  }
  0x4c   : > { %2429 = vmatprep.subr.bf16.mxu0 %v7747_v57  ;;  %v7796_v57 = vld [vmem:[%s8906_s20 + $0x2a0] ss:$16 sps:$4 sm:$0xff]  }
  0x4d   : > { %2307 = vmatpush1.bf16.msra.mxu1 %v7742_v58  ;;  %v7799_v58 = vld [vmem:[%s8906_s20 + $0x2a8] ss:$16 sps:$4 sm:$0xff]  }
  0x4e   : > { %2308 = vmatprep.subr.bf16.mxu1 %v7750_v59  ;;  %v7804_v59 = vld [vmem:[%s8906_s20 + $0x2c4] ss:$16 sps:$4 sm:$0xff]  }
  0x4f   : > { %2430 = vmatpush1.bf16.msra.mxu0 %v7745_v60  ;;  %v7807_v60 = vld [vmem:[%s8906_s20 + $0x2cc] ss:$16 sps:$4 sm:$0xff]  }
  0x50   : > { %2431 = vmatprep.subr.bf16.mxu0 %v7753_v61  ;;  %v7802_v61 = vld [vmem:[%s8906_s20 + $0x2c0] ss:$16 sps:$4 sm:$0xff]  }
  0x51   : > { %2309 = vmatpush1.bf16.msra.mxu1 %v7748_v62  ;;  %v7805_v62 = vld [vmem:[%s8906_s20 + $0x2c8] ss:$16 sps:$4 sm:$0xff]  }
  0x52   : > { %2310 = vmatprep.subr.bf16.mxu1 %v7756_v0  ;;  %v7813_v0 = vld [vmem:[%s8906_s20 + $0x2ec] ss:$16 sps:$4 sm:$0xff]  }
  0x53   : > { %2432 = vmatpush1.bf16.msra.mxu0 %v7751_v63  ;;  %v7810_v63 = vld [vmem:[%s8906_s20 + $0x2e4] ss:$16 sps:$4 sm:$0xff]  }
  0x54   : > { %2433 = vmatprep.subr.bf16.mxu0 %v7759_v1  ;;  %v7808_v1 = vld [vmem:[%s8906_s20 + $0x2e0] ss:$16 sps:$4 sm:$0xff]  }
  0x55   : > { %2311 = vmatpush1.bf16.msra.mxu1 %v7754_v2  ;;  %v7811_v2 = vld [vmem:[%s8906_s20 + $0x2e8] ss:$16 sps:$4 sm:$0xff]  }
  0x56   : > { %2312 = vmatprep.subr.bf16.mxu1 %v7762_v4  ;;  %v7819_v4 = vld [vmem:[%s8906_s20 + $0x30c] ss:$16 sps:$4 sm:$0xff]  }
  0x57   : > { %2434 = vmatpush1.bf16.msra.mxu0 %v7757_v3  ;;  %v7816_v3 = vld [vmem:[%s8906_s20 + $0x304] ss:$16 sps:$4 sm:$0xff]  }
  0x58   : > { %2435 = vmatprep.subr.bf16.mxu0 %v7765_v5  ;;  %v7814_v5 = vld [vmem:[%s8906_s20 + $0x300] ss:$16 sps:$4 sm:$0xff]  }
  0x59   : > { %2313 = vmatpush1.bf16.msra.mxu1 %v7760_v6  ;;  %v7817_v6 = vld [vmem:[%s8906_s20 + $0x308] ss:$16 sps:$4 sm:$0xff]  }
  0x5a   : > { %2323 = vmatprep.subr.bf16.mxu1 %v7768_v8  ;;  %v7825_v8 = vld [vmem:[%s8906_s20 + $0x32c] ss:$16 sps:$4 sm:$0xff]  }
  0x5b   : > { %2436 = vmatpush1.bf16.msra.mxu0 %v7763_v7  ;;  %v7822_v7 = vld [vmem:[%s8906_s20 + $0x324] ss:$16 sps:$4 sm:$0xff]  }
  0x5c   : > { %2446 = vmatprep.subr.bf16.mxu0 %v7771_v9  ;;  %v7820_v9 = vld [vmem:[%s8906_s20 + $0x320] ss:$16 sps:$4 sm:$0xff]  }
  0xed   : > { %v937_v19 = vpop.f32.mrb[0].mxu0  ;;  %v9032_v20 = vpop.f32.mrb[0].mxu1 }
  0xee   : > { %v938_v21 = vadd.f32 %v937_v19, %v821_v16  ;;  %v939_v22 = vpop.f32.mrb[1].mxu0  ;;  %v1010_v23 = vpop.f32.mrb[1].mxu1  ;;  %v7828_v16 = vld [vmem:[%s8906_s20 + $0x344] ss:$16 sps:$4 sm:$0xff]   ;;  %v7829_v19 = vld [vmem:[%s8906_s20 + $0x348] ss:$16 sps:$4 sm:$0xff]  }
  0xef   : > { %v940_v24 = vadd.f32 %v939_v22, %v825_v17  ;;  %v1011_v25 = vadd.f32 %v1010_v23, %v833_v18  ;;  %v7831_v17 = vld [vmem:[%s8906_s20 + $0x34c] ss:$16 sps:$4 sm:$0xff]   ;;  %v7826_v18 = vld [vmem:[%s8906_s20 + $0x340] ss:$16 sps:$4 sm:$0xff]  }
  0xf0   : > { %vm1084_vm2 = vcmp.gt.f32.partialorder %v938_v21, 0.0  ;;  %v1090_v26 = vmul.f32 0.01, %v938_v21  ;;  %v7837_v22 = vld [vmem:[%s8906_s20 + $0x36c] ss:$16 sps:$4 sm:$0xff]  }
  0xf1   : > { %vm1085_vm3 = vcmp.gt.f32.partialorder %v940_v24, 0.0  ;;  %v1091_v27 = vmul.f32 0.01, %v940_v24  ;;  %vm1087_vm4 = vcmp.gt.f32.partialorder %v1011_v25, 0.0  ;;  %v1093_v28 = vmul.f32 0.01, %v1011_v25 }
  0xf2   : > { %v1096_v29 = vsel %vm1084_vm2, %v938_v21, %v1090_v26  ;;  %v9036_v32 = vpop.f32.mrb[2].mxu0  ;;  %v7834_v21 = vld [vmem:[%s8906_s20 + $0x364] ss:$16 sps:$4 sm:$0xff]   ;;  %v7832_v23 = vld [vmem:[%s8906_s20 + $0x360] ss:$16 sps:$4 sm:$0xff]  }
  0xf3   : > { %v1097_v33 = vsel %vm1085_vm3, %v940_v24, %v1091_v27  ;;  %v1099_v36 = vsel %vm1087_vm4, %v1011_v25, %v1093_v28  ;;  %v9040_v37 = vpop.f32.mrb[3].mxu0  ;;  %v1102_v39 = vpack.c.bf16 %v1096_v29, %v1096_v29  ;;  %v7835_v24 = vld [vmem:[%s8906_s20 + $0x368] ss:$16 sps:$4 sm:$0xff]   ;;  %v7840_v25 = vld [vmem:[%s8906_s20 + $0x384] ss:$16 sps:$4 sm:$0xff]   ;;  %v9087_v27 = vsub.s32 2, %v9006_v11 }
  0xf4   : > { %v1103_v38 = vpack.c.bf16 %v1097_v33, %v1097_v33  ;;  %v1105_v40 = vpack.c.bf16 %v1099_v36, %v1099_v36  ;;  %v7843_v26 = vld [vmem:[%s8906_s20 + $0x38c] ss:$16 sps:$4 sm:$0xff]   ;;  %v840_v28 = vsub.s32 5, %v9006_v11  ;;  %v7838_v29 = vld [vmem:[%s8906_s20 + $0x380] ss:$16 sps:$4 sm:$0xff]  }
  0xf5   : > { %v7849_v33 = vld [vmem:[%s8906_s20 + $0x3ac] ss:$16 sps:$4 sm:$0xff]   ;;  %v7844_v36 = vld [vmem:[%s8906_s20 + $0x3a0] ss:$16 sps:$4 sm:$0xff]  }
  0xf6   : > { %2314 = vmatprep.mubr.bf16.mxu1 %v1103_v38  ;;  %2437 = vmatprep.mubr.bf16.mxu0 %v1103_v38  ;;  %v7847_v38 = vld [vmem:[%s8906_s20 + $0x3a8] ss:$16 sps:$4 sm:$0xff]  }
  0xf7   : > { %2315 = vmatmul.mubr.bf16.vlgmr.msra.gmra.mrb[4].mxu1 %v1102_v39  ;;  %2438 = vmatmul.mubr.bf16.vlgmr.msra.gmra.mrb[4].mxu0 %v1102_v39  ;;  %v7852_v39 = vld [vmem:[%s8906_s20 + $0x3c4] ss:$16 sps:$4 sm:$0xff]  }
  0xf8   : > { %2324 = vmatpush1.bf16.msra.mxu1 %v7766_v30  ;;  %2447 = vmatpush1.bf16.msra.mxu0 %v7769_v31  ;;  %v7841_v30 = vld [vmem:[%s8906_s20 + $0x388] ss:$16 sps:$4 sm:$0xff]   ;;  %v7846_v31 = vld [vmem:[%s8906_s20 + $0x3a4] ss:$16 sps:$4 sm:$0xff]  }
  0xf9   : > { %2325 = vmatprep.subr.bf16.mxu1 %v7774_v34  ;;  %2448 = vmatprep.subr.bf16.mxu0 %v7777_v35  ;;  %v829_v34 = vrot.slane %v9009_v12, %v9087_v27  ;;  %v841_v35 = vrot.slane %v9009_v12, %v840_v28  ;;  %v7858_v12 = vld [vmem:[%s8906_s20 + $0x3e4] ss:$16 sps:$4 sm:$0xff]   ;;  %v7915_v28 = vld [vmem:[%s8906_s20 + $0x50c] ss:$16 sps:$4 sm:$0xff]  }
  0xfa   : > { %2355 = vmatprep.mubr.bf16.mxu1 %v1105_v40  ;;  %2478 = vmatprep.mubr.bf16.mxu0 %v1105_v40  ;;  %v7855_v40 = vld [vmem:[%s8906_s20 + $0x3cc] ss:$16 sps:$4 sm:$0xff]  }
  0xfc   : > { %2326 = vmatpush1.bf16.msra.mxu1 %v7772_v41  ;;  %2449 = vmatpush1.bf16.msra.mxu0 %v7775_v42  ;;  %v1009_v41 = vadd.f32 %v9032_v20, %v829_v34  ;;  %v7850_v42 = vld [vmem:[%s8906_s20 + $0x3c0] ss:$16 sps:$4 sm:$0xff]  }
  0xfd   : > { %2327 = vmatprep.subr.bf16.mxu1 %v7780_v43  ;;  %2450 = vmatprep.subr.bf16.mxu0 %v7783_v44  ;;  %v7853_v43 = vld [vmem:[%s8906_s20 + $0x3c8] ss:$16 sps:$4 sm:$0xff]   ;;  %v7861_v44 = vld [vmem:[%s8906_s20 + $0x3ec] ss:$16 sps:$4 sm:$0xff]   ;;  %v7916_v34 = vld [vmem:[%s8906_s20 + $0x520] ss:$16 sps:$4 sm:$0xff]  }
  0xfe   : > { %v1092_v20 = vmul.f32 0.01, %v1009_v41  ;;  %vm1086_vm5 = vcmp.gt.f32.partialorder %v1009_v41, 0.0 }
 0x100   : > { %2328 = vmatpush1.bf16.msra.mxu1 %v7778_v45  ;;  %2451 = vmatpush1.bf16.msra.mxu0 %v7781_v46  ;;  %v1082_v45 = vadd.f32 %v9040_v37, %v841_v35  ;;  %v7856_v46 = vld [vmem:[%s8906_s20 + $0x3e0] ss:$16 sps:$4 sm:$0xff]   ;;  %v1098_v37 = vsel %vm1086_vm5, %v1009_v41, %v1092_v20  ;;  %v7919_v35 = vld [vmem:[%s8906_s20 + $0x528] ss:$16 sps:$4 sm:$0xff]   ;;  %v7930_v41 = vld [vmem:[%s8906_s20 + $0x564] ss:$16 sps:$4 sm:$0xff]  }
 0x101   : > { %2329 = vmatprep.subr.bf16.mxu1 %v7786_v47  ;;  %2452 = vmatprep.subr.bf16.mxu0 %v7789_v48  ;;  %v7859_v47 = vld [vmem:[%s8906_s20 + $0x3e8] ss:$16 sps:$4 sm:$0xff]   ;;  %v7864_v48 = vld [vmem:[%s8906_s20 + $0x404] ss:$16 sps:$4 sm:$0xff]   ;;  %v836_v20 = vsub.s32 4, %v9006_v11 }
 0x102   : > { %vm1089_vm6 = vcmp.gt.f32.partialorder %v1082_v45, 0.0  ;;  %v7943_v11 = vld [vmem:[%s8906_s20 + $0x5a8] ss:$16 sps:$4 sm:$0xff]  }
 0x104   : > { %2330 = vmatpush1.bf16.msra.mxu1 %v7784_v49  ;;  %2453 = vmatpush1.bf16.msra.mxu0 %v7787_v50  ;;  %v7867_v49 = vld [vmem:[%s8906_s20 + $0x40c] ss:$16 sps:$4 sm:$0xff]   ;;  %v1095_v50 = vmul.f32 0.01, %v1082_v45 }
 0x105   : > { %2331 = vmatprep.subr.bf16.mxu1 %v7792_v51  ;;  %2454 = vmatprep.subr.bf16.mxu0 %v7795_v52  ;;  %v7862_v51 = vld [vmem:[%s8906_s20 + $0x400] ss:$16 sps:$4 sm:$0xff]   ;;  %v7865_v52 = vld [vmem:[%s8906_s20 + $0x408] ss:$16 sps:$4 sm:$0xff]  }
 0x108   : > { %2332 = vmatpush1.bf16.msra.mxu1 %v7790_v53  ;;  %2455 = vmatpush1.bf16.msra.mxu0 %v7793_v54  ;;  %v7870_v53 = vld [vmem:[%s8906_s20 + $0x424] ss:$16 sps:$4 sm:$0xff]   ;;  %v7873_v54 = vld [vmem:[%s8906_s20 + $0x42c] ss:$16 sps:$4 sm:$0xff]  }
 0x109   : > { %2333 = vmatprep.subr.bf16.mxu1 %v7798_v55  ;;  %2456 = vmatprep.subr.bf16.mxu0 %v7801_v56  ;;  %v1101_v55 = vsel %vm1089_vm6, %v1082_v45, %v1095_v50  ;;  %v1104_v56 = vpack.c.bf16 %v1098_v37, %v1098_v37  ;;  %v7939_v45 = vld [vmem:[%s8906_s20 + $0x58c] ss:$16 sps:$4 sm:$0xff]   ;;  %v8732_v50 = vld [vmem:[%s9004_s28] sm:$0x3f]  ;;  %s7549_s28 = sshll.u32 %s9839_s19, 4 }
 0x10a   : > { %v837_v37 = vrot.slane %v8732_v50, %v836_v20  ;;  %v8015_v20 = vld [vmem:[%s8898_s30 + $0x128] ss:$16 sps:$4 sm:$0xff]   ;;  %v8026_v50 = vld [vmem:[%s8898_s30 + $0x164] ss:$16 sps:$4 sm:$0xff]   ;;  %s795_s25 = scalar_lea.vmem %s9815_s13, %s7549_s28 }
 0x10c   : > { %2334 = vmatpush1.bf16.msra.mxu1 %v7796_v57  ;;  %2457 = vmatpush1.bf16.msra.mxu0 %v7799_v58  ;;  %v7868_v57 = vld [vmem:[%s8906_s20 + $0x420] ss:$16 sps:$4 sm:$0xff]   ;;  %v7871_v58 = vld [vmem:[%s8906_s20 + $0x428] ss:$16 sps:$4 sm:$0xff]  }
 0x10d   : > { %2335 = vmatprep.subr.bf16.mxu1 %v7804_v59  ;;  %2458 = vmatprep.subr.bf16.mxu0 %v7807_v60  ;;  %v1107_v59 = vpack.c.bf16 %v1101_v55, %v1101_v55  ;;  %v7876_v60 = vld [vmem:[%s8906_s20 + $0x444] ss:$16 sps:$4 sm:$0xff]   ;;  %v7946_v55 = vld [vmem:[%s8906_s20 + $0x5c0] ss:$16 sps:$4 sm:$0xff]  }
 0x110   : > { %2336 = vmatpush1.bf16.msra.mxu1 %v7802_v61  ;;  %2459 = vmatpush1.bf16.msra.mxu0 %v7805_v62  ;;  %v7879_v61 = vld [vmem:[%s8906_s20 + $0x44c] ss:$16 sps:$4 sm:$0xff]   ;;  %v7874_v62 = vld [vmem:[%s8906_s20 + $0x440] ss:$16 sps:$4 sm:$0xff]  }
 0x111   : > { %2337 = vmatprep.subr.bf16.mxu1 %v7810_v63  ;;  %2460 = vmatprep.subr.bf16.mxu0 %v7813_v0  ;;  %v7877_v63 = vld [vmem:[%s8906_s20 + $0x448] ss:$16 sps:$4 sm:$0xff]   ;;  %v7882_v0 = vld [vmem:[%s8906_s20 + $0x464] ss:$16 sps:$4 sm:$0xff]  }
 0x114   : > { %2338 = vmatpush1.bf16.msra.mxu1 %v7808_v1  ;;  %2461 = vmatpush1.bf16.msra.mxu0 %v7811_v2  ;;  %v7885_v1 = vld [vmem:[%s8906_s20 + $0x46c] ss:$16 sps:$4 sm:$0xff]   ;;  %v7880_v2 = vld [vmem:[%s8906_s20 + $0x460] ss:$16 sps:$4 sm:$0xff]  }
 0x115   : > { %2339 = vmatprep.subr.bf16.mxu1 %v7816_v3  ;;  %2462 = vmatprep.subr.bf16.mxu0 %v7819_v4  ;;  %v7883_v3 = vld [vmem:[%s8906_s20 + $0x468] ss:$16 sps:$4 sm:$0xff]   ;;  %v7888_v4 = vld [vmem:[%s8906_s20 + $0x484] ss:$16 sps:$4 sm:$0xff]  }
 0x118   : > { %2340 = vmatpush1.bf16.msra.mxu1 %v7814_v5  ;;  %2463 = vmatpush1.bf16.msra.mxu0 %v7817_v6  ;;  %v7891_v5 = vld [vmem:[%s8906_s20 + $0x48c] ss:$16 sps:$4 sm:$0xff]   ;;  %v7886_v6 = vld [vmem:[%s8906_s20 + $0x480] ss:$16 sps:$4 sm:$0xff]  }
 0x119   : > { %2341 = vmatprep.subr.bf16.mxu1 %v7822_v7  ;;  %2464 = vmatprep.subr.bf16.mxu0 %v7825_v8  ;;  %v7889_v7 = vld [vmem:[%s8906_s20 + $0x488] ss:$16 sps:$4 sm:$0xff]   ;;  %v7894_v8 = vld [vmem:[%s8906_s20 + $0x4a4] ss:$16 sps:$4 sm:$0xff]  }
 0x11c   : > { %2342 = vmatpush1.bf16.msra.mxu1 %v7820_v9  ;;  %2465 = vmatpush1.bf16.msra.mxu0 %v7823_v10  ;;  %v7897_v9 = vld [vmem:[%s8906_s20 + $0x4ac] ss:$16 sps:$4 sm:$0xff]   ;;  %v7892_v10 = vld [vmem:[%s8906_s20 + $0x4a0] ss:$16 sps:$4 sm:$0xff]  }
 0x11d   : > { %2343 = vmatprep.subr.bf16.mxu1 %v7828_v16  ;;  %2466 = vmatprep.subr.bf16.mxu0 %v7831_v17  ;;  %v7895_v16 = vld [vmem:[%s8906_s20 + $0x4a8] ss:$16 sps:$4 sm:$0xff]   ;;  %v7900_v17 = vld [vmem:[%s8906_s20 + $0x4c4] ss:$16 sps:$4 sm:$0xff]  }
 0x120   : > { %2344 = vmatpush1.bf16.msra.mxu1 %v7826_v18  ;;  %2467 = vmatpush1.bf16.msra.mxu0 %v7829_v19  ;;  %v7903_v18 = vld [vmem:[%s8906_s20 + $0x4cc] ss:$16 sps:$4 sm:$0xff]   ;;  %v7898_v19 = vld [vmem:[%s8906_s20 + $0x4c0] ss:$16 sps:$4 sm:$0xff]  }
 0x121   : > { %2345 = vmatprep.subr.bf16.mxu1 %v7834_v21  ;;  %2468 = vmatprep.subr.bf16.mxu0 %v7837_v22  ;;  %v7901_v21 = vld [vmem:[%s8906_s20 + $0x4c8] ss:$16 sps:$4 sm:$0xff]   ;;  %v7906_v22 = vld [vmem:[%s8906_s20 + $0x4e4] ss:$16 sps:$4 sm:$0xff]  }
 0x124   : > { %2346 = vmatpush1.bf16.msra.mxu1 %v7832_v23  ;;  %2469 = vmatpush1.bf16.msra.mxu0 %v7835_v24  ;;  %v7909_v23 = vld [vmem:[%s8906_s20 + $0x4ec] ss:$16 sps:$4 sm:$0xff]   ;;  %v7904_v24 = vld [vmem:[%s8906_s20 + $0x4e0] ss:$16 sps:$4 sm:$0xff]  }
 0x125   : > { %2347 = vmatprep.subr.bf16.mxu1 %v7840_v25  ;;  %2470 = vmatprep.subr.bf16.mxu0 %v7843_v26  ;;  %v7907_v25 = vld [vmem:[%s8906_s20 + $0x4e8] ss:$16 sps:$4 sm:$0xff]   ;;  %v7912_v26 = vld [vmem:[%s8906_s20 + $0x504] ss:$16 sps:$4 sm:$0xff]  }
 0x128   : > { %2348 = vmatpush1.bf16.msra.mxu1 %v7838_v29  ;;  %2471 = vmatpush1.bf16.msra.mxu0 %v7841_v30  ;;  %v7910_v29 = vld [vmem:[%s8906_s20 + $0x500] ss:$16 sps:$4 sm:$0xff]   ;;  %v7913_v30 = vld [vmem:[%s8906_s20 + $0x508] ss:$16 sps:$4 sm:$0xff]  }
 0x129   : > { %2349 = vmatprep.subr.bf16.mxu1 %v7846_v31  ;;  %2472 = vmatprep.subr.bf16.mxu0 %v7849_v33  ;;  %v7918_v31 = vld [vmem:[%s8906_s20 + $0x524] ss:$16 sps:$4 sm:$0xff]   ;;  %v7921_v33 = vld [vmem:[%s8906_s20 + $0x52c] ss:$16 sps:$4 sm:$0xff]  }
 0x12c   : > { %2350 = vmatpush1.bf16.msra.mxu1 %v7844_v36  ;;  %2473 = vmatpush1.bf16.msra.mxu0 %v7847_v38  ;;  %v7924_v36 = vld [vmem:[%s8906_s20 + $0x544] ss:$16 sps:$4 sm:$0xff]   ;;  %v7927_v38 = vld [vmem:[%s8906_s20 + $0x54c] ss:$16 sps:$4 sm:$0xff]  }
 0x12d   : > { %2351 = vmatprep.subr.bf16.mxu1 %v7852_v39  ;;  %2474 = vmatprep.subr.bf16.mxu0 %v7855_v40  ;;  %v7922_v39 = vld [vmem:[%s8906_s20 + $0x540] ss:$16 sps:$4 sm:$0xff]   ;;  %v7925_v40 = vld [vmem:[%s8906_s20 + $0x548] ss:$16 sps:$4 sm:$0xff]  }
 0x130   : > { %2352 = vmatpush1.bf16.msra.mxu1 %v7850_v42  ;;  %2475 = vmatpush1.bf16.msra.mxu0 %v7853_v43  ;;  %v7933_v42 = vld [vmem:[%s8906_s20 + $0x56c] ss:$16 sps:$4 sm:$0xff]   ;;  %v7928_v43 = vld [vmem:[%s8906_s20 + $0x560] ss:$16 sps:$4 sm:$0xff]  }
 0x131   : > { %2353 = vmatprep.subr.bf16.mxu1 %v7858_v12  ;;  %2476 = vmatprep.subr.bf16.mxu0 %v7861_v44  ;;  %v7931_v12 = vld [vmem:[%s8906_s20 + $0x568] ss:$16 sps:$4 sm:$0xff]   ;;  %v7936_v44 = vld [vmem:[%s8906_s20 + $0x584] ss:$16 sps:$4 sm:$0xff]  }
 0x134   : > { %2354 = vmatpush1.bf16.msra.mxu1 %v7856_v46  ;;  %2477 = vmatpush1.bf16.msra.mxu0 %v7859_v47  ;;  %v7934_v46 = vld [vmem:[%s8906_s20 + $0x580] ss:$16 sps:$4 sm:$0xff]   ;;  %v7937_v47 = vld [vmem:[%s8906_s20 + $0x588] ss:$16 sps:$4 sm:$0xff]  }
 0x135   : > { %2364 = vmatprep.subr.bf16.mxu1 %v7864_v48  ;;  %2487 = vmatprep.subr.bf16.mxu0 %v7867_v49  ;;  %v7942_v48 = vld [vmem:[%s8906_s20 + $0x5a4] ss:$16 sps:$4 sm:$0xff]   ;;  %v7945_v49 = vld [vmem:[%s8906_s20 + $0x5ac] ss:$16 sps:$4 sm:$0xff]  }
 0x137   : > { %2356 = vmatmul.mubr.bf16.vlgmr.msra.gmra.mrb[4].mxu1 %v1104_v56  ;;  %2479 = vmatmul.mubr.bf16.vlgmr.msra.gmra.mrb[4].mxu0 %v1104_v56  ;;  %v7949_v56 = vld [vmem:[%s8906_s20 + $0x5c8] ss:$16 sps:$4 sm:$0xff]  }
 0x138   : > { %2365 = vmatpush1.bf16.msra.mxu1 %v7862_v51  ;;  %2488 = vmatpush1.bf16.msra.mxu0 %v7865_v52  ;;  %v7940_v51 = vld [vmem:[%s8906_s20 + $0x5a0] ss:$16 sps:$4 sm:$0xff]   ;;  %v7948_v52 = vld [vmem:[%s8906_s20 + $0x5c4] ss:$16 sps:$4 sm:$0xff]  }
 0x139   : > { %2366 = vmatprep.subr.bf16.mxu1 %v7870_v53  ;;  %2489 = vmatprep.subr.bf16.mxu0 %v7873_v54  ;;  %v7951_v53 = vld [vmem:[%s8906_s20 + $0x5cc] ss:$16 sps:$4 sm:$0xff]   ;;  %v1080_v54 = vadd.f32 %v9036_v32, %v837_v37  ;;  %v7955_v32 = vld [vmem:[%s8906_s20 + $0x5e8] ss:$16 sps:$4 sm:$0xff]  }
 0x13a   : > { %2396 = vmatprep.mubr.bf16.mxu1 %v1107_v59  ;;  %2519 = vmatprep.mubr.bf16.mxu0 %v1107_v59  ;;  %v8029_v37 = vld [vmem:[%s8898_s30 + $0x16c] ss:$16 sps:$4 sm:$0xff]  }
 0x13b   : > { %v1094_v59 = vmul.f32 0.01, %v1080_v54  ;;  %vm1088_vm7 = vcmp.gt.f32.partialorder %v1080_v54, 0.0 }
 0x13c   : > { %2367 = vmatpush1.bf16.msra.mxu1 %v7868_v57  ;;  %2490 = vmatpush1.bf16.msra.mxu0 %v7871_v58  ;;  %v7954_v57 = vld [vmem:[%s8906_s20 + $0x5e4] ss:$16 sps:$4 sm:$0xff]   ;;  %v7957_v58 = vld [vmem:[%s8906_s20 + $0x5ec] ss:$16 sps:$4 sm:$0xff]  }
 0x13d   : > { %2368 = vmatprep.subr.bf16.mxu1 %v7876_v60  ;;  %2491 = vmatprep.subr.bf16.mxu0 %v7879_v61  ;;  %v7952_v60 = vld [vmem:[%s8906_s20 + $0x5e0] ss:$16 sps:$4 sm:$0xff]   ;;  %v7960_v61 = vld [vmem:[%s8898_s30 + $0x4] ss:$16 sps:$4 sm:$0xff]   ;;  %s9249_s20 = sshll.u32 %s9839_s19, 2 }
 0x13e   : > { %s754_s16 = scalar_lea.vmem %s9806_s4, %s9249_s20  ;;  %s763_s21 = scalar_lea.vmem %s9808_s6, %s9249_s20 }
 0x13f   : > { %s772_s27 = scalar_lea.vmem %s9810_s8, %s9249_s20  ;;  %s781_s26 = scalar_lea.vmem %s9812_s10, %s9249_s20 }
 0x140   : > { %2369 = vmatpush1.bf16.msra.mxu1 %v7874_v62  ;;  %2492 = vmatpush1.bf16.msra.mxu0 %v7877_v63  ;;  %v7963_v62 = vld [vmem:[%s8898_s30 + $0xc] ss:$16 sps:$4 sm:$0xff]   ;;  %v1100_v63 = vsel %vm1088_vm7, %v1080_v54, %v1094_v59  ;;  %v8030_v54 = vld [vmem:[%s8898_s30 + $0x180] ss:$16 sps:$4 sm:$0xff]   ;;  %v8039_v59 = vld [vmem:[%s8898_s30 + $0x1a8] ss:$16 sps:$4 sm:$0xff]   ;;  %s790_s17 = scalar_lea.vmem %s9814_s12, %s9249_s20 }
 0x141   : > { %2370 = vmatprep.subr.bf16.mxu1 %v7882_v0  ;;  %2493 = vmatprep.subr.bf16.mxu0 %v7885_v1  ;;  %v7958_v0 = vld [vmem:[%s8898_s30] ss:$16 sps:$4 sm:$0xff]   ;;  %v7961_v1 = vld [vmem:[%s8898_s30 + $0x8] ss:$16 sps:$4 sm:$0xff]   ;;  %s6824_s20 = sshll.u32 %s9839_s19, 1 }
 0x144   : > { %2371 = vmatpush1.bf16.msra.mxu1 %v7880_v2  ;;  %2494 = vmatpush1.bf16.msra.mxu0 %v7883_v3  ;;  %v1106_v2 = vpack.c.bf16 %v1100_v63, %v1100_v63  ;;  %v7966_v3 = vld [vmem:[%s8898_s30 + $0x24] ss:$16 sps:$4 sm:$0xff]  }
 0x145   : > { %2372 = vmatprep.subr.bf16.mxu1 %v7888_v4  ;;  %2495 = vmatprep.subr.bf16.mxu0 %v7891_v5  ;;  %v7969_v4 = vld [vmem:[%s8898_s30 + $0x2c] ss:$16 sps:$4 sm:$0xff]   ;;  %v7964_v5 = vld [vmem:[%s8898_s30 + $0x20] ss:$16 sps:$4 sm:$0xff]   ;;  %v8050_v63 = vld [vmem:[%s8898_s30 + $0x1e4] ss:$16 sps:$4 sm:$0xff]  }
 0x148   : > { %2373 = vmatpush1.bf16.msra.mxu1 %v7886_v6  ;;  %2496 = vmatpush1.bf16.msra.mxu0 %v7889_v7  ;;  %v7967_v6 = vld [vmem:[%s8898_s30 + $0x28] ss:$16 sps:$4 sm:$0xff]   ;;  %v7972_v7 = vld [vmem:[%s8898_s30 + $0x44] ss:$16 sps:$4 sm:$0xff]  }
 0x149   : > { %2374 = vmatprep.subr.bf16.mxu1 %v7894_v8  ;;  %2497 = vmatprep.subr.bf16.mxu0 %v7897_v9  ;;  %v7975_v8 = vld [vmem:[%s8898_s30 + $0x4c] ss:$16 sps:$4 sm:$0xff]   ;;  %v7970_v9 = vld [vmem:[%s8898_s30 + $0x40] ss:$16 sps:$4 sm:$0xff]  }
 0x14c   : > { %2375 = vmatpush1.bf16.msra.mxu1 %v7892_v10  ;;  %2498 = vmatpush1.bf16.msra.mxu0 %v7895_v16  ;;  %v7973_v10 = vld [vmem:[%s8898_s30 + $0x48] ss:$16 sps:$4 sm:$0xff]   ;;  %v7978_v16 = vld [vmem:[%s8898_s30 + $0x64] ss:$16 sps:$4 sm:$0xff]  }
 0x14d   : > { %2376 = vmatprep.subr.bf16.mxu1 %v7900_v17  ;;  %2499 = vmatprep.subr.bf16.mxu0 %v7903_v18  ;;  %v7981_v17 = vld [vmem:[%s8898_s30 + $0x6c] ss:$16 sps:$4 sm:$0xff]   ;;  %v7976_v18 = vld [vmem:[%s8898_s30 + $0x60] ss:$16 sps:$4 sm:$0xff]  }
 0x150   : > { %2377 = vmatpush1.bf16.msra.mxu1 %v7898_v19  ;;  %2500 = vmatpush1.bf16.msra.mxu0 %v7901_v21  ;;  %v7979_v19 = vld [vmem:[%s8898_s30 + $0x68] ss:$16 sps:$4 sm:$0xff]   ;;  %v7984_v21 = vld [vmem:[%s8898_s30 + $0x84] ss:$16 sps:$4 sm:$0xff]  }
 0x151   : > { %2378 = vmatprep.subr.bf16.mxu1 %v7906_v22  ;;  %2501 = vmatprep.subr.bf16.mxu0 %v7909_v23  ;;  %v7987_v22 = vld [vmem:[%s8898_s30 + $0x8c] ss:$16 sps:$4 sm:$0xff]   ;;  %v7982_v23 = vld [vmem:[%s8898_s30 + $0x80] ss:$16 sps:$4 sm:$0xff]  }
 0x154   : > { %2379 = vmatpush1.bf16.msra.mxu1 %v7904_v24  ;;  %2502 = vmatpush1.bf16.msra.mxu0 %v7907_v25  ;;  %v7985_v24 = vld [vmem:[%s8898_s30 + $0x88] ss:$16 sps:$4 sm:$0xff]   ;;  %v7990_v25 = vld [vmem:[%s8898_s30 + $0xa4] ss:$16 sps:$4 sm:$0xff]  }
 0x155   : > { %2380 = vmatprep.subr.bf16.mxu1 %v7912_v26  ;;  %2503 = vmatprep.subr.bf16.mxu0 %v7915_v28  ;;  %v7993_v26 = vld [vmem:[%s8898_s30 + $0xac] ss:$16 sps:$4 sm:$0xff]   ;;  %v7988_v28 = vld [vmem:[%s8898_s30 + $0xa0] ss:$16 sps:$4 sm:$0xff]  }
 0x158   : > { %2381 = vmatpush1.bf16.msra.mxu1 %v7910_v29  ;;  %2504 = vmatpush1.bf16.msra.mxu0 %v7913_v30  ;;  %v7991_v29 = vld [vmem:[%s8898_s30 + $0xa8] ss:$16 sps:$4 sm:$0xff]   ;;  %v7996_v30 = vld [vmem:[%s8898_s30 + $0xc4] ss:$16 sps:$4 sm:$0xff]  }
 0x159   : > { %2382 = vmatprep.subr.bf16.mxu1 %v7918_v31  ;;  %2505 = vmatprep.subr.bf16.mxu0 %v7921_v33  ;;  %v7999_v31 = vld [vmem:[%s8898_s30 + $0xcc] ss:$16 sps:$4 sm:$0xff]   ;;  %v7994_v33 = vld [vmem:[%s8898_s30 + $0xc0] ss:$16 sps:$4 sm:$0xff]  }
 0x15c   : > { %2383 = vmatpush1.bf16.msra.mxu1 %v7916_v34  ;;  %2506 = vmatpush1.bf16.msra.mxu0 %v7919_v35  ;;  %v7997_v34 = vld [vmem:[%s8898_s30 + $0xc8] ss:$16 sps:$4 sm:$0xff]   ;;  %v8002_v35 = vld [vmem:[%s8898_s30 + $0xe4] ss:$16 sps:$4 sm:$0xff]  }
 0x15d   : > { %2384 = vmatprep.subr.bf16.mxu1 %v7924_v36  ;;  %2507 = vmatprep.subr.bf16.mxu0 %v7927_v38  ;;  %v8005_v36 = vld [vmem:[%s8898_s30 + $0xec] ss:$16 sps:$4 sm:$0xff]   ;;  %v8000_v38 = vld [vmem:[%s8898_s30 + $0xe0] ss:$16 sps:$4 sm:$0xff]  }
 0x160   : > { %2385 = vmatpush1.bf16.msra.mxu1 %v7922_v39  ;;  %2508 = vmatpush1.bf16.msra.mxu0 %v7925_v40  ;;  %v8003_v39 = vld [vmem:[%s8898_s30 + $0xe8] ss:$16 sps:$4 sm:$0xff]   ;;  %v8008_v40 = vld [vmem:[%s8898_s30 + $0x104] ss:$16 sps:$4 sm:$0xff]  }
 0x161   : > { %2386 = vmatprep.subr.bf16.mxu1 %v7930_v41  ;;  %2509 = vmatprep.subr.bf16.mxu0 %v7933_v42  ;;  %v8011_v41 = vld [vmem:[%s8898_s30 + $0x10c] ss:$16 sps:$4 sm:$0xff]   ;;  %v8006_v42 = vld [vmem:[%s8898_s30 + $0x100] ss:$16 sps:$4 sm:$0xff]  }
 0x164   : > { %2387 = vmatpush1.bf16.msra.mxu1 %v7928_v43  ;;  %2510 = vmatpush1.bf16.msra.mxu0 %v7931_v12  ;;  %v8009_v43 = vld [vmem:[%s8898_s30 + $0x108] ss:$16 sps:$4 sm:$0xff]   ;;  %v8014_v12 = vld [vmem:[%s8898_s30 + $0x124] ss:$16 sps:$4 sm:$0xff]  }
 0x165   : > { %2388 = vmatprep.subr.bf16.mxu1 %v7936_v44  ;;  %2511 = vmatprep.subr.bf16.mxu0 %v7939_v45  ;;  %v8017_v44 = vld [vmem:[%s8898_s30 + $0x12c] ss:$16 sps:$4 sm:$0xff]   ;;  %v8012_v45 = vld [vmem:[%s8898_s30 + $0x120] ss:$16 sps:$4 sm:$0xff]  }
 0x168   : > { %2389 = vmatpush1.bf16.msra.mxu1 %v7934_v46  ;;  %2512 = vmatpush1.bf16.msra.mxu0 %v7937_v47  ;;  %v8020_v46 = vld [vmem:[%s8898_s30 + $0x144] ss:$16 sps:$4 sm:$0xff]   ;;  %v8023_v47 = vld [vmem:[%s8898_s30 + $0x14c] ss:$16 sps:$4 sm:$0xff]  }
 0x169   : > { %2390 = vmatprep.subr.bf16.mxu1 %v7942_v48  ;;  %2513 = vmatprep.subr.bf16.mxu0 %v7945_v49  ;;  %v8018_v48 = vld [vmem:[%s8898_s30 + $0x140] ss:$16 sps:$4 sm:$0xff]   ;;  %v8021_v49 = vld [vmem:[%s8898_s30 + $0x148] ss:$16 sps:$4 sm:$0xff]  }
 0x16c   : > { %2391 = vmatpush1.bf16.msra.mxu1 %v7940_v51  ;;  %2514 = vmatpush1.bf16.msra.mxu0 %v7943_v11  ;;  %v8024_v51 = vld [vmem:[%s8898_s30 + $0x160] ss:$16 sps:$4 sm:$0xff]   ;;  %v8027_v11 = vld [vmem:[%s8898_s30 + $0x168] ss:$16 sps:$4 sm:$0xff]  }
 0x16d   : > { %2392 = vmatprep.subr.bf16.mxu1 %v7948_v52  ;;  %2515 = vmatprep.subr.bf16.mxu0 %v7951_v53  ;;  %v8032_v52 = vld [vmem:[%s8898_s30 + $0x184] ss:$16 sps:$4 sm:$0xff]   ;;  %v8035_v53 = vld [vmem:[%s8898_s30 + $0x18c] ss:$16 sps:$4 sm:$0xff]  }
 0x170   : > { %2393 = vmatpush1.bf16.msra.mxu1 %v7946_v55  ;;  %2516 = vmatpush1.bf16.msra.mxu0 %v7949_v56  ;;  %v8033_v55 = vld [vmem:[%s8898_s30 + $0x188] ss:$16 sps:$4 sm:$0xff]   ;;  %v8038_v56 = vld [vmem:[%s8898_s30 + $0x1a4] ss:$16 sps:$4 sm:$0xff]  }
 0x171   : > { %2394 = vmatprep.subr.bf16.mxu1 %v7954_v57  ;;  %2517 = vmatprep.subr.bf16.mxu0 %v7957_v58  ;;  %v8041_v57 = vld [vmem:[%s8898_s30 + $0x1ac] ss:$16 sps:$4 sm:$0xff]   ;;  %v8036_v58 = vld [vmem:[%s8898_s30 + $0x1a0] ss:$16 sps:$4 sm:$0xff]  }
 0x174   : > { %2395 = vmatpush1.bf16.msra.mxu1 %v7952_v60  ;;  %2518 = vmatpush1.bf16.msra.mxu0 %v7955_v32  ;;  %v8044_v60 = vld [vmem:[%s8898_s30 + $0x1c4] ss:$16 sps:$4 sm:$0xff]   ;;  %v8047_v32 = vld [vmem:[%s8898_s30 + $0x1cc] ss:$16 sps:$4 sm:$0xff]  }
 0x175   : > { %3334 = vmatprep.subr.bf16.mxu1 %v7960_v61  ;;  %3416 = vmatprep.subr.bf16.mxu0 %v7963_v62  ;;  %v8042_v61 = vld [vmem:[%s8898_s30 + $0x1c0] ss:$16 sps:$4 sm:$0xff]   ;;  %v8045_v62 = vld [vmem:[%s8898_s30 + $0x1c8] ss:$16 sps:$4 sm:$0xff]  }
 0x177   : > { %2397 = vmatmul.mubr.bf16.vlgmr.msra.gmra.mrb[4].mxu1 %v1106_v2  ;;  %2520 = vmatmul.mubr.bf16.vlgmr.msra.gmra.mrb[4].mxu0 %v1106_v2  ;;  %v8051_v2 = vld [vmem:[%s8898_s30 + $0x1e8] ss:$16 sps:$4 sm:$0xff]  }
 0x178   : > { %3335 = vmatpush1.bf16.msra.mxu1 %v7958_v0  ;;  %3417 = vmatpush1.bf16.msra.mxu0 %v7961_v1  ;;  %v8053_v0 = vld [vmem:[%s8898_s30 + $0x1ec] ss:$16 sps:$4 sm:$0xff]   ;;  %v8048_v1 = vld [vmem:[%s8898_s30 + $0x1e0] ss:$16 sps:$4 sm:$0xff]  }
 0x179   : > { %3336 = vmatprep.subr.bf16.mxu1 %v7966_v3  ;;  %3418 = vmatprep.subr.bf16.mxu0 %v7969_v4  ;;  %v8056_v3 = vld [vmem:[%s8898_s30 + $0x204] ss:$16 sps:$4 sm:$0xff]   ;;  %v8059_v4 = vld [vmem:[%s8898_s30 + $0x20c] ss:$16 sps:$4 sm:$0xff]  }
 0x17c   : > { %3337 = vmatpush1.bf16.msra.mxu1 %v7964_v5  ;;  %3419 = vmatpush1.bf16.msra.mxu0 %v7967_v6  ;;  %v9255_v5 = vld [vmem:[%s754_s16] sm:$0xf] }
 0x17d   : > { %3338 = vmatprep.subr.bf16.mxu1 %v7972_v7  ;;  %3420 = vmatprep.subr.bf16.mxu0 %v7975_v8  ;;  %v1305_v6 = vrot.slane %v9255_v5, %v9018_v13  ;;  %v1309_v7 = vrot.slane %v9255_v5, %v9021_v14  ;;  %v1317_v8 = vrot.slane %v9255_v5, %v9024_v15 }
 0x180   : > { %3339 = vmatpush1.bf16.msra.mxu1 %v7970_v9  ;;  %3421 = vmatpush1.bf16.msra.mxu0 %v7973_v10 }
 0x181   : > { %3340 = vmatprep.subr.bf16.mxu1 %v7978_v16  ;;  %3422 = vmatprep.subr.bf16.mxu0 %v7981_v17 }
 0x184   : > { %3341 = vmatpush1.bf16.msra.mxu1 %v7976_v18  ;;  %3423 = vmatpush1.bf16.msra.mxu0 %v7979_v19 }
 0x185   : > { %3342 = vmatprep.subr.bf16.mxu1 %v7984_v21  ;;  %3424 = vmatprep.subr.bf16.mxu0 %v7987_v22 }
 0x188   : > { %3343 = vmatpush1.bf16.msra.mxu1 %v7982_v23  ;;  %3425 = vmatpush1.bf16.msra.mxu0 %v7985_v24 }
 0x189   : > { %3344 = vmatprep.subr.bf16.mxu1 %v7990_v25  ;;  %3426 = vmatprep.subr.bf16.mxu0 %v7993_v26 }
 0x18c   : > { %3345 = vmatpush1.bf16.msra.mxu1 %v7988_v28  ;;  %3427 = vmatpush1.bf16.msra.mxu0 %v7991_v29 }
 0x18d   : > { %3346 = vmatprep.subr.bf16.mxu1 %v7996_v30  ;;  %3428 = vmatprep.subr.bf16.mxu0 %v7999_v31 }
 0x190   : > { %3347 = vmatpush1.bf16.msra.mxu1 %v7994_v33  ;;  %3429 = vmatpush1.bf16.msra.mxu0 %v7997_v34  ;;  %v8054_v34 = vld [vmem:[%s8898_s30 + $0x200] ss:$16 sps:$4 sm:$0xff]  }
 0x191   : > { %3348 = vmatprep.subr.bf16.mxu1 %v8002_v35  ;;  %3430 = vmatprep.subr.bf16.mxu0 %v8005_v36  ;;  %v8057_v35 = vld [vmem:[%s8898_s30 + $0x208] ss:$16 sps:$4 sm:$0xff]  }
 0x194   : > { %3349 = vmatpush1.bf16.msra.mxu1 %v8000_v38  ;;  %3431 = vmatpush1.bf16.msra.mxu0 %v8003_v39  ;;  %v8062_v39 = vld [vmem:[%s8898_s30 + $0x224] ss:$16 sps:$4 sm:$0xff]  }
 0x195   : > { %3350 = vmatprep.subr.bf16.mxu1 %v8008_v40  ;;  %3432 = vmatprep.subr.bf16.mxu0 %v8011_v41  ;;  %v8065_v40 = vld [vmem:[%s8898_s30 + $0x22c] ss:$16 sps:$4 sm:$0xff]  }
 0x198   : > { %3351 = vmatpush1.bf16.msra.mxu1 %v8006_v42  ;;  %3433 = vmatpush1.bf16.msra.mxu0 %v8009_v43  ;;  %v8060_v42 = vld [vmem:[%s8898_s30 + $0x220] ss:$16 sps:$4 sm:$0xff]   ;;  %v8063_v43 = vld [vmem:[%s8898_s30 + $0x228] ss:$16 sps:$4 sm:$0xff]  }
 0x199   : > { %3352 = vmatprep.subr.bf16.mxu1 %v8014_v12  ;;  %3434 = vmatprep.subr.bf16.mxu0 %v8017_v44  ;;  %v8068_v12 = vld [vmem:[%s8898_s30 + $0x244] ss:$16 sps:$4 sm:$0xff]   ;;  %v8071_v44 = vld [vmem:[%s8898_s30 + $0x24c] ss:$16 sps:$4 sm:$0xff]  }
 0x19c   : > { %3353 = vmatpush1.bf16.msra.mxu1 %v8012_v45  ;;  %3435 = vmatpush1.bf16.msra.mxu0 %v8015_v20  ;;  %v8066_v45 = vld [vmem:[%s8898_s30 + $0x240] ss:$16 sps:$4 sm:$0xff]   ;;  %v8069_v20 = vld [vmem:[%s8898_s30 + $0x248] ss:$16 sps:$4 sm:$0xff]  }
 0x19d   : > { %3354 = vmatprep.subr.bf16.mxu1 %v8020_v46  ;;  %3436 = vmatprep.subr.bf16.mxu0 %v8023_v47  ;;  %v8074_v46 = vld [vmem:[%s8898_s30 + $0x264] ss:$16 sps:$4 sm:$0xff]   ;;  %v8077_v47 = vld [vmem:[%s8898_s30 + $0x26c] ss:$16 sps:$4 sm:$0xff]  }
 0x1a0   : > { %3355 = vmatpush1.bf16.msra.mxu1 %v8018_v48  ;;  %3437 = vmatpush1.bf16.msra.mxu0 %v8021_v49  ;;  %v8072_v48 = vld [vmem:[%s8898_s30 + $0x260] ss:$16 sps:$4 sm:$0xff]   ;;  %v8075_v49 = vld [vmem:[%s8898_s30 + $0x268] ss:$16 sps:$4 sm:$0xff]  }
 0x1a1   : > { %3356 = vmatprep.subr.bf16.mxu1 %v8026_v50  ;;  %3438 = vmatprep.subr.bf16.mxu0 %v8029_v37  ;;  %v8080_v50 = vld [vmem:[%s8898_s30 + $0x284] ss:$16 sps:$4 sm:$0xff]   ;;  %v8083_v37 = vld [vmem:[%s8898_s30 + $0x28c] ss:$16 sps:$4 sm:$0xff]  }
 0x1a4   : > { %3357 = vmatpush1.bf16.msra.mxu1 %v8024_v51  ;;  %3439 = vmatpush1.bf16.msra.mxu0 %v8027_v11  ;;  %v8078_v51 = vld [vmem:[%s8898_s30 + $0x280] ss:$16 sps:$4 sm:$0xff]   ;;  %v8081_v11 = vld [vmem:[%s8898_s30 + $0x288] ss:$16 sps:$4 sm:$0xff]  }
 0x1a5   : > { %3358 = vmatprep.subr.bf16.mxu1 %v8032_v52  ;;  %3440 = vmatprep.subr.bf16.mxu0 %v8035_v53  ;;  %v8086_v52 = vld [vmem:[%s8898_s30 + $0x2a4] ss:$16 sps:$4 sm:$0xff]   ;;  %v8089_v53 = vld [vmem:[%s8898_s30 + $0x2ac] ss:$16 sps:$4 sm:$0xff]  }
 0x1a8   : > { %3359 = vmatpush1.bf16.msra.mxu1 %v8030_v54  ;;  %3441 = vmatpush1.bf16.msra.mxu0 %v8033_v55  ;;  %v8084_v54 = vld [vmem:[%s8898_s30 + $0x2a0] ss:$16 sps:$4 sm:$0xff]   ;;  %v8087_v55 = vld [vmem:[%s8898_s30 + $0x2a8] ss:$16 sps:$4 sm:$0xff]  }
 0x1a9   : > { %3360 = vmatprep.subr.bf16.mxu1 %v8038_v56  ;;  %3442 = vmatprep.subr.bf16.mxu0 %v8041_v57  ;;  %v8092_v56 = vld [vmem:[%s8898_s30 + $0x2c4] ss:$16 sps:$4 sm:$0xff]   ;;  %v8095_v57 = vld [vmem:[%s8898_s30 + $0x2cc] ss:$16 sps:$4 sm:$0xff]  }
 0x1ac   : > { %3361 = vmatpush1.bf16.msra.mxu1 %v8036_v58  ;;  %3443 = vmatpush1.bf16.msra.mxu0 %v8039_v59  ;;  %v8090_v58 = vld [vmem:[%s8898_s30 + $0x2c0] ss:$16 sps:$4 sm:$0xff]   ;;  %v8093_v59 = vld [vmem:[%s8898_s30 + $0x2c8] ss:$16 sps:$4 sm:$0xff]  }
 0x1ad   : > { %3362 = vmatprep.subr.bf16.mxu1 %v8044_v60  ;;  %3444 = vmatprep.subr.bf16.mxu0 %v8047_v32  ;;  %v8098_v60 = vld [vmem:[%s8898_s30 + $0x2e4] ss:$16 sps:$4 sm:$0xff]   ;;  %v8101_v32 = vld [vmem:[%s8898_s30 + $0x2ec] ss:$16 sps:$4 sm:$0xff]  }
 0x1b0   : > { %3363 = vmatpush1.bf16.msra.mxu1 %v8042_v61  ;;  %3445 = vmatpush1.bf16.msra.mxu0 %v8045_v62  ;;  %v8096_v61 = vld [vmem:[%s8898_s30 + $0x2e0] ss:$16 sps:$4 sm:$0xff]   ;;  %v8099_v62 = vld [vmem:[%s8898_s30 + $0x2e8] ss:$16 sps:$4 sm:$0xff]  }
 0x1b1   : > { %3364 = vmatprep.subr.bf16.mxu1 %v8050_v63  ;;  %3446 = vmatprep.subr.bf16.mxu0 %v8053_v0  ;;  %v8104_v63 = vld [vmem:[%s8898_s30 + $0x304] ss:$16 sps:$4 sm:$0xff]   ;;  %v8107_v0 = vld [vmem:[%s8898_s30 + $0x30c] ss:$16 sps:$4 sm:$0xff]  }
 0x1b4   : > { %3365 = vmatpush1.bf16.msra.mxu1 %v8048_v1  ;;  %3447 = vmatpush1.bf16.msra.mxu0 %v8051_v2  ;;  %v8102_v1 = vld [vmem:[%s8898_s30 + $0x300] ss:$16 sps:$4 sm:$0xff]   ;;  %v8105_v2 = vld [vmem:[%s8898_s30 + $0x308] ss:$16 sps:$4 sm:$0xff]  }
 0x1b5   : > { %3375 = vmatprep.subr.bf16.mxu1 %v8056_v3  ;;  %3457 = vmatprep.subr.bf16.mxu0 %v8059_v4  ;;  %v8110_v3 = vld [vmem:[%s8898_s30 + $0x324] ss:$16 sps:$4 sm:$0xff]   ;;  %v8113_v4 = vld [vmem:[%s8898_s30 + $0x32c] ss:$16 sps:$4 sm:$0xff]  }
 0x24a   : > { %v2398_v9 = vpop.f32.mrb[4].mxu1  ;;  %v9263_v10 = vpop.f32.mrb[4].mxu0 }
 0x24b   : > { %v7550_v16 = vadd.f32 %v2398_v9, %v1305_v6  ;;  %v2400_v17 = vpop.f32.mrb[5].mxu1  ;;  %v2523_v18 = vpop.f32.mrb[5].mxu0  ;;  %v8108_v6 = vld [vmem:[%s8898_s30 + $0x320] ss:$16 sps:$4 sm:$0xff]   ;;  %v8119_v9 = vld [vmem:[%s8898_s30 + $0x34c] ss:$16 sps:$4 sm:$0xff]  }
 0x24c   : > { %v7551_v19 = vadd.f32 %v2400_v17, %v1309_v7  ;;  %v7553_v21 = vadd.f32 %v2523_v18, %v1317_v8  ;;  %v2402_v22 = vpop.f32.mrb[6].mxu1  ;;  %v2525_v23 = vpop.f32.mrb[6].mxu0  ;;  %v8111_v7 = vld [vmem:[%s8898_s30 + $0x328] ss:$16 sps:$4 sm:$0xff]   ;;  %v8116_v8 = vld [vmem:[%s8898_s30 + $0x344] ss:$16 sps:$4 sm:$0xff]  }
 0x24d   : > { %vm2528_vm8 = vcmp.gt.f32.partialorder %v7550_v16, 0.0  ;;  %v2532_v24 = vmul.f32 0.01, %v7550_v16  ;;  %v2403_v29 = vpop.f32.mrb[7].mxu1  ;;  %v2526_v30 = vpop.f32.mrb[7].mxu0 }
 0x24e   : > { %vm2529_vm9 = vcmp.gt.f32.partialorder %v7551_v19, 0.0  ;;  %v2533_v25 = vmul.f32 0.01, %v7551_v19  ;;  %vm2531_vm10 = vcmp.gt.f32.partialorder %v7553_v21, 0.0  ;;  %v2535_v26 = vmul.f32 0.01, %v7553_v21 }
 0x24f   : > { %v2536_v28 = vsel %vm2528_vm8, %v7550_v16, %v2532_v24  ;;  %v8114_v16 = vld [vmem:[%s8898_s30 + $0x340] ss:$16 sps:$4 sm:$0xff]   ;;  %v8117_v17 = vld [vmem:[%s8898_s30 + $0x348] ss:$16 sps:$4 sm:$0xff]   ;;  %v8122_v18 = vld [vmem:[%s8898_s30 + $0x364] ss:$16 sps:$4 sm:$0xff]   ;;  %v1313_v30 = vrot.slane %v9255_v5, %v9087_v27 }
 0x250   : > { %v2537_v31 = vsel %vm2529_vm9, %v7551_v19, %v2533_v25  ;;  %v2539_v36 = vsel %vm2531_vm10, %v7553_v21, %v2535_v26  ;;  %v2540_v38 = vpack.c.bf16 %v2536_v28, %v2536_v28  ;;  %v8125_v19 = vld [vmem:[%s8898_s30 + $0x36c] ss:$16 sps:$4 sm:$0xff]   ;;  %v8120_v21 = vld [vmem:[%s8898_s30 + $0x360] ss:$16 sps:$4 sm:$0xff]   ;;  %v8123_v22 = vld [vmem:[%s8898_s30 + $0x368] ss:$16 sps:$4 sm:$0xff]  }
 0x251   : > { %v2541_v33 = vpack.c.bf16 %v2537_v31, %v2537_v31  ;;  %v2543_v41 = vpack.c.bf16 %v2539_v36, %v2539_v36  ;;  %v8128_v23 = vld [vmem:[%s8898_s30 + $0x384] ss:$16 sps:$4 sm:$0xff]   ;;  %v8131_v24 = vld [vmem:[%s8898_s30 + $0x38c] ss:$16 sps:$4 sm:$0xff]   ;;  %v8126_v25 = vld [vmem:[%s8898_s30 + $0x380] ss:$16 sps:$4 sm:$0xff]   ;;  %v7552_v36 = vadd.f32 %v9263_v10, %v1313_v30 }
 0x252   : > { %v8129_v26 = vld [vmem:[%s8898_s30 + $0x388] ss:$16 sps:$4 sm:$0xff]   ;;  %v8134_v28 = vld [vmem:[%s8898_s30 + $0x3a4] ss:$16 sps:$4 sm:$0xff]   ;;  %v8137_v29 = vld [vmem:[%s8898_s30 + $0x3ac] ss:$16 sps:$4 sm:$0xff]  }
 0x253   : > { %3366 = vmatprep.mubr.bf16.mxu1 %v2541_v33  ;;  %3448 = vmatprep.mubr.bf16.mxu0 %v2541_v33  ;;  %v8132_v31 = vld [vmem:[%s8898_s30 + $0x3a0] ss:$16 sps:$4 sm:$0xff]   ;;  %v8135_v33 = vld [vmem:[%s8898_s30 + $0x3a8] ss:$16 sps:$4 sm:$0xff]   ;;  %vm2530_vm11 = vcmp.gt.f32.partialorder %v7552_v36, 0.0 }
 0x254   : > { %3367 = vmatmul.mubr.bf16.vlgmr.msra.gmra.mrb[8].mxu1 %v2540_v38  ;;  %3449 = vmatmul.mubr.bf16.vlgmr.msra.gmra.mrb[8].mxu0 %v2540_v38  ;;  %v8138_v38 = vld [vmem:[%s8898_s30 + $0x3c0] ss:$16 sps:$4 sm:$0xff]   ;;  %v8141_v5 = vld [vmem:[%s8898_s30 + $0x3c8] ss:$16 sps:$4 sm:$0xff]   ;;  %v8221_v30 = vld [vmem:[%s8993_s24 + $0x16c] ss:$16 sps:$4 sm:$0xff]  }
 0x255   : > { %3376 = vmatpush1.bf16.msra.mxu1 %v8054_v34  ;;  %3458 = vmatpush1.bf16.msra.mxu0 %v8057_v35  ;;  %v8140_v34 = vld [vmem:[%s8898_s30 + $0x3c4] ss:$16 sps:$4 sm:$0xff]   ;;  %v8143_v35 = vld [vmem:[%s8898_s30 + $0x3cc] ss:$16 sps:$4 sm:$0xff]   ;;  %v8147_v10 = vld [vmem:[%s8898_s30 + $0x3e8] ss:$16 sps:$4 sm:$0xff]  }
 0x256   : > { %3407 = vmatprep.mubr.bf16.mxu1 %v2543_v41  ;;  %3489 = vmatprep.mubr.bf16.mxu0 %v2543_v41  ;;  %v2534_v41 = vmul.f32 0.01, %v7552_v36 }
 0x257   : > { %3377 = vmatprep.subr.bf16.mxu1 %v8062_v39  ;;  %3459 = vmatprep.subr.bf16.mxu0 %v8065_v40  ;;  %v8146_v39 = vld [vmem:[%s8898_s30 + $0x3e4] ss:$16 sps:$4 sm:$0xff]   ;;  %v8149_v40 = vld [vmem:[%s8898_s30 + $0x3ec] ss:$16 sps:$4 sm:$0xff]  }
 0x259   : > { %3378 = vmatpush1.bf16.msra.mxu1 %v8060_v42  ;;  %3460 = vmatpush1.bf16.msra.mxu0 %v8063_v43  ;;  %v8144_v42 = vld [vmem:[%s8898_s30 + $0x3e0] ss:$16 sps:$4 sm:$0xff]   ;;  %v8152_v43 = vld [vmem:[%s8993_s24 + $0x4] ss:$16 sps:$4 sm:$0xff]  }
 0x25a   : > { %3379 = vmatprep.subr.bf16.mxu1 %v8068_v12  ;;  %3461 = vmatprep.subr.bf16.mxu0 %v8071_v44  ;;  %v8155_v12 = vld [vmem:[%s8993_s24 + $0xc] ss:$16 sps:$4 sm:$0xff]   ;;  %v2538_v44 = vsel %vm2530_vm11, %v7552_v36, %v2534_v41  ;;  %v8222_v36 = vld [vmem:[%s8993_s24 + $0x180] ss:$16 sps:$4 sm:$0xff]   ;;  %v8231_v41 = vld [vmem:[%s8993_s24 + $0x1a8] ss:$16 sps:$4 sm:$0xff]  }
 0x25d   : > { %3380 = vmatpush1.bf16.msra.mxu1 %v8066_v45  ;;  %3462 = vmatpush1.bf16.msra.mxu0 %v8069_v20  ;;  %v8150_v45 = vld [vmem:[%s8993_s24] ss:$16 sps:$4 sm:$0xff]   ;;  %v8153_v20 = vld [vmem:[%s8993_s24 + $0x8] ss:$16 sps:$4 sm:$0xff]  }
 0x25e   : > { %3381 = vmatprep.subr.bf16.mxu1 %v8074_v46  ;;  %3463 = vmatprep.subr.bf16.mxu0 %v8077_v47  ;;  %v2542_v46 = vpack.c.bf16 %v2538_v44, %v2538_v44  ;;  %v8158_v47 = vld [vmem:[%s8993_s24 + $0x24] ss:$16 sps:$4 sm:$0xff]  }
 0x25f   : > { %v8242_v44 = vld [vmem:[%s8993_s24 + $0x1e4] ss:$16 sps:$4 sm:$0xff]  }
 0x261   : > { %3382 = vmatpush1.bf16.msra.mxu1 %v8072_v48  ;;  %3464 = vmatpush1.bf16.msra.mxu0 %v8075_v49  ;;  %v8161_v48 = vld [vmem:[%s8993_s24 + $0x2c] ss:$16 sps:$4 sm:$0xff]   ;;  %v8156_v49 = vld [vmem:[%s8993_s24 + $0x20] ss:$16 sps:$4 sm:$0xff]  }
 0x262   : > { %3383 = vmatprep.subr.bf16.mxu1 %v8080_v50  ;;  %3465 = vmatprep.subr.bf16.mxu0 %v8083_v37  ;;  %v8159_v50 = vld [vmem:[%s8993_s24 + $0x28] ss:$16 sps:$4 sm:$0xff]   ;;  %v8164_v37 = vld [vmem:[%s8993_s24 + $0x44] ss:$16 sps:$4 sm:$0xff]  }
 0x265   : > { %3384 = vmatpush1.bf16.msra.mxu1 %v8078_v51  ;;  %3466 = vmatpush1.bf16.msra.mxu0 %v8081_v11  ;;  %v8167_v51 = vld [vmem:[%s8993_s24 + $0x4c] ss:$16 sps:$4 sm:$0xff]   ;;  %v8162_v11 = vld [vmem:[%s8993_s24 + $0x40] ss:$16 sps:$4 sm:$0xff]  }
 0x266   : > { %3385 = vmatprep.subr.bf16.mxu1 %v8086_v52  ;;  %3467 = vmatprep.subr.bf16.mxu0 %v8089_v53  ;;  %v8165_v52 = vld [vmem:[%s8993_s24 + $0x48] ss:$16 sps:$4 sm:$0xff]   ;;  %v8170_v53 = vld [vmem:[%s8993_s24 + $0x64] ss:$16 sps:$4 sm:$0xff]  }
 0x269   : > { %3386 = vmatpush1.bf16.msra.mxu1 %v8084_v54  ;;  %3468 = vmatpush1.bf16.msra.mxu0 %v8087_v55  ;;  %v8173_v54 = vld [vmem:[%s8993_s24 + $0x6c] ss:$16 sps:$4 sm:$0xff]   ;;  %v8168_v55 = vld [vmem:[%s8993_s24 + $0x60] ss:$16 sps:$4 sm:$0xff]  }
 0x26a   : > { %3387 = vmatprep.subr.bf16.mxu1 %v8092_v56  ;;  %3469 = vmatprep.subr.bf16.mxu0 %v8095_v57  ;;  %v8171_v56 = vld [vmem:[%s8993_s24 + $0x68] ss:$16 sps:$4 sm:$0xff]   ;;  %v8176_v57 = vld [vmem:[%s8993_s24 + $0x84] ss:$16 sps:$4 sm:$0xff]  }
 0x26d   : > { %3388 = vmatpush1.bf16.msra.mxu1 %v8090_v58  ;;  %3470 = vmatpush1.bf16.msra.mxu0 %v8093_v59  ;;  %v8179_v58 = vld [vmem:[%s8993_s24 + $0x8c] ss:$16 sps:$4 sm:$0xff]   ;;  %v8174_v59 = vld [vmem:[%s8993_s24 + $0x80] ss:$16 sps:$4 sm:$0xff]  }
 0x26e   : > { %3389 = vmatprep.subr.bf16.mxu1 %v8098_v60  ;;  %3471 = vmatprep.subr.bf16.mxu0 %v8101_v32  ;;  %v8177_v60 = vld [vmem:[%s8993_s24 + $0x88] ss:$16 sps:$4 sm:$0xff]   ;;  %v8182_v32 = vld [vmem:[%s8993_s24 + $0xa4] ss:$16 sps:$4 sm:$0xff]  }
 0x271   : > { %3390 = vmatpush1.bf16.msra.mxu1 %v8096_v61  ;;  %3472 = vmatpush1.bf16.msra.mxu0 %v8099_v62  ;;  %v8185_v61 = vld [vmem:[%s8993_s24 + $0xac] ss:$16 sps:$4 sm:$0xff]   ;;  %v8180_v62 = vld [vmem:[%s8993_s24 + $0xa0] ss:$16 sps:$4 sm:$0xff]  }
 0x272   : > { %3391 = vmatprep.subr.bf16.mxu1 %v8104_v63  ;;  %3473 = vmatprep.subr.bf16.mxu0 %v8107_v0  ;;  %v8183_v63 = vld [vmem:[%s8993_s24 + $0xa8] ss:$16 sps:$4 sm:$0xff]   ;;  %v8188_v0 = vld [vmem:[%s8993_s24 + $0xc4] ss:$16 sps:$4 sm:$0xff]  }
 0x275   : > { %3392 = vmatpush1.bf16.msra.mxu1 %v8102_v1  ;;  %3474 = vmatpush1.bf16.msra.mxu0 %v8105_v2  ;;  %v8191_v1 = vld [vmem:[%s8993_s24 + $0xcc] ss:$16 sps:$4 sm:$0xff]   ;;  %v8186_v2 = vld [vmem:[%s8993_s24 + $0xc0] ss:$16 sps:$4 sm:$0xff]  }
 0x276   : > { %3393 = vmatprep.subr.bf16.mxu1 %v8110_v3  ;;  %3475 = vmatprep.subr.bf16.mxu0 %v8113_v4  ;;  %v8189_v3 = vld [vmem:[%s8993_s24 + $0xc8] ss:$16 sps:$4 sm:$0xff]   ;;  %v8194_v4 = vld [vmem:[%s8993_s24 + $0xe4] ss:$16 sps:$4 sm:$0xff]  }
 0x279   : > { %3394 = vmatpush1.bf16.msra.mxu1 %v8108_v6  ;;  %3476 = vmatpush1.bf16.msra.mxu0 %v8111_v7  ;;  %v8197_v6 = vld [vmem:[%s8993_s24 + $0xec] ss:$16 sps:$4 sm:$0xff]   ;;  %v8192_v7 = vld [vmem:[%s8993_s24 + $0xe0] ss:$16 sps:$4 sm:$0xff]  }
 0x27a   : > { %3395 = vmatprep.subr.bf16.mxu1 %v8116_v8  ;;  %3477 = vmatprep.subr.bf16.mxu0 %v8119_v9  ;;  %v8195_v8 = vld [vmem:[%s8993_s24 + $0xe8] ss:$16 sps:$4 sm:$0xff]   ;;  %v8200_v9 = vld [vmem:[%s8993_s24 + $0x104] ss:$16 sps:$4 sm:$0xff]  }
 0x27d   : > { %3396 = vmatpush1.bf16.msra.mxu1 %v8114_v16  ;;  %3478 = vmatpush1.bf16.msra.mxu0 %v8117_v17  ;;  %v8203_v16 = vld [vmem:[%s8993_s24 + $0x10c] ss:$16 sps:$4 sm:$0xff]   ;;  %v8198_v17 = vld [vmem:[%s8993_s24 + $0x100] ss:$16 sps:$4 sm:$0xff]  }
 0x27e   : > { %3397 = vmatprep.subr.bf16.mxu1 %v8122_v18  ;;  %3479 = vmatprep.subr.bf16.mxu0 %v8125_v19  ;;  %v8201_v18 = vld [vmem:[%s8993_s24 + $0x108] ss:$16 sps:$4 sm:$0xff]   ;;  %v8206_v19 = vld [vmem:[%s8993_s24 + $0x124] ss:$16 sps:$4 sm:$0xff]  }
 0x281   : > { %3398 = vmatpush1.bf16.msra.mxu1 %v8120_v21  ;;  %3480 = vmatpush1.bf16.msra.mxu0 %v8123_v22  ;;  %v8209_v21 = vld [vmem:[%s8993_s24 + $0x12c] ss:$16 sps:$4 sm:$0xff]   ;;  %v8204_v22 = vld [vmem:[%s8993_s24 + $0x120] ss:$16 sps:$4 sm:$0xff]  }
 0x282   : > { %3399 = vmatprep.subr.bf16.mxu1 %v8128_v23  ;;  %3481 = vmatprep.subr.bf16.mxu0 %v8131_v24  ;;  %v8207_v23 = vld [vmem:[%s8993_s24 + $0x128] ss:$16 sps:$4 sm:$0xff]   ;;  %v8212_v24 = vld [vmem:[%s8993_s24 + $0x144] ss:$16 sps:$4 sm:$0xff]  }
 0x285   : > { %3400 = vmatpush1.bf16.msra.mxu1 %v8126_v25  ;;  %3482 = vmatpush1.bf16.msra.mxu0 %v8129_v26  ;;  %v8215_v25 = vld [vmem:[%s8993_s24 + $0x14c] ss:$16 sps:$4 sm:$0xff]   ;;  %v8210_v26 = vld [vmem:[%s8993_s24 + $0x140] ss:$16 sps:$4 sm:$0xff]  }
 0x286   : > { %3401 = vmatprep.subr.bf16.mxu1 %v8134_v28  ;;  %3483 = vmatprep.subr.bf16.mxu0 %v8137_v29  ;;  %v8213_v28 = vld [vmem:[%s8993_s24 + $0x148] ss:$16 sps:$4 sm:$0xff]   ;;  %v8218_v29 = vld [vmem:[%s8993_s24 + $0x164] ss:$16 sps:$4 sm:$0xff]  }
 0x289   : > { %3402 = vmatpush1.bf16.msra.mxu1 %v8132_v31  ;;  %3484 = vmatpush1.bf16.msra.mxu0 %v8135_v33  ;;  %v8216_v31 = vld [vmem:[%s8993_s24 + $0x160] ss:$16 sps:$4 sm:$0xff]   ;;  %v8219_v33 = vld [vmem:[%s8993_s24 + $0x168] ss:$16 sps:$4 sm:$0xff]  }
 0x28a   : > { %3403 = vmatprep.subr.bf16.mxu1 %v8140_v34  ;;  %3485 = vmatprep.subr.bf16.mxu0 %v8143_v35  ;;  %v8224_v34 = vld [vmem:[%s8993_s24 + $0x184] ss:$16 sps:$4 sm:$0xff]   ;;  %v8227_v35 = vld [vmem:[%s8993_s24 + $0x18c] ss:$16 sps:$4 sm:$0xff]  }
 0x28d   : > { %3404 = vmatpush1.bf16.msra.mxu1 %v8138_v38  ;;  %3486 = vmatpush1.bf16.msra.mxu0 %v8141_v5  ;;  %v8225_v38 = vld [vmem:[%s8993_s24 + $0x188] ss:$16 sps:$4 sm:$0xff]   ;;  %v8230_v5 = vld [vmem:[%s8993_s24 + $0x1a4] ss:$16 sps:$4 sm:$0xff]  }
 0x28e   : > { %3405 = vmatprep.subr.bf16.mxu1 %v8146_v39  ;;  %3487 = vmatprep.subr.bf16.mxu0 %v8149_v40  ;;  %v8233_v39 = vld [vmem:[%s8993_s24 + $0x1ac] ss:$16 sps:$4 sm:$0xff]   ;;  %v8228_v40 = vld [vmem:[%s8993_s24 + $0x1a0] ss:$16 sps:$4 sm:$0xff]  }
 0x291   : > { %3406 = vmatpush1.bf16.msra.mxu1 %v8144_v42  ;;  %3488 = vmatpush1.bf16.msra.mxu0 %v8147_v10  ;;  %v8236_v42 = vld [vmem:[%s8993_s24 + $0x1c4] ss:$16 sps:$4 sm:$0xff]   ;;  %v8239_v10 = vld [vmem:[%s8993_s24 + $0x1cc] ss:$16 sps:$4 sm:$0xff]  }
 0x292   : > { %4304 = vmatprep.subr.bf16.mxu1 %v8152_v43  ;;  %4386 = vmatprep.subr.bf16.mxu0 %v8155_v12  ;;  %v8234_v43 = vld [vmem:[%s8993_s24 + $0x1c0] ss:$16 sps:$4 sm:$0xff]   ;;  %v8237_v12 = vld [vmem:[%s8993_s24 + $0x1c8] ss:$16 sps:$4 sm:$0xff]  }
 0x294   : > { %3408 = vmatmul.mubr.bf16.vlgmr.msra.gmra.mrb[8].mxu1 %v2542_v46  ;;  %3490 = vmatmul.mubr.bf16.vlgmr.msra.gmra.mrb[8].mxu0 %v2542_v46  ;;  %v8243_v46 = vld [vmem:[%s8993_s24 + $0x1e8] ss:$16 sps:$4 sm:$0xff]  }
 0x295   : > { %4305 = vmatpush1.bf16.msra.mxu1 %v8150_v45  ;;  %4387 = vmatpush1.bf16.msra.mxu0 %v8153_v20  ;;  %v8245_v45 = vld [vmem:[%s8993_s24 + $0x1ec] ss:$16 sps:$4 sm:$0xff]   ;;  %v8240_v20 = vld [vmem:[%s8993_s24 + $0x1e0] ss:$16 sps:$4 sm:$0xff]  }
 0x296   : > { %4306 = vmatprep.subr.bf16.mxu1 %v8158_v47  ;;  %4388 = vmatprep.subr.bf16.mxu0 %v8161_v48  ;;  %v8248_v47 = vld [vmem:[%s8993_s24 + $0x204] ss:$16 sps:$4 sm:$0xff]   ;;  %v8251_v48 = vld [vmem:[%s8993_s24 + $0x20c] ss:$16 sps:$4 sm:$0xff]  }
 0x299   : > { %4307 = vmatpush1.bf16.msra.mxu1 %v8156_v49  ;;  %4389 = vmatpush1.bf16.msra.mxu0 %v8159_v50  ;;  %v9400_v49 = vld [vmem:[%s763_s21] sm:$0xf] }
 0x29a   : > { %4308 = vmatprep.subr.bf16.mxu1 %v8164_v37  ;;  %4390 = vmatprep.subr.bf16.mxu0 %v8167_v51  ;;  %v2677_v50 = vrot.slane %v9400_v49, %v9018_v13  ;;  %v2681_v37 = vrot.slane %v9400_v49, %v9021_v14  ;;  %v2689_v51 = vrot.slane %v9400_v49, %v9024_v15 }
 0x29d   : > { %4309 = vmatpush1.bf16.msra.mxu1 %v8162_v11  ;;  %4391 = vmatpush1.bf16.msra.mxu0 %v8165_v52 }
 0x29e   : > { %4310 = vmatprep.subr.bf16.mxu1 %v8170_v53  ;;  %4392 = vmatprep.subr.bf16.mxu0 %v8173_v54 }
 0x2a1   : > { %4311 = vmatpush1.bf16.msra.mxu1 %v8168_v55  ;;  %4393 = vmatpush1.bf16.msra.mxu0 %v8171_v56 }
 0x2a2   : > { %4312 = vmatprep.subr.bf16.mxu1 %v8176_v57  ;;  %4394 = vmatprep.subr.bf16.mxu0 %v8179_v58 }
 0x2a5   : > { %4313 = vmatpush1.bf16.msra.mxu1 %v8174_v59  ;;  %4395 = vmatpush1.bf16.msra.mxu0 %v8177_v60 }
 0x2a6   : > { %4314 = vmatprep.subr.bf16.mxu1 %v8182_v32  ;;  %4396 = vmatprep.subr.bf16.mxu0 %v8185_v61 }
 0x2a9   : > { %4315 = vmatpush1.bf16.msra.mxu1 %v8180_v62  ;;  %4397 = vmatpush1.bf16.msra.mxu0 %v8183_v63 }
 0x2aa   : > { %4316 = vmatprep.subr.bf16.mxu1 %v8188_v0  ;;  %4398 = vmatprep.subr.bf16.mxu0 %v8191_v1 }
 0x2ad   : > { %4317 = vmatpush1.bf16.msra.mxu1 %v8186_v2  ;;  %4399 = vmatpush1.bf16.msra.mxu0 %v8189_v3  ;;  %v8246_v3 = vld [vmem:[%s8993_s24 + $0x200] ss:$16 sps:$4 sm:$0xff]  }
 0x2ae   : > { %4318 = vmatprep.subr.bf16.mxu1 %v8194_v4  ;;  %4400 = vmatprep.subr.bf16.mxu0 %v8197_v6  ;;  %v8249_v4 = vld [vmem:[%s8993_s24 + $0x208] ss:$16 sps:$4 sm:$0xff]  }
 0x2b1   : > { %4319 = vmatpush1.bf16.msra.mxu1 %v8192_v7  ;;  %4401 = vmatpush1.bf16.msra.mxu0 %v8195_v8  ;;  %v8254_v8 = vld [vmem:[%s8993_s24 + $0x224] ss:$16 sps:$4 sm:$0xff]  }
 0x2b2   : > { %4320 = vmatprep.subr.bf16.mxu1 %v8200_v9  ;;  %4402 = vmatprep.subr.bf16.mxu0 %v8203_v16  ;;  %v8257_v9 = vld [vmem:[%s8993_s24 + $0x22c] ss:$16 sps:$4 sm:$0xff]  }
 0x2b5   : > { %4321 = vmatpush1.bf16.msra.mxu1 %v8198_v17  ;;  %4403 = vmatpush1.bf16.msra.mxu0 %v8201_v18  ;;  %v8252_v17 = vld [vmem:[%s8993_s24 + $0x220] ss:$16 sps:$4 sm:$0xff]   ;;  %v8255_v18 = vld [vmem:[%s8993_s24 + $0x228] ss:$16 sps:$4 sm:$0xff]  }
 0x2b6   : > { %4322 = vmatprep.subr.bf16.mxu1 %v8206_v19  ;;  %4404 = vmatprep.subr.bf16.mxu0 %v8209_v21  ;;  %v8260_v19 = vld [vmem:[%s8993_s24 + $0x244] ss:$16 sps:$4 sm:$0xff]   ;;  %v8263_v21 = vld [vmem:[%s8993_s24 + $0x24c] ss:$16 sps:$4 sm:$0xff]  }
 0x2b9   : > { %4323 = vmatpush1.bf16.msra.mxu1 %v8204_v22  ;;  %4405 = vmatpush1.bf16.msra.mxu0 %v8207_v23  ;;  %v8258_v22 = vld [vmem:[%s8993_s24 + $0x240] ss:$16 sps:$4 sm:$0xff]   ;;  %v8261_v23 = vld [vmem:[%s8993_s24 + $0x248] ss:$16 sps:$4 sm:$0xff]  }
 0x2ba   : > { %4324 = vmatprep.subr.bf16.mxu1 %v8212_v24  ;;  %4406 = vmatprep.subr.bf16.mxu0 %v8215_v25  ;;  %v8266_v24 = vld [vmem:[%s8993_s24 + $0x264] ss:$16 sps:$4 sm:$0xff]   ;;  %v8269_v25 = vld [vmem:[%s8993_s24 + $0x26c] ss:$16 sps:$4 sm:$0xff]  }
 0x2bd   : > { %4325 = vmatpush1.bf16.msra.mxu1 %v8210_v26  ;;  %4407 = vmatpush1.bf16.msra.mxu0 %v8213_v28  ;;  %v8264_v26 = vld [vmem:[%s8993_s24 + $0x260] ss:$16 sps:$4 sm:$0xff]   ;;  %v8267_v28 = vld [vmem:[%s8993_s24 + $0x268] ss:$16 sps:$4 sm:$0xff]  }
 0x2be   : > { %4326 = vmatprep.subr.bf16.mxu1 %v8218_v29  ;;  %4408 = vmatprep.subr.bf16.mxu0 %v8221_v30  ;;  %v8272_v29 = vld [vmem:[%s8993_s24 + $0x284] ss:$16 sps:$4 sm:$0xff]   ;;  %v8275_v30 = vld [vmem:[%s8993_s24 + $0x28c] ss:$16 sps:$4 sm:$0xff]  }
 0x2c1   : > { %4327 = vmatpush1.bf16.msra.mxu1 %v8216_v31  ;;  %4409 = vmatpush1.bf16.msra.mxu0 %v8219_v33  ;;  %v8270_v31 = vld [vmem:[%s8993_s24 + $0x280] ss:$16 sps:$4 sm:$0xff]   ;;  %v8273_v33 = vld [vmem:[%s8993_s24 + $0x288] ss:$16 sps:$4 sm:$0xff]  }
 0x2c2   : > { %4328 = vmatprep.subr.bf16.mxu1 %v8224_v34  ;;  %4410 = vmatprep.subr.bf16.mxu0 %v8227_v35  ;;  %v8278_v34 = vld [vmem:[%s8993_s24 + $0x2a4] ss:$16 sps:$4 sm:$0xff]   ;;  %v8281_v35 = vld [vmem:[%s8993_s24 + $0x2ac] ss:$16 sps:$4 sm:$0xff]  }
 0x2c5   : > { %4329 = vmatpush1.bf16.msra.mxu1 %v8222_v36  ;;  %4411 = vmatpush1.bf16.msra.mxu0 %v8225_v38  ;;  %v8276_v36 = vld [vmem:[%s8993_s24 + $0x2a0] ss:$16 sps:$4 sm:$0xff]   ;;  %v8279_v38 = vld [vmem:[%s8993_s24 + $0x2a8] ss:$16 sps:$4 sm:$0xff]  }
 0x2c6   : > { %4330 = vmatprep.subr.bf16.mxu1 %v8230_v5  ;;  %4412 = vmatprep.subr.bf16.mxu0 %v8233_v39  ;;  %v8284_v5 = vld [vmem:[%s8993_s24 + $0x2c4] ss:$16 sps:$4 sm:$0xff]   ;;  %v8287_v39 = vld [vmem:[%s8993_s24 + $0x2cc] ss:$16 sps:$4 sm:$0xff]  }
 0x2c9   : > { %4331 = vmatpush1.bf16.msra.mxu1 %v8228_v40  ;;  %4413 = vmatpush1.bf16.msra.mxu0 %v8231_v41  ;;  %v8282_v40 = vld [vmem:[%s8993_s24 + $0x2c0] ss:$16 sps:$4 sm:$0xff]   ;;  %v8285_v41 = vld [vmem:[%s8993_s24 + $0x2c8] ss:$16 sps:$4 sm:$0xff]  }
 0x2ca   : > { %4332 = vmatprep.subr.bf16.mxu1 %v8236_v42  ;;  %4414 = vmatprep.subr.bf16.mxu0 %v8239_v10  ;;  %v8290_v42 = vld [vmem:[%s8993_s24 + $0x2e4] ss:$16 sps:$4 sm:$0xff]   ;;  %v8293_v10 = vld [vmem:[%s8993_s24 + $0x2ec] ss:$16 sps:$4 sm:$0xff]  }
 0x2cd   : > { %4333 = vmatpush1.bf16.msra.mxu1 %v8234_v43  ;;  %4415 = vmatpush1.bf16.msra.mxu0 %v8237_v12  ;;  %v8288_v43 = vld [vmem:[%s8993_s24 + $0x2e0] ss:$16 sps:$4 sm:$0xff]   ;;  %v8291_v12 = vld [vmem:[%s8993_s24 + $0x2e8] ss:$16 sps:$4 sm:$0xff]  }
 0x2ce   : > { %4334 = vmatprep.subr.bf16.mxu1 %v8242_v44  ;;  %4416 = vmatprep.subr.bf16.mxu0 %v8245_v45  ;;  %v8296_v44 = vld [vmem:[%s8993_s24 + $0x304] ss:$16 sps:$4 sm:$0xff]   ;;  %v8299_v45 = vld [vmem:[%s8993_s24 + $0x30c] ss:$16 sps:$4 sm:$0xff]  }
 0x2d1   : > { %4335 = vmatpush1.bf16.msra.mxu1 %v8240_v20  ;;  %4417 = vmatpush1.bf16.msra.mxu0 %v8243_v46  ;;  %v8294_v20 = vld [vmem:[%s8993_s24 + $0x300] ss:$16 sps:$4 sm:$0xff]   ;;  %v8297_v46 = vld [vmem:[%s8993_s24 + $0x308] ss:$16 sps:$4 sm:$0xff]  }
 0x2d2   : > { %4345 = vmatprep.subr.bf16.mxu1 %v8248_v47  ;;  %4427 = vmatprep.subr.bf16.mxu0 %v8251_v48  ;;  %v8302_v47 = vld [vmem:[%s8993_s24 + $0x324] ss:$16 sps:$4 sm:$0xff]   ;;  %v8305_v48 = vld [vmem:[%s8993_s24 + $0x32c] ss:$16 sps:$4 sm:$0xff]  }
 0x367   : > { %v3409_v11 = vpop.f32.mrb[8].mxu1  ;;  %v9408_v52 = vpop.f32.mrb[8].mxu0 }
 0x368   : > { %v7554_v53 = vadd.f32 %v3409_v11, %v2677_v50  ;;  %v3411_v54 = vpop.f32.mrb[9].mxu1  ;;  %v3493_v55 = vpop.f32.mrb[9].mxu0  ;;  %v8300_v50 = vld [vmem:[%s8993_s24 + $0x320] ss:$16 sps:$4 sm:$0xff]   ;;  %v8311_v11 = vld [vmem:[%s8993_s24 + $0x34c] ss:$16 sps:$4 sm:$0xff]  }
 0x369   : > { %v7555_v56 = vadd.f32 %v3411_v54, %v2681_v37  ;;  %v7557_v57 = vadd.f32 %v3493_v55, %v2689_v51  ;;  %v3413_v58 = vpop.f32.mrb[10].mxu1  ;;  %v3495_v59 = vpop.f32.mrb[10].mxu0  ;;  %v8303_v37 = vld [vmem:[%s8993_s24 + $0x328] ss:$16 sps:$4 sm:$0xff]   ;;  %v8308_v51 = vld [vmem:[%s8993_s24 + $0x344] ss:$16 sps:$4 sm:$0xff]  }
 0x36a   : > { %vm3498_vm12 = vcmp.gt.f32.partialorder %v7554_v53, 0.0  ;;  %v3502_v60 = vmul.f32 0.01, %v7554_v53  ;;  %v3414_v63 = vpop.f32.mrb[11].mxu1  ;;  %v3496_v0 = vpop.f32.mrb[11].mxu0 }
 0x36b   : > { %vm3499_vm13 = vcmp.gt.f32.partialorder %v7555_v56, 0.0  ;;  %v3503_v32 = vmul.f32 0.01, %v7555_v56  ;;  %vm3501_vm14 = vcmp.gt.f32.partialorder %v7557_v57, 0.0  ;;  %v3505_v61 = vmul.f32 0.01, %v7557_v57 }
 0x36c   : > { %v3506_v62 = vsel %vm3498_vm12, %v7554_v53, %v3502_v60  ;;  %v8306_v53 = vld [vmem:[%s8993_s24 + $0x340] ss:$16 sps:$4 sm:$0xff]   ;;  %v8309_v54 = vld [vmem:[%s8993_s24 + $0x348] ss:$16 sps:$4 sm:$0xff]   ;;  %v8314_v55 = vld [vmem:[%s8993_s24 + $0x364] ss:$16 sps:$4 sm:$0xff]   ;;  %v2685_v0 = vrot.slane %v9400_v49, %v9087_v27 }
 0x36d   : > { %v3507_v1 = vsel %vm3499_vm13, %v7555_v56, %v3503_v32  ;;  %v3509_v6 = vsel %vm3501_vm14, %v7557_v57, %v3505_v61  ;;  %v3510_v7 = vpack.c.bf16 %v3506_v62, %v3506_v62  ;;  %v8317_v56 = vld [vmem:[%s8993_s24 + $0x36c] ss:$16 sps:$4 sm:$0xff]   ;;  %v8312_v57 = vld [vmem:[%s8993_s24 + $0x360] ss:$16 sps:$4 sm:$0xff]   ;;  %v8315_v58 = vld [vmem:[%s8993_s24 + $0x368] ss:$16 sps:$4 sm:$0xff]  }
 0x36e   : > { %v3511_v2 = vpack.c.bf16 %v3507_v1, %v3507_v1  ;;  %v3513_v16 = vpack.c.bf16 %v3509_v6, %v3509_v6  ;;  %v8320_v59 = vld [vmem:[%s8993_s24 + $0x384] ss:$16 sps:$4 sm:$0xff]   ;;  %v8323_v60 = vld [vmem:[%s8993_s24 + $0x38c] ss:$16 sps:$4 sm:$0xff]   ;;  %v8318_v32 = vld [vmem:[%s8993_s24 + $0x380] ss:$16 sps:$4 sm:$0xff]   ;;  %v7556_v6 = vadd.f32 %v9408_v52, %v2685_v0 }
 0x36f   : > { %v8321_v61 = vld [vmem:[%s8993_s24 + $0x388] ss:$16 sps:$4 sm:$0xff]   ;;  %v8326_v62 = vld [vmem:[%s8993_s24 + $0x3a4] ss:$16 sps:$4 sm:$0xff]   ;;  %v8329_v63 = vld [vmem:[%s8993_s24 + $0x3ac] ss:$16 sps:$4 sm:$0xff]  }
 0x370   : > { %4336 = vmatprep.mubr.bf16.mxu1 %v3511_v2  ;;  %4418 = vmatprep.mubr.bf16.mxu0 %v3511_v2  ;;  %v8324_v1 = vld [vmem:[%s8993_s24 + $0x3a0] ss:$16 sps:$4 sm:$0xff]   ;;  %v8327_v2 = vld [vmem:[%s8993_s24 + $0x3a8] ss:$16 sps:$4 sm:$0xff]   ;;  %vm3500_vm15 = vcmp.gt.f32.partialorder %v7556_v6, 0.0  ;;  %vm6528_vm12 = vcmask 64512  }
 0x371   : > { %4337 = vmatmul.mubr.bf16.vlgmr.msra.gmra.mrb[12].mxu1 %v3510_v7  ;;  %4419 = vmatmul.mubr.bf16.vlgmr.msra.gmra.mrb[12].mxu0 %v3510_v7  ;;  %v8330_v7 = vld [vmem:[%s8993_s24 + $0x3c0] ss:$16 sps:$4 sm:$0xff]   ;;  %v8333_v49 = vld [vmem:[%s8993_s24 + $0x3c8] ss:$16 sps:$4 sm:$0xff]   ;;  %v8413_v0 = vld [vmem:[%s9015_s0 + $0x16c] ss:$16 sps:$4 sm:$0xff]  }
 0x372   : > { %4346 = vmatpush1.bf16.msra.mxu1 %v8246_v3  ;;  %4428 = vmatpush1.bf16.msra.mxu0 %v8249_v4  ;;  %v8332_v3 = vld [vmem:[%s8993_s24 + $0x3c4] ss:$16 sps:$4 sm:$0xff]   ;;  %v8335_v4 = vld [vmem:[%s8993_s24 + $0x3cc] ss:$16 sps:$4 sm:$0xff]   ;;  %v8339_v52 = vld [vmem:[%s8993_s24 + $0x3e8] ss:$16 sps:$4 sm:$0xff]  }
 0x373   : > { %4377 = vmatprep.mubr.bf16.mxu1 %v3513_v16  ;;  %4459 = vmatprep.mubr.bf16.mxu0 %v3513_v16  ;;  %v3504_v16 = vmul.f32 0.01, %v7556_v6 }
 0x374   : > { %4347 = vmatprep.subr.bf16.mxu1 %v8254_v8  ;;  %4429 = vmatprep.subr.bf16.mxu0 %v8257_v9  ;;  %v8338_v8 = vld [vmem:[%s8993_s24 + $0x3e4] ss:$16 sps:$4 sm:$0xff]   ;;  %v8341_v9 = vld [vmem:[%s8993_s24 + $0x3ec] ss:$16 sps:$4 sm:$0xff]  }
 0x376   : > { %4348 = vmatpush1.bf16.msra.mxu1 %v8252_v17  ;;  %4430 = vmatpush1.bf16.msra.mxu0 %v8255_v18  ;;  %v8336_v17 = vld [vmem:[%s8993_s24 + $0x3e0] ss:$16 sps:$4 sm:$0xff]   ;;  %v8344_v18 = vld [vmem:[%s9015_s0 + $0x4] ss:$16 sps:$4 sm:$0xff]  }
 0x377   : > { %4349 = vmatprep.subr.bf16.mxu1 %v8260_v19  ;;  %4431 = vmatprep.subr.bf16.mxu0 %v8263_v21  ;;  %v8347_v19 = vld [vmem:[%s9015_s0 + $0xc] ss:$16 sps:$4 sm:$0xff]   ;;  %v3508_v21 = vsel %vm3500_vm15, %v7556_v6, %v3504_v16  ;;  %v8414_v6 = vld [vmem:[%s9015_s0 + $0x180] ss:$16 sps:$4 sm:$0xff]   ;;  %v8423_v16 = vld [vmem:[%s9015_s0 + $0x1a8] ss:$16 sps:$4 sm:$0xff]  }
 0x37a   : > { %4350 = vmatpush1.bf16.msra.mxu1 %v8258_v22  ;;  %4432 = vmatpush1.bf16.msra.mxu0 %v8261_v23  ;;  %v8342_v22 = vld [vmem:[%s9015_s0] ss:$16 sps:$4 sm:$0xff]   ;;  %v8345_v23 = vld [vmem:[%s9015_s0 + $0x8] ss:$16 sps:$4 sm:$0xff]  }
 0x37b   : > { %4351 = vmatprep.subr.bf16.mxu1 %v8266_v24  ;;  %4433 = vmatprep.subr.bf16.mxu0 %v8269_v25  ;;  %v3512_v24 = vpack.c.bf16 %v3508_v21, %v3508_v21  ;;  %v8350_v25 = vld [vmem:[%s9015_s0 + $0x24] ss:$16 sps:$4 sm:$0xff]  }
 0x37c   : > { %v8434_v21 = vld [vmem:[%s9015_s0 + $0x1e4] ss:$16 sps:$4 sm:$0xff]  }
 0x37e   : > { %4352 = vmatpush1.bf16.msra.mxu1 %v8264_v26  ;;  %4434 = vmatpush1.bf16.msra.mxu0 %v8267_v28  ;;  %v8353_v26 = vld [vmem:[%s9015_s0 + $0x2c] ss:$16 sps:$4 sm:$0xff]   ;;  %v8348_v28 = vld [vmem:[%s9015_s0 + $0x20] ss:$16 sps:$4 sm:$0xff]  }
 0x37f   : > { %4353 = vmatprep.subr.bf16.mxu1 %v8272_v29  ;;  %4435 = vmatprep.subr.bf16.mxu0 %v8275_v30  ;;  %v8351_v29 = vld [vmem:[%s9015_s0 + $0x28] ss:$16 sps:$4 sm:$0xff]   ;;  %v8356_v30 = vld [vmem:[%s9015_s0 + $0x44] ss:$16 sps:$4 sm:$0xff]  }
 0x382   : > { %4354 = vmatpush1.bf16.msra.mxu1 %v8270_v31  ;;  %4436 = vmatpush1.bf16.msra.mxu0 %v8273_v33  ;;  %v8359_v31 = vld [vmem:[%s9015_s0 + $0x4c] ss:$16 sps:$4 sm:$0xff]   ;;  %v8354_v33 = vld [vmem:[%s9015_s0 + $0x40] ss:$16 sps:$4 sm:$0xff]  }
 0x383   : > { %4355 = vmatprep.subr.bf16.mxu1 %v8278_v34  ;;  %4437 = vmatprep.subr.bf16.mxu0 %v8281_v35  ;;  %v8357_v34 = vld [vmem:[%s9015_s0 + $0x48] ss:$16 sps:$4 sm:$0xff]   ;;  %v8362_v35 = vld [vmem:[%s9015_s0 + $0x64] ss:$16 sps:$4 sm:$0xff]  }
 0x386   : > { %4356 = vmatpush1.bf16.msra.mxu1 %v8276_v36  ;;  %4438 = vmatpush1.bf16.msra.mxu0 %v8279_v38  ;;  %v8365_v36 = vld [vmem:[%s9015_s0 + $0x6c] ss:$16 sps:$4 sm:$0xff]   ;;  %v8360_v38 = vld [vmem:[%s9015_s0 + $0x60] ss:$16 sps:$4 sm:$0xff]  }
 0x387   : > { %4357 = vmatprep.subr.bf16.mxu1 %v8284_v5  ;;  %4439 = vmatprep.subr.bf16.mxu0 %v8287_v39  ;;  %v8363_v5 = vld [vmem:[%s9015_s0 + $0x68] ss:$16 sps:$4 sm:$0xff]   ;;  %v8368_v39 = vld [vmem:[%s9015_s0 + $0x84] ss:$16 sps:$4 sm:$0xff]  }
 0x38a   : > { %4358 = vmatpush1.bf16.msra.mxu1 %v8282_v40  ;;  %4440 = vmatpush1.bf16.msra.mxu0 %v8285_v41  ;;  %v8371_v40 = vld [vmem:[%s9015_s0 + $0x8c] ss:$16 sps:$4 sm:$0xff]   ;;  %v8366_v41 = vld [vmem:[%s9015_s0 + $0x80] ss:$16 sps:$4 sm:$0xff]  }
 0x38b   : > { %4359 = vmatprep.subr.bf16.mxu1 %v8290_v42  ;;  %4441 = vmatprep.subr.bf16.mxu0 %v8293_v10  ;;  %v8369_v42 = vld [vmem:[%s9015_s0 + $0x88] ss:$16 sps:$4 sm:$0xff]   ;;  %v8374_v10 = vld [vmem:[%s9015_s0 + $0xa4] ss:$16 sps:$4 sm:$0xff]  }
 0x38e   : > { %4360 = vmatpush1.bf16.msra.mxu1 %v8288_v43  ;;  %4442 = vmatpush1.bf16.msra.mxu0 %v8291_v12  ;;  %v8377_v43 = vld [vmem:[%s9015_s0 + $0xac] ss:$16 sps:$4 sm:$0xff]   ;;  %v8372_v12 = vld [vmem:[%s9015_s0 + $0xa0] ss:$16 sps:$4 sm:$0xff]  }
 0x38f   : > { %4361 = vmatprep.subr.bf16.mxu1 %v8296_v44  ;;  %4443 = vmatprep.subr.bf16.mxu0 %v8299_v45  ;;  %v8375_v44 = vld [vmem:[%s9015_s0 + $0xa8] ss:$16 sps:$4 sm:$0xff]   ;;  %v8380_v45 = vld [vmem:[%s9015_s0 + $0xc4] ss:$16 sps:$4 sm:$0xff]  }
 0x392   : > { %4362 = vmatpush1.bf16.msra.mxu1 %v8294_v20  ;;  %4444 = vmatpush1.bf16.msra.mxu0 %v8297_v46  ;;  %v8383_v20 = vld [vmem:[%s9015_s0 + $0xcc] ss:$16 sps:$4 sm:$0xff]   ;;  %v8378_v46 = vld [vmem:[%s9015_s0 + $0xc0] ss:$16 sps:$4 sm:$0xff]  }
 0x393   : > { %4363 = vmatprep.subr.bf16.mxu1 %v8302_v47  ;;  %4445 = vmatprep.subr.bf16.mxu0 %v8305_v48  ;;  %v8381_v47 = vld [vmem:[%s9015_s0 + $0xc8] ss:$16 sps:$4 sm:$0xff]   ;;  %v8386_v48 = vld [vmem:[%s9015_s0 + $0xe4] ss:$16 sps:$4 sm:$0xff]  }
 0x396   : > { %4364 = vmatpush1.bf16.msra.mxu1 %v8300_v50  ;;  %4446 = vmatpush1.bf16.msra.mxu0 %v8303_v37  ;;  %v8389_v50 = vld [vmem:[%s9015_s0 + $0xec] ss:$16 sps:$4 sm:$0xff]   ;;  %v8384_v37 = vld [vmem:[%s9015_s0 + $0xe0] ss:$16 sps:$4 sm:$0xff]  }
 0x397   : > { %4365 = vmatprep.subr.bf16.mxu1 %v8308_v51  ;;  %4447 = vmatprep.subr.bf16.mxu0 %v8311_v11  ;;  %v8387_v51 = vld [vmem:[%s9015_s0 + $0xe8] ss:$16 sps:$4 sm:$0xff]   ;;  %v8392_v11 = vld [vmem:[%s9015_s0 + $0x104] ss:$16 sps:$4 sm:$0xff]  }
 0x39a   : > { %4366 = vmatpush1.bf16.msra.mxu1 %v8306_v53  ;;  %4448 = vmatpush1.bf16.msra.mxu0 %v8309_v54  ;;  %v8395_v53 = vld [vmem:[%s9015_s0 + $0x10c] ss:$16 sps:$4 sm:$0xff]   ;;  %v8390_v54 = vld [vmem:[%s9015_s0 + $0x100] ss:$16 sps:$4 sm:$0xff]  }
 0x39b   : > { %4367 = vmatprep.subr.bf16.mxu1 %v8314_v55  ;;  %4449 = vmatprep.subr.bf16.mxu0 %v8317_v56  ;;  %v8393_v55 = vld [vmem:[%s9015_s0 + $0x108] ss:$16 sps:$4 sm:$0xff]   ;;  %v8398_v56 = vld [vmem:[%s9015_s0 + $0x124] ss:$16 sps:$4 sm:$0xff]  }
 0x39e   : > { %4368 = vmatpush1.bf16.msra.mxu1 %v8312_v57  ;;  %4450 = vmatpush1.bf16.msra.mxu0 %v8315_v58  ;;  %v8401_v57 = vld [vmem:[%s9015_s0 + $0x12c] ss:$16 sps:$4 sm:$0xff]   ;;  %v8396_v58 = vld [vmem:[%s9015_s0 + $0x120] ss:$16 sps:$4 sm:$0xff]  }
 0x39f   : > { %4369 = vmatprep.subr.bf16.mxu1 %v8320_v59  ;;  %4451 = vmatprep.subr.bf16.mxu0 %v8323_v60  ;;  %v8399_v59 = vld [vmem:[%s9015_s0 + $0x128] ss:$16 sps:$4 sm:$0xff]   ;;  %v8404_v60 = vld [vmem:[%s9015_s0 + $0x144] ss:$16 sps:$4 sm:$0xff]  }
 0x3a2   : > { %4370 = vmatpush1.bf16.msra.mxu1 %v8318_v32  ;;  %4452 = vmatpush1.bf16.msra.mxu0 %v8321_v61  ;;  %v8407_v32 = vld [vmem:[%s9015_s0 + $0x14c] ss:$16 sps:$4 sm:$0xff]   ;;  %v8402_v61 = vld [vmem:[%s9015_s0 + $0x140] ss:$16 sps:$4 sm:$0xff]  }
 0x3a3   : > { %4371 = vmatprep.subr.bf16.mxu1 %v8326_v62  ;;  %4453 = vmatprep.subr.bf16.mxu0 %v8329_v63  ;;  %v8405_v62 = vld [vmem:[%s9015_s0 + $0x148] ss:$16 sps:$4 sm:$0xff]   ;;  %v8410_v63 = vld [vmem:[%s9015_s0 + $0x164] ss:$16 sps:$4 sm:$0xff]  }
 0x3a6   : > { %4372 = vmatpush1.bf16.msra.mxu1 %v8324_v1  ;;  %4454 = vmatpush1.bf16.msra.mxu0 %v8327_v2  ;;  %v8408_v1 = vld [vmem:[%s9015_s0 + $0x160] ss:$16 sps:$4 sm:$0xff]   ;;  %v8411_v2 = vld [vmem:[%s9015_s0 + $0x168] ss:$16 sps:$4 sm:$0xff]  }
 0x3a7   : > { %4373 = vmatprep.subr.bf16.mxu1 %v8332_v3  ;;  %4455 = vmatprep.subr.bf16.mxu0 %v8335_v4  ;;  %v8416_v3 = vld [vmem:[%s9015_s0 + $0x184] ss:$16 sps:$4 sm:$0xff]   ;;  %v8419_v4 = vld [vmem:[%s9015_s0 + $0x18c] ss:$16 sps:$4 sm:$0xff]  }
 0x3aa   : > { %4374 = vmatpush1.bf16.msra.mxu1 %v8330_v7  ;;  %4456 = vmatpush1.bf16.msra.mxu0 %v8333_v49  ;;  %v8417_v7 = vld [vmem:[%s9015_s0 + $0x188] ss:$16 sps:$4 sm:$0xff]   ;;  %v8422_v49 = vld [vmem:[%s9015_s0 + $0x1a4] ss:$16 sps:$4 sm:$0xff]  }
 0x3ab   : > { %4375 = vmatprep.subr.bf16.mxu1 %v8338_v8  ;;  %4457 = vmatprep.subr.bf16.mxu0 %v8341_v9  ;;  %v8425_v8 = vld [vmem:[%s9015_s0 + $0x1ac] ss:$16 sps:$4 sm:$0xff]   ;;  %v8420_v9 = vld [vmem:[%s9015_s0 + $0x1a0] ss:$16 sps:$4 sm:$0xff]  }
 0x3ae   : > { %4376 = vmatpush1.bf16.msra.mxu1 %v8336_v17  ;;  %4458 = vmatpush1.bf16.msra.mxu0 %v8339_v52  ;;  %v8428_v17 = vld [vmem:[%s9015_s0 + $0x1c4] ss:$16 sps:$4 sm:$0xff]   ;;  %v8431_v52 = vld [vmem:[%s9015_s0 + $0x1cc] ss:$16 sps:$4 sm:$0xff]  }
 0x3af   : > { %5274 = vmatprep.subr.bf16.mxu1 %v8344_v18  ;;  %5356 = vmatprep.subr.bf16.mxu0 %v8347_v19  ;;  %v8426_v18 = vld [vmem:[%s9015_s0 + $0x1c0] ss:$16 sps:$4 sm:$0xff]   ;;  %v8429_v19 = vld [vmem:[%s9015_s0 + $0x1c8] ss:$16 sps:$4 sm:$0xff]  }
 0x3b1   : > { %4378 = vmatmul.mubr.bf16.vlgmr.msra.gmra.mrb[12].mxu1 %v3512_v24  ;;  %4460 = vmatmul.mubr.bf16.vlgmr.msra.gmra.mrb[12].mxu0 %v3512_v24  ;;  %v8435_v24 = vld [vmem:[%s9015_s0 + $0x1e8] ss:$16 sps:$4 sm:$0xff]  }
 0x3b2   : > { %5275 = vmatpush1.bf16.msra.mxu1 %v8342_v22  ;;  %5357 = vmatpush1.bf16.msra.mxu0 %v8345_v23  ;;  %v8437_v22 = vld [vmem:[%s9015_s0 + $0x1ec] ss:$16 sps:$4 sm:$0xff]   ;;  %v8432_v23 = vld [vmem:[%s9015_s0 + $0x1e0] ss:$16 sps:$4 sm:$0xff]  }
 0x3b3   : > { %5276 = vmatprep.subr.bf16.mxu1 %v8350_v25  ;;  %5358 = vmatprep.subr.bf16.mxu0 %v8353_v26  ;;  %v8440_v25 = vld [vmem:[%s9015_s0 + $0x204] ss:$16 sps:$4 sm:$0xff]   ;;  %v8443_v26 = vld [vmem:[%s9015_s0 + $0x20c] ss:$16 sps:$4 sm:$0xff]  }
 0x3b6   : > { %5277 = vmatpush1.bf16.msra.mxu1 %v8348_v28  ;;  %5359 = vmatpush1.bf16.msra.mxu0 %v8351_v29  ;;  %v9545_v28 = vld [vmem:[%s772_s27] sm:$0xf] }
 0x3b7   : > { %5278 = vmatprep.subr.bf16.mxu1 %v8356_v30  ;;  %5360 = vmatprep.subr.bf16.mxu0 %v8359_v31  ;;  %v3647_v29 = vrot.slane %v9545_v28, %v9018_v13  ;;  %v3651_v30 = vrot.slane %v9545_v28, %v9021_v14  ;;  %v3659_v31 = vrot.slane %v9545_v28, %v9024_v15 }
 0x3ba   : > { %5279 = vmatpush1.bf16.msra.mxu1 %v8354_v33  ;;  %5361 = vmatpush1.bf16.msra.mxu0 %v8357_v34 }
 0x3bb   : > { %5280 = vmatprep.subr.bf16.mxu1 %v8362_v35  ;;  %5362 = vmatprep.subr.bf16.mxu0 %v8365_v36 }
 0x3be   : > { %5281 = vmatpush1.bf16.msra.mxu1 %v8360_v38  ;;  %5363 = vmatpush1.bf16.msra.mxu0 %v8363_v5 }
 0x3bf   : > { %5282 = vmatprep.subr.bf16.mxu1 %v8368_v39  ;;  %5364 = vmatprep.subr.bf16.mxu0 %v8371_v40 }
 0x3c2   : > { %5283 = vmatpush1.bf16.msra.mxu1 %v8366_v41  ;;  %5365 = vmatpush1.bf16.msra.mxu0 %v8369_v42 }
 0x3c3   : > { %5284 = vmatprep.subr.bf16.mxu1 %v8374_v10  ;;  %5366 = vmatprep.subr.bf16.mxu0 %v8377_v43 }
 0x3c6   : > { %5285 = vmatpush1.bf16.msra.mxu1 %v8372_v12  ;;  %5367 = vmatpush1.bf16.msra.mxu0 %v8375_v44 }
 0x3c7   : > { %5286 = vmatprep.subr.bf16.mxu1 %v8380_v45  ;;  %5368 = vmatprep.subr.bf16.mxu0 %v8383_v20 }
 0x3ca   : > { %5287 = vmatpush1.bf16.msra.mxu1 %v8378_v46  ;;  %5369 = vmatpush1.bf16.msra.mxu0 %v8381_v47  ;;  %v8438_v47 = vld [vmem:[%s9015_s0 + $0x200] ss:$16 sps:$4 sm:$0xff]  }
 0x3cb   : > { %5288 = vmatprep.subr.bf16.mxu1 %v8386_v48  ;;  %5370 = vmatprep.subr.bf16.mxu0 %v8389_v50  ;;  %v8441_v48 = vld [vmem:[%s9015_s0 + $0x208] ss:$16 sps:$4 sm:$0xff]  }
 0x3ce   : > { %5289 = vmatpush1.bf16.msra.mxu1 %v8384_v37  ;;  %5371 = vmatpush1.bf16.msra.mxu0 %v8387_v51  ;;  %v8446_v51 = vld [vmem:[%s9015_s0 + $0x224] ss:$16 sps:$4 sm:$0xff]  }
 0x3cf   : > { %5290 = vmatprep.subr.bf16.mxu1 %v8392_v11  ;;  %5372 = vmatprep.subr.bf16.mxu0 %v8395_v53  ;;  %v8449_v11 = vld [vmem:[%s9015_s0 + $0x22c] ss:$16 sps:$4 sm:$0xff]  }
 0x3d2   : > { %5291 = vmatpush1.bf16.msra.mxu1 %v8390_v54  ;;  %5373 = vmatpush1.bf16.msra.mxu0 %v8393_v55  ;;  %v8444_v54 = vld [vmem:[%s9015_s0 + $0x220] ss:$16 sps:$4 sm:$0xff]   ;;  %v8447_v55 = vld [vmem:[%s9015_s0 + $0x228] ss:$16 sps:$4 sm:$0xff]  }
 0x3d3   : > { %5292 = vmatprep.subr.bf16.mxu1 %v8398_v56  ;;  %5374 = vmatprep.subr.bf16.mxu0 %v8401_v57  ;;  %v8452_v56 = vld [vmem:[%s9015_s0 + $0x244] ss:$16 sps:$4 sm:$0xff]   ;;  %v8455_v57 = vld [vmem:[%s9015_s0 + $0x24c] ss:$16 sps:$4 sm:$0xff]  }
 0x3d6   : > { %5293 = vmatpush1.bf16.msra.mxu1 %v8396_v58  ;;  %5375 = vmatpush1.bf16.msra.mxu0 %v8399_v59  ;;  %v8450_v58 = vld [vmem:[%s9015_s0 + $0x240] ss:$16 sps:$4 sm:$0xff]   ;;  %v8453_v59 = vld [vmem:[%s9015_s0 + $0x248] ss:$16 sps:$4 sm:$0xff]  }
 0x3d7   : > { %5294 = vmatprep.subr.bf16.mxu1 %v8404_v60  ;;  %5376 = vmatprep.subr.bf16.mxu0 %v8407_v32  ;;  %v8458_v60 = vld [vmem:[%s9015_s0 + $0x264] ss:$16 sps:$4 sm:$0xff]   ;;  %v8461_v32 = vld [vmem:[%s9015_s0 + $0x26c] ss:$16 sps:$4 sm:$0xff]  }
 0x3da   : > { %5295 = vmatpush1.bf16.msra.mxu1 %v8402_v61  ;;  %5377 = vmatpush1.bf16.msra.mxu0 %v8405_v62  ;;  %v8456_v61 = vld [vmem:[%s9015_s0 + $0x260] ss:$16 sps:$4 sm:$0xff]   ;;  %v8459_v62 = vld [vmem:[%s9015_s0 + $0x268] ss:$16 sps:$4 sm:$0xff]  }
 0x3db   : > { %5296 = vmatprep.subr.bf16.mxu1 %v8410_v63  ;;  %5378 = vmatprep.subr.bf16.mxu0 %v8413_v0  ;;  %v8464_v63 = vld [vmem:[%s9015_s0 + $0x284] ss:$16 sps:$4 sm:$0xff]   ;;  %v8467_v0 = vld [vmem:[%s9015_s0 + $0x28c] ss:$16 sps:$4 sm:$0xff]  }
 0x3de   : > { %5297 = vmatpush1.bf16.msra.mxu1 %v8408_v1  ;;  %5379 = vmatpush1.bf16.msra.mxu0 %v8411_v2  ;;  %v8462_v1 = vld [vmem:[%s9015_s0 + $0x280] ss:$16 sps:$4 sm:$0xff]   ;;  %v8465_v2 = vld [vmem:[%s9015_s0 + $0x288] ss:$16 sps:$4 sm:$0xff]  }
 0x3df   : > { %5298 = vmatprep.subr.bf16.mxu1 %v8416_v3  ;;  %5380 = vmatprep.subr.bf16.mxu0 %v8419_v4  ;;  %v8470_v3 = vld [vmem:[%s9015_s0 + $0x2a4] ss:$16 sps:$4 sm:$0xff]   ;;  %v8473_v4 = vld [vmem:[%s9015_s0 + $0x2ac] ss:$16 sps:$4 sm:$0xff]  }
 0x3e2   : > { %5299 = vmatpush1.bf16.msra.mxu1 %v8414_v6  ;;  %5381 = vmatpush1.bf16.msra.mxu0 %v8417_v7  ;;  %v8468_v6 = vld [vmem:[%s9015_s0 + $0x2a0] ss:$16 sps:$4 sm:$0xff]   ;;  %v8471_v7 = vld [vmem:[%s9015_s0 + $0x2a8] ss:$16 sps:$4 sm:$0xff]  }
 0x3e3   : > { %5300 = vmatprep.subr.bf16.mxu1 %v8422_v49  ;;  %5382 = vmatprep.subr.bf16.mxu0 %v8425_v8  ;;  %v8476_v49 = vld [vmem:[%s9015_s0 + $0x2c4] ss:$16 sps:$4 sm:$0xff]   ;;  %v8479_v8 = vld [vmem:[%s9015_s0 + $0x2cc] ss:$16 sps:$4 sm:$0xff]  }
 0x3e6   : > { %5301 = vmatpush1.bf16.msra.mxu1 %v8420_v9  ;;  %5383 = vmatpush1.bf16.msra.mxu0 %v8423_v16  ;;  %v8474_v9 = vld [vmem:[%s9015_s0 + $0x2c0] ss:$16 sps:$4 sm:$0xff]   ;;  %v8477_v16 = vld [vmem:[%s9015_s0 + $0x2c8] ss:$16 sps:$4 sm:$0xff]  }
 0x3e7   : > { %5302 = vmatprep.subr.bf16.mxu1 %v8428_v17  ;;  %5384 = vmatprep.subr.bf16.mxu0 %v8431_v52  ;;  %v8482_v17 = vld [vmem:[%s9015_s0 + $0x2e4] ss:$16 sps:$4 sm:$0xff]   ;;  %v8485_v52 = vld [vmem:[%s9015_s0 + $0x2ec] ss:$16 sps:$4 sm:$0xff]  }
 0x3ea   : > { %5303 = vmatpush1.bf16.msra.mxu1 %v8426_v18  ;;  %5385 = vmatpush1.bf16.msra.mxu0 %v8429_v19  ;;  %v8480_v18 = vld [vmem:[%s9015_s0 + $0x2e0] ss:$16 sps:$4 sm:$0xff]   ;;  %v8483_v19 = vld [vmem:[%s9015_s0 + $0x2e8] ss:$16 sps:$4 sm:$0xff]  }
 0x3eb   : > { %5304 = vmatprep.subr.bf16.mxu1 %v8434_v21  ;;  %5386 = vmatprep.subr.bf16.mxu0 %v8437_v22  ;;  %v8488_v21 = vld [vmem:[%s9015_s0 + $0x304] ss:$16 sps:$4 sm:$0xff]   ;;  %v8491_v22 = vld [vmem:[%s9015_s0 + $0x30c] ss:$16 sps:$4 sm:$0xff]  }
 0x3ee   : > { %5305 = vmatpush1.bf16.msra.mxu1 %v8432_v23  ;;  %5387 = vmatpush1.bf16.msra.mxu0 %v8435_v24  ;;  %v8486_v23 = vld [vmem:[%s9015_s0 + $0x300] ss:$16 sps:$4 sm:$0xff]   ;;  %v8489_v24 = vld [vmem:[%s9015_s0 + $0x308] ss:$16 sps:$4 sm:$0xff]  }
 0x3ef   : > { %5315 = vmatprep.subr.bf16.mxu1 %v8440_v25  ;;  %5397 = vmatprep.subr.bf16.mxu0 %v8443_v26  ;;  %v8494_v25 = vld [vmem:[%s9015_s0 + $0x324] ss:$16 sps:$4 sm:$0xff]   ;;  %v8497_v26 = vld [vmem:[%s9015_s0 + $0x32c] ss:$16 sps:$4 sm:$0xff]  }
 0x484   : > { %v4379_v33 = vpop.f32.mrb[12].mxu1  ;;  %v9553_v34 = vpop.f32.mrb[12].mxu0 }
 0x485   : > { %v7558_v35 = vadd.f32 %v4379_v33, %v3647_v29  ;;  %v4381_v36 = vpop.f32.mrb[13].mxu1  ;;  %v4463_v38 = vpop.f32.mrb[13].mxu0  ;;  %v8492_v29 = vld [vmem:[%s9015_s0 + $0x320] ss:$16 sps:$4 sm:$0xff]   ;;  %v8503_v33 = vld [vmem:[%s9015_s0 + $0x34c] ss:$16 sps:$4 sm:$0xff]  }
 0x486   : > { %v7559_v5 = vadd.f32 %v4381_v36, %v3651_v30  ;;  %v7561_v39 = vadd.f32 %v4463_v38, %v3659_v31  ;;  %v4383_v40 = vpop.f32.mrb[14].mxu1  ;;  %v4465_v41 = vpop.f32.mrb[14].mxu0  ;;  %v8495_v30 = vld [vmem:[%s9015_s0 + $0x328] ss:$16 sps:$4 sm:$0xff]   ;;  %v8500_v31 = vld [vmem:[%s9015_s0 + $0x344] ss:$16 sps:$4 sm:$0xff]  }
 0x487   : > { %vm4468_vm0 = vcmp.gt.f32.partialorder %v7558_v35, 0.0  ;;  %v4472_v42 = vmul.f32 0.01, %v7558_v35  ;;  %v4384_v44 = vpop.f32.mrb[15].mxu1  ;;  %v4466_v45 = vpop.f32.mrb[15].mxu0 }
 0x488   : > { %vm4469_vm1 = vcmp.gt.f32.partialorder %v7559_v5, 0.0  ;;  %v4473_v10 = vmul.f32 0.01, %v7559_v5  ;;  %vm4471_vm2 = vcmp.gt.f32.partialorder %v7561_v39, 0.0  ;;  %v4475_v43 = vmul.f32 0.01, %v7561_v39 }
 0x489   : > { %v4476_v12 = vsel %vm4468_vm0, %v7558_v35, %v4472_v42  ;;  %v8498_v35 = vld [vmem:[%s9015_s0 + $0x340] ss:$16 sps:$4 sm:$0xff]   ;;  %v8501_v36 = vld [vmem:[%s9015_s0 + $0x348] ss:$16 sps:$4 sm:$0xff]   ;;  %v8506_v38 = vld [vmem:[%s9015_s0 + $0x364] ss:$16 sps:$4 sm:$0xff]   ;;  %v3655_v45 = vrot.slane %v9545_v28, %v9087_v27 }
 0x48a   : > { %v4477_v20 = vsel %vm4469_vm1, %v7559_v5, %v4473_v10  ;;  %v4479_v50 = vsel %vm4471_vm2, %v7561_v39, %v4475_v43  ;;  %v4480_v37 = vpack.c.bf16 %v4476_v12, %v4476_v12  ;;  %v8509_v5 = vld [vmem:[%s9015_s0 + $0x36c] ss:$16 sps:$4 sm:$0xff]   ;;  %v8504_v39 = vld [vmem:[%s9015_s0 + $0x360] ss:$16 sps:$4 sm:$0xff]   ;;  %v8507_v40 = vld [vmem:[%s9015_s0 + $0x368] ss:$16 sps:$4 sm:$0xff]  }
 0x48b   : > { %v4481_v46 = vpack.c.bf16 %v4477_v20, %v4477_v20  ;;  %v4483_v53 = vpack.c.bf16 %v4479_v50, %v4479_v50  ;;  %v8512_v41 = vld [vmem:[%s9015_s0 + $0x384] ss:$16 sps:$4 sm:$0xff]   ;;  %v8515_v42 = vld [vmem:[%s9015_s0 + $0x38c] ss:$16 sps:$4 sm:$0xff]   ;;  %v8510_v10 = vld [vmem:[%s9015_s0 + $0x380] ss:$16 sps:$4 sm:$0xff]   ;;  %v7560_v50 = vadd.f32 %v9553_v34, %v3655_v45 }
 0x48c   : > { %v8513_v43 = vld [vmem:[%s9015_s0 + $0x388] ss:$16 sps:$4 sm:$0xff]   ;;  %v8518_v12 = vld [vmem:[%s9015_s0 + $0x3a4] ss:$16 sps:$4 sm:$0xff]   ;;  %v8521_v44 = vld [vmem:[%s9015_s0 + $0x3ac] ss:$16 sps:$4 sm:$0xff]  }
 0x48d   : > { %5306 = vmatprep.mubr.bf16.mxu1 %v4481_v46  ;;  %5388 = vmatprep.mubr.bf16.mxu0 %v4481_v46  ;;  %v8516_v20 = vld [vmem:[%s9015_s0 + $0x3a0] ss:$16 sps:$4 sm:$0xff]   ;;  %v8519_v46 = vld [vmem:[%s9015_s0 + $0x3a8] ss:$16 sps:$4 sm:$0xff]   ;;  %vm4470_vm3 = vcmp.gt.f32.partialorder %v7560_v50, 0.0 }
 0x48e   : > { %5307 = vmatmul.mubr.bf16.vlgmr.msra.gmra.mrb[16].mxu1 %v4480_v37  ;;  %5389 = vmatmul.mubr.bf16.vlgmr.msra.gmra.mrb[16].mxu0 %v4480_v37  ;;  %v8522_v37 = vld [vmem:[%s9015_s0 + $0x3c0] ss:$16 sps:$4 sm:$0xff]   ;;  %v8525_v28 = vld [vmem:[%s9015_s0 + $0x3c8] ss:$16 sps:$4 sm:$0xff]   ;;  %v8605_v45 = vld [vmem:[%s9108_s29 + $0x16c] ss:$16 sps:$4 sm:$0xff]  }
 0x48f   : > { %5316 = vmatpush1.bf16.msra.mxu1 %v8438_v47  ;;  %5398 = vmatpush1.bf16.msra.mxu0 %v8441_v48  ;;  %v8524_v47 = vld [vmem:[%s9015_s0 + $0x3c4] ss:$16 sps:$4 sm:$0xff]   ;;  %v8527_v48 = vld [vmem:[%s9015_s0 + $0x3cc] ss:$16 sps:$4 sm:$0xff]   ;;  %v8531_v34 = vld [vmem:[%s9015_s0 + $0x3e8] ss:$16 sps:$4 sm:$0xff]  }
 0x490   : > { %5347 = vmatprep.mubr.bf16.mxu1 %v4483_v53  ;;  %5429 = vmatprep.mubr.bf16.mxu0 %v4483_v53  ;;  %v4474_v53 = vmul.f32 0.01, %v7560_v50 }
 0x491   : > { %5317 = vmatprep.subr.bf16.mxu1 %v8446_v51  ;;  %5399 = vmatprep.subr.bf16.mxu0 %v8449_v11  ;;  %v8530_v51 = vld [vmem:[%s9015_s0 + $0x3e4] ss:$16 sps:$4 sm:$0xff]   ;;  %v8533_v11 = vld [vmem:[%s9015_s0 + $0x3ec] ss:$16 sps:$4 sm:$0xff]  }
 0x493   : > { %5318 = vmatpush1.bf16.msra.mxu1 %v8444_v54  ;;  %5400 = vmatpush1.bf16.msra.mxu0 %v8447_v55  ;;  %v8528_v54 = vld [vmem:[%s9015_s0 + $0x3e0] ss:$16 sps:$4 sm:$0xff]   ;;  %v8536_v55 = vld [vmem:[%s9108_s29 + $0x4] ss:$16 sps:$4 sm:$0xff]  }
 0x494   : > { %5319 = vmatprep.subr.bf16.mxu1 %v8452_v56  ;;  %5401 = vmatprep.subr.bf16.mxu0 %v8455_v57  ;;  %v8539_v56 = vld [vmem:[%s9108_s29 + $0xc] ss:$16 sps:$4 sm:$0xff]   ;;  %v4478_v57 = vsel %vm4470_vm3, %v7560_v50, %v4474_v53  ;;  %v8606_v50 = vld [vmem:[%s9108_s29 + $0x180] ss:$16 sps:$4 sm:$0xff]   ;;  %v8615_v53 = vld [vmem:[%s9108_s29 + $0x1a8] ss:$16 sps:$4 sm:$0xff]  }
 0x497   : > { %5320 = vmatpush1.bf16.msra.mxu1 %v8450_v58  ;;  %5402 = vmatpush1.bf16.msra.mxu0 %v8453_v59  ;;  %v8534_v58 = vld [vmem:[%s9108_s29] ss:$16 sps:$4 sm:$0xff]   ;;  %v8537_v59 = vld [vmem:[%s9108_s29 + $0x8] ss:$16 sps:$4 sm:$0xff]  }
 0x498   : > { %5321 = vmatprep.subr.bf16.mxu1 %v8458_v60  ;;  %5403 = vmatprep.subr.bf16.mxu0 %v8461_v32  ;;  %v4482_v60 = vpack.c.bf16 %v4478_v57, %v4478_v57  ;;  %v8542_v32 = vld [vmem:[%s9108_s29 + $0x24] ss:$16 sps:$4 sm:$0xff]  }
 0x499   : > { %v8626_v57 = vld [vmem:[%s9108_s29 + $0x1e4] ss:$16 sps:$4 sm:$0xff]  }
 0x49b   : > { %5322 = vmatpush1.bf16.msra.mxu1 %v8456_v61  ;;  %5404 = vmatpush1.bf16.msra.mxu0 %v8459_v62  ;;  %v8545_v61 = vld [vmem:[%s9108_s29 + $0x2c] ss:$16 sps:$4 sm:$0xff]   ;;  %v8540_v62 = vld [vmem:[%s9108_s29 + $0x20] ss:$16 sps:$4 sm:$0xff]  }
 0x49c   : > { %5323 = vmatprep.subr.bf16.mxu1 %v8464_v63  ;;  %5405 = vmatprep.subr.bf16.mxu0 %v8467_v0  ;;  %v8543_v63 = vld [vmem:[%s9108_s29 + $0x28] ss:$16 sps:$4 sm:$0xff]   ;;  %v8548_v0 = vld [vmem:[%s9108_s29 + $0x44] ss:$16 sps:$4 sm:$0xff]  }
 0x49f   : > { %5324 = vmatpush1.bf16.msra.mxu1 %v8462_v1  ;;  %5406 = vmatpush1.bf16.msra.mxu0 %v8465_v2  ;;  %v8551_v1 = vld [vmem:[%s9108_s29 + $0x4c] ss:$16 sps:$4 sm:$0xff]   ;;  %v8546_v2 = vld [vmem:[%s9108_s29 + $0x40] ss:$16 sps:$4 sm:$0xff]  }
 0x4a0   : > { %5325 = vmatprep.subr.bf16.mxu1 %v8470_v3  ;;  %5407 = vmatprep.subr.bf16.mxu0 %v8473_v4  ;;  %v8549_v3 = vld [vmem:[%s9108_s29 + $0x48] ss:$16 sps:$4 sm:$0xff]   ;;  %v8554_v4 = vld [vmem:[%s9108_s29 + $0x64] ss:$16 sps:$4 sm:$0xff]  }
 0x4a3   : > { %5326 = vmatpush1.bf16.msra.mxu1 %v8468_v6  ;;  %5408 = vmatpush1.bf16.msra.mxu0 %v8471_v7  ;;  %v8557_v6 = vld [vmem:[%s9108_s29 + $0x6c] ss:$16 sps:$4 sm:$0xff]   ;;  %v8552_v7 = vld [vmem:[%s9108_s29 + $0x60] ss:$16 sps:$4 sm:$0xff]  }
 0x4a4   : > { %5327 = vmatprep.subr.bf16.mxu1 %v8476_v49  ;;  %5409 = vmatprep.subr.bf16.mxu0 %v8479_v8  ;;  %v8555_v49 = vld [vmem:[%s9108_s29 + $0x68] ss:$16 sps:$4 sm:$0xff]   ;;  %v8560_v8 = vld [vmem:[%s9108_s29 + $0x84] ss:$16 sps:$4 sm:$0xff]  }
 0x4a7   : > { %5328 = vmatpush1.bf16.msra.mxu1 %v8474_v9  ;;  %5410 = vmatpush1.bf16.msra.mxu0 %v8477_v16  ;;  %v8563_v9 = vld [vmem:[%s9108_s29 + $0x8c] ss:$16 sps:$4 sm:$0xff]   ;;  %v8558_v16 = vld [vmem:[%s9108_s29 + $0x80] ss:$16 sps:$4 sm:$0xff]  }
 0x4a8   : > { %5329 = vmatprep.subr.bf16.mxu1 %v8482_v17  ;;  %5411 = vmatprep.subr.bf16.mxu0 %v8485_v52  ;;  %v8561_v17 = vld [vmem:[%s9108_s29 + $0x88] ss:$16 sps:$4 sm:$0xff]   ;;  %v8566_v52 = vld [vmem:[%s9108_s29 + $0xa4] ss:$16 sps:$4 sm:$0xff]  }
 0x4ab   : > { %5330 = vmatpush1.bf16.msra.mxu1 %v8480_v18  ;;  %5412 = vmatpush1.bf16.msra.mxu0 %v8483_v19  ;;  %v8569_v18 = vld [vmem:[%s9108_s29 + $0xac] ss:$16 sps:$4 sm:$0xff]   ;;  %v8564_v19 = vld [vmem:[%s9108_s29 + $0xa0] ss:$16 sps:$4 sm:$0xff]  }
 0x4ac   : > { %5331 = vmatprep.subr.bf16.mxu1 %v8488_v21  ;;  %5413 = vmatprep.subr.bf16.mxu0 %v8491_v22  ;;  %v8567_v21 = vld [vmem:[%s9108_s29 + $0xa8] ss:$16 sps:$4 sm:$0xff]   ;;  %v8572_v22 = vld [vmem:[%s9108_s29 + $0xc4] ss:$16 sps:$4 sm:$0xff]  }
 0x4af   : > { %5332 = vmatpush1.bf16.msra.mxu1 %v8486_v23  ;;  %5414 = vmatpush1.bf16.msra.mxu0 %v8489_v24  ;;  %v8575_v23 = vld [vmem:[%s9108_s29 + $0xcc] ss:$16 sps:$4 sm:$0xff]   ;;  %v8570_v24 = vld [vmem:[%s9108_s29 + $0xc0] ss:$16 sps:$4 sm:$0xff]  }
 0x4b0   : > { %5333 = vmatprep.subr.bf16.mxu1 %v8494_v25  ;;  %5415 = vmatprep.subr.bf16.mxu0 %v8497_v26  ;;  %v8573_v25 = vld [vmem:[%s9108_s29 + $0xc8] ss:$16 sps:$4 sm:$0xff]   ;;  %v8578_v26 = vld [vmem:[%s9108_s29 + $0xe4] ss:$16 sps:$4 sm:$0xff]  }
 0x4b3   : > { %5334 = vmatpush1.bf16.msra.mxu1 %v8492_v29  ;;  %5416 = vmatpush1.bf16.msra.mxu0 %v8495_v30  ;;  %v8581_v29 = vld [vmem:[%s9108_s29 + $0xec] ss:$16 sps:$4 sm:$0xff]   ;;  %v8576_v30 = vld [vmem:[%s9108_s29 + $0xe0] ss:$16 sps:$4 sm:$0xff]  }
 0x4b4   : > { %5335 = vmatprep.subr.bf16.mxu1 %v8500_v31  ;;  %5417 = vmatprep.subr.bf16.mxu0 %v8503_v33  ;;  %v8579_v31 = vld [vmem:[%s9108_s29 + $0xe8] ss:$16 sps:$4 sm:$0xff]   ;;  %v8584_v33 = vld [vmem:[%s9108_s29 + $0x104] ss:$16 sps:$4 sm:$0xff]  }
 0x4b7   : > { %5336 = vmatpush1.bf16.msra.mxu1 %v8498_v35  ;;  %5418 = vmatpush1.bf16.msra.mxu0 %v8501_v36  ;;  %v8587_v35 = vld [vmem:[%s9108_s29 + $0x10c] ss:$16 sps:$4 sm:$0xff]   ;;  %v8582_v36 = vld [vmem:[%s9108_s29 + $0x100] ss:$16 sps:$4 sm:$0xff]  }
 0x4b8   : > { %5337 = vmatprep.subr.bf16.mxu1 %v8506_v38  ;;  %5419 = vmatprep.subr.bf16.mxu0 %v8509_v5  ;;  %v8585_v38 = vld [vmem:[%s9108_s29 + $0x108] ss:$16 sps:$4 sm:$0xff]   ;;  %v8590_v5 = vld [vmem:[%s9108_s29 + $0x124] ss:$16 sps:$4 sm:$0xff]  }
 0x4bb   : > { %5338 = vmatpush1.bf16.msra.mxu1 %v8504_v39  ;;  %5420 = vmatpush1.bf16.msra.mxu0 %v8507_v40  ;;  %v8593_v39 = vld [vmem:[%s9108_s29 + $0x12c] ss:$16 sps:$4 sm:$0xff]   ;;  %v8588_v40 = vld [vmem:[%s9108_s29 + $0x120] ss:$16 sps:$4 sm:$0xff]  }
 0x4bc   : > { %5339 = vmatprep.subr.bf16.mxu1 %v8512_v41  ;;  %5421 = vmatprep.subr.bf16.mxu0 %v8515_v42  ;;  %v8591_v41 = vld [vmem:[%s9108_s29 + $0x128] ss:$16 sps:$4 sm:$0xff]   ;;  %v8596_v42 = vld [vmem:[%s9108_s29 + $0x144] ss:$16 sps:$4 sm:$0xff]  }
 0x4bf   : > { %5340 = vmatpush1.bf16.msra.mxu1 %v8510_v10  ;;  %5422 = vmatpush1.bf16.msra.mxu0 %v8513_v43  ;;  %v8599_v10 = vld [vmem:[%s9108_s29 + $0x14c] ss:$16 sps:$4 sm:$0xff]   ;;  %v8594_v43 = vld [vmem:[%s9108_s29 + $0x140] ss:$16 sps:$4 sm:$0xff]  }
 0x4c0   : > { %5341 = vmatprep.subr.bf16.mxu1 %v8518_v12  ;;  %5423 = vmatprep.subr.bf16.mxu0 %v8521_v44  ;;  %v8597_v12 = vld [vmem:[%s9108_s29 + $0x148] ss:$16 sps:$4 sm:$0xff]   ;;  %v8602_v44 = vld [vmem:[%s9108_s29 + $0x164] ss:$16 sps:$4 sm:$0xff]  }
 0x4c3   : > { %5342 = vmatpush1.bf16.msra.mxu1 %v8516_v20  ;;  %5424 = vmatpush1.bf16.msra.mxu0 %v8519_v46  ;;  %v8600_v20 = vld [vmem:[%s9108_s29 + $0x160] ss:$16 sps:$4 sm:$0xff]   ;;  %v8603_v46 = vld [vmem:[%s9108_s29 + $0x168] ss:$16 sps:$4 sm:$0xff]  }
 0x4c4   : > { %5343 = vmatprep.subr.bf16.mxu1 %v8524_v47  ;;  %5425 = vmatprep.subr.bf16.mxu0 %v8527_v48  ;;  %v8608_v47 = vld [vmem:[%s9108_s29 + $0x184] ss:$16 sps:$4 sm:$0xff]   ;;  %v8611_v48 = vld [vmem:[%s9108_s29 + $0x18c] ss:$16 sps:$4 sm:$0xff]  }
 0x4c7   : > { %5344 = vmatpush1.bf16.msra.mxu1 %v8522_v37  ;;  %5426 = vmatpush1.bf16.msra.mxu0 %v8525_v28  ;;  %v8609_v37 = vld [vmem:[%s9108_s29 + $0x188] ss:$16 sps:$4 sm:$0xff]   ;;  %v8614_v28 = vld [vmem:[%s9108_s29 + $0x1a4] ss:$16 sps:$4 sm:$0xff]  }
 0x4c8   : > { %5345 = vmatprep.subr.bf16.mxu1 %v8530_v51  ;;  %5427 = vmatprep.subr.bf16.mxu0 %v8533_v11  ;;  %v8617_v51 = vld [vmem:[%s9108_s29 + $0x1ac] ss:$16 sps:$4 sm:$0xff]   ;;  %v8612_v11 = vld [vmem:[%s9108_s29 + $0x1a0] ss:$16 sps:$4 sm:$0xff]  }
 0x4cb   : > { %5346 = vmatpush1.bf16.msra.mxu1 %v8528_v54  ;;  %5428 = vmatpush1.bf16.msra.mxu0 %v8531_v34  ;;  %v8620_v54 = vld [vmem:[%s9108_s29 + $0x1c4] ss:$16 sps:$4 sm:$0xff]   ;;  %v8623_v34 = vld [vmem:[%s9108_s29 + $0x1cc] ss:$16 sps:$4 sm:$0xff]  }
 0x4cc   : > { %6244 = vmatprep.subr.bf16.mxu1 %v8536_v55  ;;  %6326 = vmatprep.subr.bf16.mxu0 %v8539_v56  ;;  %v8618_v55 = vld [vmem:[%s9108_s29 + $0x1c0] ss:$16 sps:$4 sm:$0xff]   ;;  %v8621_v56 = vld [vmem:[%s9108_s29 + $0x1c8] ss:$16 sps:$4 sm:$0xff]  }
 0x4ce   : > { %5348 = vmatmul.mubr.bf16.vlgmr.msra.gmra.mrb[16].mxu1 %v4482_v60  ;;  %5430 = vmatmul.mubr.bf16.vlgmr.msra.gmra.mrb[16].mxu0 %v4482_v60  ;;  %v8627_v60 = vld [vmem:[%s9108_s29 + $0x1e8] ss:$16 sps:$4 sm:$0xff]  }
 0x4cf   : > { %6245 = vmatpush1.bf16.msra.mxu1 %v8534_v58  ;;  %6327 = vmatpush1.bf16.msra.mxu0 %v8537_v59  ;;  %v8629_v58 = vld [vmem:[%s9108_s29 + $0x1ec] ss:$16 sps:$4 sm:$0xff]   ;;  %v8624_v59 = vld [vmem:[%s9108_s29 + $0x1e0] ss:$16 sps:$4 sm:$0xff]  }
 0x4d0   : > { %6246 = vmatprep.subr.bf16.mxu1 %v8542_v32  ;;  %6328 = vmatprep.subr.bf16.mxu0 %v8545_v61  ;;  %v8632_v32 = vld [vmem:[%s9108_s29 + $0x204] ss:$16 sps:$4 sm:$0xff]   ;;  %v8635_v61 = vld [vmem:[%s9108_s29 + $0x20c] ss:$16 sps:$4 sm:$0xff]  }
 0x4d3   : > { %6247 = vmatpush1.bf16.msra.mxu1 %v8540_v62  ;;  %6329 = vmatpush1.bf16.msra.mxu0 %v8543_v63  ;;  %v9690_v62 = vld [vmem:[%s781_s26] sm:$0xf]  ;;  %s808_s26 = sadd.s32 %s6824_s20, %s9841_s18 }
 0x4d4   : > { %6248 = vmatprep.subr.bf16.mxu1 %v8548_v0  ;;  %6330 = vmatprep.subr.bf16.mxu0 %v8551_v1  ;;  %v4617_v63 = vrot.slane %v9690_v62, %v9018_v13  ;;  %v4621_v0 = vrot.slane %v9690_v62, %v9021_v14  ;;  %v4629_v1 = vrot.slane %v9690_v62, %v9024_v15  ;;  %s6825_s28 = sshll.u32 %s808_s26, 3 }
 0x4d7   : > { %6249 = vmatpush1.bf16.msra.mxu1 %v8546_v2  ;;  %6331 = vmatpush1.bf16.msra.mxu0 %v8549_v3 }
 0x4d8   : > { %6250 = vmatprep.subr.bf16.mxu1 %v8554_v4  ;;  %6332 = vmatprep.subr.bf16.mxu0 %v8557_v6 }
 0x4db   : > { %6251 = vmatpush1.bf16.msra.mxu1 %v8552_v7  ;;  %6333 = vmatpush1.bf16.msra.mxu0 %v8555_v49 }
 0x4dc   : > { %6252 = vmatprep.subr.bf16.mxu1 %v8560_v8  ;;  %6334 = vmatprep.subr.bf16.mxu0 %v8563_v9 }
 0x4df   : > { %6253 = vmatpush1.bf16.msra.mxu1 %v8558_v16  ;;  %6335 = vmatpush1.bf16.msra.mxu0 %v8561_v17 }
 0x4e0   : > { %6254 = vmatprep.subr.bf16.mxu1 %v8566_v52  ;;  %6336 = vmatprep.subr.bf16.mxu0 %v8569_v18 }
 0x4e3   : > { %6255 = vmatpush1.bf16.msra.mxu1 %v8564_v19  ;;  %6337 = vmatpush1.bf16.msra.mxu0 %v8567_v21 }
 0x4e4   : > { %6256 = vmatprep.subr.bf16.mxu1 %v8572_v22  ;;  %6338 = vmatprep.subr.bf16.mxu0 %v8575_v23 }
 0x4e7   : > { %6257 = vmatpush1.bf16.msra.mxu1 %v8570_v24  ;;  %6339 = vmatpush1.bf16.msra.mxu0 %v8573_v25  ;;  %v8630_v25 = vld [vmem:[%s9108_s29 + $0x200] ss:$16 sps:$4 sm:$0xff]  }
 0x4e8   : > { %6258 = vmatprep.subr.bf16.mxu1 %v8578_v26  ;;  %6340 = vmatprep.subr.bf16.mxu0 %v8581_v29  ;;  %v8633_v26 = vld [vmem:[%s9108_s29 + $0x208] ss:$16 sps:$4 sm:$0xff]  }
 0x4eb   : > { %6259 = vmatpush1.bf16.msra.mxu1 %v8576_v30  ;;  %6341 = vmatpush1.bf16.msra.mxu0 %v8579_v31  ;;  %v8638_v31 = vld [vmem:[%s9108_s29 + $0x224] ss:$16 sps:$4 sm:$0xff]  }
 0x4ec   : > { %6260 = vmatprep.subr.bf16.mxu1 %v8584_v33  ;;  %6342 = vmatprep.subr.bf16.mxu0 %v8587_v35  ;;  %v8641_v33 = vld [vmem:[%s9108_s29 + $0x22c] ss:$16 sps:$4 sm:$0xff]  }
 0x4ef   : > { %6261 = vmatpush1.bf16.msra.mxu1 %v8582_v36  ;;  %6343 = vmatpush1.bf16.msra.mxu0 %v8585_v38  ;;  %v8636_v36 = vld [vmem:[%s9108_s29 + $0x220] ss:$16 sps:$4 sm:$0xff]   ;;  %v8639_v38 = vld [vmem:[%s9108_s29 + $0x228] ss:$16 sps:$4 sm:$0xff]  }
 0x4f0   : > { %6262 = vmatprep.subr.bf16.mxu1 %v8590_v5  ;;  %6344 = vmatprep.subr.bf16.mxu0 %v8593_v39  ;;  %v8644_v5 = vld [vmem:[%s9108_s29 + $0x244] ss:$16 sps:$4 sm:$0xff]   ;;  %v8647_v39 = vld [vmem:[%s9108_s29 + $0x24c] ss:$16 sps:$4 sm:$0xff]  }
 0x4f3   : > { %6263 = vmatpush1.bf16.msra.mxu1 %v8588_v40  ;;  %6345 = vmatpush1.bf16.msra.mxu0 %v8591_v41  ;;  %v8642_v40 = vld [vmem:[%s9108_s29 + $0x240] ss:$16 sps:$4 sm:$0xff]   ;;  %v8645_v41 = vld [vmem:[%s9108_s29 + $0x248] ss:$16 sps:$4 sm:$0xff]  }
 0x4f4   : > { %6264 = vmatprep.subr.bf16.mxu1 %v8596_v42  ;;  %6346 = vmatprep.subr.bf16.mxu0 %v8599_v10  ;;  %v8650_v42 = vld [vmem:[%s9108_s29 + $0x264] ss:$16 sps:$4 sm:$0xff]   ;;  %v8653_v10 = vld [vmem:[%s9108_s29 + $0x26c] ss:$16 sps:$4 sm:$0xff]  }
 0x4f7   : > { %6265 = vmatpush1.bf16.msra.mxu1 %v8594_v43  ;;  %6347 = vmatpush1.bf16.msra.mxu0 %v8597_v12  ;;  %v8648_v43 = vld [vmem:[%s9108_s29 + $0x260] ss:$16 sps:$4 sm:$0xff]   ;;  %v8651_v12 = vld [vmem:[%s9108_s29 + $0x268] ss:$16 sps:$4 sm:$0xff]  }
 0x4f8   : > { %6266 = vmatprep.subr.bf16.mxu1 %v8602_v44  ;;  %6348 = vmatprep.subr.bf16.mxu0 %v8605_v45  ;;  %v8656_v44 = vld [vmem:[%s9108_s29 + $0x284] ss:$16 sps:$4 sm:$0xff]   ;;  %v8659_v45 = vld [vmem:[%s9108_s29 + $0x28c] ss:$16 sps:$4 sm:$0xff]  }
 0x4fb   : > { %6267 = vmatpush1.bf16.msra.mxu1 %v8600_v20  ;;  %6349 = vmatpush1.bf16.msra.mxu0 %v8603_v46  ;;  %v8654_v20 = vld [vmem:[%s9108_s29 + $0x280] ss:$16 sps:$4 sm:$0xff]   ;;  %v8657_v46 = vld [vmem:[%s9108_s29 + $0x288] ss:$16 sps:$4 sm:$0xff]  }
 0x4fc   : > { %6268 = vmatprep.subr.bf16.mxu1 %v8608_v47  ;;  %6350 = vmatprep.subr.bf16.mxu0 %v8611_v48  ;;  %v8662_v47 = vld [vmem:[%s9108_s29 + $0x2a4] ss:$16 sps:$4 sm:$0xff]   ;;  %v8665_v48 = vld [vmem:[%s9108_s29 + $0x2ac] ss:$16 sps:$4 sm:$0xff]  }
 0x4ff   : > { %6269 = vmatpush1.bf16.msra.mxu1 %v8606_v50  ;;  %6351 = vmatpush1.bf16.msra.mxu0 %v8609_v37  ;;  %v8660_v50 = vld [vmem:[%s9108_s29 + $0x2a0] ss:$16 sps:$4 sm:$0xff]   ;;  %v8663_v37 = vld [vmem:[%s9108_s29 + $0x2a8] ss:$16 sps:$4 sm:$0xff]  }
 0x500   : > { %6270 = vmatprep.subr.bf16.mxu1 %v8614_v28  ;;  %6352 = vmatprep.subr.bf16.mxu0 %v8617_v51  ;;  %v8668_v28 = vld [vmem:[%s9108_s29 + $0x2c4] ss:$16 sps:$4 sm:$0xff]   ;;  %v8671_v51 = vld [vmem:[%s9108_s29 + $0x2cc] ss:$16 sps:$4 sm:$0xff]  }
 0x503   : > { %6271 = vmatpush1.bf16.msra.mxu1 %v8612_v11  ;;  %6353 = vmatpush1.bf16.msra.mxu0 %v8615_v53  ;;  %v8666_v11 = vld [vmem:[%s9108_s29 + $0x2c0] ss:$16 sps:$4 sm:$0xff]   ;;  %v8669_v53 = vld [vmem:[%s9108_s29 + $0x2c8] ss:$16 sps:$4 sm:$0xff]  }
 0x504   : > { %6272 = vmatprep.subr.bf16.mxu1 %v8620_v54  ;;  %6354 = vmatprep.subr.bf16.mxu0 %v8623_v34  ;;  %v8674_v54 = vld [vmem:[%s9108_s29 + $0x2e4] ss:$16 sps:$4 sm:$0xff]   ;;  %v8677_v34 = vld [vmem:[%s9108_s29 + $0x2ec] ss:$16 sps:$4 sm:$0xff]  }
 0x507   : > { %6273 = vmatpush1.bf16.msra.mxu1 %v8618_v55  ;;  %6355 = vmatpush1.bf16.msra.mxu0 %v8621_v56  ;;  %v8672_v55 = vld [vmem:[%s9108_s29 + $0x2e0] ss:$16 sps:$4 sm:$0xff]   ;;  %v8675_v56 = vld [vmem:[%s9108_s29 + $0x2e8] ss:$16 sps:$4 sm:$0xff]  }
 0x508   : > { %6274 = vmatprep.subr.bf16.mxu1 %v8626_v57  ;;  %6356 = vmatprep.subr.bf16.mxu0 %v8629_v58  ;;  %v8680_v57 = vld [vmem:[%s9108_s29 + $0x304] ss:$16 sps:$4 sm:$0xff]   ;;  %v8683_v58 = vld [vmem:[%s9108_s29 + $0x30c] ss:$16 sps:$4 sm:$0xff]  }
 0x50b   : > { %6275 = vmatpush1.bf16.msra.mxu1 %v8624_v59  ;;  %6357 = vmatpush1.bf16.msra.mxu0 %v8627_v60  ;;  %v8678_v59 = vld [vmem:[%s9108_s29 + $0x300] ss:$16 sps:$4 sm:$0xff]   ;;  %v8681_v60 = vld [vmem:[%s9108_s29 + $0x308] ss:$16 sps:$4 sm:$0xff]  }
 0x50c   : > { %6285 = vmatprep.subr.bf16.mxu1 %v8632_v32  ;;  %6367 = vmatprep.subr.bf16.mxu0 %v8635_v61  ;;  %v8686_v32 = vld [vmem:[%s9108_s29 + $0x324] ss:$16 sps:$4 sm:$0xff]   ;;  %v8689_v61 = vld [vmem:[%s9108_s29 + $0x32c] ss:$16 sps:$4 sm:$0xff]  }
 0x5a1   : > { %v5349_v2 = vpop.f32.mrb[16].mxu1  ;;  %v9698_v3 = vpop.f32.mrb[16].mxu0 }
 0x5a2   : > { %v7562_v4 = vadd.f32 %v5349_v2, %v4617_v63  ;;  %v5351_v6 = vpop.f32.mrb[17].mxu1  ;;  %v5433_v7 = vpop.f32.mrb[17].mxu0  ;;  %v8684_v63 = vld [vmem:[%s9108_s29 + $0x320] ss:$16 sps:$4 sm:$0xff]   ;;  %v8695_v2 = vld [vmem:[%s9108_s29 + $0x34c] ss:$16 sps:$4 sm:$0xff]  }
 0x5a3   : > { %v7563_v49 = vadd.f32 %v5351_v6, %v4621_v0  ;;  %v7565_v8 = vadd.f32 %v5433_v7, %v4629_v1  ;;  %v5353_v9 = vpop.f32.mrb[18].mxu1  ;;  %v5435_v16 = vpop.f32.mrb[18].mxu0  ;;  %v8687_v0 = vld [vmem:[%s9108_s29 + $0x328] ss:$16 sps:$4 sm:$0xff]   ;;  %v8692_v1 = vld [vmem:[%s9108_s29 + $0x344] ss:$16 sps:$4 sm:$0xff]  }
 0x5a4   : > { %vm5438_vm4 = vcmp.gt.f32.partialorder %v7562_v4, 0.0  ;;  %v5442_v17 = vmul.f32 0.01, %v7562_v4  ;;  %v5354_v21 = vpop.f32.mrb[19].mxu1  ;;  %v5436_v22 = vpop.f32.mrb[19].mxu0 }
 0x5a5   : > { %vm5439_vm5 = vcmp.gt.f32.partialorder %v7563_v49, 0.0  ;;  %v5443_v52 = vmul.f32 0.01, %v7563_v49  ;;  %vm5441_vm6 = vcmp.gt.f32.partialorder %v7565_v8, 0.0  ;;  %v5445_v18 = vmul.f32 0.01, %v7565_v8 }
 0x5a6   : > { %v5446_v19 = vsel %vm5438_vm4, %v7562_v4, %v5442_v17  ;;  %v8690_v4 = vld [vmem:[%s9108_s29 + $0x340] ss:$16 sps:$4 sm:$0xff]   ;;  %v8693_v6 = vld [vmem:[%s9108_s29 + $0x348] ss:$16 sps:$4 sm:$0xff]   ;;  %v8698_v7 = vld [vmem:[%s9108_s29 + $0x364] ss:$16 sps:$4 sm:$0xff]   ;;  %v4625_v22 = vrot.slane %v9690_v62, %v9087_v27 }
 0x5a7   : > { %v5447_v23 = vsel %vm5439_vm5, %v7563_v49, %v5443_v52  ;;  %v5449_v29 = vsel %vm5441_vm6, %v7565_v8, %v5445_v18  ;;  %v5450_v30 = vpack.c.bf16 %v5446_v19, %v5446_v19  ;;  %v8701_v49 = vld [vmem:[%s9108_s29 + $0x36c] ss:$16 sps:$4 sm:$0xff]   ;;  %v8696_v8 = vld [vmem:[%s9108_s29 + $0x360] ss:$16 sps:$4 sm:$0xff]   ;;  %v8699_v9 = vld [vmem:[%s9108_s29 + $0x368] ss:$16 sps:$4 sm:$0xff]  }
 0x5a8   : > { %v5451_v24 = vpack.c.bf16 %v5447_v23, %v5447_v23  ;;  %v5453_v35 = vpack.c.bf16 %v5449_v29, %v5449_v29  ;;  %v8704_v16 = vld [vmem:[%s9108_s29 + $0x384] ss:$16 sps:$4 sm:$0xff]   ;;  %v8707_v17 = vld [vmem:[%s9108_s29 + $0x38c] ss:$16 sps:$4 sm:$0xff]   ;;  %v8702_v52 = vld [vmem:[%s9108_s29 + $0x380] ss:$16 sps:$4 sm:$0xff]   ;;  %v7564_v29 = vadd.f32 %v9698_v3, %v4625_v22 }
 0x5a9   : > { %v8705_v18 = vld [vmem:[%s9108_s29 + $0x388] ss:$16 sps:$4 sm:$0xff]   ;;  %v8710_v19 = vld [vmem:[%s9108_s29 + $0x3a4] ss:$16 sps:$4 sm:$0xff]   ;;  %v8713_v21 = vld [vmem:[%s9108_s29 + $0x3ac] ss:$16 sps:$4 sm:$0xff]  }
 0x5aa   : > { %6276 = vmatprep.mubr.bf16.mxu1 %v5451_v24  ;;  %6358 = vmatprep.mubr.bf16.mxu0 %v5451_v24  ;;  %v8708_v23 = vld [vmem:[%s9108_s29 + $0x3a0] ss:$16 sps:$4 sm:$0xff]   ;;  %v8711_v24 = vld [vmem:[%s9108_s29 + $0x3a8] ss:$16 sps:$4 sm:$0xff]   ;;  %v8722_v62 = vld [vmem:[%s9108_s29 + $0x3e4] ss:$16 sps:$4 sm:$0xff]  }
 0x5ab   : > { %6277 = vmatmul.mubr.bf16.vlgmr.msra.gmra.mrb[20].mxu1 %v5450_v30  ;;  %6359 = vmatmul.mubr.bf16.vlgmr.msra.gmra.mrb[20].mxu0 %v5450_v30  ;;  %v8714_v30 = vld [vmem:[%s9108_s29 + $0x3c0] ss:$16 sps:$4 sm:$0xff]   ;;  %vm5440_vm7 = vcmp.gt.f32.partialorder %v7564_v29, 0.0 }
 0x5ac   : > { %6286 = vmatpush1.bf16.msra.mxu1 %v8630_v25  ;;  %6368 = vmatpush1.bf16.msra.mxu0 %v8633_v26  ;;  %v8716_v25 = vld [vmem:[%s9108_s29 + $0x3c4] ss:$16 sps:$4 sm:$0xff]   ;;  %v8719_v26 = vld [vmem:[%s9108_s29 + $0x3cc] ss:$16 sps:$4 sm:$0xff]  }
 0x5ad   : > { %6317 = vmatprep.mubr.bf16.mxu1 %v5453_v35  ;;  %6399 = vmatprep.mubr.bf16.mxu0 %v5453_v35  ;;  %v5444_v35 = vmul.f32 0.01, %v7564_v29 }
 0x5ae   : > { %6287 = vmatprep.subr.bf16.mxu1 %v8638_v31  ;;  %6369 = vmatprep.subr.bf16.mxu0 %v8641_v33  ;;  %v8717_v31 = vld [vmem:[%s9108_s29 + $0x3c8] ss:$16 sps:$4 sm:$0xff]   ;;  %v8725_v33 = vld [vmem:[%s9108_s29 + $0x3ec] ss:$16 sps:$4 sm:$0xff]  }
 0x5b0   : > { %6288 = vmatpush1.bf16.msra.mxu1 %v8636_v36  ;;  %6370 = vmatpush1.bf16.msra.mxu0 %v8639_v38  ;;  %v8720_v36 = vld [vmem:[%s9108_s29 + $0x3e0] ss:$16 sps:$4 sm:$0xff]   ;;  %v8723_v38 = vld [vmem:[%s9108_s29 + $0x3e8] ss:$16 sps:$4 sm:$0xff]   ;;  %s9827_s29 = sshll.u32 %s9839_s19, 3 }
 0x5b1   : > { %6289 = vmatprep.subr.bf16.mxu1 %v8644_v5  ;;  %6371 = vmatprep.subr.bf16.mxu0 %v8647_v39  ;;  %v5448_v5 = vsel %vm5440_vm7, %v7564_v29, %v5444_v35  ;;  %v6420_v39 = vld [vmem:[%s795_s25] sm:$0xff]  ;;  %s799_s23 = scalar_lea.vmem %s9816_s14, %s9827_s29 }
 0x5b2   : > { %v5452_v3 = vpack.c.bf16 %v5448_v5, %v5448_v5 }
 0x5b4   : > { %6290 = vmatpush1.bf16.msra.mxu1 %v8642_v40  ;;  %6372 = vmatpush1.bf16.msra.mxu0 %v8645_v41  ;;  %v6421_v40 = vld [vmem:[%s795_s25 + $0x8] sm:$0xff]  ;;  %v7540_v41 = vcombine.high %v6420_v39, %v6420_v39  ;;  %s810_s25 = scalar_lea.vmem %s9817_s15, %s6825_s28 }
 0x5b5   : > { %6291 = vmatprep.subr.bf16.mxu1 %v8650_v42  ;;  %6373 = vmatprep.subr.bf16.mxu0 %v8653_v10  ;;  %v7542_v42 = vcombine.high %v6421_v40, %v6421_v40  ;;  %v8774_v10 = vmov 0  }
 0x5b6   : > { %7666 = vset.pattern.permute.xlu0 %v8774_v10 }
 0x5b8   : > { %6292 = vmatpush1.bf16.msra.mxu1 %v8648_v43  ;;  %6374 = vmatpush1.bf16.msra.mxu0 %v8651_v12  ;;  %v6426_v43 = vld [vmem:[%s799_s23] sm:$0xff] }
 0x5b9   : > { %6293 = vmatprep.subr.bf16.mxu1 %v8656_v44  ;;  %6375 = vmatprep.subr.bf16.mxu0 %v8659_v45  ;;  %v5582_v12 = vld [vmem:[%s790_s17] sm:$0xf] }
 0x5ba   : > { %6429 = vperm.xlu0 %7666, %v6426_v43   ;;  %v5587_v44 = vrot.slane %v5582_v12, %v9018_v13  ;;  %v5595_v45 = vrot.slane %v5582_v12, %v9087_v27 }
 0x5bc   : > { %6294 = vmatpush1.bf16.msra.mxu1 %v8654_v20  ;;  %6376 = vmatpush1.bf16.msra.mxu0 %v8657_v46  ;;  %v5591_v20 = vrot.slane %v5582_v12, %v9021_v14  ;;  %v5599_v46 = vrot.slane %v5582_v12, %v9024_v15 }
 0x5bd   : > { %6295 = vmatprep.subr.bf16.mxu1 %v8662_v47  ;;  %6377 = vmatprep.subr.bf16.mxu0 %v8665_v48 }
 0x5c0   : > { %6296 = vmatpush1.bf16.msra.mxu1 %v8660_v50  ;;  %6378 = vmatpush1.bf16.msra.mxu0 %v8663_v37 }
 0x5c1   : > { %6297 = vmatprep.subr.bf16.mxu1 %v8668_v28  ;;  %6379 = vmatprep.subr.bf16.mxu0 %v8671_v51 }
 0x5c4   : > { %6298 = vmatpush1.bf16.msra.mxu1 %v8666_v11  ;;  %6380 = vmatpush1.bf16.msra.mxu0 %v8669_v53 }
 0x5c5   : > { %6299 = vmatprep.subr.bf16.mxu1 %v8674_v54  ;;  %6381 = vmatprep.subr.bf16.mxu0 %v8677_v34 }
 0x5c8   : > { %6300 = vmatpush1.bf16.msra.mxu1 %v8672_v55  ;;  %6382 = vmatpush1.bf16.msra.mxu0 %v8675_v56 }
 0x5c9   : > { %6301 = vmatprep.subr.bf16.mxu1 %v8680_v57  ;;  %6383 = vmatprep.subr.bf16.mxu0 %v8683_v58 }
 0x5cc   : > { %6302 = vmatpush1.bf16.msra.mxu1 %v8678_v59  ;;  %6384 = vmatpush1.bf16.msra.mxu0 %v8681_v60 }
 0x5cd   : > { %6303 = vmatprep.subr.bf16.mxu1 %v8686_v32  ;;  %6385 = vmatprep.subr.bf16.mxu0 %v8689_v61 }
 0x5d0   : > { %6304 = vmatpush1.bf16.msra.mxu1 %v8684_v63  ;;  %6386 = vmatpush1.bf16.msra.mxu0 %v8687_v0 }
 0x5d1   : > { %6305 = vmatprep.subr.bf16.mxu1 %v8692_v1  ;;  %6387 = vmatprep.subr.bf16.mxu0 %v8695_v2  ;;  %v7539_v1 = vcombine.low %v6420_v39, %v6420_v39  ;;  %v7541_v2 = vcombine.low %v6421_v40, %v6421_v40 }
 0x5d4   : > { %6306 = vmatpush1.bf16.msra.mxu1 %v8690_v4  ;;  %6388 = vmatpush1.bf16.msra.mxu0 %v8693_v6 }
 0x5d5   : > { %6307 = vmatprep.subr.bf16.mxu1 %v8698_v7  ;;  %6389 = vmatprep.subr.bf16.mxu0 %v8701_v49 }
 0x5d8   : > { %6308 = vmatpush1.bf16.msra.mxu1 %v8696_v8  ;;  %6390 = vmatpush1.bf16.msra.mxu0 %v8699_v9 }
 0x5d9   : > { %6309 = vmatprep.subr.bf16.mxu1 %v8704_v16  ;;  %6391 = vmatprep.subr.bf16.mxu0 %v8707_v17 }
 0x5dc   : > { %6310 = vmatpush1.bf16.msra.mxu1 %v8702_v52  ;;  %6392 = vmatpush1.bf16.msra.mxu0 %v8705_v18 }
 0x5dd   : > { %6311 = vmatprep.subr.bf16.mxu1 %v8710_v19  ;;  %6393 = vmatprep.subr.bf16.mxu0 %v8713_v21 }
 0x5e0   : > { %6312 = vmatpush1.bf16.msra.mxu1 %v8708_v23  ;;  %6394 = vmatpush1.bf16.msra.mxu0 %v8711_v24 }
 0x5e1   : > { %6313 = vmatprep.subr.bf16.mxu1 %v8716_v25  ;;  %6395 = vmatprep.subr.bf16.mxu0 %v8719_v26 }
 0x5e4   : > { %6314 = vmatpush1.bf16.msra.mxu1 %v8714_v30  ;;  %6396 = vmatpush1.bf16.msra.mxu0 %v8717_v31 }
 0x5e5   : > { %6315 = vmatprep.subr.bf16.mxu1 %v8722_v62  ;;  %6397 = vmatprep.subr.bf16.mxu0 %v8725_v33 }
 0x5e8   : > { %6316 = vmatpush1.bf16.msra.mxu1 %v8720_v36  ;;  %6398 = vmatpush1.bf16.msra.mxu0 %v8723_v38 }
 0x5eb   : > { %6318 = vmatmul.mubr.bf16.vlgmr.msra.gmra.mrb[20].mxu1 %v5452_v3  ;;  %6400 = vmatmul.mubr.bf16.vlgmr.msra.gmra.mrb[20].mxu0 %v5452_v3 }
 0x5ec   : > { %6478 = vmatprep.mubr.bf16.mxu0 %v7540_v41  ;;  %6518 = vmatprep.mubr.bf16.mxu1 %v7542_v42 }
 0x639   : > { %v6430_v4 = vpop.permute.xlu0 %6429 }
 0x6be   : > { %v6319_v47 = vpop.f32.mrb[20].mxu1  ;;  %v6401_v48 = vpop.f32.mrb[20].mxu0 }
 0x6bf   : > { %v7566_v50 = vadd.f32 %v6319_v47, %v5587_v44  ;;  %v7568_v37 = vadd.f32 %v6401_v48, %v5595_v45  ;;  %v6321_v28 = vpop.f32.mrb[21].mxu1  ;;  %v6403_v51 = vpop.f32.mrb[21].mxu0 }
 0x6c0   : > { %v7567_v11 = vadd.f32 %v6321_v28, %v5591_v20  ;;  %v7569_v53 = vadd.f32 %v6403_v51, %v5599_v46  ;;  %v6323_v54 = vpop.f32.mrb[22].mxu1  ;;  %v6405_v34 = vpop.f32.mrb[22].mxu0 }
 0x6c1   : > { %vm6408_vm8 = vcmp.gt.f32.partialorder %v7566_v50, 0.0  ;;  %v6412_v55 = vmul.f32 0.01, %v7566_v50  ;;  %vm6410_vm9 = vcmp.gt.f32.partialorder %v7568_v37, 0.0  ;;  %v6414_v13 = vmul.f32 0.01, %v7568_v37 }
 0x6c2   : > { %vm6409_vm10 = vcmp.gt.f32.partialorder %v7567_v11, 0.0  ;;  %v6413_v27 = vmul.f32 0.01, %v7567_v11  ;;  %vm6411_vm11 = vcmp.gt.f32.partialorder %v7569_v53, 0.0  ;;  %v6415_v14 = vmul.f32 0.01, %v7569_v53 }
 0x6c3   : > { %v6416_v56 = vsel %vm6408_vm8, %v7566_v50, %v6412_v55  ;;  %v6418_v15 = vsel %vm6410_vm9, %v7568_v37, %v6414_v13  ;;  %v6324_v57 = vpop.f32.mrb[23].mxu1  ;;  %v6406_v58 = vpop.f32.mrb[23].mxu0 }
 0x6c4   : > { %v6417_v59 = vsel %vm6409_vm10, %v7567_v11, %v6413_v27  ;;  %v6419_v60 = vsel %vm6411_vm11, %v7569_v53, %v6415_v14  ;;  %v6422_v63 = vpack.c.bf16 %v6416_v56, %v6416_v56  ;;  %v6424_v0 = vpack.c.bf16 %v6418_v15, %v6418_v15 }
 0x6c5   : > { %v6423_v32 = vpack.c.bf16 %v6417_v59, %v6417_v59  ;;  %v6425_v61 = vpack.c.bf16 %v6419_v60, %v6419_v60 }
 0x6c7   : > { %6446 = vmatprep.subr.bf16.mxu0 %v6423_v32  ;;  %6486 = vmatprep.subr.bf16.mxu1 %v6425_v61 }
 0x6c8   : > { %6447 = vmatpush1.bf16.xpose.msra.mxu0 %v6422_v63  ;;  %6487 = vmatpush1.bf16.xpose.msra.mxu1 %v6424_v0 }
 0x6cf   : > { %6479 = vmatmul.mubr.bf16.vlgmr.msra.gmra.mrb[24].mxu0 %v7539_v1  ;;  %6519 = vmatmul.mubr.bf16.vlgmr.msra.gmra.mrb[24].mxu1 %v7541_v2 }
 0x7a2   : > { %v6480_v6 = vpop.f32.mrb[24].mxu0  ;;  %v6520_v7 = vpop.f32.mrb[24].mxu1 }
 0x7a3   : > { %v6481_v49 = vadd.f32 %v6480_v6, %v6430_v4  ;;  %v6482_v8 = vpop.f32.mrb[25].mxu0  ;;  %v6522_v9 = vpop.f32.mrb[25].mxu1 }
 0x7a4   : > { %v6483_v16 = vpop.f32.mrb[26].mxu0  ;;  %v6523_v17 = vpop.f32.mrb[26].mxu1 }
 0x7a5   : > { %v6521_v52 = vadd.f32 %v6520_v7, %v6481_v49  ;;  %v6484_v18 = vpop.f32.mrb[27].mxu0  ;;  %v6524_v19 = vpop.f32.mrb[27].mxu1 }
 0x7a7   : > { %8730 = vtanh.f32 %v6521_v52 }
 0x7b1   : > { %v8731_v21 = vpop.eup %8730 }
 0x7b2   : > { %v6527_v22 = vmul.f32 2.0, %v8731_v21 }
 0x7b4   : > { %6529 = vst.msk [vmem:[%s810_s25] sm:$0xff] %vm6528_vm12, %v6527_v22 }
 0x7b5 PF: > { %s25_s22 = sadd.s32 1, %s8771_s22   ;;  %s9828_s18 = sld [smem:[#allocation2_spill]] }
 0x7b6   : > { %p22_p7 = scmp.ge.s32.totalorder %s25_s22, 6   ;;  %s9829_s19 = sld [smem:[#allocation3_spill]] }
 0x7b7   : > { %s9830_s20 = sld [smem:[#allocation4_spill]]  ;;  %s9831_s21 = sld [smem:[#allocation5_spill]] }
 0x7b8   :  { %24 = sbr.rel (!%p22_p7) target bundleno = 3 (0x3), region = 152 }

</bundles_post_ra>
